<compile_context>
chip_gen: v6e
topology: v6e:2x2x1
jax: 0.10.0
libtpu: 0.0.40
codegen_flags: <defaults>
</compile_context>

<pallas_src>
import numpy as np
import jax
import jax.numpy as jnp
from jax import lax
from jax.experimental import pallas as pl
from jax.experimental.pallas import tpu as pltpu

# ----------------------------- configuration --------------------------------
N = 2              # batch size (RPN.forward hard-codes `for bi in range(2)`)
C_IN = 256         # RPNHead in_channels
C_OUT = 256        # RPNHead out_channels
A = 3              # num_anchors per spatial location
BOX_DIM = 4
H = W = 16         # spatial size of the (single) feature map
STRIDE = 8
HW = H * W
NHW = N * HW       # batch folded into rows = 512
M = HW * A         # anchors per image = 768
K9 = 9 * C_IN      # fused 3x3-conv contraction dim = 2304
OUTC = 128         # lane-dense combined head output width (obj | deltas | pad)


# ------------------------------ Pallas kernel --------------------------------
def rpn_fused_kernel(x_ref, w3_ref, b3_ref, wc_ref, bc_ref,
                     mask_ref, tgt_ref,
                     out_ref, loss_ref):
    """Fused RPN head (3x3 conv + ReLU + both 1x1 convs) and losses, both images.

    x_ref    : (NHW, 9*C_IN)  bf16  im2col slab (both images stacked on rows)
    w3_ref   : (9*C_IN, C_OUT) bf16 3x3 conv weights, rows grouped (tap, cin)
    b3_ref   : (1, C_OUT)      f32
    wc_ref   : (C_OUT, 128)    bf16 cols 0:3 obj, 3:15 deltas, rest 0
    bc_ref   : (1, 128)        f32
    mask_ref : (NHW, 128)      bf16 cols 0:3 valid mask, 3:15 positive mask
    tgt_ref  : (NHW, 128)      f32  cols 0:3 obj labels,  3:15 gt deltas
    out_ref  : (NHW, 128)      bf16 raw head outputs (obj | deltas | pad)
    loss_ref : (1, 128)        f32  lane 0 = obj-loss sum, lane 1 = loc-loss sum
    """
    # 3x3 conv + bias + ReLU as ONE K=2304 MXU matmul (bf16 in, f32 accumulate).
    hid = jnp.dot(x_ref[...], w3_ref[...], preferred_element_type=jnp.float32)
    hid = jnp.maximum(hid + b3_ref[...], 0.0)

    # Both 1x1 convs as ONE lane-dense matmul.
    out = jnp.dot(hid.astype(jnp.bfloat16), wc_ref[...],
                  preferred_element_type=jnp.float32) + bc_ref[...]
    out_ref[...] = out.astype(out_ref.dtype)

    # Losses on full (NHW, 128) vregs; obj vs. loc separated by a constant
    # lane-iota mask (no column slices / relayouts).
    mask = mask_ref[...].astype(jnp.float32)
    tgt = tgt_ref[...]
    col = lax.broadcasted_iota(jnp.int32, (NHW, OUTC), 1)
    obj_w = mask * (col < A).astype(jnp.float32)
    loc_w = mask * (col >= A).astype(jnp.float32)

    # numerically stable BCE with logits: max(x,0) - x*y + log(1 + exp(-|x|))
    bce = jnp.maximum(out, 0.0) - out * tgt + jnp.log(1.0 + jnp.exp(-jnp.abs(out)))
    obj_sum = jnp.sum(bce * obj_w)
    # smooth_l1 with beta=0 == |pred - target|
    loc_sum = jnp.sum(jnp.abs(out - tgt) * loc_w)

    lane = lax.broadcasted_iota(jnp.int32, (1, OUTC), 1)
    loss_ref[...] = jnp.where(lane < 1,
                              jnp.broadcast_to(obj_sum, (1, OUTC)),
                              jnp.broadcast_to(loc_sum, (1, OUTC)))


# ------------------------------ kernel wrapper --------------------------------
def rpn_fused_call(x_slab, w3, b3, wc, bc, mask, tgt):
    grid_spec = pltpu.PrefetchScalarGridSpec(
        num_scalar_prefetch=0,
        grid=(1,),                       # batch folded into rows -> single step
        in_specs=[
            pl.BlockSpec((NHW, K9), lambda i: (0, 0)),
            pl.BlockSpec((K9, C_OUT), lambda i: (0, 0)),
            pl.BlockSpec((1, C_OUT), lambda i: (0, 0)),
            pl.BlockSpec((C_OUT, OUTC), lambda i: (0, 0)),
            pl.BlockSpec((1, OUTC), lambda i: (0, 0)),
            pl.BlockSpec((NHW, OUTC), lambda i: (0, 0)),
            pl.BlockSpec((NHW, OUTC), lambda i: (0, 0)),
        ],
        out_specs=[
            pl.BlockSpec((NHW, OUTC), lambda i: (0, 0)),
            pl.BlockSpec((1, OUTC), lambda i: (0, 0)),
        ],
    )
    # TODO(synk): on v7x, per-image CORE_PARALLEL (grid=(N,)) could split the two
    # images across TensorCores; kept single-step here for portability.
    out, loss = pl.pallas_call(
        rpn_fused_kernel,
        out_shape=(jax.ShapeDtypeStruct((NHW, OUTC), jnp.bfloat16),
                   jax.ShapeDtypeStruct((1, OUTC), jnp.float32)),
        grid_spec=grid_spec,
        compiler_params=pltpu.CompilerParams(
            dimension_semantics=("arbitrary",)),
    )(x_slab, w3, b3, wc, bc, mask, tgt)
    return out, loss


def build_im2col(feat_nchw):
    """(N, C_IN, H, W) f32 -> (N*H*W, 9*C_IN) bf16 im2col slab (pad=1, 3x3).

    Cast to bf16 FIRST so the big slab is never materialized in f32.
    """
    x = jnp.transpose(feat_nchw, (0, 2, 3, 1)).astype(jnp.bfloat16)  # NHWC bf16
    x_pad = jnp.pad(x, ((0, 0), (1, 1), (1, 1), (0, 0)))
    taps = [x_pad[:, dy:dy + H, dx:dx + W, :]
            for dy in range(3) for dx in range(3)]                   # k = dy*3 + dx
    slab = jnp.stack(taps, axis=3)                                   # (N, H, W, 9, C_IN)
    return slab.reshape(NHW, K9)


@jax.jit
def rpn_device_forward(feat, w3, b3, wc, bc, mask, tgt):
    x_slab = build_im2col(feat)
    out, loss = rpn_fused_call(x_slab, w3, b3, wc, bc, mask, tgt)
    out = out.astype(jnp.float32)
    # == score.permute(0,2,3,1).flatten(1)
    pred_logits = out[:, 0:A].reshape(N, M)
    # == x.view(N,A,4,H,W).permute(0,3,4,1,2).flatten(1,-2)
    pred_deltas = out[:, A:A + A * BOX_DIM].reshape(N, M, BOX_DIM)
    # (loss_img0 + loss_img1) / 2 with per-image reduction='sum'
    obj_loss = loss[0, 0] / 2.0
    loc_loss = loss[0, 1] / 2.0
    return obj_loss, loc_loss, pred_logits, pred_deltas


# --------------------------- host-side RPN helpers ---------------------------
def generate_anchors():
    """(H, W, A) grid anchors, flattened in (h, w, a) order to match predictions."""
    sizes = np.array([16.0, 32.0, 64.0], np.float32)
    ys, xs = np.meshgrid(np.arange(H), np.arange(W), indexing="ij")
    cx = (xs + 0.5) * STRIDE
    cy = (ys + 0.5) * STRIDE
    anchors = np.zeros((H, W, A, 4), np.float32)
    for a in range(A):
        half = sizes[a] / 2.0
        anchors[..., a, 0] = cx - half
        anchors[..., a, 1] = cy - half
        anchors[..., a, 2] = cx + half
        anchors[..., a, 3] = cy + half
    return anchors.reshape(-1, 4)


def pairwise_iou(boxes1, boxes2):
    a1 = (boxes1[:, 2] - boxes1[:, 0]) * (boxes1[:, 3] - boxes1[:, 1])
    a2 = (boxes2[:, 2] - boxes2[:, 0]) * (boxes2[:, 3] - boxes2[:, 1])
    lt = np.maximum(boxes1[:, None, :2], boxes2[None, :, :2])
    rb = np.minimum(boxes1[:, None, 2:], boxes2[None, :, 2:])
    wh = np.clip(rb - lt, 0.0, None)
    inter = wh[..., 0] * wh[..., 1]
    return inter / (a1[:, None] + a2[None, :] - inter + 1e-9)


def label_anchors(anchors, gt, pos_thresh=0.7, neg_thresh=0.3):
    iou = pairwise_iou(anchors, gt)                  # (M, G)
    gt_idx = iou.argmax(axis=1)
    max_iou = iou.max(axis=1)
    label = np.full((anchors.shape[0],), -1.0, np.float32)
    label[max_iou < neg_thresh] = 0.0
    label[max_iou >= pos_thresh] = 1.0
    # standard RPN rule: best anchor per gt is always positive
    label[iou.argmax(axis=0)] = 1.0
    return label, gt_idx


def subsample_labels(labels, num_samples=256, positive_fraction=0.5):
    # TODO(synk): deterministic stand-in for torch.randperm-based subsampling.
    pos = np.nonzero(labels == 1.0)[0]
    neg = np.nonzero(labels == 0.0)[0]
    num_pos = min(len(pos), int(num_samples * positive_fraction))
    num_neg = min(len(neg), num_samples - num_pos)
    return pos[:num_pos], neg[:num_neg]


def get_deltas(src, tgt):
    sw = src[:, 2] - src[:, 0]
    sh = src[:, 3] - src[:, 1]
    scx = src[:, 0] + 0.5 * sw
    scy = src[:, 1] + 0.5 * sh
    tw = tgt[:, 2] - tgt[:, 0]
    th = tgt[:, 3] - tgt[:, 1]
    tcx = tgt[:, 0] + 0.5 * tw
    tcy = tgt[:, 1] + 0.5 * th
    dx = (tcx - scx) / sw
    dy = (tcy - scy) / sh
    dw = np.log(tw / sw)
    dh = np.log(th / sh)
    return np.stack([dx, dy, dw, dh], axis=1).astype(np.float32)


def build_loss_tensors(anchors_np, gt_bboxes_np):
    """Merged lane-dense loss tensors matching the fused head output columns.

    mask : (NHW, 128) bf16  cols 0:3  valid (pos+neg) mask, cols 3:15 positive mask
    tgt  : (NHW, 128) f32   cols 0:3  obj labels,           cols 3:15 gt deltas
    """
    # TODO(synk): in a training loop this should be jitted on-device / cached
    # per gt set rather than rebuilt in numpy every call.
    labels = np.full((N, M), -1.0, np.float32)
    valid_mask = np.zeros((N, M), np.float32)
    pos_mask = np.zeros((N, M), np.float32)
    gt_deltas = np.zeros((N, M, BOX_DIM), np.float32)
    for bi in range(2):
        label, gt_i = label_anchors(anchors_np, gt_bboxes_np[bi])
        pos_i, neg_i = subsample_labels(label)
        labels[bi] = label
        valid_mask[bi, np.concatenate([pos_i, neg_i])] = 1.0
        pos_mask[bi, pos_i] = 1.0
        gt_deltas[bi] = get_deltas(anchors_np, gt_bboxes_np[bi][gt_i])

    mask128 = np.zeros((N, HW, OUTC), np.float32)
    tgt128 = np.zeros((N, HW, OUTC), np.float32)
    mask128[:, :, 0:A] = valid_mask.reshape(N, HW, A)
    mask128[:, :, A:A + A * BOX_DIM] = np.repeat(
        pos_mask.reshape(N, HW, A)[..., None], BOX_DIM, axis=-1
    ).reshape(N, HW, A * BOX_DIM)
    tgt128[:, :, 0:A] = labels.reshape(N, HW, A)
    tgt128[:, :, A:A + A * BOX_DIM] = gt_deltas.reshape(N, HW, A * BOX_DIM)

    mask = jnp.asarray(mask128.reshape(NHW, OUTC), dtype=jnp.bfloat16)  # 0/1 exact
    tgt = jnp.asarray(tgt128.reshape(NHW, OUTC), dtype=jnp.float32)
    return mask, tgt


def rpn_forward(features, anchors_np, gt_bboxes_np, params):
    """Mirrors RPN.forward: returns (object_loss, local_loss) plus flattened preds."""
    w3, b3, wc, bc = params
    # RPNHead over the (single) feature map; sorted(reverse=True) order is trivial.
    feat = features["p3"]
    mask, tgt = build_loss_tensors(anchors_np, gt_bboxes_np)
    # TODO(synk): the sigmoid-threshold proposal re-subsampling in the reference
    # only feeds the disabled (vis=False) cv2 visualization branch and never
    # affects the returned losses, so it is omitted here.
    return rpn_device_forward(feat, w3, b3, wc, bc, mask, tgt), (mask, tgt)


# ---------------------------------- main --------------------------------------
if __name__ == "__main__":
    key = jax.random.PRNGKey(0)
    keys = jax.random.split(key, 9)

    # feature map (PyTorch NCHW convention)
    feat = jax.random.normal(keys[0], (N, C_IN, H, W), jnp.float32)

    # deterministic parameters (PyTorch Conv2d shapes: OIHW weights, (O,) bias)
    w3_t = 0.05 * jax.random.normal(keys[1], (C_OUT, C_IN, 3, 3), jnp.float32)
    b3_t = 0.05 * jax.random.normal(keys[2], (C_OUT,), jnp.float32)
    wo_t = 0.05 * jax.random.normal(keys[3], (A, C_OUT, 1, 1), jnp.float32)
    bo_t = 0.05 * jax.random.normal(keys[4], (A,), jnp.float32)
    wd_t = 0.05 * jax.random.normal(keys[5], (A * BOX_DIM, C_OUT, 1, 1), jnp.float32)
    bd_t = 0.05 * jax.random.normal(keys[6], (A * BOX_DIM,), jnp.float32)

    # ground-truth boxes: (N, 3, 4) xyxy, guaranteed positive width/height
    centers = jax.random.uniform(keys[7], (N, 3, 2), minval=32.0, maxval=96.0)
    sizes = jax.random.uniform(keys[8], (N, 3, 2), minval=16.0, maxval=48.0)
    gt_bboxes = jnp.concatenate([centers - sizes / 2.0, centers + sizes / 2.0], axis=-1)
    gt_np = np.asarray(gt_bboxes)

    anchors_np = generate_anchors()                        # (768, 4)

    # kernel-layout parameters (bf16 matmul operands, f32 biases)
    w3 = jnp.transpose(w3_t, (2, 3, 1, 0)).reshape(K9, C_OUT).astype(jnp.bfloat16)
    b3 = b3_t.reshape(1, C_OUT)
    wo = jnp.transpose(wo_t[:, :, 0, 0], (1, 0))           # (C_OUT, A)
    wd = jnp.transpose(wd_t[:, :, 0, 0], (1, 0))           # (C_OUT, A*4)
    wc = jnp.zeros((C_OUT, OUTC), jnp.float32)
    wc = wc.at[:, 0:A].set(wo).at[:, A:A + A * BOX_DIM].set(wd)
    wc = wc.astype(jnp.bfloat16)
    bc = jnp.zeros((1, OUTC), jnp.float32)
    bc = bc.at[0, 0:A].set(bo_t).at[0, A:A + A * BOX_DIM].set(bd_t)
    params = (w3, b3, wc, bc)

    features = {"p3": feat}
    (obj_loss, loc_loss, pred_logits, pred_deltas), (mask, tgt) = rpn_forward(
        features, anchors_np, gt_np, params)
    obj_loss = jax.block_until_ready(obj_loss)
    loc_loss = jax.block_until_ready(loc_loss)
    pred_logits = jax.block_until_ready(pred_logits)
    pred_deltas = jax.block_until_ready(pred_deltas)

    # ------------------ reference check of the conv hot path ------------------
    # Mirror the kernel's bf16 operand rounding so the comparison isolates the
    # conv/matmul structure (accumulation stays f32 in both paths).
    def rbf16(x):
        return x.astype(jnp.bfloat16).astype(jnp.float32)

    dn = ("NCHW", "OIHW", "NCHW")
    hp = lax.Precision.HIGHEST
    hid = jnp.maximum(
        lax.conv_general_dilated(rbf16(feat), rbf16(w3_t), (1, 1), "SAME",
                                 dimension_numbers=dn, precision=hp)
        + b3_t[None, :, None, None], 0.0)
    hid = rbf16(hid)
    obj_ref = lax.conv_general_dilated(hid, rbf16(wo_t), (1, 1), "VALID",
                                       dimension_numbers=dn, precision=hp) \
        + bo_t[None, :, None, None]
    dlt_ref = lax.conv_general_dilated(hid, rbf16(wd_t), (1, 1), "VALID",
                                       dimension_numbers=dn, precision=hp) \
        + bd_t[None, :, None, None]
    obj_ref_flat = jnp.transpose(obj_ref, (0, 2, 3, 1)).reshape(N, M)
    dlt_ref_flat = jnp.transpose(dlt_ref.reshape(N, A, BOX_DIM, H, W),
                                 (0, 3, 4, 1, 2)).reshape(N, M, BOX_DIM)
    # predictions are returned as bf16 -> slightly looser tolerance than before
    np.testing.assert_allclose(np.asarray(pred_logits), np.asarray(obj_ref_flat),
                               rtol=2e-2, atol=2e-2)
    np.testing.assert_allclose(np.asarray(pred_deltas), np.asarray(dlt_ref_flat),
                               rtol=2e-2, atol=2e-2)

    # ------------------------- reference check of losses ----------------------
    ref128 = np.zeros((NHW, OUTC), np.float32)
    ref128[:, 0:A] = np.asarray(obj_ref_flat).reshape(NHW, A)
    ref128[:, A:A + A * BOX_DIM] = np.asarray(dlt_ref_flat).reshape(NHW, A * BOX_DIM)
    mask_f = np.asarray(mask, dtype=np.float32)
    tgt_f = np.asarray(tgt)
    col = np.arange(OUTC)
    is_obj = (col < A).astype(np.float32)
    is_loc = (col >= A).astype(np.float32)
    bce_ref = (np.maximum(ref128, 0.0) - ref128 * tgt_f
               + np.log1p(np.exp(-np.abs(ref128))))
    ref_obj = float(np.sum(bce_ref * mask_f * is_obj)) / 2.0
    ref_loc = float(np.sum(np.abs(ref128 - tgt_f) * mask_f * is_loc)) / 2.0
    assert np.isfinite(float(obj_loss)) and np.isfinite(float(loc_loss))
    np.testing.assert_allclose(float(obj_loss), ref_obj, rtol=5e-2, atol=1.0)
    np.testing.assert_allclose(float(loc_loss), ref_loc, rtol=5e-2, atol=1.0)

    print("KERNEL_OK")
</pallas_src>

<mosaic_0001>
module attributes {stable_mosaic.version = 11 : i64} {
  func.func @rpn_fused_kernel(%arg0: i32, %arg1: memref<512x2304xbf16, #tpu.memory_space<vmem>>, %arg2: memref<2304x256xbf16, #tpu.memory_space<vmem>>, %arg3: memref<1x256xf32, #tpu.memory_space<vmem>>, %arg4: memref<256x128xbf16, #tpu.memory_space<vmem>>, %arg5: memref<1x128xf32, #tpu.memory_space<vmem>>, %arg6: memref<512x128xbf16, #tpu.memory_space<vmem>>, %arg7: memref<512x128xf32, #tpu.memory_space<vmem>>, %arg8: memref<512x128xbf16, #tpu.memory_space<vmem>>, %arg9: memref<1x128xf32, #tpu.memory_space<vmem>>) attributes {dimension_semantics = [#tpu.dimension_semantics<arbitrary>], iteration_bounds = array<i64: 1>, scalar_prefetch = 0 : i64, scratch_operands = 0 : i64, tpu.core_type = #tpu.core_type<tc>, window_params = [{pipeline_mode = #tpu.pipeline_mode<synchronous>, transform_indices = @transform_0, window_bounds = array<i64: 512, 2304>}, {pipeline_mode = #tpu.pipeline_mode<synchronous>, transform_indices = @transform_1, window_bounds = array<i64: 2304, 256>}, {pipeline_mode = #tpu.pipeline_mode<synchronous>, transform_indices = @transform_2, window_bounds = array<i64: 1, 256>}, {pipeline_mode = #tpu.pipeline_mode<synchronous>, transform_indices = @transform_3, window_bounds = array<i64: 256, 128>}, {pipeline_mode = #tpu.pipeline_mode<synchronous>, transform_indices = @transform_4, window_bounds = array<i64: 1, 128>}, {pipeline_mode = #tpu.pipeline_mode<synchronous>, transform_indices = @transform_5, window_bounds = array<i64: 512, 128>}, {pipeline_mode = #tpu.pipeline_mode<synchronous>, transform_indices = @transform_6, window_bounds = array<i64: 512, 128>}, {pipeline_mode = #tpu.pipeline_mode<synchronous>, transform_indices = @transform_7, window_bounds = array<i64: 512, 128>}, {pipeline_mode = #tpu.pipeline_mode<synchronous>, transform_indices = @transform_8, window_bounds = array<i64: 1, 128>}]} {
    %c0 = arith.constant 0 : index
    %c0_0 = arith.constant 0 : index
    %0 = vector.load %arg1[%c0, %c0_0] : memref<512x2304xbf16, #tpu.memory_space<vmem>>, vector<512x2304xbf16>
    %c0_1 = arith.constant 0 : index
    %c0_2 = arith.constant 0 : index
    %1 = vector.load %arg2[%c0_1, %c0_2] : memref<2304x256xbf16, #tpu.memory_space<vmem>>, vector<2304x256xbf16>
    %cst = arith.constant dense<0.000000e+00> : vector<512x256xf32>
    %2 = tpu.matmul %0, %1, %cst {dimension_numbers = #tpu.dot_dimension_numbers<[1], [0], [0], [1], [0, 0, 1, 1], [], []>} : vector<512x2304xbf16>, vector<2304x256xbf16>, vector<512x256xf32> -> vector<512x256xf32>
    %c0_3 = arith.constant 0 : index
    %c0_4 = arith.constant 0 : index
    %3 = vector.load %arg3[%c0_3, %c0_4] : memref<1x256xf32, #tpu.memory_space<vmem>>, vector<1x256xf32>
    %4 = vector.broadcast %3 : vector<1x256xf32> to vector<512x256xf32>
    %5 = arith.addf %2, %4 : vector<512x256xf32>
    %cst_5 = arith.constant 0.000000e+00 : f32
    %6 = vector.broadcast %cst_5 : f32 to vector<512x256xf32>
    %7 = arith.maximumf %5, %6 : vector<512x256xf32>
    %8 = arith.truncf %7 : vector<512x256xf32> to vector<512x256xbf16>
    %c0_6 = arith.constant 0 : index
    %c0_7 = arith.constant 0 : index
    %9 = vector.load %arg4[%c0_6, %c0_7] : memref<256x128xbf16, #tpu.memory_space<vmem>>, vector<256x128xbf16>
    %cst_8 = arith.constant dense<0.000000e+00> : vector<512x128xf32>
    %10 = tpu.matmul %8, %9, %cst_8 {dimension_numbers = #tpu.dot_dimension_numbers<[1], [0], [0], [1], [0, 0, 1, 1], [], []>} : vector<512x256xbf16>, vector<256x128xbf16>, vector<512x128xf32> -> vector<512x128xf32>
    %c0_9 = arith.constant 0 : index
    %c0_10 = arith.constant 0 : index
    %11 = vector.load %arg5[%c0_9, %c0_10] : memref<1x128xf32, #tpu.memory_space<vmem>>, vector<1x128xf32>
    %12 = vector.broadcast %11 : vector<1x128xf32> to vector<512x128xf32>
    %13 = arith.addf %10, %12 : vector<512x128xf32>
    %14 = arith.truncf %13 : vector<512x128xf32> to vector<512x128xbf16>
    %c0_11 = arith.constant 0 : index
    %c0_12 = arith.constant 0 : index
    %15 = vector.load %arg8[%c0_11, %c0_12] : memref<512x128xbf16, #tpu.memory_space<vmem>>, vector<512x128xbf16>
    tpu.vector_store %arg8[%c0_11, %c0_12], %14 {strides = array<i32>} : memref<512x128xbf16, #tpu.memory_space<vmem>>, vector<512x128xbf16>,
    %c0_13 = arith.constant 0 : index
    %c0_14 = arith.constant 0 : index
    %16 = vector.load %arg6[%c0_13, %c0_14] : memref<512x128xbf16, #tpu.memory_space<vmem>>, vector<512x128xbf16>
    %17 = arith.extf %16 : vector<512x128xbf16> to vector<512x128xf32>
    %c0_15 = arith.constant 0 : index
    %c0_16 = arith.constant 0 : index
    %18 = vector.load %arg7[%c0_15, %c0_16] : memref<512x128xf32, #tpu.memory_space<vmem>>, vector<512x128xf32>
    %19 = tpu.iota {dimensions = array<i32: 1>} : vector<512x128xi32>
    %c3_i32 = arith.constant 3 : i32
    %20 = vector.broadcast %c3_i32 : i32 to vector<512x128xi32>
    %21 = arith.cmpi slt, %19, %20 : vector<512x128xi32>
    %22 = arith.extui %21 : vector<512x128xi1> to vector<512x128xi32>
    %23 = arith.sitofp %22 : vector<512x128xi32> to vector<512x128xf32>
    %24 = arith.mulf %17, %23 : vector<512x128xf32>
    %c3_i32_17 = arith.constant 3 : i32
    %25 = vector.broadcast %c3_i32_17 : i32 to vector<512x128xi32>
    %26 = arith.cmpi sge, %19, %25 : vector<512x128xi32>
    %27 = arith.extui %26 : vector<512x128xi1> to vector<512x128xi32>
    %28 = arith.sitofp %27 : vector<512x128xi32> to vector<512x128xf32>
    %29 = arith.mulf %17, %28 : vector<512x128xf32>
    %cst_18 = arith.constant 0.000000e+00 : f32
    %30 = vector.broadcast %cst_18 : f32 to vector<512x128xf32>
    %31 = arith.maximumf %13, %30 : vector<512x128xf32>
    %32 = arith.mulf %13, %18 : vector<512x128xf32>
    %33 = arith.subf %31, %32 : vector<512x128xf32>
    %34 = math.absf %13 : vector<512x128xf32>
    %cst_19 = arith.constant 0.000000e+00 : f32
    %35 = vector.broadcast %cst_19 : f32 to vector<512x128xf32>
    %36 = arith.subf %35, %34 : vector<512x128xf32>
    %37 = math.exp %36 : vector<512x128xf32>
    %cst_20 = arith.constant 1.000000e+00 : f32
    %38 = vector.broadcast %cst_20 : f32 to vector<512x128xf32>
    %39 = arith.addf %38, %37 : vector<512x128xf32>
    %40 = math.log %39 : vector<512x128xf32>
    %41 = arith.addf %33, %40 : vector<512x128xf32>
    %42 = arith.mulf %41, %24 : vector<512x128xf32>
    %43 = vector.shape_cast %42 : vector<512x128xf32> to vector<1x512x128xf32>
    %cst_21 = arith.constant dense<0.000000e+00> : vector<1xf32>
    %44 = vector.multi_reduction <add>, %43, %cst_21 [1, 2] : vector<1x512x128xf32> to vector<1xf32>
    %45 = vector.shape_cast %44 : vector<1xf32> to vector<1x1x1xf32>
    %46 = vector.extract %45[0, 0, 0] : f32 from vector<1x1x1xf32>
    %47 = arith.subf %13, %18 : vector<512x128xf32>
    %48 = math.absf %47 : vector<512x128xf32>
    %49 = arith.mulf %48, %29 : vector<512x128xf32>
    %50 = vector.shape_cast %49 : vector<512x128xf32> to vector<1x512x128xf32>
    %cst_22 = arith.constant dense<0.000000e+00> : vector<1xf32>
    %51 = vector.multi_reduction <add>, %50, %cst_22 [1, 2] : vector<1x512x128xf32> to vector<1xf32>
    %52 = vector.shape_cast %51 : vector<1xf32> to vector<1x1x1xf32>
    %53 = vector.extract %52[0, 0, 0] : f32 from vector<1x1x1xf32>
    %54 = tpu.iota {dimensions = array<i32: 1>} : vector<1x128xi32>
    %c1_i32 = arith.constant 1 : i32
    %55 = vector.broadcast %c1_i32 : i32 to vector<1x128xi32>
    %56 = arith.cmpi slt, %54, %55 : vector<1x128xi32>
    %57 = vector.broadcast %46 : f32 to vector<1x128xf32>
    %58 = vector.broadcast %53 : f32 to vector<1x128xf32>
    %59 = arith.select %56, %57, %58 : vector<1x128xi1>, vector<1x128xf32>
    %c0_23 = arith.constant 0 : index
    %c0_24 = arith.constant 0 : index
    %60 = vector.load %arg9[%c0_23, %c0_24] : memref<1x128xf32, #tpu.memory_space<vmem>>, vector<1x128xf32>
    tpu.vector_store %arg9[%c0_23, %c0_24], %59 {strides = array<i32>} : memref<1x128xf32, #tpu.memory_space<vmem>>, vector<1x128xf32>,
    return
  }
  func.func @transform_0(%arg0: i32) -> (i32, i32) {
    %c0_i32 = arith.constant 0 : i32
    %c0_i32_0 = arith.constant 0 : i32
    %c0_i32_1 = arith.constant 0 : i32
    return %c0_i32, %c0_i32_0 : i32, i32
  }
  func.func @transform_1(%arg0: i32) -> (i32, i32) {
    %c0_i32 = arith.constant 0 : i32
    %c0_i32_0 = arith.constant 0 : i32
    %c0_i32_1 = arith.constant 0 : i32
    return %c0_i32, %c0_i32_0 : i32, i32
  }
  func.func @transform_2(%arg0: i32) -> (i32, i32) {
    %c0_i32 = arith.constant 0 : i32
    %c0_i32_0 = arith.constant 0 : i32
    %c0_i32_1 = arith.constant 0 : i32
    return %c0_i32, %c0_i32_0 : i32, i32
  }
  func.func @transform_3(%arg0: i32) -> (i32, i32) {
    %c0_i32 = arith.constant 0 : i32
    %c0_i32_0 = arith.constant 0 : i32
    %c0_i32_1 = arith.constant 0 : i32
    return %c0_i32, %c0_i32_0 : i32, i32
  }
  func.func @transform_4(%arg0: i32) -> (i32, i32) {
    %c0_i32 = arith.constant 0 : i32
    %c0_i32_0 = arith.constant 0 : i32
    %c0_i32_1 = arith.constant 0 : i32
    return %c0_i32, %c0_i32_0 : i32, i32
  }
  func.func @transform_5(%arg0: i32) -> (i32, i32) {
    %c0_i32 = arith.constant 0 : i32
    %c0_i32_0 = arith.constant 0 : i32
    %c0_i32_1 = arith.constant 0 : i32
    return %c0_i32, %c0_i32_0 : i32, i32
  }
  func.func @transform_6(%arg0: i32) -> (i32, i32) {
    %c0_i32 = arith.constant 0 : i32
    %c0_i32_0 = arith.constant 0 : i32
    %c0_i32_1 = arith.constant 0 : i32
    return %c0_i32, %c0_i32_0 : i32, i32
  }
  func.func @transform_7(%arg0: i32) -> (i32, i32) {
    %c0_i32 = arith.constant 0 : i32
    %c0_i32_0 = arith.constant 0 : i32
    %c0_i32_1 = arith.constant 0 : i32
    return %c0_i32, %c0_i32_0 : i32, i32
  }
  func.func @transform_8(%arg0: i32) -> (i32, i32) {
    %c0_i32 = arith.constant 0 : i32
    %c0_i32_0 = arith.constant 0 : i32
    %c0_i32_1 = arith.constant 0 : i32
    return %c0_i32, %c0_i32_0 : i32, i32
  }
}

</mosaic_0001>

<bundles_post_ra>
// kernel: rpn_device_forward.1
= control target key start
LH: loop header
LB: loop body
LE: loop exit
PB: predicated region body
PF: predicated region fallthrough
CT: control target
= control target key end

     0   :  { %s20472_s1 = inlined_call_operand.vmem [shape: bf16[2304,256], index: 1, kind: input, shape index: {}]   ;;  %s20473_s0 = inlined_call_operand.vmem [shape: bf16[512,2304], index: 0, kind: input, shape index: {}]   ;;  %s20474_s2 = inlined_call_operand.vmem [shape: f32[1,256], index: 2, kind: input, shape index: {}]   ;;  %s20475_s3 = inlined_call_operand.vmem [shape: bf16[256,128], index: 3, kind: input, shape index: {}]   ;;  %s20476_s5 = inlined_call_operand.vmem [shape: bf16[512,128], index: 5, kind: input, shape index: {}]   ;;  %s20477_s4 = inlined_call_operand.vmem [shape: f32[1,128], index: 4, kind: input, shape index: {}]   ;;  %s20478_s6 = inlined_call_operand.vmem [shape: f32[512,128], index: 6, kind: input, shape index: {}]   ;;  %s20479_s7 = inlined_call_operand.vmem [shape: bf16[512,128], index: 7, kind: output, shape index: {0}]   ;;  %s20480_s8 = inlined_call_operand.vmem [shape: f32[1,128], index: 8, kind: output, shape index: {1}]  }
   0x1   :  { %v12150_v0 = vld [vmem:[%s20472_s1 + $0x74] ss:$8 sps:$4 sm:$0xff]   ;;  %v12152_v1 = vld [vmem:[%s20472_s1 + $0x70] ss:$8 sps:$4 sm:$0xff]   ;;  %v12156_v4 = vld [vmem:[%s20472_s1 + $0x64] ss:$8 sps:$4 sm:$0xff]  }
   0x2   :  { %5225 = vmatprep.subr.bf16.mxu0 %v12150_v0  ;;  %v12153_v2 = vld [vmem:[%s20472_s1 + $0x174] ss:$8 sps:$4 sm:$0xff]   ;;  %v12155_v3 = vld [vmem:[%s20472_s1 + $0x170] ss:$8 sps:$4 sm:$0xff]   ;;  %v12158_v5 = vld [vmem:[%s20472_s1 + $0x60] ss:$8 sps:$4 sm:$0xff]  }
   0x3   :  { %5226 = vmatpush1.bf16.msra.mxu0 %v12152_v1  ;;  %5578 = vmatprep.subr.bf16.mxu1 %v12153_v2  ;;  %v12159_v6 = vld [vmem:[%s20472_s1 + $0x164] ss:$8 sps:$4 sm:$0xff]   ;;  %v12161_v7 = vld [vmem:[%s20472_s1 + $0x160] ss:$8 sps:$4 sm:$0xff]   ;;  %v12162_v8 = vld [vmem:[%s20472_s1 + $0x54] ss:$8 sps:$4 sm:$0xff]  }
   0x4   :  { %5579 = vmatpush1.bf16.msra.mxu1 %v12155_v3  ;;  %5227 = vmatprep.subr.bf16.mxu0 %v12156_v4  ;;  %v12164_v9 = vld [vmem:[%s20472_s1 + $0x50] ss:$8 sps:$4 sm:$0xff]   ;;  %v12165_v10 = vld [vmem:[%s20472_s1 + $0x154] ss:$8 sps:$4 sm:$0xff]   ;;  %v12168_v11 = vld [vmem:[%s20472_s1 + $0x44] ss:$8 sps:$4 sm:$0xff]  }
   0x5   :  { %5580 = vmatprep.subr.bf16.mxu1 %v12159_v6  ;;  %v12167_v12 = vld [vmem:[%s20472_s1 + $0x150] ss:$8 sps:$4 sm:$0xff]   ;;  %v12171_v13 = vld [vmem:[%s20472_s1 + $0x144] ss:$8 sps:$4 sm:$0xff]   ;;  %v12170_v14 = vld [vmem:[%s20472_s1 + $0x40] ss:$8 sps:$4 sm:$0xff]  }
   0x6   :  { %v12174_v15 = vld [vmem:[%s20472_s1 + $0x34] ss:$8 sps:$4 sm:$0xff]   ;;  %v12173_v16 = vld [vmem:[%s20472_s1 + $0x140] ss:$8 sps:$4 sm:$0xff]   ;;  %v12176_v18 = vld [vmem:[%s20472_s1 + $0x30] ss:$8 sps:$4 sm:$0xff]  }
   0x7   :  { %5228 = vmatpush1.bf16.msra.mxu0 %v12158_v5  ;;  %v12177_v17 = vld [vmem:[%s20472_s1 + $0x134] ss:$8 sps:$4 sm:$0xff]   ;;  %v12180_v19 = vld [vmem:[%s20472_s1 + $0x24] ss:$8 sps:$4 sm:$0xff]   ;;  %v12179_v20 = vld [vmem:[%s20472_s1 + $0x130] ss:$8 sps:$4 sm:$0xff]  }
   0x8   :  { %5229 = vmatprep.subr.bf16.mxu0 %v12162_v8  ;;  %5581 = vmatpush1.bf16.msra.mxu1 %v12161_v7  ;;  %v12183_v21 = vld [vmem:[%s20472_s1 + $0x124] ss:$8 sps:$4 sm:$0xff]   ;;  %v12182_v22 = vld [vmem:[%s20472_s1 + $0x20] ss:$8 sps:$4 sm:$0xff]   ;;  %v12186_v23 = vld [vmem:[%s20472_s1 + $0x14] ss:$8 sps:$4 sm:$0xff]  }
   0x9   :  { %5582 = vmatprep.subr.bf16.mxu1 %v12165_v10  ;;  %v12185_v24 = vld [vmem:[%s20472_s1 + $0x120] ss:$8 sps:$4 sm:$0xff]   ;;  %v12189_v25 = vld [vmem:[%s20472_s1 + $0x114] ss:$8 sps:$4 sm:$0xff]   ;;  %v12188_v26 = vld [vmem:[%s20472_s1 + $0x10] ss:$8 sps:$4 sm:$0xff]  }
   0xa   :  { %v12192_v27 = vld [vmem:[%s20472_s1 + $0x4] ss:$8 sps:$4 sm:$0xff]   ;;  %v12191_v28 = vld [vmem:[%s20472_s1 + $0x110] ss:$8 sps:$4 sm:$0xff]   ;;  %v12194_v30 = vld [vmem:[%s20472_s1] ss:$8 sps:$4 sm:$0xff]  }
   0xb   :  { %5230 = vmatpush1.bf16.msra.mxu0 %v12164_v9  ;;  %v12195_v29 = vld [vmem:[%s20472_s1 + $0x104] ss:$8 sps:$4 sm:$0xff]   ;;  %v12198_v31 = vld [vmem:[%s20472_s1 + $0xf4] ss:$8 sps:$4 sm:$0xff]   ;;  %v12197_v32 = vld [vmem:[%s20472_s1 + $0x100] ss:$8 sps:$4 sm:$0xff]  }
   0xc   :  { %5231 = vmatprep.subr.bf16.mxu0 %v12168_v11  ;;  %5583 = vmatpush1.bf16.msra.mxu1 %v12167_v12  ;;  %v12201_v33 = vld [vmem:[%s20472_s1 + $0x1f4] ss:$8 sps:$4 sm:$0xff]   ;;  %v12200_v34 = vld [vmem:[%s20472_s1 + $0xf0] ss:$8 sps:$4 sm:$0xff]   ;;  %v12204_v35 = vld [vmem:[%s20472_s1 + $0xe4] ss:$8 sps:$4 sm:$0xff]  }
   0xd   :  { %5584 = vmatprep.subr.bf16.mxu1 %v12171_v13  ;;  %v12203_v36 = vld [vmem:[%s20472_s1 + $0x1f0] ss:$8 sps:$4 sm:$0xff]   ;;  %v12207_v37 = vld [vmem:[%s20472_s1 + $0x1e4] ss:$8 sps:$4 sm:$0xff]   ;;  %v12206_v38 = vld [vmem:[%s20472_s1 + $0xe0] ss:$8 sps:$4 sm:$0xff]  }
   0xe   :  { %v12210_v39 = vld [vmem:[%s20472_s1 + $0xd4] ss:$8 sps:$4 sm:$0xff]   ;;  %v12209_v40 = vld [vmem:[%s20472_s1 + $0x1e0] ss:$8 sps:$4 sm:$0xff]   ;;  %v12212_v42 = vld [vmem:[%s20472_s1 + $0xd0] ss:$8 sps:$4 sm:$0xff]  }
   0xf   :  { %5232 = vmatpush1.bf16.msra.mxu0 %v12170_v14  ;;  %v12213_v41 = vld [vmem:[%s20472_s1 + $0x1d4] ss:$8 sps:$4 sm:$0xff]   ;;  %v12216_v43 = vld [vmem:[%s20472_s1 + $0xc4] ss:$8 sps:$4 sm:$0xff]   ;;  %v12215_v44 = vld [vmem:[%s20472_s1 + $0x1d0] ss:$8 sps:$4 sm:$0xff]  }
  0x10   :  { %5233 = vmatprep.subr.bf16.mxu0 %v12174_v15  ;;  %5585 = vmatpush1.bf16.msra.mxu1 %v12173_v16  ;;  %v12219_v45 = vld [vmem:[%s20472_s1 + $0x1c4] ss:$8 sps:$4 sm:$0xff]   ;;  %v12218_v46 = vld [vmem:[%s20472_s1 + $0xc0] ss:$8 sps:$4 sm:$0xff]   ;;  %v12222_v48 = vld [vmem:[%s20472_s1 + $0xb4] ss:$8 sps:$4 sm:$0xff]  }
  0x11   :  { %5586 = vmatprep.subr.bf16.mxu1 %v12177_v17  ;;  %v12247_v47 = vld [vmem:[%s20473_s0 + $0x4] ss:$72 sps:$4 sm:$0xff]   ;;  %v12221_v49 = vld [vmem:[%s20472_s1 + $0x1c0] ss:$8 sps:$4 sm:$0xff]   ;;  %v12225_v50 = vld [vmem:[%s20472_s1 + $0x1b4] ss:$8 sps:$4 sm:$0xff]  }
  0x12   :  { %5257 = vmatprep.mubr.bf16.mxu0 %v12247_v47  ;;  %v12254_v51 = vld [vmem:[%s20473_s0 + $0xc] ss:$72 sps:$4 sm:$0xff]   ;;  %v12224_v52 = vld [vmem:[%s20472_s1 + $0xb0] ss:$8 sps:$4 sm:$0xff]   ;;  %v12230_v56 = vld [vmem:[%s20472_s1 + $0xa0] ss:$8 sps:$4 sm:$0xff]  }
  0x13   :  { %5234 = vmatpush1.bf16.msra.mxu0 %v12176_v18  ;;  %v12228_v53 = vld [vmem:[%s20472_s1 + $0xa4] ss:$8 sps:$4 sm:$0xff]   ;;  %5610 = vmatprep.mubr.bf16.mxu1 %v12254_v51  ;;  %v12227_v54 = vld [vmem:[%s20472_s1 + $0x1b0] ss:$8 sps:$4 sm:$0xff]   ;;  %v12234_v57 = vld [vmem:[%s20472_s1 + $0x94] ss:$8 sps:$4 sm:$0xff]  }
  0x14   :  { %5235 = vmatprep.subr.bf16.mxu0 %v12180_v19  ;;  %5587 = vmatpush1.bf16.msra.mxu1 %v12179_v20  ;;  %v12231_v55 = vld [vmem:[%s20472_s1 + $0x1a4] ss:$8 sps:$4 sm:$0xff]   ;;  %v12233_v58 = vld [vmem:[%s20472_s1 + $0x1a0] ss:$8 sps:$4 sm:$0xff]   ;;  %v12237_v59 = vld [vmem:[%s20472_s1 + $0x194] ss:$8 sps:$4 sm:$0xff]  }
  0x15   :  { %5588 = vmatprep.subr.bf16.mxu1 %v12183_v21  ;;  %v12236_v60 = vld [vmem:[%s20472_s1 + $0x90] ss:$8 sps:$4 sm:$0xff]   ;;  %v12240_v61 = vld [vmem:[%s20472_s1 + $0x84] ss:$8 sps:$4 sm:$0xff]   ;;  %v12242_v0 = vld [vmem:[%s20472_s1 + $0x80] ss:$8 sps:$4 sm:$0xff]  }
  0x16   :  { %v12239_v62 = vld [vmem:[%s20472_s1 + $0x190] ss:$8 sps:$4 sm:$0xff]   ;;  %v12243_v63 = vld [vmem:[%s20472_s1 + $0x184] ss:$8 sps:$4 sm:$0xff]   ;;  %v12251_v1 = vld [vmem:[%s20472_s1 + $0x274] ss:$8 sps:$4 sm:$0xff]  }
  0x17   :  { %5236 = vmatpush1.bf16.msra.mxu0 %v12182_v22  ;;  %v12248_v2 = vld [vmem:[%s20472_s1 + $0x180] ss:$8 sps:$4 sm:$0xff]   ;;  %v12249_v4 = vld [vmem:[%s20472_s1 + $0x270] ss:$8 sps:$4 sm:$0xff]   ;;  %v12255_v6 = vld [vmem:[%s20473_s0 + $0x94] ss:$72 sps:$4 sm:$0xff]  }
  0x18   :  { %5237 = vmatprep.subr.bf16.mxu0 %v12186_v23  ;;  %5589 = vmatpush1.bf16.msra.mxu1 %v12185_v24  ;;  %v12245_v3 = vld [vmem:[%s20473_s0] ss:$72 sps:$4 sm:$0xff]   ;;  %v12266_v7 = vld [vmem:[%s20472_s1 + $0x264] ss:$8 sps:$4 sm:$0xff]   ;;  %v12281_v10 = vld [vmem:[%s20472_s1 + $0x254] ss:$8 sps:$4 sm:$0xff]  }
  0x19   :  { %5590 = vmatprep.subr.bf16.mxu1 %v12189_v25  ;;  %v12252_v5 = vld [vmem:[%s20473_s0 + $0x8] ss:$72 sps:$4 sm:$0xff]   ;;  %v12258_v8 = vld [vmem:[%s20473_s0 + $0x9c] ss:$72 sps:$4 sm:$0xff]   ;;  %v12260_v12 = vld [vmem:[%s20473_s0 + $0x98] ss:$72 sps:$4 sm:$0xff]  }
  0x1a   :  { %v12264_v9 = vld [vmem:[%s20472_s1 + $0x260] ss:$8 sps:$4 sm:$0xff]   ;;  %v12257_v11 = vld [vmem:[%s20473_s0 + $0x90] ss:$72 sps:$4 sm:$0xff]   ;;  %v12261_v13 = vld [vmem:[%s20473_s0 + $0x124] ss:$72 sps:$4 sm:$0xff]  }
  0x1b   :  { %5238 = vmatpush1.bf16.msra.mxu0 %v12188_v26  ;;  %v12279_v14 = vld [vmem:[%s20472_s1 + $0x250] ss:$8 sps:$4 sm:$0xff]   ;;  %v12296_v15 = vld [vmem:[%s20472_s1 + $0x244] ss:$8 sps:$4 sm:$0xff]   ;;  %v12294_v17 = vld [vmem:[%s20472_s1 + $0x240] ss:$8 sps:$4 sm:$0xff]  }
  0x1c   :  { %5239 = vmatprep.subr.bf16.mxu0 %v12192_v27  ;;  %5591 = vmatpush1.bf16.msra.mxu1 %v12191_v28  ;;  %v12267_v16 = vld [vmem:[%s20473_s0 + $0x12c] ss:$72 sps:$4 sm:$0xff]   ;;  %v12263_v19 = vld [vmem:[%s20473_s0 + $0x120] ss:$72 sps:$4 sm:$0xff]   ;;  %v12309_v22 = vld [vmem:[%s20472_s1 + $0x230] ss:$8 sps:$4 sm:$0xff]  }
  0x1d   :  { %5592 = vmatprep.subr.bf16.mxu1 %v12195_v29  ;;  %v12311_v18 = vld [vmem:[%s20472_s1 + $0x234] ss:$8 sps:$4 sm:$0xff]   ;;  %v12269_v20 = vld [vmem:[%s20473_s0 + $0x128] ss:$72 sps:$4 sm:$0xff]   ;;  %v12326_v23 = vld [vmem:[%s20472_s1 + $0x224] ss:$8 sps:$4 sm:$0xff]  }
  0x1e   :  { %v12270_v21 = vld [vmem:[%s20473_s0 + $0x1b4] ss:$72 sps:$4 sm:$0xff]   ;;  %v12324_v25 = vld [vmem:[%s20472_s1 + $0x220] ss:$8 sps:$4 sm:$0xff]   ;;  %v12272_v27 = vld [vmem:[%s20473_s0 + $0x1b0] ss:$72 sps:$4 sm:$0xff]  }
  0x1f   :  { %5240 = vmatpush1.bf16.msra.mxu0 %v12194_v30  ;;  %v12273_v24 = vld [vmem:[%s20473_s0 + $0x1bc] ss:$72 sps:$4 sm:$0xff]   ;;  %v12339_v29 = vld [vmem:[%s20472_s1 + $0x210] ss:$8 sps:$4 sm:$0xff]  }
  0x20   :  { %5241 = vmatprep.subr.bf16.mxu0 %v12198_v31  ;;  %5593 = vmatpush1.bf16.msra.mxu1 %v12197_v32  ;;  %v12341_v26 = vld [vmem:[%s20472_s1 + $0x214] ss:$8 sps:$4 sm:$0xff]   ;;  %v12276_v28 = vld [vmem:[%s20473_s0 + $0x244] ss:$72 sps:$4 sm:$0xff]   ;;  %v12275_v30 = vld [vmem:[%s20473_s0 + $0x1b8] ss:$72 sps:$4 sm:$0xff]  }
  0x21   :  { %5594 = vmatprep.subr.bf16.mxu1 %v12201_v33  ;;  %v12282_v31 = vld [vmem:[%s20473_s0 + $0x24c] ss:$72 sps:$4 sm:$0xff]   ;;  %v12354_v32 = vld [vmem:[%s20472_s1 + $0x200] ss:$8 sps:$4 sm:$0xff]   ;;  %v12303_v51 = vld [vmem:[%s20473_s0 + $0x3fc] ss:$72 sps:$4 sm:$0xff]  }
  0x22   :  { %v12356_v33 = vld [vmem:[%s20472_s1 + $0x204] ss:$8 sps:$4 sm:$0xff]   ;;  %v12300_v47 = vld [vmem:[%s20473_s0 + $0x3f4] ss:$72 sps:$4 sm:$0xff]  }
  0x23   :  { %5242 = vmatpush2.bf16.msra.mxu0 %v12200_v34  ;;  %v12278_v34 = vld [vmem:[%s20473_s0 + $0x240] ss:$72 sps:$4 sm:$0xff]  }
  0x24   :  { %5243 = vmatprep.subr.bf16.mxu0 %v12204_v35  ;;  %5595 = vmatpush2.bf16.msra.mxu1 %v12203_v36  ;;  %v12285_v35 = vld [vmem:[%s20473_s0 + $0x2d4] ss:$72 sps:$4 sm:$0xff]   ;;  %v12284_v36 = vld [vmem:[%s20473_s0 + $0x248] ss:$72 sps:$4 sm:$0xff]  }
  0x25   :  { %5596 = vmatprep.subr.bf16.mxu1 %v12207_v37  ;;  %v12288_v37 = vld [vmem:[%s20473_s0 + $0x2dc] ss:$72 sps:$4 sm:$0xff]  }
  0x27   :  { %5244 = vmatpush2.bf16.msra.mxu0 %v12206_v38  ;;  %v12369_v38 = vld [vmem:[%s20472_s1 + $0x2f0] ss:$8 sps:$4 sm:$0xff]  }
  0x28   :  { %5245 = vmatprep.subr.bf16.mxu0 %v12210_v39  ;;  %5597 = vmatpush2.bf16.msra.mxu1 %v12209_v40  ;;  %v12371_v39 = vld [vmem:[%s20472_s1 + $0x2f4] ss:$8 sps:$4 sm:$0xff]   ;;  %v12287_v40 = vld [vmem:[%s20473_s0 + $0x2d0] ss:$72 sps:$4 sm:$0xff]  }
  0x29   :  { %5598 = vmatprep.subr.bf16.mxu1 %v12213_v41  ;;  %v12290_v41 = vld [vmem:[%s20473_s0 + $0x2d8] ss:$72 sps:$4 sm:$0xff]  }
  0x2b   :  { %5246 = vmatpush2.bf16.msra.mxu0 %v12212_v42  ;;  %v12291_v42 = vld [vmem:[%s20473_s0 + $0x364] ss:$72 sps:$4 sm:$0xff]  }
  0x2c   :  { %5247 = vmatprep.subr.bf16.mxu0 %v12216_v43  ;;  %5599 = vmatpush2.bf16.msra.mxu1 %v12215_v44  ;;  %v12297_v43 = vld [vmem:[%s20473_s0 + $0x36c] ss:$72 sps:$4 sm:$0xff]   ;;  %v12384_v44 = vld [vmem:[%s20472_s1 + $0x2e0] ss:$8 sps:$4 sm:$0xff]  }
  0x2d   :  { %5600 = vmatprep.subr.bf16.mxu1 %v12219_v45  ;;  %v12386_v45 = vld [vmem:[%s20472_s1 + $0x2e4] ss:$8 sps:$4 sm:$0xff]  }
  0x2f   :  { %5248 = vmatpush2.bf16.msra.mxu0 %v12218_v46  ;;  %v12293_v46 = vld [vmem:[%s20473_s0 + $0x360] ss:$72 sps:$4 sm:$0xff]  }
  0x30   :  { %5249 = vmatprep.subr.bf16.mxu0 %v12222_v48  ;;  %5601 = vmatpush2.bf16.msra.mxu1 %v12221_v49  ;;  %v12399_v48 = vld [vmem:[%s20472_s1 + $0x2d0] ss:$8 sps:$4 sm:$0xff]   ;;  %v12401_v49 = vld [vmem:[%s20472_s1 + $0x2d4] ss:$8 sps:$4 sm:$0xff]  }
  0x31   :  { %5602 = vmatprep.subr.bf16.mxu1 %v12225_v50  ;;  %v12299_v50 = vld [vmem:[%s20473_s0 + $0x368] ss:$72 sps:$4 sm:$0xff]  }
  0x33   :  { %5250 = vmatpush2.bf16.msra.mxu0 %v12224_v52  ;;  %v12302_v52 = vld [vmem:[%s20473_s0 + $0x3f0] ss:$72 sps:$4 sm:$0xff]  }
  0x34   :  { %5251 = vmatprep.subr.bf16.mxu0 %v12228_v53  ;;  %5603 = vmatpush2.bf16.msra.mxu1 %v12227_v54  ;;  %v12414_v53 = vld [vmem:[%s20472_s1 + $0x2c0] ss:$8 sps:$4 sm:$0xff]   ;;  %v12416_v54 = vld [vmem:[%s20472_s1 + $0x2c4] ss:$8 sps:$4 sm:$0xff]  }
  0x35   :  { %5604 = vmatprep.subr.bf16.mxu1 %v12231_v55  ;;  %v12306_v55 = vld [vmem:[%s20473_s0 + $0x484] ss:$72 sps:$4 sm:$0xff]  }
  0x37   :  { %5252 = vmatpush2.bf16.msra.mxu0 %v12230_v56  ;;  %v12305_v56 = vld [vmem:[%s20473_s0 + $0x3f8] ss:$72 sps:$4 sm:$0xff]  }
  0x38   :  { %5253 = vmatprep.subr.bf16.mxu0 %v12234_v57  ;;  %5605 = vmatpush2.bf16.msra.mxu1 %v12233_v58  ;;  %v12312_v57 = vld [vmem:[%s20473_s0 + $0x48c] ss:$72 sps:$4 sm:$0xff]   ;;  %v12308_v58 = vld [vmem:[%s20473_s0 + $0x480] ss:$72 sps:$4 sm:$0xff]  }
  0x39   :  { %5606 = vmatprep.subr.bf16.mxu1 %v12237_v59  ;;  %v12315_v59 = vld [vmem:[%s20473_s0 + $0x514] ss:$72 sps:$4 sm:$0xff]  }
  0x3b   :  { %5254 = vmatpush2.bf16.msra.mxu0 %v12236_v60  ;;  %v12314_v60 = vld [vmem:[%s20473_s0 + $0x488] ss:$72 sps:$4 sm:$0xff]  }
  0x3c   :  { %5255 = vmatprep.subr.bf16.mxu0 %v12240_v61  ;;  %5607 = vmatpush2.bf16.msra.mxu1 %v12239_v62  ;;  %v12318_v61 = vld [vmem:[%s20473_s0 + $0x51c] ss:$72 sps:$4 sm:$0xff]  }
  0x3d   :  { %5608 = vmatprep.subr.bf16.mxu1 %v12243_v63  ;;  %v12437_v62 = vld [vmem:[%s20472_s1 + $0x374] ss:$8 sps:$4 sm:$0xff]   ;;  %v12429_v63 = vld [vmem:[%s20472_s1 + $0x2b0] ss:$8 sps:$4 sm:$0xff]  }
  0x3f   :  { %5256 = vmatpush2.bf16.msra.mxu0 %v12242_v0  ;;  %v12431_v0 = vld [vmem:[%s20472_s1 + $0x2b4] ss:$8 sps:$4 sm:$0xff]  }
  0x40   :  { %5931 = vmatprep.subr.bf16.mxu0 %v12251_v1  ;;  %5609 = vmatpush2.bf16.msra.mxu1 %v12248_v2  ;;  %v12435_v1 = vld [vmem:[%s20472_s1 + $0x370] ss:$8 sps:$4 sm:$0xff]  }
  0x41   :  { %v12317_v2 = vld [vmem:[%s20473_s0 + $0x510] ss:$72 sps:$4 sm:$0xff]   ;;  %6284 = vmatprep.subr.bf16.mxu1 %v12437_v62  ;;  %v12530_v62 = vld [vmem:[%s20472_s1 + $0x394] ss:$8 sps:$4 sm:$0xff]  }
  0x42   :  { %5258 = vmatmul.mubr.bf16.vlgmr.msra.gmra.mxu0 %v12245_v3  ;;  %v12440_v3 = vld [vmem:[%s20472_s1 + $0x364] ss:$8 sps:$4 sm:$0xff]  }
  0x43   :  { %5932 = vmatpush1.bf16.msra.mxu0 %v12249_v4  ;;  %5267 = vmatprep.mubr.bf16.mxu0 %v12255_v6  ;;  %v12321_v4 = vld [vmem:[%s20473_s0 + $0x5a4] ss:$72 sps:$4 sm:$0xff]   ;;  %v12320_v6 = vld [vmem:[%s20473_s0 + $0x518] ss:$72 sps:$4 sm:$0xff]  }
  0x44   :  { %5611 = vmatmul.mubr.bf16.vlgmr.msra.gmra.mxu1 %v12252_v5  ;;  %5933 = vmatprep.subr.bf16.mxu0 %v12266_v7  ;;  %v12438_v5 = vld [vmem:[%s20472_s1 + $0x360] ss:$8 sps:$4 sm:$0xff]   ;;  %v12327_v7 = vld [vmem:[%s20473_s0 + $0x5ac] ss:$72 sps:$4 sm:$0xff]  }
  0x45   :  { %5620 = vmatprep.mubr.bf16.mxu1 %v12258_v8  ;;  %6285 = vmatpush1.bf16.msra.mxu1 %v12435_v1  ;;  %v12449_v8 = vld [vmem:[%s20472_s1 + $0x354] ss:$8 sps:$4 sm:$0xff]   ;;  %v12533_v1 = vld [vmem:[%s20472_s1 + $0x384] ss:$8 sps:$4 sm:$0xff]  }
  0x46   :  { %6286 = vmatprep.subr.bf16.mxu1 %v12440_v3  ;;  %v12531_v3 = vld [vmem:[%s20472_s1 + $0x380] ss:$8 sps:$4 sm:$0xff]  }
  0x47   :  { %5934 = vmatpush1.bf16.msra.mxu0 %v12264_v9  ;;  %v12447_v9 = vld [vmem:[%s20472_s1 + $0x350] ss:$8 sps:$4 sm:$0xff]  }
  0x48   :  { %5935 = vmatprep.subr.bf16.mxu0 %v12281_v10  ;;  %v12323_v10 = vld [vmem:[%s20473_s0 + $0x5a0] ss:$72 sps:$4 sm:$0xff]  }
  0x49   :  { %6287 = vmatpush1.bf16.msra.mxu1 %v12438_v5  ;;  %v12378_v5 = vld [vmem:[%s20473_s0 + $0x99c] ss:$72 sps:$4 sm:$0xff]  }
  0x4a   :  { %5268 = vmatmul.mubr.bf16.gmra.mxu0 %v12257_v11  ;;  %6288 = vmatprep.subr.bf16.mxu1 %v12449_v8  ;;  %v12452_v11 = vld [vmem:[%s20472_s1 + $0x344] ss:$8 sps:$4 sm:$0xff]  }
  0x4b   :  { %5277 = vmatprep.mubr.bf16.mxu0 %v12261_v13  ;;  %5936 = vmatpush1.bf16.msra.mxu0 %v12279_v14  ;;  %v12450_v13 = vld [vmem:[%s20472_s1 + $0x340] ss:$8 sps:$4 sm:$0xff]   ;;  %v12381_v8 = vld [vmem:[%s20473_s0 + $0xa24] ss:$72 sps:$4 sm:$0xff]  }
  0x4c   :  { %5621 = vmatmul.mubr.bf16.gmra.mxu1 %v12260_v12  ;;  %5937 = vmatprep.subr.bf16.mxu0 %v12296_v15  ;;  %v12330_v12 = vld [vmem:[%s20473_s0 + $0x634] ss:$72 sps:$4 sm:$0xff]   ;;  %v12329_v14 = vld [vmem:[%s20473_s0 + $0x5a8] ss:$72 sps:$4 sm:$0xff]  }
  0x4d   :  { %5630 = vmatprep.mubr.bf16.mxu1 %v12267_v16  ;;  %6289 = vmatpush1.bf16.msra.mxu1 %v12447_v9  ;;  %v12333_v15 = vld [vmem:[%s20473_s0 + $0x63c] ss:$72 sps:$4 sm:$0xff]   ;;  %v12380_v9 = vld [vmem:[%s20473_s0 + $0x998] ss:$72 sps:$4 sm:$0xff]  }
  0x4e   :  { %6290 = vmatprep.subr.bf16.mxu1 %v12452_v11  ;;  %v12464_v16 = vld [vmem:[%s20472_s1 + $0x334] ss:$8 sps:$4 sm:$0xff]   ;;  %v12383_v11 = vld [vmem:[%s20473_s0 + $0xa20] ss:$72 sps:$4 sm:$0xff]  }
  0x4f   :  { %5938 = vmatpush1.bf16.msra.mxu0 %v12294_v17  ;;  %v12456_v17 = vld [vmem:[%s20472_s1 + $0x2a0] ss:$8 sps:$4 sm:$0xff]  }
  0x50   :  { %5939 = vmatprep.subr.bf16.mxu0 %v12311_v18  ;;  %v12458_v18 = vld [vmem:[%s20472_s1 + $0x2a4] ss:$8 sps:$4 sm:$0xff]  }
  0x51   :  { %6291 = vmatpush1.bf16.msra.mxu1 %v12450_v13  ;;  %v12389_v13 = vld [vmem:[%s20473_s0 + $0xa28] ss:$72 sps:$4 sm:$0xff]  }
  0x52   :  { %5278 = vmatmul.mubr.bf16.gmra.mxu0 %v12263_v19  ;;  %v12462_v19 = vld [vmem:[%s20472_s1 + $0x330] ss:$8 sps:$4 sm:$0xff]   ;;  %6292 = vmatprep.subr.bf16.mxu1 %v12464_v16  ;;  %v12396_v16 = vld [vmem:[%s20473_s0 + $0xb44] ss:$72 sps:$4 sm:$0xff]  }
  0x53   :  { %5287 = vmatprep.mubr.bf16.mxu0 %v12270_v21  ;;  %5940 = vmatpush1.bf16.msra.mxu0 %v12309_v22  ;;  %v12467_v21 = vld [vmem:[%s20472_s1 + $0x324] ss:$8 sps:$4 sm:$0xff]  }
  0x54   :  { %5631 = vmatmul.mubr.bf16.gmra.mxu1 %v12269_v20  ;;  %5941 = vmatprep.subr.bf16.mxu0 %v12326_v23  ;;  %v12332_v20 = vld [vmem:[%s20473_s0 + $0x630] ss:$72 sps:$4 sm:$0xff]   ;;  %v12336_v22 = vld [vmem:[%s20473_s0 + $0x6c4] ss:$72 sps:$4 sm:$0xff]   ;;  %v12465_v23 = vld [vmem:[%s20472_s1 + $0x320] ss:$8 sps:$4 sm:$0xff]  }
  0x55   :  { %5640 = vmatprep.mubr.bf16.mxu1 %v12273_v24  ;;  %6293 = vmatpush1.bf16.msra.mxu1 %v12462_v19  ;;  %v12335_v24 = vld [vmem:[%s20473_s0 + $0x638] ss:$72 sps:$4 sm:$0xff]  }
  0x56   :  { %6294 = vmatprep.subr.bf16.mxu1 %v12467_v21  ;;  %v12398_v19 = vld [vmem:[%s20473_s0 + $0xb40] ss:$72 sps:$4 sm:$0xff]  }
  0x57   :  { %5942 = vmatpush1.bf16.msra.mxu0 %v12324_v25  ;;  %v12342_v25 = vld [vmem:[%s20473_s0 + $0x6cc] ss:$72 sps:$4 sm:$0xff]   ;;  %v12404_v21 = vld [vmem:[%s20473_s0 + $0xb48] ss:$72 sps:$4 sm:$0xff]  }
  0x58   :  { %5943 = vmatprep.subr.bf16.mxu0 %v12341_v26  ;;  %v12476_v26 = vld [vmem:[%s20472_s1 + $0x314] ss:$8 sps:$4 sm:$0xff]  }
  0x59   :  { %6295 = vmatpush1.bf16.msra.mxu1 %v12465_v23  ;;  %v12407_v23 = vld [vmem:[%s20473_s0 + $0xbd0] ss:$72 sps:$4 sm:$0xff]  }
  0x5a   :  { %5288 = vmatmul.mubr.bf16.gmra.mxu0 %v12272_v27  ;;  %v12474_v27 = vld [vmem:[%s20472_s1 + $0x310] ss:$8 sps:$4 sm:$0xff]   ;;  %6296 = vmatprep.subr.bf16.mxu1 %v12476_v26  ;;  %v12417_v26 = vld [vmem:[%s20473_s0 + $0xc6c] ss:$72 sps:$4 sm:$0xff]  }
  0x5b   :  { %5297 = vmatprep.mubr.bf16.mxu0 %v12276_v28  ;;  %5944 = vmatpush1.bf16.msra.mxu0 %v12339_v29  ;;  %v12338_v28 = vld [vmem:[%s20473_s0 + $0x6c0] ss:$72 sps:$4 sm:$0xff]   ;;  %v12479_v29 = vld [vmem:[%s20472_s1 + $0x304] ss:$8 sps:$4 sm:$0xff]  }
  0x5c   :  { %5641 = vmatmul.mubr.bf16.gmra.mxu1 %v12275_v30  ;;  %5945 = vmatprep.subr.bf16.mxu0 %v12356_v33  ;;  %v12345_v30 = vld [vmem:[%s20473_s0 + $0x754] ss:$72 sps:$4 sm:$0xff]  }
  0x5d   :  { %5650 = vmatprep.mubr.bf16.mxu1 %v12282_v31  ;;  %6297 = vmatpush1.bf16.msra.mxu1 %v12474_v27  ;;  %v12477_v31 = vld [vmem:[%s20472_s1 + $0x300] ss:$8 sps:$4 sm:$0xff]   ;;  %v12348_v33 = vld [vmem:[%s20473_s0 + $0x75c] ss:$72 sps:$4 sm:$0xff]  }
  0x5e   :  { %6298 = vmatprep.subr.bf16.mxu1 %v12479_v29  ;;  %v12413_v27 = vld [vmem:[%s20473_s0 + $0xc60] ss:$72 sps:$4 sm:$0xff]  }
  0x5f   :  { %5946 = vmatpush1.bf16.msra.mxu0 %v12354_v32  ;;  %v12344_v32 = vld [vmem:[%s20473_s0 + $0x6c8] ss:$72 sps:$4 sm:$0xff]  }
  0x60   :  { %5947 = vmatprep.subr.bf16.mxu0 %v12371_v39  ;;  %v12494_v39 = vld [vmem:[%s20472_s1 + $0x3e4] ss:$8 sps:$4 sm:$0xff]   ;;  %v12419_v29 = vld [vmem:[%s20473_s0 + $0xc68] ss:$72 sps:$4 sm:$0xff]  }
  0x61   :  { %6299 = vmatpush1.bf16.msra.mxu1 %v12477_v31  ;;  %v20481_v31 = vlaneseq }
  0x62   :  { %5298 = vmatmul.mubr.bf16.gmra.mxu0 %v12278_v34  ;;  %v12491_v34 = vld [vmem:[%s20472_s1 + $0x3f4] ss:$8 sps:$4 sm:$0xff]  }
  0x63   :  { %5307 = vmatprep.mubr.bf16.mxu0 %v12285_v35  ;;  %5948 = vmatpush2.bf16.msra.mxu0 %v12369_v38  ;;  %v12483_v35 = vld [vmem:[%s20472_s1 + $0x290] ss:$8 sps:$4 sm:$0xff]  }
  0x64   :  { %5651 = vmatmul.mubr.bf16.gmra.mxu1 %v12284_v36  ;;  %5949 = vmatprep.subr.bf16.mxu0 %v12386_v45  ;;  %v12485_v36 = vld [vmem:[%s20472_s1 + $0x294] ss:$8 sps:$4 sm:$0xff]   ;;  %v12347_v38 = vld [vmem:[%s20473_s0 + $0x750] ss:$72 sps:$4 sm:$0xff]  }
  0x65   :  { %5660 = vmatprep.mubr.bf16.mxu1 %v12288_v37  ;;  %v12489_v37 = vld [vmem:[%s20472_s1 + $0x3f0] ss:$8 sps:$4 sm:$0xff]   ;;  %6300 = vmatprep.subr.bf16.mxu1 %v12491_v34  ;;  %v896_v34 = vshrl.u32 %v20481_v31, 7 }
  0x66   :  { %6301 = vmatpush2.bf16.msra.mxu1 %v12489_v37  ;;  %v12501_v45 = vld [vmem:[%s20472_s1 + $0x3d0] ss:$8 sps:$4 sm:$0xff]   ;;  %v893_v37 = vld [vmem:[%s20474_s2] sm:$0x3] }
  0x67   :  { %5950 = vmatpush2.bf16.msra.mxu0 %v12384_v44  ;;  %6302 = vmatprep.subr.bf16.mxu1 %v12494_v39  ;;  %v12503_v44 = vld [vmem:[%s20472_s1 + $0x3d4] ss:$8 sps:$4 sm:$0xff]   ;;  %v12428_v39 = vld [vmem:[%s20473_s0 + $0xd80] ss:$72 sps:$4 sm:$0xff]  }
  0x68   :  { %5951 = vmatprep.subr.bf16.mxu0 %v12401_v49  ;;  %v12504_v49 = vld [vmem:[%s20472_s1 + $0x3c0] ss:$8 sps:$4 sm:$0xff]  }
  0x6a   :  { %5308 = vmatmul.mubr.bf16.gmra.mxu0 %v12287_v40  ;;  %v12351_v40 = vld [vmem:[%s20473_s0 + $0x7e4] ss:$72 sps:$4 sm:$0xff]  }
  0x6b   :  { %5317 = vmatprep.mubr.bf16.mxu0 %v12291_v42  ;;  %5952 = vmatpush2.bf16.msra.mxu0 %v12399_v48  ;;  %v12350_v42 = vld [vmem:[%s20473_s0 + $0x758] ss:$72 sps:$4 sm:$0xff]   ;;  %v12360_v48 = vld [vmem:[%s20473_s0 + $0x874] ss:$72 sps:$4 sm:$0xff]  }
  0x6c   :  { %5661 = vmatmul.mubr.bf16.gmra.mxu1 %v12290_v41  ;;  %5953 = vmatprep.subr.bf16.mxu0 %v12416_v54  ;;  %v12492_v41 = vld [vmem:[%s20472_s1 + $0x3e0] ss:$8 sps:$4 sm:$0xff]   ;;  %v12512_v54 = vld [vmem:[%s20472_s1 + $0x284] ss:$8 sps:$4 sm:$0xff]  }
  0x6d   :  { %5670 = vmatprep.mubr.bf16.mxu1 %v12297_v43  ;;  %v12357_v43 = vld [vmem:[%s20473_s0 + $0x7ec] ss:$72 sps:$4 sm:$0xff]   ;;  %6303 = vmatpush2.bf16.msra.mxu1 %v12492_v41 }
  0x6e   :  { %6304 = vmatprep.subr.bf16.mxu1 %v12503_v44 }
  0x6f   :  { %5954 = vmatpush2.bf16.msra.mxu0 %v12414_v53  ;;  %v12510_v53 = vld [vmem:[%s20472_s1 + $0x280] ss:$8 sps:$4 sm:$0xff]  }
  0x70   :  { %5955 = vmatprep.subr.bf16.mxu0 %v12431_v0  ;;  %v12368_v0 = vld [vmem:[%s20473_s0 + $0x900] ss:$72 sps:$4 sm:$0xff]  }
  0x71   :  { %6305 = vmatpush2.bf16.msra.mxu1 %v12501_v45  ;;  %v12444_v45 = vld [vmem:[%s20473_s0 + $0xe1c] ss:$72 sps:$4 sm:$0xff]  }
  0x72   :  { %5318 = vmatmul.mubr.bf16.gmra.mxu0 %v12293_v46  ;;  %v12353_v46 = vld [vmem:[%s20473_s0 + $0x7e0] ss:$72 sps:$4 sm:$0xff]  }
  0x73   :  { %5327 = vmatprep.mubr.bf16.mxu0 %v12300_v47  ;;  %5956 = vmatpush2.bf16.msra.mxu0 %v12429_v63  ;;  %v12506_v47 = vld [vmem:[%s20472_s1 + $0x3c4] ss:$8 sps:$4 sm:$0xff]   ;;  %v12528_v63 = vld [vmem:[%s20472_s1 + $0x390] ss:$8 sps:$4 sm:$0xff]  }
  0x74   :  { %5671 = vmatmul.mubr.bf16.gmra.mxu1 %v12299_v50  ;;  %5957 = vmatprep.subr.bf16.mxu0 %v12458_v18  ;;  %v12359_v50 = vld [vmem:[%s20473_s0 + $0x7e8] ss:$72 sps:$4 sm:$0xff]   ;;  %v12402_v18 = vld [vmem:[%s20473_s0 + $0xb4c] ss:$72 sps:$4 sm:$0xff]  }
  0x75   :  { %5680 = vmatprep.mubr.bf16.mxu1 %v12303_v51  ;;  %6306 = vmatprep.subr.bf16.mxu1 %v12506_v47  ;;  %v12363_v51 = vld [vmem:[%s20473_s0 + $0x87c] ss:$72 sps:$4 sm:$0xff]  }
  0x76   :  { %6307 = vmatpush2.bf16.msra.mxu1 %v12504_v49 }
  0x77   :  { %5958 = vmatpush2.bf16.msra.mxu0 %v12456_v17  ;;  %v12395_v17 = vld [vmem:[%s20473_s0 + $0xab8] ss:$72 sps:$4 sm:$0xff]  }
  0x78   :  { %5959 = vmatprep.subr.bf16.mxu0 %v12485_v36  ;;  %v12432_v36 = vld [vmem:[%s20473_s0 + $0xd8c] ss:$72 sps:$4 sm:$0xff]  }
  0x7a   :  { %5328 = vmatmul.mubr.bf16.gmra.mxu0 %v12302_v52  ;;  %v12518_v52 = vld [vmem:[%s20472_s1 + $0x3b4] ss:$8 sps:$4 sm:$0xff]  }
  0x7b   :  { %5337 = vmatprep.mubr.bf16.mxu0 %v12306_v55  ;;  %5960 = vmatpush2.bf16.msra.mxu0 %v12483_v35  ;;  %v12516_v55 = vld [vmem:[%s20472_s1 + $0x3b0] ss:$8 sps:$4 sm:$0xff]  }
  0x7c   :  { %5681 = vmatmul.mubr.bf16.gmra.mxu1 %v12305_v56  ;;  %v12362_v56 = vld [vmem:[%s20473_s0 + $0x870] ss:$72 sps:$4 sm:$0xff]   ;;  %6308 = vmatprep.subr.bf16.mxu1 %v12518_v52 }
  0x7d   :  { %5690 = vmatprep.mubr.bf16.mxu1 %v12312_v57  ;;  %5961 = vmatprep.subr.bf16.mxu0 %v12512_v54  ;;  %v12521_v57 = vld [vmem:[%s20472_s1 + $0x3a4] ss:$8 sps:$4 sm:$0xff]   ;;  %v12425_v35 = vld [vmem:[%s20473_s0 + $0xcf8] ss:$72 sps:$4 sm:$0xff]  }
  0x7e   :  { %6309 = vmatpush2.bf16.msra.mxu1 %v12516_v55 }
  0x7f   :  { %5962 = vmatpush2.bf16.msra.mxu0 %v12510_v53  ;;  %6310 = vmatprep.subr.bf16.mxu1 %v12521_v57  ;;  %v12453_v57 = vld [vmem:[%s20473_s0 + $0xea4] ss:$72 sps:$4 sm:$0xff]  }
  0x82   :  { %5338 = vmatmul.mubr.bf16.gmra.mxu0 %v12308_v58  ;;  %v12366_v58 = vld [vmem:[%s20473_s0 + $0x904] ss:$72 sps:$4 sm:$0xff]  }
  0x83   :  { %5347 = vmatprep.mubr.bf16.mxu0 %v12315_v59  ;;  %v12519_v59 = vld [vmem:[%s20472_s1 + $0x3a0] ss:$8 sps:$4 sm:$0xff]  }
  0x84   :  { %5691 = vmatmul.mubr.bf16.gmra.mxu1 %v12314_v60  ;;  %v12365_v60 = vld [vmem:[%s20473_s0 + $0x878] ss:$72 sps:$4 sm:$0xff]  }
  0x85   :  { %5700 = vmatprep.mubr.bf16.mxu1 %v12318_v61  ;;  %v12372_v61 = vld [vmem:[%s20473_s0 + $0x90c] ss:$72 sps:$4 sm:$0xff]   ;;  %6311 = vmatpush2.bf16.msra.mxu1 %v12519_v59 }
  0x86   :  { %6312 = vmatprep.subr.bf16.mxu1 %v12530_v62 }
  0x89   :  { %6313 = vmatpush2.bf16.msra.mxu1 %v12528_v63  ;;  %v12459_v63 = vld [vmem:[%s20473_s0 + $0xeac] ss:$72 sps:$4 sm:$0xff]  }
  0x8a   :  { %5348 = vmatmul.mubr.bf16.gmra.mxu0 %v12317_v2  ;;  %v12375_v2 = vld [vmem:[%s20473_s0 + $0x994] ss:$72 sps:$4 sm:$0xff]   ;;  %6314 = vmatprep.subr.bf16.mxu1 %v12533_v1 }
  0x8b   :  { %5357 = vmatprep.mubr.bf16.mxu0 %v12321_v4  ;;  %v12374_v4 = vld [vmem:[%s20473_s0 + $0x908] ss:$72 sps:$4 sm:$0xff]  }
  0x8c   :  { %5701 = vmatmul.mubr.bf16.gmra.mxu1 %v12320_v6  ;;  %v12539_v6 = vld [vmem:[%s20472_s1 + $0x474] ss:$8 sps:$4 sm:$0xff]  }
  0x8d   :  { %5710 = vmatprep.mubr.bf16.mxu1 %v12327_v7  ;;  %6315 = vmatpush2.bf16.msra.mxu1 %v12531_v3  ;;  %v12377_v7 = vld [vmem:[%s20473_s0 + $0x990] ss:$72 sps:$4 sm:$0xff]  }
  0x8e   :  { %6637 = vmatprep.subr.bf16.mxu0 %v12539_v6  ;;  %v12455_v6 = vld [vmem:[%s20473_s0 + $0xea0] ss:$72 sps:$4 sm:$0xff]  }
  0x92   :  { %5358 = vmatmul.mubr.bf16.gmra.mxu0 %v12323_v10  ;;  %v12387_v10 = vld [vmem:[%s20473_s0 + $0xa2c] ss:$72 sps:$4 sm:$0xff]  }
  0x93   :  { %5367 = vmatprep.mubr.bf16.mxu0 %v12330_v12  ;;  %v12390_v12 = vld [vmem:[%s20473_s0 + $0xab4] ss:$72 sps:$4 sm:$0xff]  }
  0x94   :  { %5711 = vmatmul.mubr.bf16.gmra.mxu1 %v12329_v14  ;;  %v12393_v14 = vld [vmem:[%s20473_s0 + $0xabc] ss:$72 sps:$4 sm:$0xff]  }
  0x95   :  { %5720 = vmatprep.mubr.bf16.mxu1 %v12333_v15  ;;  %v12392_v15 = vld [vmem:[%s20473_s0 + $0xab0] ss:$72 sps:$4 sm:$0xff]  }
  0x9a   :  { %5368 = vmatmul.mubr.bf16.gmra.mxu0 %v12332_v20  ;;  %v12405_v20 = vld [vmem:[%s20473_s0 + $0xbd4] ss:$72 sps:$4 sm:$0xff]  }
  0x9b   :  { %5377 = vmatprep.mubr.bf16.mxu0 %v12336_v22  ;;  %v12408_v22 = vld [vmem:[%s20473_s0 + $0xbdc] ss:$72 sps:$4 sm:$0xff]  }
  0x9c   :  { %5721 = vmatmul.mubr.bf16.gmra.mxu1 %v12335_v24  ;;  %v12411_v24 = vld [vmem:[%s20473_s0 + $0xc64] ss:$72 sps:$4 sm:$0xff]  }
  0x9d   :  { %5730 = vmatprep.mubr.bf16.mxu1 %v12342_v25  ;;  %v12410_v25 = vld [vmem:[%s20473_s0 + $0xbd8] ss:$72 sps:$4 sm:$0xff]  }
  0xa2   :  { %5378 = vmatmul.mubr.bf16.gmra.mxu0 %v12338_v28  ;;  %v12420_v28 = vld [vmem:[%s20473_s0 + $0xcf4] ss:$72 sps:$4 sm:$0xff]  }
  0xa3   :  { %5387 = vmatprep.mubr.bf16.mxu0 %v12345_v30  ;;  %v12423_v30 = vld [vmem:[%s20473_s0 + $0xcfc] ss:$72 sps:$4 sm:$0xff]  }
  0xa4   :  { %5731 = vmatmul.mubr.bf16.gmra.mxu1 %v12344_v32  ;;  %v12422_v32 = vld [vmem:[%s20473_s0 + $0xcf0] ss:$72 sps:$4 sm:$0xff]  }
  0xa5   :  { %5740 = vmatprep.mubr.bf16.mxu1 %v12348_v33  ;;  %v12426_v33 = vld [vmem:[%s20473_s0 + $0xd84] ss:$72 sps:$4 sm:$0xff]  }
  0xaa   :  { %5388 = vmatmul.mubr.bf16.gmra.mxu0 %v12347_v38  ;;  %v897_v38 = vsub.s32 0, %v896_v34 }
  0xab   :  { %5397 = vmatprep.mubr.bf16.mxu0 %v12351_v40  ;;  %v901_v40 = vsub.s32 1, %v896_v34  ;;  %v12482_v34 = vld [vmem:[%s20473_s0 + $0xfc4] ss:$72 sps:$4 sm:$0xff]  }
  0xac   :  { %5741 = vmatmul.mubr.bf16.gmra.mxu1 %v12350_v42  ;;  %v14456_v41 = vrot.slane %v893_v37, %v897_v38  ;;  %v12441_v42 = vld [vmem:[%s20473_s0 + $0xe14] ss:$72 sps:$4 sm:$0xff]  }
  0xad   :  { %5750 = vmatprep.mubr.bf16.mxu1 %v12357_v43  ;;  %v12434_v43 = vld [vmem:[%s20473_s0 + $0xd88] ss:$72 sps:$4 sm:$0xff]   ;;  %v14464_v44 = vrot.slane %v893_v37, %v901_v40  ;;  %v12473_v37 = vld [vmem:[%s20473_s0 + $0xf38] ss:$72 sps:$4 sm:$0xff]   ;;  %v12488_v40 = vld [vmem:[%s20473_s0 + $0xfcc] ss:$72 sps:$4 sm:$0xff]  }
  0xb2   :  { %5398 = vmatmul.mubr.bf16.gmra.mxu0 %v12353_v46 }
  0xb3   :  { %5407 = vmatprep.mubr.bf16.mxu0 %v12360_v48 }
  0xb4   :  { %5751 = vmatmul.mubr.bf16.gmra.mxu1 %v12359_v50  ;;  %v12443_v50 = vld [vmem:[%s20473_s0 + $0xe10] ss:$72 sps:$4 sm:$0xff]  }
  0xb5   :  { %5760 = vmatprep.mubr.bf16.mxu1 %v12363_v51 }
  0xba   :  { %5408 = vmatmul.mubr.bf16.gmra.mxu0 %v12362_v56 }
  0xbb   :  { %5417 = vmatprep.mubr.bf16.mxu0 %v12366_v58 }
  0xbc   :  { %5761 = vmatmul.mubr.bf16.gmra.mxu1 %v12365_v60  ;;  %v12446_v60 = vld [vmem:[%s20473_s0 + $0xe18] ss:$72 sps:$4 sm:$0xff]  }
  0xbd   :  { %5770 = vmatprep.mubr.bf16.mxu1 %v12372_v61 }
  0xc2   :  { %5418 = vmatmul.mubr.bf16.gmra.mxu0 %v12368_v0 }
  0xc3   :  { %5427 = vmatprep.mubr.bf16.mxu0 %v12375_v2 }
  0xc4   :  { %5771 = vmatmul.mubr.bf16.gmra.mxu1 %v12374_v4 }
  0xc5   :  { %5780 = vmatprep.mubr.bf16.mxu1 %v12378_v5 }
  0xca   :  { %5428 = vmatmul.mubr.bf16.gmra.mxu0 %v12377_v7 }
  0xcb   :  { %5437 = vmatprep.mubr.bf16.mxu0 %v12381_v8 }
  0xcc   :  { %5781 = vmatmul.mubr.bf16.gmra.mxu1 %v12380_v9 }
  0xcd   :  { %5790 = vmatprep.mubr.bf16.mxu1 %v12387_v10 }
  0xd2   :  { %5438 = vmatmul.mubr.bf16.gmra.mxu0 %v12383_v11 }
  0xd3   :  { %5447 = vmatprep.mubr.bf16.mxu0 %v12390_v12 }
  0xd4   :  { %5791 = vmatmul.mubr.bf16.gmra.mxu1 %v12389_v13  ;;  %v12468_v13 = vld [vmem:[%s20473_s0 + $0xf34] ss:$72 sps:$4 sm:$0xff]  }
  0xd5   :  { %5800 = vmatprep.mubr.bf16.mxu1 %v12393_v14 }
  0xda   :  { %5448 = vmatmul.mubr.bf16.gmra.mxu0 %v12392_v15 }
  0xdb   :  { %5457 = vmatprep.mubr.bf16.mxu0 %v12396_v16  ;;  %v12461_v16 = vld [vmem:[%s20473_s0 + $0xea8] ss:$72 sps:$4 sm:$0xff]  }
  0xdc   :  { %5801 = vmatmul.mubr.bf16.gmra.mxu1 %v12395_v17 }
  0xdd   :  { %5810 = vmatprep.mubr.bf16.mxu1 %v12402_v18 }
  0xe2   :  { %5458 = vmatmul.mubr.bf16.gmra.mxu0 %v12398_v19  ;;  %v12471_v19 = vld [vmem:[%s20473_s0 + $0xf3c] ss:$72 sps:$4 sm:$0xff]  }
  0xe3   :  { %5467 = vmatprep.mubr.bf16.mxu0 %v12405_v20 }
  0xe4   :  { %5811 = vmatmul.mubr.bf16.gmra.mxu1 %v12404_v21 }
  0xe5   :  { %5820 = vmatprep.mubr.bf16.mxu1 %v12408_v22 }
  0xea   :  { %5468 = vmatmul.mubr.bf16.gmra.mxu0 %v12407_v23 }
  0xeb   :  { %5477 = vmatprep.mubr.bf16.mxu0 %v12411_v24 }
  0xec   :  { %5821 = vmatmul.mubr.bf16.gmra.mxu1 %v12410_v25 }
  0xed   :  { %5830 = vmatprep.mubr.bf16.mxu1 %v12417_v26  ;;  %v12470_v26 = vld [vmem:[%s20473_s0 + $0xf30] ss:$72 sps:$4 sm:$0xff]  }
  0xf2   :  { %5478 = vmatmul.mubr.bf16.gmra.mxu0 %v12413_v27 }
  0xf3   :  { %5487 = vmatprep.mubr.bf16.mxu0 %v12420_v28 }
  0xf4   :  { %5831 = vmatmul.mubr.bf16.gmra.mxu1 %v12419_v29 }
  0xf5   :  { %5840 = vmatprep.mubr.bf16.mxu1 %v12423_v30 }
  0xfa   :  { %5488 = vmatmul.mubr.bf16.gmra.mxu0 %v12422_v32 }
  0xfb   :  { %5497 = vmatprep.mubr.bf16.mxu0 %v12426_v33 }
  0xfc   :  { %5841 = vmatmul.mubr.bf16.gmra.mxu1 %v12425_v35 }
  0xfd   :  { %5850 = vmatprep.mubr.bf16.mxu1 %v12432_v36 }
 0x102   :  { %v5259_v46 = vpop.f32.mrf.mxu0  ;;  %5498 = vmatmul.mubr.bf16.gmra.mxu0 %v12428_v39 }
 0x103   :  { %v5260_v47 = vadd.f32 %v5259_v46, %v14456_v41  ;;  %5507 = vmatprep.mubr.bf16.mxu0 %v12441_v42 }
 0x104   :  { %v5261_v48 = vpop.f32.mrf.mxu0  ;;  %v5612_v49 = vpop.f32.mrf.mxu1  ;;  %5851 = vmatmul.mubr.bf16.gmra.mxu1 %v12434_v43 }
 0x105   :  { %v5262_v51 = vadd.f32 %v5261_v48, %v14464_v44  ;;  %v14474_v52 = vadd.f32 %v5612_v49, %v5260_v47  ;;  %5860 = vmatprep.mubr.bf16.mxu1 %v12444_v45  ;;  %v12480_v49 = vld [vmem:[%s20473_s0 + $0xfc0] ss:$72 sps:$4 sm:$0xff]  }
 0x106   :  { %v5263_v53 = vpop.f32.mrf.mxu0  ;;  %v5614_v54 = vpop.f32.mrf.mxu1 }
 0x107   :  { %v5264_v55 = vadd.f32 %v5263_v53, %v14456_v41  ;;  %v14477_v56 = vadd.f32 %v5614_v54, %v5262_v51 }
 0x108   :  { %v5265_v58 = vpop.f32.mrf.mxu0  ;;  %v5616_v59 = vpop.f32.mrf.mxu1 }
 0x109   :  { %v5266_v61 = vadd.f32 %v5265_v58, %v14464_v44  ;;  %v14486_v62 = vadd.f32 %v5616_v59, %v5264_v55  ;;  %v12497_v58 = vld [vmem:[%s20473_s0 + $0x1054] ss:$72 sps:$4 sm:$0xff]  }
 0x10a   :  { %v5269_v0 = vpop.f32.mrf.mxu0  ;;  %5508 = vmatmul.mubr.bf16.gmra.mxu0 %v12443_v50  ;;  %v5618_v1 = vpop.f32.mrf.mxu1 }
 0x10b   :  { %v5270_v2 = vadd.f32 %v5269_v0, %v14456_v41  ;;  %v14492_v3 = vadd.f32 %v5618_v1, %v5266_v61  ;;  %5517 = vmatprep.mubr.bf16.mxu0 %v12453_v57  ;;  %v12486_v61 = vld [vmem:[%s20473_s0 + $0xfc8] ss:$72 sps:$4 sm:$0xff]   ;;  %v12500_v1 = vld [vmem:[%s20473_s0 + $0x105c] ss:$72 sps:$4 sm:$0xff]  }
 0x10c   :  { %v5271_v4 = vpop.f32.mrf.mxu0  ;;  %v5622_v5 = vpop.f32.mrf.mxu1  ;;  %5861 = vmatmul.mubr.bf16.gmra.mxu1 %v12446_v60 }
 0x10d   :  { %v5272_v7 = vadd.f32 %v5271_v4, %v14464_v44  ;;  %v14498_v8 = vadd.f32 %v5622_v5, %v5270_v2  ;;  %5870 = vmatprep.mubr.bf16.mxu1 %v12459_v63 }
 0x10e   :  { %v5273_v9 = vpop.f32.mrf.mxu0  ;;  %v5624_v10 = vpop.f32.mrf.mxu1 }
 0x10f   :  { %v5274_v11 = vadd.f32 %v5273_v9, %v14456_v41  ;;  %v14501_v12 = vadd.f32 %v5624_v10, %v5272_v7  ;;  %v12495_v10 = vld [vmem:[%s20473_s0 + $0x1050] ss:$72 sps:$4 sm:$0xff]  }
 0x110   :  { %v5275_v14 = vpop.f32.mrf.mxu0  ;;  %v5626_v15 = vpop.f32.mrf.mxu1 }
 0x111   :  { %v5276_v17 = vadd.f32 %v5275_v14, %v14464_v44  ;;  %v14510_v18 = vadd.f32 %v5626_v15, %v5274_v11 }
 0x112   :  { %v5279_v20 = vpop.f32.mrf.mxu0  ;;  %5518 = vmatmul.mubr.bf16.gmra.mxu0 %v12455_v6  ;;  %v5628_v21 = vpop.f32.mrf.mxu1 }
 0x113   :  { %v5280_v22 = vadd.f32 %v5279_v20, %v14456_v41  ;;  %v14516_v23 = vadd.f32 %v5628_v21, %v5276_v17  ;;  %5527 = vmatprep.mubr.bf16.mxu0 %v12468_v13 }
 0x114   :  { %v5281_v24 = vpop.f32.mrf.mxu0  ;;  %v5632_v25 = vpop.f32.mrf.mxu1  ;;  %5871 = vmatmul.mubr.bf16.gmra.mxu1 %v12461_v16 }
 0x115   :  { %v5282_v27 = vadd.f32 %v5281_v24, %v14464_v44  ;;  %v14522_v28 = vadd.f32 %v5632_v25, %v5280_v22  ;;  %5880 = vmatprep.mubr.bf16.mxu1 %v12471_v19  ;;  %v12509_v19 = vld [vmem:[%s20473_s0 + $0x10e4] ss:$72 sps:$4 sm:$0xff]   ;;  %v12498_v22 = vld [vmem:[%s20473_s0 + $0x1058] ss:$72 sps:$4 sm:$0xff]  }
 0x116   :  { %v5283_v29 = vpop.f32.mrf.mxu0  ;;  %v5634_v30 = vpop.f32.mrf.mxu1 }
 0x117   :  { %v5284_v32 = vadd.f32 %v5283_v29, %v14456_v41  ;;  %v14525_v33 = vadd.f32 %v5634_v30, %v5282_v27 }
 0x118   :  { %v5285_v35 = vpop.f32.mrf.mxu0  ;;  %v5636_v36 = vpop.f32.mrf.mxu1 }
 0x119   :  { %v5286_v38 = vadd.f32 %v5285_v35, %v14464_v44  ;;  %v14534_v39 = vadd.f32 %v5636_v36, %v5284_v32  ;;  %v12507_v36 = vld [vmem:[%s20473_s0 + $0x10e0] ss:$72 sps:$4 sm:$0xff]  }
 0x11a   :  { %v5289_v42 = vpop.f32.mrf.mxu0  ;;  %5528 = vmatmul.mubr.bf16.gmra.mxu0 %v12470_v26  ;;  %v5638_v43 = vpop.f32.mrf.mxu1  ;;  %v12515_v26 = vld [vmem:[%s20473_s0 + $0x10ec] ss:$72 sps:$4 sm:$0xff]  }
 0x11b   :  { %v5290_v45 = vadd.f32 %v5289_v42, %v14456_v41  ;;  %v14540_v46 = vadd.f32 %v5638_v43, %v5286_v38  ;;  %5537 = vmatprep.mubr.bf16.mxu0 %v12482_v34 }
 0x11c   :  { %v5291_v47 = vpop.f32.mrf.mxu0  ;;  %v5642_v48 = vpop.f32.mrf.mxu1  ;;  %5881 = vmatmul.mubr.bf16.gmra.mxu1 %v12473_v37 }
 0x11d   :  { %v5292_v50 = vadd.f32 %v5291_v47, %v14464_v44  ;;  %v14546_v51 = vadd.f32 %v5642_v48, %v5290_v45  ;;  %5890 = vmatprep.mubr.bf16.mxu1 %v12488_v40  ;;  %v12524_v47 = vld [vmem:[%s20473_s0 + $0x1174] ss:$72 sps:$4 sm:$0xff]  }
 0x11e   :  { %v5293_v53 = vpop.f32.mrf.mxu0  ;;  %v5644_v54 = vpop.f32.mrf.mxu1 }
 0x11f   :  { %v5294_v55 = vadd.f32 %v5293_v53, %v14456_v41  ;;  %v14549_v57 = vadd.f32 %v5644_v54, %v5292_v50  ;;  %v12513_v50 = vld [vmem:[%s20473_s0 + $0x10e8] ss:$72 sps:$4 sm:$0xff]  }
 0x120   :  { %v5295_v59 = vpop.f32.mrf.mxu0  ;;  %v5646_v60 = vpop.f32.mrf.mxu1 }
 0x121   :  { %v5296_v63 = vadd.f32 %v5295_v59, %v14464_v44  ;;  %v14558_v0 = vadd.f32 %v5646_v60, %v5294_v55  ;;  %v12527_v55 = vld [vmem:[%s20473_s0 + $0x117c] ss:$72 sps:$4 sm:$0xff]  }
 0x122   :  { %v5299_v2 = vpop.f32.mrf.mxu0  ;;  %5538 = vmatmul.mubr.bf16.gmra.mxu0 %v12480_v49  ;;  %v5648_v4 = vpop.f32.mrf.mxu1 }
 0x123   :  { %v5300_v5 = vadd.f32 %v5299_v2, %v14456_v41  ;;  %v14564_v6 = vadd.f32 %v5648_v4, %v5296_v63  ;;  %5547 = vmatprep.mubr.bf16.mxu0 %v12497_v58  ;;  %v12522_v2 = vld [vmem:[%s20473_s0 + $0x1170] ss:$72 sps:$4 sm:$0xff]  }
 0x124   :  { %v5301_v7 = vpop.f32.mrf.mxu0  ;;  %v5652_v9 = vpop.f32.mrf.mxu1  ;;  %5891 = vmatmul.mubr.bf16.gmra.mxu1 %v12486_v61 }
 0x125   :  { %v5302_v11 = vadd.f32 %v5301_v7, %v14464_v44  ;;  %v14570_v13 = vadd.f32 %v5652_v9, %v5300_v5  ;;  %5900 = vmatprep.mubr.bf16.mxu1 %v12500_v1 }
 0x126   :  { %v5303_v14 = vpop.f32.mrf.mxu0  ;;  %v5654_v15 = vpop.f32.mrf.mxu1 }
 0x127   :  { %v5304_v16 = vadd.f32 %v5303_v14, %v14456_v41  ;;  %v14573_v17 = vadd.f32 %v5654_v15, %v5302_v11  ;;  %v12536_v14 = vld [vmem:[%s20473_s0 + $0x14] ss:$72 sps:$4 sm:$0xff]  }
 0x128   :  { %v5305_v20 = vpop.f32.mrf.mxu0  ;;  %v5656_v21 = vpop.f32.mrf.mxu1 }
 0x129   :  { %v5306_v24 = vadd.f32 %v5305_v20, %v14464_v44  ;;  %v14582_v25 = vadd.f32 %v5656_v21, %v5304_v16 }
 0x12a   :  { %v5309_v27 = vpop.f32.mrf.mxu0  ;;  %5548 = vmatmul.mubr.bf16.gmra.mxu0 %v12495_v10  ;;  %v5658_v29 = vpop.f32.mrf.mxu1 }
 0x12b   :  { %v5310_v30 = vadd.f32 %v5309_v27, %v14456_v41  ;;  %v14588_v32 = vadd.f32 %v5658_v29, %v5306_v24  ;;  %5557 = vmatprep.mubr.bf16.mxu0 %v12509_v19  ;;  %v12525_v19 = vld [vmem:[%s20473_s0 + $0x1178] ss:$72 sps:$4 sm:$0xff]  }
 0x12c   :  { %v5311_v34 = vpop.f32.mrf.mxu0  ;;  %v5662_v35 = vpop.f32.mrf.mxu1  ;;  %5901 = vmatmul.mubr.bf16.gmra.mxu1 %v12498_v22  ;;  %v12542_v22 = vld [vmem:[%s20473_s0 + $0x1c] ss:$72 sps:$4 sm:$0xff]  }
 0x12d   :  { %v5312_v37 = vadd.f32 %v5311_v34, %v14464_v44  ;;  %v14594_v38 = vadd.f32 %v5662_v35, %v5310_v30  ;;  %5910 = vmatprep.mubr.bf16.mxu1 %v12515_v26  ;;  %v12534_v35 = vld [vmem:[%s20473_s0 + $0x10] ss:$72 sps:$4 sm:$0xff]  }
 0x12e   :  { %v5313_v40 = vpop.f32.mrf.mxu0  ;;  %v5664_v42 = vpop.f32.mrf.mxu1 }
 0x12f   :  { %v5314_v43 = vadd.f32 %v5313_v40, %v14456_v41  ;;  %v14597_v45 = vadd.f32 %v5664_v42, %v5312_v37  ;;  %v12537_v40 = vld [vmem:[%s20472_s1 + $0x470] ss:$8 sps:$4 sm:$0xff]  }
 0x130   :  { %v5315_v48 = vpop.f32.mrf.mxu0  ;;  %v5666_v49 = vpop.f32.mrf.mxu1 }
 0x131   :  { %v5316_v53 = vadd.f32 %v5315_v48, %v14464_v44  ;;  %v14606_v54 = vadd.f32 %v5666_v49, %v5314_v43 }
 0x132   :  { %v5319_v58 = vpop.f32.mrf.mxu0  ;;  %5558 = vmatmul.mubr.bf16.gmra.mxu0 %v12507_v36  ;;  %v5668_v59 = vpop.f32.mrf.mxu1 }
 0x133   :  { %v5320_v60 = vadd.f32 %v5319_v58, %v14456_v41  ;;  %v14612_v61 = vadd.f32 %v5668_v59, %v5316_v53  ;;  %5567 = vmatprep.mubr.bf16.mxu0 %v12524_v47  ;;  %v12540_v47 = vld [vmem:[%s20473_s0 + $0x18] ss:$72 sps:$4 sm:$0xff]   ;;  %v12554_v58 = vld [vmem:[%s20472_s1 + $0x464] ss:$8 sps:$4 sm:$0xff]  }
 0x134   :  { %v5321_v63 = vpop.f32.mrf.mxu0  ;;  %v5672_v1 = vpop.f32.mrf.mxu1  ;;  %5911 = vmatmul.mubr.bf16.gmra.mxu1 %v12513_v50  ;;  %v12545_v50 = vld [vmem:[%s20473_s0 + $0xa4] ss:$72 sps:$4 sm:$0xff]  }
 0x135   :  { %v5322_v4 = vadd.f32 %v5321_v63, %v14464_v44  ;;  %v14618_v5 = vadd.f32 %v5672_v1, %v5320_v60  ;;  %5920 = vmatprep.mubr.bf16.mxu1 %v12527_v55  ;;  %v12548_v63 = vld [vmem:[%s20473_s0 + $0xac] ss:$72 sps:$4 sm:$0xff]  }
 0x136   :  { %v5323_v7 = vpop.f32.mrf.mxu0  ;;  %v5674_v9 = vpop.f32.mrf.mxu1 }
 0x137   :  { %v5324_v10 = vadd.f32 %v5323_v7, %v14456_v41  ;;  %v14621_v11 = vadd.f32 %v5674_v9, %v5322_v4  ;;  %v12552_v9 = vld [vmem:[%s20472_s1 + $0x460] ss:$8 sps:$4 sm:$0xff]  }
 0x138   :  { %v5325_v15 = vpop.f32.mrf.mxu0  ;;  %v5676_v16 = vpop.f32.mrf.mxu1 }
 0x139   :  { %v5326_v20 = vadd.f32 %v5325_v15, %v14464_v44  ;;  %v14630_v21 = vadd.f32 %v5676_v16, %v5324_v10  ;;  %v12569_v10 = vld [vmem:[%s20472_s1 + $0x454] ss:$8 sps:$4 sm:$0xff]   ;;  %v12543_v16 = vld [vmem:[%s20473_s0 + $0xa0] ss:$72 sps:$4 sm:$0xff]  }
 0x13a   :  { %v5329_v24 = vpop.f32.mrf.mxu0  ;;  %5568 = vmatmul.mubr.bf16.gmra.mxu0 %v12522_v2  ;;  %v5678_v26 = vpop.f32.mrf.mxu1 }
 0x13b   :  { %v5330_v27 = vadd.f32 %v5329_v24, %v14456_v41  ;;  %v14636_v29 = vadd.f32 %v5678_v26, %v5326_v20  ;;  %5963 = vmatprep.mubr.bf16.mxu0 %v12536_v14 }
 0x13c   :  { %v5331_v30 = vpop.f32.mrf.mxu0  ;;  %v5682_v34 = vpop.f32.mrf.mxu1  ;;  %5921 = vmatmul.mubr.bf16.gmra.mxu1 %v12525_v19 }
 0x13d   :  { %v5332_v36 = vadd.f32 %v5331_v30, %v14464_v44  ;;  %v14642_v37 = vadd.f32 %v5682_v34, %v5330_v27  ;;  %6316 = vmatprep.mubr.bf16.mxu1 %v12542_v22  ;;  %v12551_v22 = vld [vmem:[%s20473_s0 + $0x134] ss:$72 sps:$4 sm:$0xff]   ;;  %v12546_v27 = vld [vmem:[%s20473_s0 + $0xa8] ss:$72 sps:$4 sm:$0xff]  }
 0x13e   :  { %v5333_v42 = vpop.f32.mrf.mxu0  ;;  %v5684_v43 = vpop.f32.mrf.mxu1 }
 0x13f   :  { %v5334_v48 = vadd.f32 %v5333_v42, %v14456_v41  ;;  %v14651_v49 = vadd.f32 %v5684_v43, %v5332_v36  ;;  %v12567_v36 = vld [vmem:[%s20472_s1 + $0x450] ss:$8 sps:$4 sm:$0xff]   ;;  %v12584_v43 = vld [vmem:[%s20472_s1 + $0x444] ss:$8 sps:$4 sm:$0xff]  }
 0x140   :  { %v5335_v53 = vpop.f32.mrf.mxu0  ;;  %v5686_v55 = vpop.f32.mrf.mxu1 }
 0x141   :  { %v5336_v59 = vadd.f32 %v5335_v53, %v14464_v44  ;;  %v14660_v60 = vadd.f32 %v5686_v55, %v5334_v48 }
 0x142   :  { %v5339_v1 = vpop.f32.mrf.mxu0  ;;  %v5688_v2 = vpop.f32.mrf.mxu1  ;;  %5964 = vmatmul.mubr.bf16.vlgmr.msra.gmra.mxu0 %v12534_v35  ;;  %v12557_v35 = vld [vmem:[%s20473_s0 + $0x13c] ss:$72 sps:$4 sm:$0xff]  }
 0x143   :  { %v5340_v4 = vadd.f32 %v5339_v1, %v14456_v41  ;;  %v14666_v7 = vadd.f32 %v5688_v2, %v5336_v59  ;;  %6638 = vmatpush1.bf16.msra.mxu0 %v12537_v40  ;;  %5973 = vmatprep.mubr.bf16.mxu0 %v12545_v50  ;;  %v12582_v50 = vld [vmem:[%s20472_s1 + $0x440] ss:$8 sps:$4 sm:$0xff]  }
 0x144   :  { %v5341_v14 = vpop.f32.mrf.mxu0  ;;  %v5692_v15 = vpop.f32.mrf.mxu1  ;;  %6317 = vmatmul.mubr.bf16.vlgmr.msra.gmra.mxu1 %v12540_v47  ;;  %6639 = vmatprep.subr.bf16.mxu0 %v12554_v58  ;;  %v12599_v58 = vld [vmem:[%s20472_s1 + $0x434] ss:$8 sps:$4 sm:$0xff]  }
 0x145   :  { %v5342_v19 = vadd.f32 %v5341_v14, %v14464_v44  ;;  %v14678_v20 = vadd.f32 %v5692_v15, %v5340_v4  ;;  %6326 = vmatprep.mubr.bf16.mxu1 %v12548_v63  ;;  %v12549_v4 = vld [vmem:[%s20473_s0 + $0x130] ss:$72 sps:$4 sm:$0xff]   ;;  %v12560_v14 = vld [vmem:[%s20473_s0 + $0x1c4] ss:$72 sps:$4 sm:$0xff]  }
 0x146   :  { %v5343_v24 = vpop.f32.mrf.mxu0  ;;  %v5694_v26 = vpop.f32.mrf.mxu1 }
 0x147   :  { %v5344_v30 = vadd.f32 %v5343_v24, %v14456_v41  ;;  %v14687_v34 = vadd.f32 %v5694_v26, %v5342_v19  ;;  %6640 = vmatpush1.bf16.msra.mxu0 %v12552_v9  ;;  %v12555_v19 = vld [vmem:[%s20473_s0 + $0x138] ss:$72 sps:$4 sm:$0xff]  }
 0x148   :  { %v5345_v40 = vpop.f32.mrf.mxu0  ;;  %v5696_v42 = vpop.f32.mrf.mxu1  ;;  %6641 = vmatprep.subr.bf16.mxu0 %v12569_v10  ;;  %v12597_v26 = vld [vmem:[%s20472_s1 + $0x430] ss:$8 sps:$4 sm:$0xff]  }
 0x149   :  { %v5346_v47 = vadd.f32 %v5345_v40, %v14464_v44  ;;  %v14699_v48 = vadd.f32 %v5696_v42, %v5344_v30  ;;  %v12563_v42 = vld [vmem:[%s20473_s0 + $0x1cc] ss:$72 sps:$4 sm:$0xff]  }
 0x14a   :  { %v5349_v53 = vpop.f32.mrf.mxu0  ;;  %v5698_v55 = vpop.f32.mrf.mxu1  ;;  %5974 = vmatmul.mubr.bf16.gmra.mxu0 %v12543_v16 }
 0x14b   :  { %v5350_v59 = vadd.f32 %v5349_v53, %v14456_v41  ;;  %v14708_v63 = vadd.f32 %v5698_v55, %v5346_v47  ;;  %5983 = vmatprep.mubr.bf16.mxu0 %v12551_v22  ;;  %6642 = vmatpush1.bf16.msra.mxu0 %v12567_v36  ;;  %v12612_v55 = vld [vmem:[%s20472_s1 + $0x420] ss:$8 sps:$4 sm:$0xff]  }
 0x14c   :  { %v5351_v1 = vpop.f32.mrf.mxu0  ;;  %v5702_v2 = vpop.f32.mrf.mxu1  ;;  %6327 = vmatmul.mubr.bf16.gmra.mxu1 %v12546_v27  ;;  %6643 = vmatprep.subr.bf16.mxu0 %v12584_v43 }
 0x14d   :  { %v5352_v9 = vadd.f32 %v5351_v1, %v14464_v44  ;;  %v14714_v10 = vadd.f32 %v5702_v2, %v5350_v59  ;;  %6336 = vmatprep.mubr.bf16.mxu1 %v12557_v35  ;;  %v12614_v35 = vld [vmem:[%s20472_s1 + $0x424] ss:$8 sps:$4 sm:$0xff]   ;;  %v12558_v2 = vld [vmem:[%s20473_s0 + $0x1c0] ss:$72 sps:$4 sm:$0xff]  }
 0x14e   :  { %v5353_v15 = vpop.f32.mrf.mxu0  ;;  %v5704_v16 = vpop.f32.mrf.mxu1 }
 0x14f   :  { %v5354_v22 = vadd.f32 %v5353_v15, %v14456_v41  ;;  %v14723_v24 = vadd.f32 %v5704_v16, %v5352_v9  ;;  %6644 = vmatpush1.bf16.msra.mxu0 %v12582_v50 }
 0x150   :  { %v5355_v27 = vpop.f32.mrf.mxu0  ;;  %v5706_v30 = vpop.f32.mrf.mxu1  ;;  %6645 = vmatprep.subr.bf16.mxu0 %v12599_v58  ;;  %v12629_v58 = vld [vmem:[%s20472_s1 + $0x414] ss:$8 sps:$4 sm:$0xff]  }
 0x151   :  { %v5356_v36 = vadd.f32 %v5355_v27, %v14464_v44  ;;  %v14732_v40 = vadd.f32 %v5706_v30, %v5354_v22  ;;  %v12572_v27 = vld [vmem:[%s20473_s0 + $0x25c] ss:$72 sps:$4 sm:$0xff]   ;;  %v12627_v30 = vld [vmem:[%s20472_s1 + $0x410] ss:$8 sps:$4 sm:$0xff]  }
 0x152   :  { %v5359_v43 = vpop.f32.mrf.mxu0  ;;  %v5708_v47 = vpop.f32.mrf.mxu1  ;;  %5984 = vmatmul.mubr.bf16.gmra.mxu0 %v12549_v4 }
 0x153   :  { %v5360_v50 = vadd.f32 %v5359_v43, %v14456_v41  ;;  %v14738_v53 = vadd.f32 %v5708_v47, %v5356_v36  ;;  %5993 = vmatprep.mubr.bf16.mxu0 %v12560_v14  ;;  %6646 = vmatpush1.bf16.msra.mxu0 %v12597_v26  ;;  %v12566_v14 = vld [vmem:[%s20473_s0 + $0x254] ss:$72 sps:$4 sm:$0xff]  }
 0x154   :  { %v5361_v59 = vpop.f32.mrf.mxu0  ;;  %v5712_v1 = vpop.f32.mrf.mxu1  ;;  %6337 = vmatmul.mubr.bf16.gmra.mxu1 %v12555_v19  ;;  %6647 = vmatprep.subr.bf16.mxu0 %v12614_v35  ;;  %v12561_v19 = vld [vmem:[%s20473_s0 + $0x1c8] ss:$72 sps:$4 sm:$0xff]  }
 0x155   :  { %v5362_v4 = vadd.f32 %v5361_v59, %v14464_v44  ;;  %v14750_v9 = vadd.f32 %v5712_v1, %v5360_v50  ;;  %6346 = vmatprep.mubr.bf16.mxu1 %v12563_v42  ;;  %v12644_v42 = vld [vmem:[%s20472_s1 + $0x404] ss:$8 sps:$4 sm:$0xff]   ;;  %v12642_v50 = vld [vmem:[%s20472_s1 + $0x400] ss:$8 sps:$4 sm:$0xff]   ;;  %v12659_v1 = vld [vmem:[%s20472_s1 + $0x4f4] ss:$8 sps:$4 sm:$0xff]  }
 0x156   :  { %v5363_v15 = vpop.f32.mrf.mxu0  ;;  %v5714_v16 = vpop.f32.mrf.mxu1 }
 0x157   :  { %v5364_v22 = vadd.f32 %v5363_v15, %v14456_v41  ;;  %v14759_v26 = vadd.f32 %v5714_v16, %v5362_v4  ;;  %6648 = vmatpush1.bf16.msra.mxu0 %v12612_v55 }
 0x158   :  { %v5365_v35 = vpop.f32.mrf.mxu0  ;;  %v5716_v36 = vpop.f32.mrf.mxu1  ;;  %6649 = vmatprep.subr.bf16.mxu0 %v12629_v58 }
 0x159   :  { %v5366_v43 = vadd.f32 %v5365_v35, %v14464_v44  ;;  %v14771_v47 = vadd.f32 %v5716_v36, %v5364_v22  ;;  %v12564_v22 = vld [vmem:[%s20473_s0 + $0x250] ss:$72 sps:$4 sm:$0xff]   ;;  %v12575_v36 = vld [vmem:[%s20473_s0 + $0x2e4] ss:$72 sps:$4 sm:$0xff]  }
 0x15a   :  { %v5369_v55 = vpop.f32.mrf.mxu0  ;;  %v5718_v59 = vpop.f32.mrf.mxu1  ;;  %5994 = vmatmul.mubr.bf16.gmra.mxu0 %v12558_v2 }
 0x15b   :  { %v5370_v58 = vadd.f32 %v5369_v55, %v14456_v41  ;;  %v14780_v4 = vadd.f32 %v5718_v59, %v5366_v43  ;;  %6003 = vmatprep.mubr.bf16.mxu0 %v12566_v14  ;;  %6650 = vmatpush1.bf16.msra.mxu0 %v12627_v30 }
 0x15c   :  { %v5371_v15 = vpop.f32.mrf.mxu0  ;;  %v5722_v16 = vpop.f32.mrf.mxu1  ;;  %6347 = vmatmul.mubr.bf16.gmra.mxu1 %v12561_v19  ;;  %6651 = vmatprep.subr.bf16.mxu0 %v12644_v42  ;;  %v12570_v19 = vld [vmem:[%s20473_s0 + $0x258] ss:$72 sps:$4 sm:$0xff]  }
 0x15d   :  { %v5372_v2 = vadd.f32 %v5371_v15, %v14464_v44  ;;  %v14786_v35 = vadd.f32 %v5722_v16, %v5370_v58  ;;  %6356 = vmatprep.mubr.bf16.mxu1 %v12572_v27  ;;  %v12657_v42 = vld [vmem:[%s20472_s1 + $0x4f0] ss:$8 sps:$4 sm:$0xff]   ;;  %v12674_v58 = vld [vmem:[%s20472_s1 + $0x4e4] ss:$8 sps:$4 sm:$0xff]  }
 0x15e   :  { %v5373_v43 = vpop.f32.mrf.mxu0  ;;  %v5724_v14 = vpop.f32.mrf.mxu1 }
 0x15f   :  { %v5374_v30 = vadd.f32 %v5373_v43, %v14456_v41  ;;  %v14795_v55 = vadd.f32 %v5724_v14, %v5372_v2  ;;  %6652 = vmatpush1.bf16.msra.mxu0 %v12642_v50  ;;  %v12578_v2 = vld [vmem:[%s20473_s0 + $0x2ec] ss:$72 sps:$4 sm:$0xff]  }
 0x160   :  { %v5375_v27 = vpop.f32.mrf.mxu0  ;;  %v5726_v59 = vpop.f32.mrf.mxu1  ;;  %6653 = vmatprep.subr.bf16.mxu0 %v12659_v1  ;;  %v12672_v1 = vld [vmem:[%s20472_s1 + $0x4e0] ss:$8 sps:$4 sm:$0xff]  }
 0x161   :  { %20497 = vst [vmem:[#allocation2_spill] sm:$0xff] %v14795_v55  ;;  %v5376_v15 = vadd.f32 %v5375_v27, %v14464_v44  ;;  %v14804_v16 = vadd.f32 %v5726_v59, %v5374_v30  ;;  %v12689_v30 = vld [vmem:[%s20472_s1 + $0x4d4] ss:$8 sps:$4 sm:$0xff]  }
 0x162   :  { %v5379_v50 = vpop.f32.mrf.mxu0  ;;  %v5728_v43 = vpop.f32.mrf.mxu1  ;;  %6004 = vmatmul.mubr.bf16.gmra.mxu0 %v12564_v22  ;;  %v12573_v22 = vld [vmem:[%s20473_s0 + $0x2e0] ss:$72 sps:$4 sm:$0xff]  }
 0x163   :  { %20498 = vst [vmem:[#allocation3_spill] sm:$0xff] %v14804_v16  ;;  %v5380_v14 = vadd.f32 %v5379_v50, %v14456_v41  ;;  %v14810_v31 = vadd.f32 %v5728_v43, %v5376_v15  ;;  %6013 = vmatprep.mubr.bf16.mxu0 %v12575_v36  ;;  %6654 = vmatpush2.bf16.msra.mxu0 %v12657_v42  ;;  %v12581_v42 = vld [vmem:[%s20473_s0 + $0x374] ss:$72 sps:$4 sm:$0xff]  }
 0x164   :  { %v5381_v27 = vpop.f32.mrf.mxu0  ;;  %v5732_v59 = vpop.f32.mrf.mxu1  ;;  %6357 = vmatmul.mubr.bf16.gmra.mxu1 %v12570_v19  ;;  %6655 = vmatprep.subr.bf16.mxu0 %v12674_v58  ;;  %v12687_v19 = vld [vmem:[%s20472_s1 + $0x4d0] ss:$8 sps:$4 sm:$0xff]  }
 0x165   :  { %20499 = vst [vmem:[#allocation4_spill] sm:$0xff] %v14810_v31  ;;  %v5382_v15 = vadd.f32 %v5381_v27, %v14464_v44  ;;  %v14822_v36 = vadd.f32 %v5732_v59, %v5380_v14  ;;  %6366 = vmatprep.mubr.bf16.mxu1 %v12578_v2  ;;  %v12576_v2 = vld [vmem:[%s20473_s0 + $0x2e8] ss:$72 sps:$4 sm:$0xff]  }
 0x166   :  { %v5383_v50 = vpop.f32.mrf.mxu0  ;;  %v5734_v43 = vpop.f32.mrf.mxu1 }
 0x167   :  { %20500 = vst [vmem:[#allocation5_spill] sm:$0xff] %v14822_v36  ;;  %v5384_v31 = vadd.f32 %v5383_v50, %v14456_v41  ;;  %v14828_v16 = vadd.f32 %v5734_v43, %v5382_v15  ;;  %6656 = vmatpush2.bf16.msra.mxu0 %v12672_v1  ;;  %v12587_v15 = vld [vmem:[%s20473_s0 + $0x37c] ss:$72 sps:$4 sm:$0xff]  }
 0x168   :  { %v5385_v58 = vpop.f32.mrf.mxu0  ;;  %v5736_v27 = vpop.f32.mrf.mxu1  ;;  %6657 = vmatprep.subr.bf16.mxu0 %v12689_v30 }
 0x169   :  { %20501 = vst [vmem:[#allocation6_spill] sm:$0xff] %v14828_v16  ;;  %v5386_v14 = vadd.f32 %v5385_v58, %v14464_v44  ;;  %v14837_v59 = vadd.f32 %v5736_v27, %v5384_v31  ;;  %v12579_v31 = vld [vmem:[%s20473_s0 + $0x370] ss:$72 sps:$4 sm:$0xff]  }
 0x16a   :  { %v5389_v1 = vpop.f32.mrf.mxu0  ;;  %v5738_v50 = vpop.f32.mrf.mxu1  ;;  %6014 = vmatmul.mubr.bf16.gmra.mxu0 %v12573_v22 }
 0x16b   :  { %v5390_v43 = vadd.f32 %v5389_v1, %v14456_v41  ;;  %v14843_v16 = vadd.f32 %v5738_v50, %v5386_v14  ;;  %6023 = vmatprep.mubr.bf16.mxu0 %v12581_v42  ;;  %6658 = vmatpush2.bf16.msra.mxu0 %v12687_v19  ;;  %v12590_v42 = vld [vmem:[%s20473_s0 + $0x404] ss:$72 sps:$4 sm:$0xff]   ;;  %v12585_v50 = vld [vmem:[%s20473_s0 + $0x378] ss:$72 sps:$4 sm:$0xff]  }
 0x16c   :  { %v5391_v36 = vpop.f32.mrf.mxu0  ;;  %v5742_v55 = vpop.f32.mrf.mxu1  ;;  %6367 = vmatmul.mubr.bf16.gmra.mxu1 %v12576_v2 }
 0x16d   :  { %20502 = vst [vmem:[#allocation7_spill] sm:$0xff] %v14843_v16  ;;  %v5392_v30 = vadd.f32 %v5391_v36, %v14464_v44  ;;  %v14849_v58 = vadd.f32 %v5742_v55, %v5390_v43  ;;  %6376 = vmatprep.mubr.bf16.mxu1 %v12587_v15  ;;  %v12593_v15 = vld [vmem:[%s20473_s0 + $0x40c] ss:$72 sps:$4 sm:$0xff]  }
 0x16e   :  { %v5393_v27 = vpop.f32.mrf.mxu0  ;;  %v5744_v22 = vpop.f32.mrf.mxu1 }
 0x16f   :  { %20503 = vst [vmem:[#allocation8_spill] sm:$0xff] %v14849_v58  ;;  %v5394_v1 = vadd.f32 %v5393_v27, %v14456_v41  ;;  %v14852_v14 = vadd.f32 %v5744_v22, %v5392_v30 }
 0x170   :  { %v5395_v19 = vpop.f32.mrf.mxu0  ;;  %v5746_v2 = vpop.f32.mrf.mxu1 }
 0x171   :  { %20504 = vst [vmem:[#allocation9_spill] sm:$0xff] %v14852_v14  ;;  %v5396_v55 = vadd.f32 %v5395_v19, %v14464_v44  ;;  %v14861_v36 = vadd.f32 %v5746_v2, %v5394_v1  ;;  %v12702_v14 = vld [vmem:[%s20472_s1 + $0x4c0] ss:$8 sps:$4 sm:$0xff]   ;;  %v12704_v1 = vld [vmem:[%s20472_s1 + $0x4c4] ss:$8 sps:$4 sm:$0xff]  }
 0x172   :  { %v5399_v43 = vpop.f32.mrf.mxu0  ;;  %v5748_v30 = vpop.f32.mrf.mxu1  ;;  %6024 = vmatmul.mubr.bf16.gmra.mxu0 %v12579_v31  ;;  %v12588_v31 = vld [vmem:[%s20473_s0 + $0x400] ss:$72 sps:$4 sm:$0xff]   ;;  %6659 = vmatprep.subr.bf16.mxu0 %v12704_v1 }
 0x173   :  { %20505 = vst [vmem:[#allocation10_spill] sm:$0xff] %v14861_v36  ;;  %v5400_v27 = vadd.f32 %v5399_v43, %v14456_v41  ;;  %v14867_v22 = vadd.f32 %v5748_v30, %v5396_v55  ;;  %6033 = vmatprep.mubr.bf16.mxu0 %v12590_v42  ;;  %6660 = vmatpush2.bf16.msra.mxu0 %v12702_v14  ;;  %v12602_v14 = vld [vmem:[%s20473_s0 + $0x49c] ss:$72 sps:$4 sm:$0xff]  }
 0x174   :  { %v5401_v19 = vpop.f32.mrf.mxu0  ;;  %v5752_v2 = vpop.f32.mrf.mxu1  ;;  %6377 = vmatmul.mubr.bf16.gmra.mxu1 %v12585_v50  ;;  %v12596_v50 = vld [vmem:[%s20473_s0 + $0x494] ss:$72 sps:$4 sm:$0xff]  }
 0x175   :  { %20506 = vst [vmem:[#allocation11_spill] sm:$0xff] %v14867_v22  ;;  %v5402_v43 = vadd.f32 %v5401_v19, %v14464_v44  ;;  %v14879_v55 = vadd.f32 %v5752_v2, %v5400_v27  ;;  %6386 = vmatprep.mubr.bf16.mxu1 %v12593_v15  ;;  %v12591_v27 = vld [vmem:[%s20473_s0 + $0x408] ss:$72 sps:$4 sm:$0xff]  }
 0x176   :  { %v5403_v42 = vpop.f32.mrf.mxu0  ;;  %v5754_v30 = vpop.f32.mrf.mxu1 }
 0x177   :  { %20507 = vst [vmem:[#allocation12_spill] sm:$0xff] %v14879_v55  ;;  %v5404_v22 = vadd.f32 %v5403_v42, %v14456_v41  ;;  %v14882_v36 = vadd.f32 %v5754_v30, %v5402_v43 }
 0x178   :  { %v5405_v58 = vpop.f32.mrf.mxu0  ;;  %v5756_v16 = vpop.f32.mrf.mxu1 }
 0x179   :  { %20508 = vst [vmem:[#allocation13_spill] sm:$0xff] %v14882_v36  ;;  %v5406_v15 = vadd.f32 %v5405_v58, %v14464_v44  ;;  %v14891_v1 = vadd.f32 %v5756_v16, %v5404_v22  ;;  %v12594_v16 = vld [vmem:[%s20473_s0 + $0x490] ss:$72 sps:$4 sm:$0xff]  }
 0x17a   :  { %v5409_v19 = vpop.f32.mrf.mxu0  ;;  %v5758_v2 = vpop.f32.mrf.mxu1  ;;  %6034 = vmatmul.mubr.bf16.gmra.mxu0 %v12588_v31 }
 0x17b   :  { %20509 = vst [vmem:[#allocation14_spill] sm:$0xff] %v14891_v1  ;;  %v5410_v43 = vadd.f32 %v5409_v19, %v14456_v41  ;;  %v14897_v42 = vadd.f32 %v5758_v2, %v5406_v15  ;;  %6043 = vmatprep.mubr.bf16.mxu0 %v12596_v50  ;;  %v12605_v50 = vld [vmem:[%s20473_s0 + $0x524] ss:$72 sps:$4 sm:$0xff]   ;;  %v12600_v2 = vld [vmem:[%s20473_s0 + $0x498] ss:$72 sps:$4 sm:$0xff]  }
 0x17c   :  { %v5411_v30 = vpop.f32.mrf.mxu0  ;;  %v5762_v36 = vpop.f32.mrf.mxu1  ;;  %6387 = vmatmul.mubr.bf16.gmra.mxu1 %v12591_v27 }
 0x17d   :  { %20510 = vst [vmem:[#allocation15_spill] sm:$0xff] %v14897_v42  ;;  %v5412_v58 = vadd.f32 %v5411_v30, %v14464_v44  ;;  %v14903_v22 = vadd.f32 %v5762_v36, %v5410_v43  ;;  %6396 = vmatprep.mubr.bf16.mxu1 %v12602_v14  ;;  %v12725_v30 = vld [vmem:[%s20472_s1 + $0x574] ss:$8 sps:$4 sm:$0xff]  }
 0x17e   :  { %v5413_v1 = vpop.f32.mrf.mxu0  ;;  %v5764_v55 = vpop.f32.mrf.mxu1  ;;  %6990 = vmatprep.subr.bf16.mxu1 %v12725_v30  ;;  %v12611_v30 = vld [vmem:[%s20473_s0 + $0x5b4] ss:$72 sps:$4 sm:$0xff]  }
 0x17f   :  { %20511 = vst [vmem:[#allocation16_spill] sm:$0xff] %v14903_v22  ;;  %v5414_v31 = vadd.f32 %v5413_v1, %v14456_v41  ;;  %v14906_v19 = vadd.f32 %v5764_v55, %v5412_v58  ;;  %v12608_v1 = vld [vmem:[%s20473_s0 + $0x52c] ss:$72 sps:$4 sm:$0xff]  }
 0x180   :  { %v5415_v27 = vpop.f32.mrf.mxu0  ;;  %v5766_v15 = vpop.f32.mrf.mxu1  ;;  %v12728_v22 = vld [vmem:[%s20472_s1 + $0x564] ss:$8 sps:$4 sm:$0xff]  }
 0x181   :  { %20512 = vst [vmem:[#allocation17_spill] sm:$0xff] %v14906_v19  ;;  %v5416_v36 = vadd.f32 %v5415_v27, %v14464_v44  ;;  %v14915_v43 = vadd.f32 %v5766_v15, %v5414_v31  ;;  %v12717_v31 = vld [vmem:[%s20472_s1 + $0x4b0] ss:$8 sps:$4 sm:$0xff]   ;;  %v12719_v27 = vld [vmem:[%s20472_s1 + $0x4b4] ss:$8 sps:$4 sm:$0xff]  }
 0x182   :  { %v5419_v55 = vpop.f32.mrf.mxu0  ;;  %v5768_v14 = vpop.f32.mrf.mxu1  ;;  %6044 = vmatmul.mubr.bf16.gmra.mxu0 %v12594_v16  ;;  %v12723_v16 = vld [vmem:[%s20472_s1 + $0x570] ss:$8 sps:$4 sm:$0xff]   ;;  %6661 = vmatprep.subr.bf16.mxu0 %v12719_v27 }
 0x183   :  { %20513 = vst [vmem:[#allocation18_spill] sm:$0xff] %v14915_v43  ;;  %v5420_v58 = vadd.f32 %v5419_v55, %v14456_v41  ;;  %v14924_v19 = vadd.f32 %v5768_v14, %v5416_v36  ;;  %6053 = vmatprep.mubr.bf16.mxu0 %v12605_v50  ;;  %v12603_v36 = vld [vmem:[%s20473_s0 + $0x520] ss:$72 sps:$4 sm:$0xff]   ;;  %6662 = vmatpush2.bf16.msra.mxu0 %v12717_v31 }
 0x184   :  { %v5421_v15 = vpop.f32.mrf.mxu0  ;;  %v5772_v43 = vpop.f32.mrf.mxu1  ;;  %6397 = vmatmul.mubr.bf16.gmra.mxu1 %v12600_v2  ;;  %v12606_v31 = vld [vmem:[%s20473_s0 + $0x528] ss:$72 sps:$4 sm:$0xff]  }
 0x185   :  { %20514 = vst [vmem:[#allocation19_spill] sm:$0xff] %v14924_v19  ;;  %v5422_v50 = vadd.f32 %v5421_v15, %v14464_v44  ;;  %v14939_v55 = vadd.f32 %v5772_v43, %v5420_v58  ;;  %6406 = vmatprep.mubr.bf16.mxu1 %v12608_v1  ;;  %6991 = vmatpush1.bf16.msra.mxu1 %v12723_v16  ;;  %v12726_v43 = vld [vmem:[%s20472_s1 + $0x560] ss:$8 sps:$4 sm:$0xff]  }
 0x186   :  { %v5423_v14 = vpop.f32.mrf.mxu0  ;;  %v5774_v19 = vpop.f32.mrf.mxu1  ;;  %6992 = vmatprep.subr.bf16.mxu1 %v12728_v22  ;;  %v12735_v22 = vld [vmem:[%s20472_s1 + $0x550] ss:$8 sps:$4 sm:$0xff]  }
 0x187   :  { %20515 = vst [vmem:[#allocation20_spill] sm:$0xff] %v14939_v55  ;;  %v5424_v2 = vadd.f32 %v5423_v14, %v14456_v41  ;;  %v14945_v42 = vadd.f32 %v5774_v19, %v5422_v50  ;;  %v12617_v19 = vld [vmem:[%s20473_s0 + $0x5bc] ss:$72 sps:$4 sm:$0xff]  }
 0x188   :  { %v5425_v1 = vpop.f32.mrf.mxu0  ;;  %v5776_v58 = vpop.f32.mrf.mxu1  ;;  %v12737_v14 = vld [vmem:[%s20472_s1 + $0x554] ss:$8 sps:$4 sm:$0xff]  }
 0x189   :  { %20516 = vst [vmem:[#allocation21_spill] sm:$0xff] %v14945_v42  ;;  %v5426_v27 = vadd.f32 %v5425_v1, %v14464_v44  ;;  %v14957_v16 = vadd.f32 %v5776_v58, %v5424_v2  ;;  %6993 = vmatpush1.bf16.msra.mxu1 %v12726_v43 }
 0x18a   :  { %v5429_v15 = vpop.f32.mrf.mxu0  ;;  %v5778_v50 = vpop.f32.mrf.mxu1  ;;  %6054 = vmatmul.mubr.bf16.gmra.mxu0 %v12603_v36  ;;  %v12609_v36 = vld [vmem:[%s20473_s0 + $0x5b0] ss:$72 sps:$4 sm:$0xff]   ;;  %6994 = vmatprep.subr.bf16.mxu1 %v12737_v14  ;;  %v12620_v14 = vld [vmem:[%s20473_s0 + $0x644] ss:$72 sps:$4 sm:$0xff]  }
 0x18b   :  { %20517 = vst [vmem:[#allocation22_spill] sm:$0xff] %v14957_v16  ;;  %v5430_v42 = vadd.f32 %v5429_v15, %v14456_v41  ;;  %v14966_v55 = vadd.f32 %v5778_v50, %v5426_v27  ;;  %6063 = vmatprep.mubr.bf16.mxu0 %v12611_v30  ;;  %v12740_v30 = vld [vmem:[%s20472_s1 + $0x544] ss:$8 sps:$4 sm:$0xff]  }
 0x18c   :  { %v5431_v2 = vpop.f32.mrf.mxu0  ;;  %v5782_v1 = vpop.f32.mrf.mxu1  ;;  %6407 = vmatmul.mubr.bf16.gmra.mxu1 %v12606_v31 }
 0x18d   :  { %20518 = vst [vmem:[#allocation23_spill] sm:$0xff] %v14966_v55  ;;  %v5432_v43 = vadd.f32 %v5431_v2, %v14464_v44  ;;  %v14975_v58 = vadd.f32 %v5782_v1, %v5430_v42  ;;  %6416 = vmatprep.mubr.bf16.mxu1 %v12617_v19  ;;  %6995 = vmatpush1.bf16.msra.mxu1 %v12735_v22  ;;  %v12738_v42 = vld [vmem:[%s20472_s1 + $0x540] ss:$8 sps:$4 sm:$0xff]  }
 0x18e   :  { %v5433_v27 = vpop.f32.mrf.mxu0  ;;  %v5784_v15 = vpop.f32.mrf.mxu1  ;;  %v12615_v22 = vld [vmem:[%s20473_s0 + $0x5b8] ss:$72 sps:$4 sm:$0xff]   ;;  %6996 = vmatprep.subr.bf16.mxu1 %v12740_v30 }
 0x18f   :  { %20519 = vst [vmem:[#allocation24_spill] sm:$0xff] %v14975_v58  ;;  %v5434_v50 = vadd.f32 %v5433_v27, %v14456_v41  ;;  %v14981_v31 = vadd.f32 %v5784_v15, %v5432_v43  ;;  %v12623_v43 = vld [vmem:[%s20473_s0 + $0x64c] ss:$72 sps:$4 sm:$0xff]   ;;  %v12744_v30 = vld [vmem:[%s20472_s1 + $0x4a0] ss:$8 sps:$4 sm:$0xff]  }
 0x190   :  { %v5435_v19 = vpop.f32.mrf.mxu0  ;;  %v5786_v2 = vpop.f32.mrf.mxu1  ;;  %v12752_v58 = vld [vmem:[%s20472_s1 + $0x534] ss:$8 sps:$4 sm:$0xff]  }
 0x191   :  { %20520 = vst [vmem:[#allocation25_spill] sm:$0xff] %v14981_v31  ;;  %v5436_v1 = vadd.f32 %v5435_v19, %v14464_v44  ;;  %v14993_v27 = vadd.f32 %v5786_v2, %v5434_v50  ;;  %6997 = vmatpush1.bf16.msra.mxu1 %v12738_v42  ;;  %v12746_v50 = vld [vmem:[%s20472_s1 + $0x4a4] ss:$8 sps:$4 sm:$0xff]  }
 0x192   :  { %v5439_v15 = vpop.f32.mrf.mxu0  ;;  %v5788_v31 = vpop.f32.mrf.mxu1  ;;  %6064 = vmatmul.mubr.bf16.gmra.mxu0 %v12609_v36  ;;  %v12750_v36 = vld [vmem:[%s20472_s1 + $0x530] ss:$8 sps:$4 sm:$0xff]   ;;  %6998 = vmatprep.subr.bf16.mxu1 %v12752_v58  ;;  %v12626_v58 = vld [vmem:[%s20473_s0 + $0x6d4] ss:$72 sps:$4 sm:$0xff]  }
 0x193   :  { %20521 = vst [vmem:[#allocation26_spill] sm:$0xff] %v14993_v27  ;;  %v5440_v55 = vadd.f32 %v5439_v15, %v14456_v41  ;;  %v15002_v16 = vadd.f32 %v5788_v31, %v5436_v1  ;;  %6073 = vmatprep.mubr.bf16.mxu0 %v12620_v14  ;;  %v12618_v31 = vld [vmem:[%s20473_s0 + $0x640] ss:$72 sps:$4 sm:$0xff]   ;;  %6663 = vmatprep.subr.bf16.mxu0 %v12746_v50 }
 0x194   :  { %v5441_v42 = vpop.f32.mrf.mxu0  ;;  %v5792_v19 = vpop.f32.mrf.mxu1  ;;  %6417 = vmatmul.mubr.bf16.gmra.mxu1 %v12615_v22  ;;  %6664 = vmatpush2.bf16.msra.mxu0 %v12744_v30  ;;  %v12621_v30 = vld [vmem:[%s20473_s0 + $0x648] ss:$72 sps:$4 sm:$0xff]  }
 0x195   :  { %20522 = vst [vmem:[#allocation27_spill] sm:$0xff] %v15002_v16  ;;  %v5442_v14 = vadd.f32 %v5441_v42, %v14464_v44  ;;  %v15017_v2 = vadd.f32 %v5792_v19, %v5440_v55  ;;  %6426 = vmatprep.mubr.bf16.mxu1 %v12623_v43  ;;  %6999 = vmatpush1.bf16.msra.mxu1 %v12750_v36  ;;  %v12755_v16 = vld [vmem:[%s20472_s1 + $0x524] ss:$8 sps:$4 sm:$0xff]   ;;  %v12753_v55 = vld [vmem:[%s20472_s1 + $0x520] ss:$8 sps:$4 sm:$0xff]  }
 0x196   :  { %v5443_v1 = vpop.f32.mrf.mxu0  ;;  %v5794_v15 = vpop.f32.mrf.mxu1  ;;  %7000 = vmatprep.subr.bf16.mxu1 %v12755_v16  ;;  %v12632_v19 = vld [vmem:[%s20473_s0 + $0x6dc] ss:$72 sps:$4 sm:$0xff]   ;;  %v12762_v16 = vld [vmem:[%s20472_s1 + $0x510] ss:$8 sps:$4 sm:$0xff]  }
 0x197   :  { %20523 = vst [vmem:[#allocation28_spill] sm:$0xff] %v15017_v2  ;;  %v5444_v22 = vadd.f32 %v5443_v1, %v14456_v41  ;;  %v15023_v27 = vadd.f32 %v5794_v15, %v5442_v14  ;;  %v12764_v15 = vld [vmem:[%s20472_s1 + $0x514] ss:$8 sps:$4 sm:$0xff]  }
 0x198   :  { %v5445_v43 = vpop.f32.mrf.mxu0  ;;  %v5796_v50 = vpop.f32.mrf.mxu1 }
 0x199   :  { %20524 = vst [vmem:[#allocation29_spill] sm:$0xff] %v15023_v27  ;;  %v5446_v36 = vadd.f32 %v5445_v43, %v14464_v44  ;;  %v15035_v42 = vadd.f32 %v5796_v50, %v5444_v22  ;;  %7001 = vmatpush1.bf16.msra.mxu1 %v12753_v55 }
 0x19a   :  { %v5449_v14 = vpop.f32.mrf.mxu0  ;;  %v5798_v1 = vpop.f32.mrf.mxu1  ;;  %6074 = vmatmul.mubr.bf16.gmra.mxu0 %v12618_v31  ;;  %v12624_v31 = vld [vmem:[%s20473_s0 + $0x6d0] ss:$72 sps:$4 sm:$0xff]   ;;  %7002 = vmatprep.subr.bf16.mxu1 %v12764_v15  ;;  %v12635_v15 = vld [vmem:[%s20473_s0 + $0x764] ss:$72 sps:$4 sm:$0xff]  }
 0x19b   :  { %20525 = vst [vmem:[#allocation30_spill] sm:$0xff] %v15035_v42  ;;  %v5450_v27 = vadd.f32 %v5449_v14, %v14456_v41  ;;  %v15044_v2 = vadd.f32 %v5798_v1, %v5446_v36  ;;  %6083 = vmatprep.mubr.bf16.mxu0 %v12626_v58  ;;  %v12767_v58 = vld [vmem:[%s20472_s1 + $0x504] ss:$8 sps:$4 sm:$0xff]  }
 0x19c   :  { %v5451_v22 = vpop.f32.mrf.mxu0  ;;  %v5802_v43 = vpop.f32.mrf.mxu1  ;;  %6427 = vmatmul.mubr.bf16.gmra.mxu1 %v12621_v30 }
 0x19d   :  { %20526 = vst [vmem:[#allocation31_spill] sm:$0xff] %v15044_v2  ;;  %v5452_v55 = vadd.f32 %v5451_v22, %v14464_v44  ;;  %v15053_v50 = vadd.f32 %v5802_v43, %v5450_v27  ;;  %6436 = vmatprep.mubr.bf16.mxu1 %v12632_v19  ;;  %7003 = vmatpush1.bf16.msra.mxu1 %v12762_v16  ;;  %v12765_v27 = vld [vmem:[%s20472_s1 + $0x500] ss:$8 sps:$4 sm:$0xff]  }
 0x19e   :  { %v5453_v36 = vpop.f32.mrf.mxu0  ;;  %v5804_v14 = vpop.f32.mrf.mxu1  ;;  %v12630_v16 = vld [vmem:[%s20473_s0 + $0x6d8] ss:$72 sps:$4 sm:$0xff]   ;;  %7004 = vmatprep.subr.bf16.mxu1 %v12767_v58 }
 0x19f   :  { %20527 = vst [vmem:[#allocation32_spill] sm:$0xff] %v15053_v50  ;;  %v5454_v1 = vadd.f32 %v5453_v36, %v14456_v41  ;;  %v15059_v30 = vadd.f32 %v5804_v14, %v5452_v55  ;;  %v12638_v55 = vld [vmem:[%s20473_s0 + $0x76c] ss:$72 sps:$4 sm:$0xff]   ;;  %v12771_v58 = vld [vmem:[%s20472_s1 + $0x490] ss:$8 sps:$4 sm:$0xff]  }
 0x1a0   :  { %v5455_v19 = vpop.f32.mrf.mxu0  ;;  %v5806_v22 = vpop.f32.mrf.mxu1  ;;  %v12779_v50 = vld [vmem:[%s20472_s1 + $0x5f4] ss:$8 sps:$4 sm:$0xff]  }
 0x1a1   :  { %20528 = vst [vmem:[#allocation33_spill] sm:$0xff] %v15059_v30  ;;  %v5456_v43 = vadd.f32 %v5455_v19, %v14464_v44  ;;  %v15071_v36 = vadd.f32 %v5806_v22, %v5454_v1  ;;  %7005 = vmatpush1.bf16.msra.mxu1 %v12765_v27  ;;  %v12773_v1 = vld [vmem:[%s20472_s1 + $0x494] ss:$8 sps:$4 sm:$0xff]  }
 0x1a2   :  { %v5459_v14 = vpop.f32.mrf.mxu0  ;;  %v5808_v30 = vpop.f32.mrf.mxu1  ;;  %6084 = vmatmul.mubr.bf16.gmra.mxu0 %v12624_v31  ;;  %v12777_v31 = vld [vmem:[%s20472_s1 + $0x5f0] ss:$8 sps:$4 sm:$0xff]   ;;  %7006 = vmatprep.subr.bf16.mxu1 %v12779_v50  ;;  %v12641_v50 = vld [vmem:[%s20473_s0 + $0x7f4] ss:$72 sps:$4 sm:$0xff]  }
 0x1a3   :  { %20529 = vst [vmem:[#allocation34_spill] sm:$0xff] %v15071_v36  ;;  %v5460_v2 = vadd.f32 %v5459_v14, %v14456_v41  ;;  %v15080_v42 = vadd.f32 %v5808_v30, %v5456_v43  ;;  %6093 = vmatprep.mubr.bf16.mxu0 %v12635_v15  ;;  %v12633_v30 = vld [vmem:[%s20473_s0 + $0x760] ss:$72 sps:$4 sm:$0xff]   ;;  %6665 = vmatprep.subr.bf16.mxu0 %v12773_v1 }
 0x1a4   :  { %v5461_v27 = vpop.f32.mrf.mxu0  ;;  %v5812_v19 = vpop.f32.mrf.mxu1  ;;  %6437 = vmatmul.mubr.bf16.gmra.mxu1 %v12630_v16  ;;  %6666 = vmatpush2.bf16.msra.mxu0 %v12771_v58  ;;  %v12636_v58 = vld [vmem:[%s20473_s0 + $0x768] ss:$72 sps:$4 sm:$0xff]  }
 0x1a5   :  { %20530 = vst [vmem:[#allocation35_spill] sm:$0xff] %v15080_v42  ;;  %v5462_v15 = vadd.f32 %v5461_v27, %v14464_v44  ;;  %v15095_v22 = vadd.f32 %v5812_v19, %v5460_v2  ;;  %6446 = vmatprep.mubr.bf16.mxu1 %v12638_v55  ;;  %7007 = vmatpush2.bf16.msra.mxu1 %v12777_v31  ;;  %v12782_v42 = vld [vmem:[%s20472_s1 + $0x5e4] ss:$8 sps:$4 sm:$0xff]   ;;  %v12780_v2 = vld [vmem:[%s20472_s1 + $0x5e0] ss:$8 sps:$4 sm:$0xff]  }
 0x1a6   :  { %v5463_v43 = vpop.f32.mrf.mxu0  ;;  %v5814_v14 = vpop.f32.mrf.mxu1  ;;  %7008 = vmatprep.subr.bf16.mxu1 %v12782_v42  ;;  %v12647_v19 = vld [vmem:[%s20473_s0 + $0x7fc] ss:$72 sps:$4 sm:$0xff]   ;;  %v12789_v42 = vld [vmem:[%s20472_s1 + $0x5d0] ss:$8 sps:$4 sm:$0xff]  }
 0x1a7   :  { %20531 = vst [vmem:[#allocation36_spill] sm:$0xff] %v15095_v22  ;;  %v5464_v16 = vadd.f32 %v5463_v43, %v14456_v41  ;;  %v15101_v36 = vadd.f32 %v5814_v14, %v5462_v15  ;;  %v12791_v14 = vld [vmem:[%s20472_s1 + $0x5d4] ss:$8 sps:$4 sm:$0xff]  }
 0x1a8   :  { %v5465_v55 = vpop.f32.mrf.mxu0  ;;  %v5816_v1 = vpop.f32.mrf.mxu1 }
 0x1a9   :  { %20532 = vst [vmem:[#allocation37_spill] sm:$0xff] %v15101_v36  ;;  %v5466_v31 = vadd.f32 %v5465_v55, %v14464_v44  ;;  %v15113_v27 = vadd.f32 %v5816_v1, %v5464_v16  ;;  %7009 = vmatpush2.bf16.msra.mxu1 %v12780_v2 }
 0x1aa   :  { %v5469_v15 = vpop.f32.mrf.mxu0  ;;  %v5818_v43 = vpop.f32.mrf.mxu1  ;;  %6094 = vmatmul.mubr.bf16.gmra.mxu0 %v12633_v30  ;;  %v12639_v30 = vld [vmem:[%s20473_s0 + $0x7f0] ss:$72 sps:$4 sm:$0xff]   ;;  %7010 = vmatprep.subr.bf16.mxu1 %v12791_v14  ;;  %v12650_v14 = vld [vmem:[%s20473_s0 + $0x884] ss:$72 sps:$4 sm:$0xff]  }
 0x1ab   :  { %20533 = vst [vmem:[#allocation38_spill] sm:$0xff] %v15113_v27  ;;  %v5470_v36 = vadd.f32 %v5469_v15, %v14456_v41  ;;  %v15122_v22 = vadd.f32 %v5818_v43, %v5466_v31  ;;  %6103 = vmatprep.mubr.bf16.mxu0 %v12641_v50  ;;  %v12794_v50 = vld [vmem:[%s20472_s1 + $0x5c4] ss:$8 sps:$4 sm:$0xff]  }
 0x1ac   :  { %v5471_v16 = vpop.f32.mrf.mxu0  ;;  %v5822_v55 = vpop.f32.mrf.mxu1  ;;  %6447 = vmatmul.mubr.bf16.gmra.mxu1 %v12636_v58 }
 0x1ad   :  { %20534 = vst [vmem:[#allocation39_spill] sm:$0xff] %v15122_v22  ;;  %v5472_v2 = vadd.f32 %v5471_v16, %v14464_v44  ;;  %v15131_v1 = vadd.f32 %v5822_v55, %v5470_v36  ;;  %6456 = vmatprep.mubr.bf16.mxu1 %v12647_v19  ;;  %7011 = vmatpush2.bf16.msra.mxu1 %v12789_v42  ;;  %v12792_v36 = vld [vmem:[%s20472_s1 + $0x5c0] ss:$8 sps:$4 sm:$0xff]  }
 0x1ae   :  { %v5473_v31 = vpop.f32.mrf.mxu0  ;;  %v5824_v15 = vpop.f32.mrf.mxu1  ;;  %v12645_v42 = vld [vmem:[%s20473_s0 + $0x7f8] ss:$72 sps:$4 sm:$0xff]   ;;  %7012 = vmatprep.subr.bf16.mxu1 %v12794_v50 }
 0x1af   :  { %20535 = vst [vmem:[#allocation40_spill] sm:$0xff] %v15131_v1  ;;  %v5474_v43 = vadd.f32 %v5473_v31, %v14456_v41  ;;  %v15137_v58 = vadd.f32 %v5824_v15, %v5472_v2  ;;  %v12653_v2 = vld [vmem:[%s20473_s0 + $0x88c] ss:$72 sps:$4 sm:$0xff]   ;;  %v12798_v50 = vld [vmem:[%s20472_s1 + $0x480] ss:$8 sps:$4 sm:$0xff]  }
 0x1b0   :  { %v5475_v19 = vpop.f32.mrf.mxu0  ;;  %v5826_v16 = vpop.f32.mrf.mxu1  ;;  %v12806_v1 = vld [vmem:[%s20472_s1 + $0x5b4] ss:$8 sps:$4 sm:$0xff]  }
 0x1b1   :  { %20536 = vst [vmem:[#allocation41_spill] sm:$0xff] %v15137_v58  ;;  %v5476_v55 = vadd.f32 %v5475_v19, %v14464_v44  ;;  %v15149_v31 = vadd.f32 %v5826_v16, %v5474_v43  ;;  %7013 = vmatpush2.bf16.msra.mxu1 %v12792_v36  ;;  %v12800_v43 = vld [vmem:[%s20472_s1 + $0x484] ss:$8 sps:$4 sm:$0xff]  }
 0x1b2   :  { %v5479_v15 = vpop.f32.mrf.mxu0  ;;  %v5828_v58 = vpop.f32.mrf.mxu1  ;;  %6104 = vmatmul.mubr.bf16.gmra.mxu0 %v12639_v30  ;;  %v12804_v30 = vld [vmem:[%s20472_s1 + $0x5b0] ss:$8 sps:$4 sm:$0xff]   ;;  %7014 = vmatprep.subr.bf16.mxu1 %v12806_v1 }
 0x1b3   :  { %20537 = vst [vmem:[#allocation42_spill] sm:$0xff] %v15149_v31  ;;  %v5480_v22 = vadd.f32 %v5479_v15, %v14456_v41  ;;  %v15158_v27 = vadd.f32 %v5828_v58, %v5476_v55  ;;  %6113 = vmatprep.mubr.bf16.mxu0 %v12650_v14  ;;  %6667 = vmatprep.subr.bf16.mxu0 %v12800_v43  ;;  %v12648_v15 = vld [vmem:[%s20473_s0 + $0x880] ss:$72 sps:$4 sm:$0xff]  }
 0x1b4   :  { %v5481_v36 = vpop.f32.mrf.mxu0  ;;  %v5832_v19 = vpop.f32.mrf.mxu1  ;;  %6457 = vmatmul.mubr.bf16.gmra.mxu1 %v12645_v42  ;;  %6668 = vmatpush2.bf16.msra.mxu0 %v12798_v50  ;;  %v12651_v50 = vld [vmem:[%s20473_s0 + $0x888] ss:$72 sps:$4 sm:$0xff]  }
 0x1b5   :  { %20538 = vst [vmem:[#allocation43_spill] sm:$0xff] %v15158_v27  ;;  %v5482_v58 = vadd.f32 %v5481_v36, %v14464_v44  ;;  %v15170_v16 = vadd.f32 %v5832_v19, %v5480_v22  ;;  %6466 = vmatprep.mubr.bf16.mxu1 %v12653_v2  ;;  %7015 = vmatpush2.bf16.msra.mxu1 %v12804_v30  ;;  %v12809_v27 = vld [vmem:[%s20472_s1 + $0x5a4] ss:$8 sps:$4 sm:$0xff]   ;;  %v12656_v22 = vld [vmem:[%s20473_s0 + $0x914] ss:$72 sps:$4 sm:$0xff]  }
 0x1b6   :  { %v5483_v14 = vpop.f32.mrf.mxu0  ;;  %v5834_v55 = vpop.f32.mrf.mxu1  ;;  %v12807_v2 = vld [vmem:[%s20472_s1 + $0x5a0] ss:$8 sps:$4 sm:$0xff]   ;;  %7016 = vmatprep.subr.bf16.mxu1 %v12809_v27  ;;  %v12816_v27 = vld [vmem:[%s20472_s1 + $0x590] ss:$8 sps:$4 sm:$0xff]  }
 0x1b7   :  { %20539 = vst [vmem:[#allocation44_spill] sm:$0xff] %v15170_v16  ;;  %v5484_v1 = vadd.f32 %v5483_v14, %v14456_v41  ;;  %v15179_v42 = vadd.f32 %v5834_v55, %v5482_v58  ;;  %v12662_v58 = vld [vmem:[%s20473_s0 + $0x91c] ss:$72 sps:$4 sm:$0xff]  }
 0x1b8   :  { %v5485_v43 = vpop.f32.mrf.mxu0  ;;  %v5836_v36 = vpop.f32.mrf.mxu1 }
 0x1b9   :  { %20540 = vst [vmem:[#allocation45_spill] sm:$0xff] %v15179_v42  ;;  %v5486_v30 = vadd.f32 %v5485_v43, %v14464_v44  ;;  %v15191_v19 = vadd.f32 %v5836_v36, %v5484_v1  ;;  %7017 = vmatpush2.bf16.msra.mxu1 %v12807_v2  ;;  %v12818_v42 = vld [vmem:[%s20472_s1 + $0x594] ss:$8 sps:$4 sm:$0xff]  }
 0x1ba   :  { %v5489_v14 = vpop.f32.mrf.mxu0  ;;  %v5838_v55 = vpop.f32.mrf.mxu1  ;;  %6114 = vmatmul.mubr.bf16.gmra.mxu0 %v12648_v15  ;;  %7018 = vmatprep.subr.bf16.mxu1 %v12818_v42  ;;  %v12819_v42 = vld [vmem:[%s20472_s1 + $0x580] ss:$8 sps:$4 sm:$0xff]  }
 0x1bb   :  { %20541 = vst [vmem:[#allocation46_spill] sm:$0xff] %v15191_v19  ;;  %v5490_v16 = vadd.f32 %v5489_v14, %v14456_v41  ;;  %v15200_v31 = vadd.f32 %v5838_v55, %v5486_v30  ;;  %6123 = vmatprep.mubr.bf16.mxu0 %v12656_v22  ;;  %v12654_v30 = vld [vmem:[%s20473_s0 + $0x910] ss:$72 sps:$4 sm:$0xff]   ;;  %v12821_v22 = vld [vmem:[%s20472_s1 + $0x584] ss:$8 sps:$4 sm:$0xff]  }
 0x1bc   :  { %v5491_v1 = vpop.f32.mrf.mxu0  ;;  %v5842_v43 = vpop.f32.mrf.mxu1  ;;  %6467 = vmatmul.mubr.bf16.gmra.mxu1 %v12651_v50 }
 0x1bd   :  { %20542 = vst [vmem:[#allocation47_spill] sm:$0xff] %v15200_v31  ;;  %v5492_v15 = vadd.f32 %v5491_v1, %v14464_v44  ;;  %v15206_v2 = vadd.f32 %v5842_v43, %v5490_v16  ;;  %6476 = vmatprep.mubr.bf16.mxu1 %v12662_v58  ;;  %7019 = vmatpush2.bf16.msra.mxu1 %v12816_v27  ;;  %v12665_v16 = vld [vmem:[%s20473_s0 + $0x9a4] ss:$72 sps:$4 sm:$0xff]   ;;  %v12660_v27 = vld [vmem:[%s20473_s0 + $0x918] ss:$72 sps:$4 sm:$0xff]  }
 0x1be   :  { %v5493_v36 = vpop.f32.mrf.mxu0  ;;  %v5844_v19 = vpop.f32.mrf.mxu1  ;;  %7020 = vmatprep.subr.bf16.mxu1 %v12821_v22  ;;  %v12827_v22 = vld [vmem:[%s20472_s1 + $0x674] ss:$8 sps:$4 sm:$0xff]  }
 0x1bf   :  { %20543 = vst [vmem:[#allocation48_spill] sm:$0xff] %v15206_v2  ;;  %v5494_v14 = vadd.f32 %v5493_v36, %v14456_v41  ;;  %v15215_v50 = vadd.f32 %v5844_v19, %v5492_v15  ;;  %v12668_v19 = vld [vmem:[%s20473_s0 + $0x9ac] ss:$72 sps:$4 sm:$0xff]   ;;  %7343 = vmatprep.subr.bf16.mxu0 %v12827_v22 }
 0x1c0   :  { %v5495_v58 = vpop.f32.mrf.mxu0  ;;  %v5846_v55 = vpop.f32.mrf.mxu1 }
 0x1c1   :  { %20544 = vst [vmem:[#allocation49_spill] sm:$0xff] %v15215_v50  ;;  %v5496_v1 = vadd.f32 %v5495_v58, %v14464_v44  ;;  %v15227_v43 = vadd.f32 %v5846_v55, %v5494_v14  ;;  %7021 = vmatpush2.bf16.msra.mxu1 %v12819_v42 }
 0x1c2   :  { %v5499_v15 = vpop.f32.mrf.mxu0  ;;  %v5848_v36 = vpop.f32.mrf.mxu1  ;;  %6124 = vmatmul.mubr.bf16.gmra.mxu0 %v12654_v30 }
 0x1c3   :  { %20545 = vst [vmem:[#allocation50_spill] sm:$0xff] %v15227_v43  ;;  %v5500_v50 = vadd.f32 %v5499_v15, %v14456_v41  ;;  %v15233_v2 = vadd.f32 %v5848_v36, %v5496_v1  ;;  %6133 = vmatprep.mubr.bf16.mxu0 %v12665_v16  ;;  %v12663_v1 = vld [vmem:[%s20473_s0 + $0x9a0] ss:$72 sps:$4 sm:$0xff]  }
 0x1c4   :  { %v5501_v58 = vpop.f32.mrf.mxu0  ;;  %v5852_v14 = vpop.f32.mrf.mxu1  ;;  %6477 = vmatmul.mubr.bf16.gmra.mxu1 %v12660_v27  ;;  %v12671_v27 = vld [vmem:[%s20473_s0 + $0xa34] ss:$72 sps:$4 sm:$0xff]  }
 0x1c5   :  { %20546 = vst [vmem:[#allocation51_spill] sm:$0xff] %v15233_v2  ;;  %v5502_v55 = vadd.f32 %v5501_v58, %v14464_v44  ;;  %v15239_v43 = vadd.f32 %v5852_v14, %v5500_v50  ;;  %6486 = vmatprep.mubr.bf16.mxu1 %v12668_v19  ;;  %v12666_v50 = vld [vmem:[%s20473_s0 + $0x9a8] ss:$72 sps:$4 sm:$0xff]   ;;  %v12677_v14 = vld [vmem:[%s20473_s0 + $0xa3c] ss:$72 sps:$4 sm:$0xff]  }
 0x1c6   :  { %v5503_v30 = vpop.f32.mrf.mxu0  ;;  %v5854_v42 = vpop.f32.mrf.mxu1 }
 0x1c7   :  { %20547 = vst [vmem:[#allocation52_spill] sm:$0xff] %v15239_v43  ;;  %v5504_v16 = vadd.f32 %v5503_v30, %v14456_v41  ;;  %v15245_v15 = vadd.f32 %v5854_v42, %v5502_v55 }
 0x1c8   :  { %v5505_v36 = vpop.f32.mrf.mxu0  ;;  %v5856_v58 = vpop.f32.mrf.mxu1 }
 0x1c9   :  { %20548 = vst [vmem:[#allocation53_spill] sm:$0xff] %v15245_v15  ;;  %v5506_v19 = vadd.f32 %v5505_v36, %v14464_v44  ;;  %v15254_v22 = vadd.f32 %v5856_v58, %v5504_v16 }
 0x1ca   :  { %v5509_v55 = vpop.f32.mrf.mxu0  ;;  %v5858_v30 = vpop.f32.mrf.mxu1  ;;  %6134 = vmatmul.mubr.bf16.gmra.mxu0 %v12663_v1 }
 0x1cb   :  { %20549 = vst [vmem:[#allocation54_spill] sm:$0xff] %v15254_v22  ;;  %v5510_v42 = vadd.f32 %v5509_v55, %v14456_v41  ;;  %v15260_v15 = vadd.f32 %v5858_v30, %v5506_v19  ;;  %6143 = vmatprep.mubr.bf16.mxu0 %v12671_v27  ;;  %v12669_v22 = vld [vmem:[%s20473_s0 + $0xa30] ss:$72 sps:$4 sm:$0xff]   ;;  %v12680_v27 = vld [vmem:[%s20473_s0 + $0xac4] ss:$72 sps:$4 sm:$0xff]  }
 0x1cc   :  { %v5511_v43 = vpop.f32.mrf.mxu0  ;;  %v5862_v2 = vpop.f32.mrf.mxu1  ;;  %6487 = vmatmul.mubr.bf16.gmra.mxu1 %v12666_v50  ;;  %v12683_v30 = vld [vmem:[%s20473_s0 + $0xacc] ss:$72 sps:$4 sm:$0xff]  }
 0x1cd   :  { %20550 = vst [vmem:[#allocation55_spill] sm:$0xff] %v15260_v15  ;;  %v5512_v31 = vadd.f32 %v5511_v43, %v14464_v44  ;;  %v15263_v36 = vadd.f32 %v5862_v2, %v5510_v42  ;;  %6496 = vmatprep.mubr.bf16.mxu1 %v12677_v14  ;;  %v12675_v2 = vld [vmem:[%s20473_s0 + $0xa38] ss:$72 sps:$4 sm:$0xff]  }
 0x1ce   :  { %v5513_v16 = vpop.f32.mrf.mxu0  ;;  %v5864_v58 = vpop.f32.mrf.mxu1 }
 0x1cf   :  { %20551 = vst [vmem:[#allocation56_spill] sm:$0xff] %v15263_v36  ;;  %v5514_v1 = vadd.f32 %v5513_v16, %v14456_v41  ;;  %v15269_v55 = vadd.f32 %v5864_v58, %v5512_v31 }
 0x1d0   :  { %v5515_v50 = vpop.f32.mrf.mxu0  ;;  %v5866_v19 = vpop.f32.mrf.mxu1 }
 0x1d1   :  { %20552 = vst [vmem:[#allocation57_spill] sm:$0xff] %v15269_v55  ;;  %v5516_v43 = vadd.f32 %v5515_v50, %v14464_v44  ;;  %v15278_v14 = vadd.f32 %v5866_v19, %v5514_v1 }
 0x1d2   :  { %v5519_v31 = vpop.f32.mrf.mxu0  ;;  %v5868_v42 = vpop.f32.mrf.mxu1  ;;  %6144 = vmatmul.mubr.bf16.gmra.mxu0 %v12669_v22 }
 0x1d3   :  { %20553 = vst [vmem:[#allocation58_spill] sm:$0xff] %v15278_v14  ;;  %v5520_v16 = vadd.f32 %v5519_v31, %v14456_v41  ;;  %v15284_v58 = vadd.f32 %v5868_v42, %v5516_v43  ;;  %6153 = vmatprep.mubr.bf16.mxu0 %v12680_v27  ;;  %v12678_v14 = vld [vmem:[%s20473_s0 + $0xac0] ss:$72 sps:$4 sm:$0xff]   ;;  %v12686_v27 = vld [vmem:[%s20473_s0 + $0xb54] ss:$72 sps:$4 sm:$0xff]  }
 0x1d4   :  { %v5521_v55 = vpop.f32.mrf.mxu0  ;;  %v5872_v36 = vpop.f32.mrf.mxu1  ;;  %6497 = vmatmul.mubr.bf16.gmra.mxu1 %v12675_v2  ;;  %v12692_v42 = vld [vmem:[%s20473_s0 + $0xb5c] ss:$72 sps:$4 sm:$0xff]  }
 0x1d5   :  { %20554 = vst [vmem:[#allocation59_spill] sm:$0xff] %v15284_v58  ;;  %v5522_v15 = vadd.f32 %v5521_v55, %v14464_v44  ;;  %v15287_v50 = vadd.f32 %v5872_v36, %v5520_v16  ;;  %6506 = vmatprep.mubr.bf16.mxu1 %v12683_v30  ;;  %v12681_v36 = vld [vmem:[%s20473_s0 + $0xac8] ss:$72 sps:$4 sm:$0xff]  }
 0x1d6   :  { %v5523_v1 = vpop.f32.mrf.mxu0  ;;  %v5874_v19 = vpop.f32.mrf.mxu1 }
 0x1d7   :  { %20555 = vst [vmem:[#allocation60_spill] sm:$0xff] %v15287_v50  ;;  %v5524_v22 = vadd.f32 %v5523_v1, %v14456_v41  ;;  %v15293_v31 = vadd.f32 %v5874_v19, %v5522_v15 }
 0x1d8   :  { %v5525_v2 = vpop.f32.mrf.mxu0  ;;  %v5876_v43 = vpop.f32.mrf.mxu1 }
 0x1d9   :  { %20556 = vst [vmem:[#allocation61_spill] sm:$0xff] %v15293_v31  ;;  %v5526_v55 = vadd.f32 %v5525_v2, %v14464_v44  ;;  %v15302_v30 = vadd.f32 %v5876_v43, %v5524_v22 }
 0x1da   :  { %v5529_v15 = vpop.f32.mrf.mxu0  ;;  %v5878_v16 = vpop.f32.mrf.mxu1  ;;  %6154 = vmatmul.mubr.bf16.gmra.mxu0 %v12678_v14 }
 0x1db   :  { %20557 = vst [vmem:[#allocation62_spill] sm:$0xff] %v15302_v30  ;;  %v5530_v1 = vadd.f32 %v5529_v15, %v14456_v41  ;;  %v15308_v19 = vadd.f32 %v5878_v16, %v5526_v55  ;;  %6163 = vmatprep.mubr.bf16.mxu0 %v12686_v27  ;;  %v12684_v30 = vld [vmem:[%s20473_s0 + $0xb50] ss:$72 sps:$4 sm:$0xff]   ;;  %v12695_v27 = vld [vmem:[%s20473_s0 + $0xbe4] ss:$72 sps:$4 sm:$0xff]  }
 0x1dc   :  { %v5531_v31 = vpop.f32.mrf.mxu0  ;;  %v5882_v50 = vpop.f32.mrf.mxu1  ;;  %6507 = vmatmul.mubr.bf16.gmra.mxu1 %v12681_v36  ;;  %v12698_v16 = vld [vmem:[%s20473_s0 + $0xbec] ss:$72 sps:$4 sm:$0xff]  }
 0x1dd   :  { %20558 = vst [vmem:[#allocation63_spill] sm:$0xff] %v15308_v19  ;;  %v5532_v58 = vadd.f32 %v5531_v31, %v14464_v44  ;;  %v15311_v2 = vadd.f32 %v5882_v50, %v5530_v1  ;;  %6516 = vmatprep.mubr.bf16.mxu1 %v12692_v42  ;;  %v12690_v50 = vld [vmem:[%s20473_s0 + $0xb58] ss:$72 sps:$4 sm:$0xff]  }
 0x1de   :  { %v5533_v22 = vpop.f32.mrf.mxu0  ;;  %v5884_v43 = vpop.f32.mrf.mxu1 }
 0x1df   :  { %20559 = vst [vmem:[#allocation64_spill] sm:$0xff] %v15311_v2  ;;  %v5534_v14 = vadd.f32 %v5533_v22, %v14456_v41  ;;  %v15317_v15 = vadd.f32 %v5884_v43, %v5532_v58 }
 0x1e0   :  { %v5535_v36 = vpop.f32.mrf.mxu0  ;;  %v5886_v55 = vpop.f32.mrf.mxu1 }
 0x1e1   :  { %20560 = vst [vmem:[#allocation65_spill] sm:$0xff] %v15317_v15  ;;  %v5536_v31 = vadd.f32 %v5535_v36, %v14464_v44  ;;  %v15326_v42 = vadd.f32 %v5886_v55, %v5534_v14 }
 0x1e2   :  { %v5539_v58 = vpop.f32.mrf.mxu0  ;;  %v5888_v1 = vpop.f32.mrf.mxu1  ;;  %6164 = vmatmul.mubr.bf16.gmra.mxu0 %v12684_v30 }
 0x1e3   :  { %20561 = vst [vmem:[#allocation66_spill] sm:$0xff] %v15326_v42  ;;  %v5540_v22 = vadd.f32 %v5539_v58, %v14456_v41  ;;  %v15332_v43 = vadd.f32 %v5888_v1, %v5536_v31  ;;  %6173 = vmatprep.mubr.bf16.mxu0 %v12695_v27  ;;  %v12693_v42 = vld [vmem:[%s20473_s0 + $0xbe0] ss:$72 sps:$4 sm:$0xff]   ;;  %v12701_v27 = vld [vmem:[%s20473_s0 + $0xc74] ss:$72 sps:$4 sm:$0xff]  }
 0x1e4   :  { %v5541_v15 = vpop.f32.mrf.mxu0  ;;  %v5892_v2 = vpop.f32.mrf.mxu1  ;;  %6517 = vmatmul.mubr.bf16.gmra.mxu1 %v12690_v50  ;;  %v12707_v1 = vld [vmem:[%s20473_s0 + $0xc7c] ss:$72 sps:$4 sm:$0xff]  }
 0x1e5   :  { %20562 = vst [vmem:[#allocation67_spill] sm:$0xff] %v15332_v43  ;;  %v5542_v19 = vadd.f32 %v5541_v15, %v14464_v44  ;;  %v15335_v36 = vadd.f32 %v5892_v2, %v5540_v22  ;;  %6526 = vmatprep.mubr.bf16.mxu1 %v12698_v16  ;;  %v12696_v2 = vld [vmem:[%s20473_s0 + $0xbe8] ss:$72 sps:$4 sm:$0xff]  }
 0x1e6   :  { %v5543_v14 = vpop.f32.mrf.mxu0  ;;  %v5894_v55 = vpop.f32.mrf.mxu1 }
 0x1e7   :  { %20563 = vst [vmem:[#allocation68_spill] sm:$0xff] %v15335_v36  ;;  %v5544_v30 = vadd.f32 %v5543_v14, %v14456_v41  ;;  %v15341_v58 = vadd.f32 %v5894_v55, %v5542_v19 }
 0x1e8   :  { %v5545_v50 = vpop.f32.mrf.mxu0  ;;  %v5896_v31 = vpop.f32.mrf.mxu1 }
 0x1e9   :  { %20564 = vst [vmem:[#allocation69_spill] sm:$0xff] %v15341_v58  ;;  %v5546_v15 = vadd.f32 %v5545_v50, %v14464_v44  ;;  %v15350_v16 = vadd.f32 %v5896_v31, %v5544_v30 }
 0x1ea   :  { %v5549_v19 = vpop.f32.mrf.mxu0  ;;  %v5898_v22 = vpop.f32.mrf.mxu1  ;;  %6174 = vmatmul.mubr.bf16.gmra.mxu0 %v12693_v42 }
 0x1eb   :  { %20565 = vst [vmem:[#allocation70_spill] sm:$0xff] %v15350_v16  ;;  %v5550_v14 = vadd.f32 %v5549_v19, %v14456_v41  ;;  %v15356_v55 = vadd.f32 %v5898_v22, %v5546_v15  ;;  %6183 = vmatprep.mubr.bf16.mxu0 %v12701_v27  ;;  %v12699_v16 = vld [vmem:[%s20473_s0 + $0xc70] ss:$72 sps:$4 sm:$0xff]   ;;  %v12710_v27 = vld [vmem:[%s20473_s0 + $0xd04] ss:$72 sps:$4 sm:$0xff]  }
 0x1ec   :  { %v5551_v58 = vpop.f32.mrf.mxu0  ;;  %v5902_v36 = vpop.f32.mrf.mxu1  ;;  %6527 = vmatmul.mubr.bf16.gmra.mxu1 %v12696_v2  ;;  %v12713_v22 = vld [vmem:[%s20473_s0 + $0xd0c] ss:$72 sps:$4 sm:$0xff]  }
 0x1ed   :  { %20566 = vst [vmem:[#allocation71_spill] sm:$0xff] %v15356_v55  ;;  %v5552_v43 = vadd.f32 %v5551_v58, %v14464_v44  ;;  %v15359_v50 = vadd.f32 %v5902_v36, %v5550_v14  ;;  %6536 = vmatprep.mubr.bf16.mxu1 %v12707_v1  ;;  %v12705_v36 = vld [vmem:[%s20473_s0 + $0xc78] ss:$72 sps:$4 sm:$0xff]  }
 0x1ee   :  { %v5553_v30 = vpop.f32.mrf.mxu0  ;;  %v5904_v31 = vpop.f32.mrf.mxu1 }
 0x1ef   :  { %20567 = vst [vmem:[#allocation72_spill] sm:$0xff] %v15359_v50  ;;  %v5554_v42 = vadd.f32 %v5553_v30, %v14456_v41  ;;  %v15365_v19 = vadd.f32 %v5904_v31, %v5552_v43 }
 0x1f0   :  { %v5555_v2 = vpop.f32.mrf.mxu0  ;;  %v5906_v15 = vpop.f32.mrf.mxu1 }
 0x1f1   :  { %20568 = vst [vmem:[#allocation73_spill] sm:$0xff] %v15365_v19  ;;  %v5556_v58 = vadd.f32 %v5555_v2, %v14464_v44  ;;  %v15374_v1 = vadd.f32 %v5906_v15, %v5554_v42 }
 0x1f2   :  { %v5559_v43 = vpop.f32.mrf.mxu0  ;;  %v5908_v14 = vpop.f32.mrf.mxu1  ;;  %6184 = vmatmul.mubr.bf16.gmra.mxu0 %v12699_v16 }
 0x1f3   :  { %20569 = vst [vmem:[#allocation74_spill] sm:$0xff] %v15374_v1  ;;  %v5560_v30 = vadd.f32 %v5559_v43, %v14456_v41  ;;  %v15380_v31 = vadd.f32 %v5908_v14, %v5556_v58  ;;  %6193 = vmatprep.mubr.bf16.mxu0 %v12710_v27  ;;  %v12708_v1 = vld [vmem:[%s20473_s0 + $0xd00] ss:$72 sps:$4 sm:$0xff]   ;;  %v12716_v27 = vld [vmem:[%s20473_s0 + $0xd94] ss:$72 sps:$4 sm:$0xff]  }
 0x1f4   :  { %v5561_v19 = vpop.f32.mrf.mxu0  ;;  %v5912_v50 = vpop.f32.mrf.mxu1  ;;  %6537 = vmatmul.mubr.bf16.gmra.mxu1 %v12705_v36  ;;  %v12722_v14 = vld [vmem:[%s20473_s0 + $0xd9c] ss:$72 sps:$4 sm:$0xff]  }
 0x1f5   :  { %20570 = vst [vmem:[#allocation75_spill] sm:$0xff] %v15380_v31  ;;  %v5562_v55 = vadd.f32 %v5561_v19, %v14464_v44  ;;  %v15383_v2 = vadd.f32 %v5912_v50, %v5560_v30  ;;  %6546 = vmatprep.mubr.bf16.mxu1 %v12713_v22  ;;  %v12711_v50 = vld [vmem:[%s20473_s0 + $0xd08] ss:$72 sps:$4 sm:$0xff]  }
 0x1f6   :  { %v5563_v42 = vpop.f32.mrf.mxu0  ;;  %v5914_v15 = vpop.f32.mrf.mxu1 }
 0x1f7   :  { %20571 = vst [vmem:[#allocation76_spill] sm:$0xff] %v15383_v2  ;;  %v5564_v16 = vadd.f32 %v5563_v42, %v14456_v41  ;;  %v15389_v43 = vadd.f32 %v5914_v15, %v5562_v55 }
 0x1f8   :  { %v5565_v36 = vpop.f32.mrf.mxu0  ;;  %v5916_v58 = vpop.f32.mrf.mxu1 }
 0x1f9   :  { %20572 = vst [vmem:[#allocation77_spill] sm:$0xff] %v15389_v43  ;;  %v5566_v19 = vadd.f32 %v5565_v36, %v14464_v44  ;;  %v15398_v22 = vadd.f32 %v5916_v58, %v5564_v16 }
 0x1fa   :  { %v5569_v55 = vpop.f32.mrf.mxu0  ;;  %v5918_v30 = vpop.f32.mrf.mxu1  ;;  %6194 = vmatmul.mubr.bf16.gmra.mxu0 %v12708_v1 }
 0x1fb   :  { %20573 = vst [vmem:[#allocation78_spill] sm:$0xff] %v15398_v22  ;;  %v5570_v42 = vadd.f32 %v5569_v55, %v14456_v41  ;;  %v15404_v15 = vadd.f32 %v5918_v30, %v5566_v19  ;;  %6203 = vmatprep.mubr.bf16.mxu0 %v12716_v27  ;;  %v12714_v22 = vld [vmem:[%s20473_s0 + $0xd90] ss:$72 sps:$4 sm:$0xff]   ;;  %v12731_v27 = vld [vmem:[%s20473_s0 + $0xe24] ss:$72 sps:$4 sm:$0xff]  }
 0x1fc   :  { %v5571_v43 = vpop.f32.mrf.mxu0  ;;  %v5922_v2 = vpop.f32.mrf.mxu1  ;;  %6547 = vmatmul.mubr.bf16.gmra.mxu1 %v12711_v50 }
 0x1fd   :  { %v5572_v31 = vadd.f32 %v5571_v43, %v14464_v44  ;;  %v15407_v36 = vadd.f32 %v5922_v2, %v5570_v42  ;;  %6556 = vmatprep.mubr.bf16.mxu1 %v12722_v14  ;;  %v12720_v2 = vld [vmem:[%s20473_s0 + $0xd98] ss:$72 sps:$4 sm:$0xff]  }
 0x1fe   :  { %v5573_v16 = vpop.f32.mrf.mxu0  ;;  %v5924_v58 = vpop.f32.mrf.mxu1 }
 0x1ff   :  { %20574 = vst [vmem:[#allocation79_spill] sm:$0xff] %v15407_v36  ;;  %v5574_v1 = vadd.f32 %v5573_v16, %v14456_v41  ;;  %v15413_v55 = vadd.f32 %v5924_v58, %v5572_v31  ;;  %v12734_v41 = vld [vmem:[%s20473_s0 + $0xe2c] ss:$72 sps:$4 sm:$0xff]  }
 0x200   :  { %v5575_v50 = vpop.f32.mrf.mxu0  ;;  %v5926_v19 = vpop.f32.mrf.mxu1 }
 0x201   :  { %20575 = vst [vmem:[#allocation80_spill] sm:$0xff] %v15413_v55  ;;  %v5576_v43 = vadd.f32 %v5575_v50, %v14464_v44  ;;  %v15422_v14 = vadd.f32 %v5926_v19, %v5574_v1  ;;  %v12729_v19 = vld [vmem:[%s20473_s0 + $0xe20] ss:$72 sps:$4 sm:$0xff]  }
 0x202   :  { %v5928_v31 = vpop.f32.mrf.mxu1  ;;  %v5965_v30 = vpop.f32.mrf.mxu0  ;;  %6204 = vmatmul.mubr.bf16.gmra.mxu0 %v12714_v22 }
 0x203   :  { %v15427_v42 = vadd.f32 %v5928_v31, %v5576_v43  ;;  %v5966_v16 = vadd.f32 %v5965_v30, %v14474_v52  ;;  %6213 = vmatprep.mubr.bf16.mxu0 %v12731_v27  ;;  %v12743_v52 = vld [vmem:[%s20473_s0 + $0xeb4] ss:$72 sps:$4 sm:$0xff]  }
 0x204   :  { %v5967_v58 = vpop.f32.mrf.mxu0  ;;  %v6318_v55 = vpop.f32.mrf.mxu1  ;;  %6557 = vmatmul.mubr.bf16.gmra.mxu1 %v12720_v2 }
 0x205   :  { %v5968_v36 = vadd.f32 %v5967_v58, %v14477_v56  ;;  %v15431_v44 = vadd.f32 %v6318_v55, %v5966_v16  ;;  %6566 = vmatprep.mubr.bf16.mxu1 %v12734_v41  ;;  %v12732_v56 = vld [vmem:[%s20473_s0 + $0xe28] ss:$72 sps:$4 sm:$0xff]  }
 0x206   :  { %v5969_v1 = vpop.f32.mrf.mxu0  ;;  %v6320_v50 = vpop.f32.mrf.mxu1 }
 0x207   :  { %v5970_v22 = vadd.f32 %v5969_v1, %v14486_v62  ;;  %v15437_v43 = vadd.f32 %v6320_v50, %v5968_v36  ;;  %v12749_v62 = vld [vmem:[%s20473_s0 + $0xebc] ss:$72 sps:$4 sm:$0xff]  }
 0x208   :  { %v5971_v27 = vpop.f32.mrf.mxu0  ;;  %v6322_v2 = vpop.f32.mrf.mxu1 }
 0x209   :  { %v5972_v55 = vadd.f32 %v5971_v27, %v14492_v3  ;;  %v15446_v41 = vadd.f32 %v6322_v2, %v5970_v22 }
 0x20a   :  { %v5975_v36 = vpop.f32.mrf.mxu0  ;;  %6214 = vmatmul.mubr.bf16.gmra.mxu0 %v12729_v19  ;;  %v6324_v31 = vpop.f32.mrf.mxu1  ;;  %v12741_v19 = vld [vmem:[%s20473_s0 + $0xeb0] ss:$72 sps:$4 sm:$0xff]  }
 0x20b   :  { %v5976_v30 = vadd.f32 %v5975_v36, %v14498_v8  ;;  %v15452_v16 = vadd.f32 %v6324_v31, %v5972_v55  ;;  %6223 = vmatprep.mubr.bf16.mxu0 %v12743_v52  ;;  %v12758_v52 = vld [vmem:[%s20473_s0 + $0xf44] ss:$72 sps:$4 sm:$0xff]  }
 0x20c   :  { %v5977_v58 = vpop.f32.mrf.mxu0  ;;  %v6328_v1 = vpop.f32.mrf.mxu1  ;;  %6567 = vmatmul.mubr.bf16.gmra.mxu1 %v12732_v56 }
 0x20d   :  { %v5978_v50 = vadd.f32 %v5977_v58, %v14501_v12  ;;  %v15455_v3 = vadd.f32 %v6328_v1, %v5976_v30  ;;  %6576 = vmatprep.mubr.bf16.mxu1 %v12749_v62  ;;  %v12747_v12 = vld [vmem:[%s20473_s0 + $0xeb8] ss:$72 sps:$4 sm:$0xff]  }
 0x20e   :  { %v5979_v22 = vpop.f32.mrf.mxu0  ;;  %v6330_v27 = vpop.f32.mrf.mxu1 }
 0x20f   :  { %v5980_v2 = vadd.f32 %v5979_v22, %v14510_v18  ;;  %v15461_v8 = vadd.f32 %v6330_v27, %v5978_v50  ;;  %v12761_v18 = vld [vmem:[%s20473_s0 + $0xf4c] ss:$72 sps:$4 sm:$0xff]  }
 0x210   :  { %v5981_v56 = vpop.f32.mrf.mxu0  ;;  %v6332_v55 = vpop.f32.mrf.mxu1 }
 0x211   :  { %v5982_v62 = vadd.f32 %v5981_v56, %v14516_v23  ;;  %v15470_v36 = vadd.f32 %v6332_v55, %v5980_v2 }
 0x212   :  { %v5985_v31 = vpop.f32.mrf.mxu0  ;;  %6224 = vmatmul.mubr.bf16.gmra.mxu0 %v12741_v19  ;;  %v6334_v30 = vpop.f32.mrf.mxu1  ;;  %v12756_v19 = vld [vmem:[%s20473_s0 + $0xf40] ss:$72 sps:$4 sm:$0xff]  }
 0x213   :  { %v5986_v58 = vadd.f32 %v5985_v31, %v14522_v28  ;;  %v15476_v1 = vadd.f32 %v6334_v30, %v5982_v62  ;;  %6233 = vmatprep.mubr.bf16.mxu0 %v12758_v52  ;;  %v12770_v52 = vld [vmem:[%s20473_s0 + $0xfd4] ss:$72 sps:$4 sm:$0xff]  }
 0x214   :  { %v5987_v50 = vpop.f32.mrf.mxu0  ;;  %v6338_v22 = vpop.f32.mrf.mxu1  ;;  %6577 = vmatmul.mubr.bf16.gmra.mxu1 %v12747_v12 }
 0x215   :  { %v5988_v27 = vadd.f32 %v5987_v50, %v14525_v33  ;;  %v15479_v23 = vadd.f32 %v6338_v22, %v5986_v58  ;;  %6586 = vmatprep.mubr.bf16.mxu1 %v12761_v18  ;;  %v12759_v33 = vld [vmem:[%s20473_s0 + $0xf48] ss:$72 sps:$4 sm:$0xff]  }
 0x216   :  { %v5989_v2 = vpop.f32.mrf.mxu0  ;;  %v6340_v56 = vpop.f32.mrf.mxu1 }
 0x217   :  { %v5990_v55 = vadd.f32 %v5989_v2, %v14534_v39  ;;  %v15485_v28 = vadd.f32 %v6340_v56, %v5988_v27  ;;  %v12776_v39 = vld [vmem:[%s20473_s0 + $0xfdc] ss:$72 sps:$4 sm:$0xff]  }
 0x218   :  { %v5991_v12 = vpop.f32.mrf.mxu0  ;;  %v6342_v62 = vpop.f32.mrf.mxu1 }
 0x219   :  { %v5992_v18 = vadd.f32 %v5991_v12, %v14540_v46  ;;  %v15494_v31 = vadd.f32 %v6342_v62, %v5990_v55 }
 0x21a   :  { %v5995_v30 = vpop.f32.mrf.mxu0  ;;  %6234 = vmatmul.mubr.bf16.gmra.mxu0 %v12756_v19  ;;  %v6344_v58 = vpop.f32.mrf.mxu1  ;;  %v12768_v19 = vld [vmem:[%s20473_s0 + $0xfd0] ss:$72 sps:$4 sm:$0xff]  }
 0x21b   :  { %v5996_v50 = vadd.f32 %v5995_v30, %v14546_v51  ;;  %v15500_v22 = vadd.f32 %v6344_v58, %v5992_v18  ;;  %6243 = vmatprep.mubr.bf16.mxu0 %v12770_v52  ;;  %v12785_v52 = vld [vmem:[%s20473_s0 + $0x1064] ss:$72 sps:$4 sm:$0xff]  }
 0x21c   :  { %v5997_v27 = vpop.f32.mrf.mxu0  ;;  %v6348_v2 = vpop.f32.mrf.mxu1  ;;  %6587 = vmatmul.mubr.bf16.gmra.mxu1 %v12759_v33 }
 0x21d   :  { %v5998_v56 = vadd.f32 %v5997_v27, %v14549_v57  ;;  %v15503_v46 = vadd.f32 %v6348_v2, %v5996_v50  ;;  %6596 = vmatprep.mubr.bf16.mxu1 %v12776_v39  ;;  %v12774_v57 = vld [vmem:[%s20473_s0 + $0xfd8] ss:$72 sps:$4 sm:$0xff]  }
 0x21e   :  { %v5999_v55 = vpop.f32.mrf.mxu0  ;;  %v6350_v12 = vpop.f32.mrf.mxu1 }
 0x21f   :  { %v6000_v62 = vadd.f32 %v5999_v55, %v14558_v0  ;;  %v15509_v51 = vadd.f32 %v6350_v12, %v5998_v56  ;;  %v12788_v0 = vld [vmem:[%s20473_s0 + $0x106c] ss:$72 sps:$4 sm:$0xff]  }
 0x220   :  { %v6001_v33 = vpop.f32.mrf.mxu0  ;;  %v6352_v18 = vpop.f32.mrf.mxu1 }
 0x221   :  { %v6002_v39 = vadd.f32 %v6001_v33, %v14564_v6  ;;  %v15518_v30 = vadd.f32 %v6352_v18, %v6000_v62 }
 0x222   :  { %v6005_v58 = vpop.f32.mrf.mxu0  ;;  %6244 = vmatmul.mubr.bf16.gmra.mxu0 %v12768_v19  ;;  %v6354_v50 = vpop.f32.mrf.mxu1  ;;  %v12783_v19 = vld [vmem:[%s20473_s0 + $0x1060] ss:$72 sps:$4 sm:$0xff]  }
 0x223   :  { %v6006_v27 = vadd.f32 %v6005_v58, %v14570_v13  ;;  %v15524_v2 = vadd.f32 %v6354_v50, %v6002_v39  ;;  %6253 = vmatprep.mubr.bf16.mxu0 %v12785_v52  ;;  %v12797_v52 = vld [vmem:[%s20473_s0 + $0x10f4] ss:$72 sps:$4 sm:$0xff]  }
 0x224   :  { %v6007_v56 = vpop.f32.mrf.mxu0  ;;  %v6358_v55 = vpop.f32.mrf.mxu1  ;;  %6597 = vmatmul.mubr.bf16.gmra.mxu1 %v12774_v57 }
 0x225   :  { %v6008_v12 = vadd.f32 %v6007_v56, %v14573_v17  ;;  %v15527_v6 = vadd.f32 %v6358_v55, %v6006_v27  ;;  %6606 = vmatprep.mubr.bf16.mxu1 %v12788_v0  ;;  %v12786_v17 = vld [vmem:[%s20473_s0 + $0x1068] ss:$72 sps:$4 sm:$0xff]  }
 0x226   :  { %v6009_v62 = vpop.f32.mrf.mxu0  ;;  %v6360_v33 = vpop.f32.mrf.mxu1 }
 0x227   :  { %v6010_v18 = vadd.f32 %v6009_v62, %v14582_v25  ;;  %v15533_v13 = vadd.f32 %v6360_v33, %v6008_v12  ;;  %v12803_v25 = vld [vmem:[%s20473_s0 + $0x10fc] ss:$72 sps:$4 sm:$0xff]  }
 0x228   :  { %v6011_v57 = vpop.f32.mrf.mxu0  ;;  %v6362_v39 = vpop.f32.mrf.mxu1 }
 0x229   :  { %v6012_v0 = vadd.f32 %v6011_v57, %v14588_v32  ;;  %v15542_v58 = vadd.f32 %v6362_v39, %v6010_v18 }
 0x22a   :  { %v6015_v50 = vpop.f32.mrf.mxu0  ;;  %6254 = vmatmul.mubr.bf16.gmra.mxu0 %v12783_v19  ;;  %v6364_v27 = vpop.f32.mrf.mxu1  ;;  %v12795_v19 = vld [vmem:[%s20473_s0 + $0x10f0] ss:$72 sps:$4 sm:$0xff]  }
 0x22b   :  { %v6016_v56 = vadd.f32 %v6015_v50, %v14594_v38  ;;  %v15548_v55 = vadd.f32 %v6364_v27, %v6012_v0  ;;  %6263 = vmatprep.mubr.bf16.mxu0 %v12797_v52  ;;  %v12812_v52 = vld [vmem:[%s20473_s0 + $0x1184] ss:$72 sps:$4 sm:$0xff]  }
 0x22c   :  { %v6017_v12 = vpop.f32.mrf.mxu0  ;;  %v6368_v62 = vpop.f32.mrf.mxu1  ;;  %6607 = vmatmul.mubr.bf16.gmra.mxu1 %v12786_v17 }
 0x22d   :  { %v6018_v33 = vadd.f32 %v6017_v12, %v14597_v45  ;;  %v15551_v32 = vadd.f32 %v6368_v62, %v6016_v56  ;;  %6616 = vmatprep.mubr.bf16.mxu1 %v12803_v25  ;;  %v12801_v45 = vld [vmem:[%s20473_s0 + $0x10f8] ss:$72 sps:$4 sm:$0xff]  }
 0x22e   :  { %v6019_v18 = vpop.f32.mrf.mxu0  ;;  %v6370_v57 = vpop.f32.mrf.mxu1 }
 0x22f   :  { %v6020_v39 = vadd.f32 %v6019_v18, %v14606_v54  ;;  %v15557_v38 = vadd.f32 %v6370_v57, %v6018_v33  ;;  %v12815_v54 = vld [vmem:[%s20473_s0 + $0x118c] ss:$72 sps:$4 sm:$0xff]  }
 0x230   :  { %v6021_v17 = vpop.f32.mrf.mxu0  ;;  %v6372_v0 = vpop.f32.mrf.mxu1 }
 0x231   :  { %v6022_v25 = vadd.f32 %v6021_v17, %v14612_v61  ;;  %v15566_v50 = vadd.f32 %v6372_v0, %v6020_v39 }
 0x232   :  { %v6025_v27 = vpop.f32.mrf.mxu0  ;;  %6264 = vmatmul.mubr.bf16.gmra.mxu0 %v12795_v19  ;;  %v6374_v56 = vpop.f32.mrf.mxu1  ;;  %v12810_v19 = vld [vmem:[%s20473_s0 + $0x1180] ss:$72 sps:$4 sm:$0xff]  }
 0x233   :  { %v6026_v12 = vadd.f32 %v6025_v27, %v14618_v5  ;;  %v15572_v62 = vadd.f32 %v6374_v56, %v6022_v25  ;;  %6273 = vmatprep.mubr.bf16.mxu0 %v12812_v52  ;;  %v12824_v52 = vld [vmem:[%s20473_s0 + $0x24] ss:$72 sps:$4 sm:$0xff]  }
 0x234   :  { %v6027_v33 = vpop.f32.mrf.mxu0  ;;  %v6378_v18 = vpop.f32.mrf.mxu1  ;;  %6617 = vmatmul.mubr.bf16.gmra.mxu1 %v12801_v45 }
 0x235   :  { %v6028_v57 = vadd.f32 %v6027_v33, %v14621_v11  ;;  %v15575_v61 = vadd.f32 %v6378_v18, %v6026_v12  ;;  %6626 = vmatprep.mubr.bf16.mxu1 %v12815_v54  ;;  %v12813_v11 = vld [vmem:[%s20473_s0 + $0x1188] ss:$72 sps:$4 sm:$0xff]  }
 0x236   :  { %v6029_v39 = vpop.f32.mrf.mxu0  ;;  %v6380_v17 = vpop.f32.mrf.mxu1 }
 0x237   :  { %v6030_v0 = vadd.f32 %v6029_v39, %v14630_v21  ;;  %v15581_v5 = vadd.f32 %v6380_v17, %v6028_v57  ;;  %v12830_v21 = vld [vmem:[%s20473_s0 + $0x2c] ss:$72 sps:$4 sm:$0xff]  }
 0x238   :  { %v6031_v45 = vpop.f32.mrf.mxu0  ;;  %v6382_v25 = vpop.f32.mrf.mxu1 }
 0x239   :  { %v6032_v54 = vadd.f32 %v6031_v45, %v14636_v29  ;;  %v15590_v27 = vadd.f32 %v6382_v25, %v6030_v0 }
 0x23a   :  { %v6035_v56 = vpop.f32.mrf.mxu0  ;;  %6274 = vmatmul.mubr.bf16.gmra.mxu0 %v12810_v19  ;;  %v6384_v12 = vpop.f32.mrf.mxu1  ;;  %v12822_v19 = vld [vmem:[%s20473_s0 + $0x20] ss:$72 sps:$4 sm:$0xff]  }
 0x23b   :  { %v6036_v33 = vadd.f32 %v6035_v56, %v14642_v37  ;;  %v15596_v18 = vadd.f32 %v6384_v12, %v6032_v54  ;;  %6669 = vmatprep.mubr.bf16.mxu0 %v12824_v52  ;;  %v12825_v52 = vld [vmem:[%s20472_s1 + $0x670] ss:$8 sps:$4 sm:$0xff]  }
 0x23c   :  { %v6037_v57 = vpop.f32.mrf.mxu0  ;;  %v6388_v39 = vpop.f32.mrf.mxu1  ;;  %6627 = vmatmul.mubr.bf16.gmra.mxu1 %v12813_v11 }
 0x23d   :  { %v6038_v17 = vadd.f32 %v6037_v57, %v14651_v49  ;;  %v15599_v29 = vadd.f32 %v6388_v39, %v6036_v33  ;;  %7022 = vmatprep.mubr.bf16.mxu1 %v12830_v21  ;;  %v12833_v49 = vld [vmem:[%s20473_s0 + $0xb4] ss:$72 sps:$4 sm:$0xff]   ;;  %v12828_v21 = vld [vmem:[%s20473_s0 + $0x28] ss:$72 sps:$4 sm:$0xff]  }
 0x23e   :  { %v6039_v0 = vpop.f32.mrf.mxu0  ;;  %v6390_v45 = vpop.f32.mrf.mxu1  ;;  %v12836_v33 = vld [vmem:[%s20473_s0 + $0xbc] ss:$72 sps:$4 sm:$0xff]  }
 0x23f   :  { %v6040_v25 = vadd.f32 %v6039_v0, %v14660_v60  ;;  %v15605_v37 = vadd.f32 %v6390_v45, %v6038_v17  ;;  %v12842_v60 = vld [vmem:[%s20472_s1 + $0x664] ss:$8 sps:$4 sm:$0xff]   ;;  %v12840_v45 = vld [vmem:[%s20472_s1 + $0x660] ss:$8 sps:$4 sm:$0xff]  }
 0x240   :  { %v6041_v11 = vpop.f32.mrf.mxu0  ;;  %v6392_v54 = vpop.f32.mrf.mxu1 }
 0x241   :  { %v6042_v56 = vadd.f32 %v6041_v11, %v14666_v7  ;;  %v15620_v12 = vadd.f32 %v6392_v54, %v6040_v25  ;;  %v12857_v11 = vld [vmem:[%s20472_s1 + $0x654] ss:$8 sps:$4 sm:$0xff]  }
 0x242   :  { %v6045_v57 = vpop.f32.mrf.mxu0  ;;  %v6394_v39 = vpop.f32.mrf.mxu1  ;;  %6670 = vmatmul.mubr.bf16.vlgmr.msra.gmra.mxu0 %v12822_v19 }
 0x243   :  { %v6046_v17 = vadd.f32 %v6045_v57, %v14678_v20  ;;  %v15626_v0 = vadd.f32 %v6394_v39, %v6042_v56  ;;  %7344 = vmatpush1.bf16.msra.mxu0 %v12825_v52  ;;  %6679 = vmatprep.mubr.bf16.mxu0 %v12833_v49  ;;  %v12831_v49 = vld [vmem:[%s20473_s0 + $0xb0] ss:$72 sps:$4 sm:$0xff]  }
 0x244   :  { %v6047_v7 = vpop.f32.mrf.mxu0  ;;  %v6398_v25 = vpop.f32.mrf.mxu1  ;;  %7023 = vmatmul.mubr.bf16.vlgmr.msra.gmra.mxu1 %v12828_v21  ;;  %7345 = vmatprep.subr.bf16.mxu0 %v12842_v60  ;;  %v12839_v21 = vld [vmem:[%s20473_s0 + $0x144] ss:$72 sps:$4 sm:$0xff]   ;;  %v12834_v39 = vld [vmem:[%s20473_s0 + $0xb8] ss:$72 sps:$4 sm:$0xff]  }
 0x245   :  { %v6048_v19 = vadd.f32 %v6047_v7, %v14687_v34  ;;  %v15635_v54 = vadd.f32 %v6398_v25, %v6046_v17  ;;  %7032 = vmatprep.mubr.bf16.mxu1 %v12836_v33  ;;  %v12855_v34 = vld [vmem:[%s20472_s1 + $0x650] ss:$8 sps:$4 sm:$0xff]  }
 0x246   :  { %v6049_v20 = vpop.f32.mrf.mxu0  ;;  %v6400_v52 = vpop.f32.mrf.mxu1 }
 0x247   :  { %v6050_v56 = vadd.f32 %v6049_v20, %v14699_v48  ;;  %v15641_v57 = vadd.f32 %v6400_v52, %v6048_v19  ;;  %7346 = vmatpush1.bf16.msra.mxu0 %v12840_v45  ;;  %v12872_v48 = vld [vmem:[%s20472_s1 + $0x644] ss:$8 sps:$4 sm:$0xff]  }
 0x248   :  { %v6051_v60 = vpop.f32.mrf.mxu0  ;;  %v6402_v33 = vpop.f32.mrf.mxu1  ;;  %7347 = vmatprep.subr.bf16.mxu0 %v12857_v11  ;;  %v12845_v45 = vld [vmem:[%s20473_s0 + $0x14c] ss:$72 sps:$4 sm:$0xff]   ;;  %v12870_v11 = vld [vmem:[%s20472_s1 + $0x640] ss:$8 sps:$4 sm:$0xff]  }
 0x249   :  { %v6052_v17 = vadd.f32 %v6051_v60, %v14708_v63  ;;  %v15656_v7 = vadd.f32 %v6402_v33, %v6050_v56  ;;  %v12887_v60 = vld [vmem:[%s20472_s1 + $0x634] ss:$8 sps:$4 sm:$0xff]  }
 0x24a   :  { %v6055_v25 = vpop.f32.mrf.mxu0  ;;  %v6404_v19 = vpop.f32.mrf.mxu1  ;;  %6680 = vmatmul.mubr.bf16.gmra.mxu0 %v12831_v49 }
 0x24b   :  { %v6056_v20 = vadd.f32 %v6055_v25, %v14714_v10  ;;  %v15662_v52 = vadd.f32 %v6404_v19, %v6052_v17  ;;  %6689 = vmatprep.mubr.bf16.mxu0 %v12839_v21  ;;  %7348 = vmatpush1.bf16.msra.mxu0 %v12855_v34  ;;  %v12837_v34 = vld [vmem:[%s20473_s0 + $0x140] ss:$72 sps:$4 sm:$0xff]  }
 0x24c   :  { %v6057_v63 = vpop.f32.mrf.mxu0  ;;  %v6408_v56 = vpop.f32.mrf.mxu1  ;;  %7033 = vmatmul.mubr.bf16.gmra.mxu1 %v12834_v39  ;;  %7349 = vmatprep.subr.bf16.mxu0 %v12872_v48  ;;  %v12848_v39 = vld [vmem:[%s20473_s0 + $0x1d4] ss:$72 sps:$4 sm:$0xff]   ;;  %v12843_v19 = vld [vmem:[%s20473_s0 + $0x148] ss:$72 sps:$4 sm:$0xff]  }
 0x24d   :  { %v6058_v49 = vadd.f32 %v6057_v63, %v14723_v24  ;;  %v15671_v33 = vadd.f32 %v6408_v56, %v6056_v20  ;;  %7042 = vmatprep.mubr.bf16.mxu1 %v12845_v45  ;;  %v12885_v24 = vld [vmem:[%s20472_s1 + $0x630] ss:$8 sps:$4 sm:$0xff]  }
 0x24e   :  { %v6059_v10 = vpop.f32.mrf.mxu0  ;;  %v6410_v21 = vpop.f32.mrf.mxu1 }
 0x24f   :  { %v6060_v17 = vadd.f32 %v6059_v10, %v14732_v40  ;;  %v15677_v25 = vadd.f32 %v6410_v21, %v6058_v49  ;;  %7350 = vmatpush1.bf16.msra.mxu0 %v12870_v11  ;;  %v12902_v40 = vld [vmem:[%s20472_s1 + $0x624] ss:$8 sps:$4 sm:$0xff]  }
 0x250   :  { %v6061_v48 = vpop.f32.mrf.mxu0  ;;  %v6412_v45 = vpop.f32.mrf.mxu1  ;;  %7351 = vmatprep.subr.bf16.mxu0 %v12887_v60  ;;  %v12851_v11 = vld [vmem:[%s20473_s0 + $0x1dc] ss:$72 sps:$4 sm:$0xff]   ;;  %v12900_v60 = vld [vmem:[%s20472_s1 + $0x620] ss:$8 sps:$4 sm:$0xff]  }
 0x251   :  { %v6062_v20 = vadd.f32 %v6061_v48, %v14738_v53  ;;  %v15692_v63 = vadd.f32 %v6412_v45, %v6060_v17  ;;  %v12917_v48 = vld [vmem:[%s20472_s1 + $0x614] ss:$8 sps:$4 sm:$0xff]  }
 0x252   :  { %v6065_v56 = vpop.f32.mrf.mxu0  ;;  %v6414_v49 = vpop.f32.mrf.mxu1  ;;  %6690 = vmatmul.mubr.bf16.gmra.mxu0 %v12837_v34 }
 0x253   :  { %v6066_v10 = vadd.f32 %v6065_v56, %v14750_v9  ;;  %v15698_v21 = vadd.f32 %v6414_v49, %v6062_v20  ;;  %6699 = vmatprep.mubr.bf16.mxu0 %v12848_v39  ;;  %7352 = vmatpush1.bf16.msra.mxu0 %v12885_v24  ;;  %v12846_v24 = vld [vmem:[%s20473_s0 + $0x1d0] ss:$72 sps:$4 sm:$0xff]  }
 0x254   :  { %v6067_v53 = vpop.f32.mrf.mxu0  ;;  %v6418_v17 = vpop.f32.mrf.mxu1  ;;  %7043 = vmatmul.mubr.bf16.gmra.mxu1 %v12843_v19  ;;  %7353 = vmatprep.subr.bf16.mxu0 %v12902_v40  ;;  %v12854_v19 = vld [vmem:[%s20473_s0 + $0x264] ss:$72 sps:$4 sm:$0xff]   ;;  %v12849_v49 = vld [vmem:[%s20473_s0 + $0x1d8] ss:$72 sps:$4 sm:$0xff]  }
 0x255   :  { %v6068_v34 = vadd.f32 %v6067_v53, %v14759_v26  ;;  %v15707_v45 = vadd.f32 %v6418_v17, %v6066_v10  ;;  %7052 = vmatprep.mubr.bf16.mxu1 %v12851_v11  ;;  %v12915_v26 = vld [vmem:[%s20472_s1 + $0x610] ss:$8 sps:$4 sm:$0xff]  }
 0x256   :  { %v6069_v9 = vpop.f32.mrf.mxu0  ;;  %v6420_v39 = vpop.f32.mrf.mxu1 }
 0x257   :  { %v6070_v20 = vadd.f32 %v6069_v9, %v14771_v47  ;;  %v15713_v56 = vadd.f32 %v6420_v39, %v6068_v34  ;;  %7354 = vmatpush1.bf16.msra.mxu0 %v12900_v60  ;;  %v12932_v47 = vld [vmem:[%s20472_s1 + $0x604] ss:$8 sps:$4 sm:$0xff]  }
 0x258   :  { %v6071_v40 = vpop.f32.mrf.mxu0  ;;  %v6422_v11 = vpop.f32.mrf.mxu1  ;;  %7355 = vmatprep.subr.bf16.mxu0 %v12917_v48  ;;  %v12860_v60 = vld [vmem:[%s20473_s0 + $0x26c] ss:$72 sps:$4 sm:$0xff]   ;;  %v12930_v48 = vld [vmem:[%s20472_s1 + $0x600] ss:$8 sps:$4 sm:$0xff]  }
 0x259   :  { %v6072_v10 = vadd.f32 %v6071_v40, %v14780_v4  ;;  %v15728_v53 = vadd.f32 %v6422_v11, %v6070_v20  ;;  %v12947_v40 = vld [vmem:[%s20472_s1 + $0x6f4] ss:$8 sps:$4 sm:$0xff]   ;;  %v20578_v11 = vld [vmem:[#allocation2_spill] sm:$0xff] }
 0x25a   :  { %v6075_v17 = vpop.f32.mrf.mxu0  ;;  %v6424_v34 = vpop.f32.mrf.mxu1  ;;  %6700 = vmatmul.mubr.bf16.gmra.mxu0 %v12846_v24 }
 0x25b   :  { %20576 = vst [vmem:[#allocation81_spill] sm:$0xff] %v15728_v53  ;;  %v6076_v9 = vadd.f32 %v6075_v17, %v14786_v35  ;;  %v15734_v39 = vadd.f32 %v6424_v34, %v6072_v10  ;;  %6709 = vmatprep.mubr.bf16.mxu0 %v12854_v19  ;;  %7356 = vmatpush1.bf16.msra.mxu0 %v12915_v26  ;;  %v12852_v26 = vld [vmem:[%s20473_s0 + $0x260] ss:$72 sps:$4 sm:$0xff]  }
 0x25c   :  { %v6077_v4 = vpop.f32.mrf.mxu0  ;;  %v6428_v20 = vpop.f32.mrf.mxu1  ;;  %7053 = vmatmul.mubr.bf16.gmra.mxu1 %v12849_v49  ;;  %7357 = vmatprep.subr.bf16.mxu0 %v12932_v47  ;;  %v20580_v10 = vld [vmem:[#allocation3_spill] sm:$0xff]  ;;  %v12863_v49 = vld [vmem:[%s20473_s0 + $0x2f4] ss:$72 sps:$4 sm:$0xff]   ;;  %v12945_v47 = vld [vmem:[%s20472_s1 + $0x6f0] ss:$8 sps:$4 sm:$0xff]  }
 0x25d   :  { %20577 = vst [vmem:[#allocation82_spill] sm:$0xff] %v15734_v39  ;;  %v6078_v24 = vadd.f32 %v6077_v4, %v20578_v11  ;;  %v15743_v53 = vadd.f32 %v6428_v20, %v6076_v9  ;;  %7062 = vmatprep.mubr.bf16.mxu1 %v12860_v60  ;;  %v12858_v4 = vld [vmem:[%s20473_s0 + $0x268] ss:$72 sps:$4 sm:$0xff]   ;;  %v12962_v20 = vld [vmem:[%s20472_s1 + $0x6e4] ss:$8 sps:$4 sm:$0xff]  }
 0x25e   :  { %v6079_v35 = vpop.f32.mrf.mxu0  ;;  %v6430_v19 = vpop.f32.mrf.mxu1  ;;  %v20582_v11 = vld [vmem:[#allocation4_spill] sm:$0xff] }
 0x25f   :  { %20579 = vst [vmem:[#allocation2_spill] sm:$0xff] %v15743_v53  ;;  %v6080_v17 = vadd.f32 %v6079_v35, %v20580_v10  ;;  %v15749_v34 = vadd.f32 %v6430_v19, %v6078_v24  ;;  %7358 = vmatpush1.bf16.msra.mxu0 %v12930_v48  ;;  %v12866_v48 = vld [vmem:[%s20473_s0 + $0x2fc] ss:$72 sps:$4 sm:$0xff]  }
 0x260   :  { %v6081_v60 = vpop.f32.mrf.mxu0  ;;  %v6432_v9 = vpop.f32.mrf.mxu1  ;;  %7359 = vmatprep.subr.bf16.mxu0 %v12947_v40  ;;  %v12960_v40 = vld [vmem:[%s20472_s1 + $0x6e0] ss:$8 sps:$4 sm:$0xff]  }
 0x261   :  { %20581 = vst [vmem:[#allocation3_spill] sm:$0xff] %v15749_v34  ;;  %v6082_v24 = vadd.f32 %v6081_v60, %v20582_v11  ;;  %v15764_v35 = vadd.f32 %v6432_v9, %v6080_v17  ;;  %v20584_v34 = vld [vmem:[#allocation5_spill] sm:$0xff]  ;;  %v20586_v11 = vld [vmem:[#allocation6_spill] sm:$0xff] }
 0x262   :  { %v6085_v19 = vpop.f32.mrf.mxu0  ;;  %v6434_v10 = vpop.f32.mrf.mxu1  ;;  %6710 = vmatmul.mubr.bf16.gmra.mxu0 %v12852_v26  ;;  %v12977_v9 = vld [vmem:[%s20472_s1 + $0x6d4] ss:$8 sps:$4 sm:$0xff]  }
 0x263   :  { %20583 = vst [vmem:[#allocation4_spill] sm:$0xff] %v15764_v35  ;;  %v6086_v53 = vadd.f32 %v6085_v19, %v20584_v34  ;;  %v15770_v39 = vadd.f32 %v6434_v10, %v6082_v24  ;;  %6719 = vmatprep.mubr.bf16.mxu0 %v12863_v49  ;;  %7360 = vmatpush2.bf16.msra.mxu0 %v12945_v47  ;;  %v12861_v47 = vld [vmem:[%s20473_s0 + $0x2f0] ss:$72 sps:$4 sm:$0xff]  }
 0x264   :  { %v6087_v60 = vpop.f32.mrf.mxu0  ;;  %v6438_v17 = vpop.f32.mrf.mxu1  ;;  %7063 = vmatmul.mubr.bf16.gmra.mxu1 %v12858_v4  ;;  %7361 = vmatprep.subr.bf16.mxu0 %v12962_v20  ;;  %v12869_v4 = vld [vmem:[%s20473_s0 + $0x384] ss:$72 sps:$4 sm:$0xff]   ;;  %v12864_v10 = vld [vmem:[%s20473_s0 + $0x2f8] ss:$72 sps:$4 sm:$0xff]  }
 0x265   :  { %20585 = vst [vmem:[#allocation5_spill] sm:$0xff] %v15770_v39  ;;  %v6088_v26 = vadd.f32 %v6087_v60, %v20586_v11  ;;  %v15779_v35 = vadd.f32 %v6438_v17, %v6086_v53  ;;  %7072 = vmatprep.mubr.bf16.mxu1 %v12866_v48  ;;  %v12975_v53 = vld [vmem:[%s20472_s1 + $0x6d0] ss:$8 sps:$4 sm:$0xff]   ;;  %v20589_v60 = vld [vmem:[#allocation7_spill] sm:$0xff] }
 0x266   :  { %v6089_v34 = vpop.f32.mrf.mxu0  ;;  %v6440_v49 = vpop.f32.mrf.mxu1  ;;  %v12875_v11 = vld [vmem:[%s20473_s0 + $0x38c] ss:$72 sps:$4 sm:$0xff]  }
 0x267   :  { %20587 = vst [vmem:[#allocation6_spill] sm:$0xff] %v15779_v35  ;;  %v6090_v24 = vadd.f32 %v6089_v34, %v14837_v59  ;;  %v15785_v19 = vadd.f32 %v6440_v49, %v6088_v26  ;;  %7362 = vmatpush2.bf16.msra.mxu0 %v12960_v40  ;;  %v20591_v34 = vld [vmem:[#allocation8_spill] sm:$0xff] }
 0x268   :  { %v6091_v20 = vpop.f32.mrf.mxu0  ;;  %v6442_v48 = vpop.f32.mrf.mxu1  ;;  %7363 = vmatprep.subr.bf16.mxu0 %v12977_v9  ;;  %v20593_v9 = vld [vmem:[#allocation9_spill] sm:$0xff] }
 0x269   :  { %20588 = vst [vmem:[#allocation83_spill] sm:$0xff] %v15785_v19  ;;  %v6092_v59 = vadd.f32 %v6091_v20, %v20589_v60  ;;  %v15797_v17 = vadd.f32 %v6442_v48, %v6090_v24 }
 0x26a   :  { %v6095_v40 = vpop.f32.mrf.mxu0  ;;  %v6444_v26 = vpop.f32.mrf.mxu1  ;;  %6720 = vmatmul.mubr.bf16.gmra.mxu0 %v12861_v47  ;;  %v12867_v47 = vld [vmem:[%s20473_s0 + $0x380] ss:$72 sps:$4 sm:$0xff]  }
 0x26b   :  { %20590 = vst [vmem:[#allocation7_spill] sm:$0xff] %v15797_v17  ;;  %v6096_v49 = vadd.f32 %v6095_v40, %v20591_v34  ;;  %v15803_v19 = vadd.f32 %v6444_v26, %v6092_v59  ;;  %6729 = vmatprep.mubr.bf16.mxu0 %v12869_v4  ;;  %7364 = vmatpush2.bf16.msra.mxu0 %v12975_v53  ;;  %v20595_v17 = vld [vmem:[#allocation10_spill] sm:$0xff]  ;;  %v12878_v4 = vld [vmem:[%s20473_s0 + $0x414] ss:$72 sps:$4 sm:$0xff]  }
 0x26c   :  { %v6097_v35 = vpop.f32.mrf.mxu0  ;;  %v6448_v39 = vpop.f32.mrf.mxu1  ;;  %7073 = vmatmul.mubr.bf16.gmra.mxu1 %v12864_v10 }
 0x26d   :  { %20592 = vst [vmem:[#allocation8_spill] sm:$0xff] %v15803_v19  ;;  %v6098_v20 = vadd.f32 %v6097_v35, %v20593_v9  ;;  %v15806_v24 = vadd.f32 %v6448_v39, %v6096_v49  ;;  %7082 = vmatprep.mubr.bf16.mxu1 %v12875_v11  ;;  %v12873_v39 = vld [vmem:[%s20473_s0 + $0x388] ss:$72 sps:$4 sm:$0xff]  }
 0x26e   :  { %v6099_v48 = vpop.f32.mrf.mxu0  ;;  %v6450_v60 = vpop.f32.mrf.mxu1  ;;  %v20597_v35 = vld [vmem:[#allocation11_spill] sm:$0xff]  ;;  %v20599_v9 = vld [vmem:[#allocation12_spill] sm:$0xff] }
 0x26f   :  { %20594 = vst [vmem:[#allocation9_spill] sm:$0xff] %v15806_v24  ;;  %v6100_v40 = vadd.f32 %v6099_v48, %v20595_v17  ;;  %v15812_v59 = vadd.f32 %v6450_v60, %v6098_v20  ;;  %v12881_v17 = vld [vmem:[%s20473_s0 + $0x41c] ss:$72 sps:$4 sm:$0xff]   ;;  %v12990_v60 = vld [vmem:[%s20472_s1 + $0x6c0] ss:$8 sps:$4 sm:$0xff]  }
 0x270   :  { %v6101_v53 = vpop.f32.mrf.mxu0  ;;  %v6452_v10 = vpop.f32.mrf.mxu1  ;;  %v20609_v24 = vld [vmem:[#allocation17_spill] sm:$0xff] }
 0x271   :  { %20596 = vst [vmem:[#allocation10_spill] sm:$0xff] %v15812_v59  ;;  %v6102_v11 = vadd.f32 %v6101_v53, %v20597_v35  ;;  %v15821_v26 = vadd.f32 %v6452_v10, %v6100_v40  ;;  %v12992_v40 = vld [vmem:[%s20472_s1 + $0x6c4] ss:$8 sps:$4 sm:$0xff]   ;;  %v20601_v35 = vld [vmem:[#allocation13_spill] sm:$0xff] }
 0x272   :  { %v6105_v34 = vpop.f32.mrf.mxu0  ;;  %v6454_v49 = vpop.f32.mrf.mxu1  ;;  %6730 = vmatmul.mubr.bf16.gmra.mxu0 %v12867_v47  ;;  %7365 = vmatprep.subr.bf16.mxu0 %v12992_v40  ;;  %v20605_v40 = vld [vmem:[#allocation15_spill] sm:$0xff] }
 0x273   :  { %20598 = vst [vmem:[#allocation11_spill] sm:$0xff] %v15821_v26  ;;  %v6106_v20 = vadd.f32 %v6105_v34, %v20599_v9  ;;  %v15827_v48 = vadd.f32 %v6454_v49, %v6102_v11  ;;  %6739 = vmatprep.mubr.bf16.mxu0 %v12878_v4  ;;  %v12876_v4 = vld [vmem:[%s20473_s0 + $0x410] ss:$72 sps:$4 sm:$0xff]   ;;  %7366 = vmatpush2.bf16.msra.mxu0 %v12990_v60  ;;  %v20603_v34 = vld [vmem:[#allocation14_spill] sm:$0xff]  ;;  %v12890_v60 = vld [vmem:[%s20473_s0 + $0x4ac] ss:$72 sps:$4 sm:$0xff]  }
 0x274   :  { %v6107_v53 = vpop.f32.mrf.mxu0  ;;  %v6458_v10 = vpop.f32.mrf.mxu1  ;;  %7083 = vmatmul.mubr.bf16.gmra.mxu1 %v12873_v39  ;;  %v12884_v39 = vld [vmem:[%s20473_s0 + $0x4a4] ss:$72 sps:$4 sm:$0xff]  }
 0x275   :  { %20600 = vst [vmem:[#allocation12_spill] sm:$0xff] %v15827_v48  ;;  %v6108_v26 = vadd.f32 %v6107_v53, %v20601_v35  ;;  %v15836_v59 = vadd.f32 %v6458_v10, %v6106_v20  ;;  %7092 = vmatprep.mubr.bf16.mxu1 %v12881_v17  ;;  %v12879_v17 = vld [vmem:[%s20473_s0 + $0x418] ss:$72 sps:$4 sm:$0xff]  }
 0x276   :  { %v6109_v47 = vpop.f32.mrf.mxu0  ;;  %v6460_v11 = vpop.f32.mrf.mxu1 }
 0x277   :  { %20602 = vst [vmem:[#allocation13_spill] sm:$0xff] %v15836_v59  ;;  %v6110_v49 = vadd.f32 %v6109_v47, %v20603_v34  ;;  %v15842_v9 = vadd.f32 %v6460_v11, %v6108_v26  ;;  %v20607_v11 = vld [vmem:[#allocation16_spill] sm:$0xff] }
 0x278   :  { %v6111_v53 = vpop.f32.mrf.mxu0  ;;  %v6462_v20 = vpop.f32.mrf.mxu1 }
 0x279   :  { %20604 = vst [vmem:[#allocation14_spill] sm:$0xff] %v15842_v9  ;;  %v6112_v10 = vadd.f32 %v6111_v53, %v20605_v40  ;;  %v15851_v35 = vadd.f32 %v6462_v20, %v6110_v49  ;;  %v12882_v40 = vld [vmem:[%s20473_s0 + $0x4a0] ss:$72 sps:$4 sm:$0xff]  }
 0x27a   :  { %v6115_v26 = vpop.f32.mrf.mxu0  ;;  %v6464_v47 = vpop.f32.mrf.mxu1  ;;  %6740 = vmatmul.mubr.bf16.gmra.mxu0 %v12876_v4  ;;  %v20611_v4 = vld [vmem:[#allocation18_spill] sm:$0xff] }
 0x27b   :  { %20606 = vst [vmem:[#allocation15_spill] sm:$0xff] %v15851_v35  ;;  %v6116_v34 = vadd.f32 %v6115_v26, %v20607_v11  ;;  %v15857_v9 = vadd.f32 %v6464_v47, %v6112_v10  ;;  %6749 = vmatprep.mubr.bf16.mxu0 %v12884_v39  ;;  %v12893_v39 = vld [vmem:[%s20473_s0 + $0x534] ss:$72 sps:$4 sm:$0xff]  }
 0x27c   :  { %v6117_v59 = vpop.f32.mrf.mxu0  ;;  %v6468_v48 = vpop.f32.mrf.mxu1  ;;  %7093 = vmatmul.mubr.bf16.gmra.mxu1 %v12879_v17  ;;  %v12896_v47 = vld [vmem:[%s20473_s0 + $0x53c] ss:$72 sps:$4 sm:$0xff]  }
 0x27d   :  { %20608 = vst [vmem:[#allocation16_spill] sm:$0xff] %v15857_v9  ;;  %v6118_v19 = vadd.f32 %v6117_v59, %v20609_v24  ;;  %v15860_v53 = vadd.f32 %v6468_v48, %v6116_v34  ;;  %7102 = vmatprep.mubr.bf16.mxu1 %v12890_v60  ;;  %v12888_v24 = vld [vmem:[%s20473_s0 + $0x4a8] ss:$72 sps:$4 sm:$0xff]   ;;  %v13013_v34 = vld [vmem:[%s20472_s1 + $0x774] ss:$8 sps:$4 sm:$0xff]  }
 0x27e   :  { %v6119_v49 = vpop.f32.mrf.mxu0  ;;  %v6470_v20 = vpop.f32.mrf.mxu1  ;;  %v20613_v59 = vld [vmem:[#allocation19_spill] sm:$0xff]  ;;  %7696 = vmatprep.subr.bf16.mxu1 %v13013_v34 }
 0x27f   :  { %20610 = vst [vmem:[#allocation17_spill] sm:$0xff] %v15860_v53  ;;  %v6120_v35 = vadd.f32 %v6119_v49, %v20611_v4  ;;  %v15866_v26 = vadd.f32 %v6470_v20, %v6118_v19  ;;  %v20615_v49 = vld [vmem:[#allocation20_spill] sm:$0xff] }
 0x280   :  { %v6121_v17 = vpop.f32.mrf.mxu0  ;;  %v6472_v10 = vpop.f32.mrf.mxu1 }
 0x281   :  { %20612 = vst [vmem:[#allocation18_spill] sm:$0xff] %v15866_v26  ;;  %v6122_v48 = vadd.f32 %v6121_v17, %v20613_v59  ;;  %v15875_v60 = vadd.f32 %v6472_v10, %v6120_v35  ;;  %v13005_v35 = vld [vmem:[%s20472_s1 + $0x6b0] ss:$8 sps:$4 sm:$0xff]   ;;  %v13007_v17 = vld [vmem:[%s20472_s1 + $0x6b4] ss:$8 sps:$4 sm:$0xff]  }
 0x282   :  { %v6125_v19 = vpop.f32.mrf.mxu0  ;;  %v6474_v11 = vpop.f32.mrf.mxu1  ;;  %6750 = vmatmul.mubr.bf16.gmra.mxu0 %v12882_v40  ;;  %v13011_v40 = vld [vmem:[%s20472_s1 + $0x770] ss:$8 sps:$4 sm:$0xff]   ;;  %7367 = vmatprep.subr.bf16.mxu0 %v13007_v17 }
 0x283   :  { %20614 = vst [vmem:[#allocation19_spill] sm:$0xff] %v15875_v60  ;;  %v6126_v20 = vadd.f32 %v6125_v19, %v20615_v49  ;;  %v15884_v4 = vadd.f32 %v6474_v11, %v6122_v48  ;;  %6759 = vmatprep.mubr.bf16.mxu0 %v12893_v39  ;;  %v20617_v19 = vld [vmem:[#allocation21_spill] sm:$0xff]  ;;  %7368 = vmatpush2.bf16.msra.mxu0 %v13005_v35  ;;  %v13016_v60 = vld [vmem:[%s20472_s1 + $0x764] ss:$8 sps:$4 sm:$0xff]  }
 0x284   :  { %v6127_v10 = vpop.f32.mrf.mxu0  ;;  %v6478_v59 = vpop.f32.mrf.mxu1  ;;  %7103 = vmatmul.mubr.bf16.gmra.mxu1 %v12888_v24  ;;  %v20619_v24 = vld [vmem:[#allocation22_spill] sm:$0xff] }
 0x285   :  { %20616 = vst [vmem:[#allocation20_spill] sm:$0xff] %v15884_v4  ;;  %v6128_v48 = vadd.f32 %v6127_v10, %v20617_v19  ;;  %v15896_v11 = vadd.f32 %v6478_v59, %v6126_v20  ;;  %7112 = vmatprep.mubr.bf16.mxu1 %v12896_v47  ;;  %v12891_v4 = vld [vmem:[%s20473_s0 + $0x530] ss:$72 sps:$4 sm:$0xff]   ;;  %7697 = vmatpush1.bf16.msra.mxu1 %v13011_v40  ;;  %v12899_v47 = vld [vmem:[%s20473_s0 + $0x5c4] ss:$72 sps:$4 sm:$0xff]  }
 0x286   :  { %v6129_v39 = vpop.f32.mrf.mxu0  ;;  %v6480_v49 = vpop.f32.mrf.mxu1  ;;  %v13014_v20 = vld [vmem:[%s20472_s1 + $0x760] ss:$8 sps:$4 sm:$0xff]   ;;  %7698 = vmatprep.subr.bf16.mxu1 %v13016_v60  ;;  %v13023_v60 = vld [vmem:[%s20472_s1 + $0x750] ss:$8 sps:$4 sm:$0xff]  }
 0x287   :  { %20618 = vst [vmem:[#allocation21_spill] sm:$0xff] %v15896_v11  ;;  %v6130_v34 = vadd.f32 %v6129_v39, %v20619_v24  ;;  %v15905_v26 = vadd.f32 %v6480_v49, %v6128_v48  ;;  %v12894_v35 = vld [vmem:[%s20473_s0 + $0x538] ss:$72 sps:$4 sm:$0xff]   ;;  %v20621_v40 = vld [vmem:[#allocation23_spill] sm:$0xff]  ;;  %v13025_v24 = vld [vmem:[%s20472_s1 + $0x754] ss:$8 sps:$4 sm:$0xff]  }
 0x288   :  { %v6131_v17 = vpop.f32.mrf.mxu0  ;;  %v6482_v10 = vpop.f32.mrf.mxu1  ;;  %v12905_v48 = vld [vmem:[%s20473_s0 + $0x5cc] ss:$72 sps:$4 sm:$0xff]  }
 0x289   :  { %20620 = vst [vmem:[#allocation22_spill] sm:$0xff] %v15905_v26  ;;  %v6132_v59 = vadd.f32 %v6131_v17, %v20621_v40  ;;  %v15917_v19 = vadd.f32 %v6482_v10, %v6130_v34  ;;  %7699 = vmatpush1.bf16.msra.mxu1 %v13014_v20  ;;  %v20623_v26 = vld [vmem:[#allocation24_spill] sm:$0xff]  ;;  %v20625_v10 = vld [vmem:[#allocation25_spill] sm:$0xff] }
 0x28a   :  { %v6135_v39 = vpop.f32.mrf.mxu0  ;;  %v6484_v49 = vpop.f32.mrf.mxu1  ;;  %6760 = vmatmul.mubr.bf16.gmra.mxu0 %v12891_v4  ;;  %7700 = vmatprep.subr.bf16.mxu1 %v13025_v24 }
 0x28b   :  { %20622 = vst [vmem:[#allocation23_spill] sm:$0xff] %v15917_v19  ;;  %v6136_v11 = vadd.f32 %v6135_v39, %v20623_v26  ;;  %v15926_v53 = vadd.f32 %v6484_v49, %v6132_v59  ;;  %6769 = vmatprep.mubr.bf16.mxu0 %v12899_v47  ;;  %v12897_v26 = vld [vmem:[%s20473_s0 + $0x5c0] ss:$72 sps:$4 sm:$0xff]   ;;  %v13028_v47 = vld [vmem:[%s20472_s1 + $0x744] ss:$8 sps:$4 sm:$0xff]  }
 0x28c   :  { %v6137_v34 = vpop.f32.mrf.mxu0  ;;  %v6488_v17 = vpop.f32.mrf.mxu1  ;;  %7113 = vmatmul.mubr.bf16.gmra.mxu1 %v12894_v35  ;;  %v20627_v59 = vld [vmem:[#allocation26_spill] sm:$0xff] }
 0x28d   :  { %20624 = vst [vmem:[#allocation24_spill] sm:$0xff] %v15926_v53  ;;  %v6138_v4 = vadd.f32 %v6137_v34, %v20625_v10  ;;  %v15932_v20 = vadd.f32 %v6488_v17, %v6136_v11  ;;  %7122 = vmatprep.mubr.bf16.mxu1 %v12905_v48  ;;  %7701 = vmatpush1.bf16.msra.mxu1 %v13023_v60  ;;  %v12908_v11 = vld [vmem:[%s20473_s0 + $0x654] ss:$72 sps:$4 sm:$0xff]   ;;  %v13026_v48 = vld [vmem:[%s20472_s1 + $0x740] ss:$8 sps:$4 sm:$0xff]  }
 0x28e   :  { %v6139_v40 = vpop.f32.mrf.mxu0  ;;  %v6490_v19 = vpop.f32.mrf.mxu1  ;;  %v12903_v60 = vld [vmem:[%s20473_s0 + $0x5c8] ss:$72 sps:$4 sm:$0xff]   ;;  %7702 = vmatprep.subr.bf16.mxu1 %v13028_v47 }
 0x28f   :  { %20626 = vst [vmem:[#allocation25_spill] sm:$0xff] %v15932_v20  ;;  %v6140_v39 = vadd.f32 %v6139_v40, %v20627_v59  ;;  %v15941_v35 = vadd.f32 %v6490_v19, %v6138_v4  ;;  %v20629_v34 = vld [vmem:[#allocation27_spill] sm:$0xff]  ;;  %v12911_v19 = vld [vmem:[%s20473_s0 + $0x65c] ss:$72 sps:$4 sm:$0xff]  }
 0x290   :  { %v6141_v49 = vpop.f32.mrf.mxu0  ;;  %v6492_v24 = vpop.f32.mrf.mxu1  ;;  %v13040_v59 = vld [vmem:[%s20472_s1 + $0x734] ss:$8 sps:$4 sm:$0xff]   ;;  %v13032_v47 = vld [vmem:[%s20472_s1 + $0x6a0] ss:$8 sps:$4 sm:$0xff]  }
 0x291   :  { %20628 = vst [vmem:[#allocation26_spill] sm:$0xff] %v15941_v35  ;;  %v6142_v17 = vadd.f32 %v6141_v49, %v20629_v34  ;;  %v15953_v10 = vadd.f32 %v6492_v24, %v6140_v39  ;;  %7703 = vmatpush1.bf16.msra.mxu1 %v13026_v48  ;;  %v20631_v35 = vld [vmem:[#allocation28_spill] sm:$0xff]  ;;  %v13034_v39 = vld [vmem:[%s20472_s1 + $0x6a4] ss:$8 sps:$4 sm:$0xff]  }
 0x292   :  { %v6145_v4 = vpop.f32.mrf.mxu0  ;;  %v6494_v40 = vpop.f32.mrf.mxu1  ;;  %6770 = vmatmul.mubr.bf16.gmra.mxu0 %v12897_v26  ;;  %v13038_v26 = vld [vmem:[%s20472_s1 + $0x730] ss:$8 sps:$4 sm:$0xff]   ;;  %7704 = vmatprep.subr.bf16.mxu1 %v13040_v59 }
 0x293   :  { %20630 = vst [vmem:[#allocation27_spill] sm:$0xff] %v15953_v10  ;;  %v6146_v20 = vadd.f32 %v6145_v4, %v20631_v35  ;;  %v15962_v53 = vadd.f32 %v6494_v40, %v6142_v17  ;;  %6779 = vmatprep.mubr.bf16.mxu0 %v12908_v11  ;;  %v20633_v35 = vld [vmem:[#allocation29_spill] sm:$0xff]  ;;  %7369 = vmatprep.subr.bf16.mxu0 %v13034_v39  ;;  %v13043_v40 = vld [vmem:[%s20472_s1 + $0x724] ss:$8 sps:$4 sm:$0xff]  }
 0x294   :  { %v6147_v48 = vpop.f32.mrf.mxu0  ;;  %v6498_v49 = vpop.f32.mrf.mxu1  ;;  %7123 = vmatmul.mubr.bf16.gmra.mxu1 %v12903_v60  ;;  %v12906_v4 = vld [vmem:[%s20473_s0 + $0x650] ss:$72 sps:$4 sm:$0xff]   ;;  %7370 = vmatpush2.bf16.msra.mxu0 %v13032_v47  ;;  %v20635_v60 = vld [vmem:[#allocation30_spill] sm:$0xff] }
 0x295   :  { %20632 = vst [vmem:[#allocation28_spill] sm:$0xff] %v15962_v53  ;;  %v6148_v24 = vadd.f32 %v6147_v48, %v20633_v35  ;;  %v15974_v34 = vadd.f32 %v6498_v49, %v6146_v20  ;;  %7132 = vmatprep.mubr.bf16.mxu1 %v12911_v19  ;;  %7705 = vmatpush1.bf16.msra.mxu1 %v13038_v26  ;;  %v12914_v20 = vld [vmem:[%s20473_s0 + $0x6e4] ss:$72 sps:$4 sm:$0xff]   ;;  %v13041_v19 = vld [vmem:[%s20472_s1 + $0x720] ss:$8 sps:$4 sm:$0xff]  }
 0x296   :  { %v6149_v11 = vpop.f32.mrf.mxu0  ;;  %v6500_v17 = vpop.f32.mrf.mxu1  ;;  %v12909_v47 = vld [vmem:[%s20473_s0 + $0x658] ss:$72 sps:$4 sm:$0xff]   ;;  %7706 = vmatprep.subr.bf16.mxu1 %v13043_v40  ;;  %v20637_v26 = vld [vmem:[#allocation31_spill] sm:$0xff] }
 0x297   :  { %20634 = vst [vmem:[#allocation29_spill] sm:$0xff] %v15974_v34  ;;  %v6150_v59 = vadd.f32 %v6149_v11, %v20635_v60  ;;  %v15983_v53 = vadd.f32 %v6500_v17, %v6148_v24  ;;  %v12920_v24 = vld [vmem:[%s20473_s0 + $0x6ec] ss:$72 sps:$4 sm:$0xff]   ;;  %v13050_v40 = vld [vmem:[%s20472_s1 + $0x710] ss:$8 sps:$4 sm:$0xff]  }
 0x298   :  { %v6151_v39 = vpop.f32.mrf.mxu0  ;;  %v6502_v48 = vpop.f32.mrf.mxu1  ;;  %v13052_v60 = vld [vmem:[%s20472_s1 + $0x714] ss:$8 sps:$4 sm:$0xff]  }
 0x299   :  { %20636 = vst [vmem:[#allocation30_spill] sm:$0xff] %v15983_v53  ;;  %v6152_v49 = vadd.f32 %v6151_v39, %v20637_v26  ;;  %v15995_v35 = vadd.f32 %v6502_v48, %v6150_v59  ;;  %7707 = vmatpush1.bf16.msra.mxu1 %v13041_v19  ;;  %v20639_v53 = vld [vmem:[#allocation32_spill] sm:$0xff]  ;;  %v20641_v48 = vld [vmem:[#allocation33_spill] sm:$0xff] }
 0x29a   :  { %v6155_v11 = vpop.f32.mrf.mxu0  ;;  %v6504_v17 = vpop.f32.mrf.mxu1  ;;  %6780 = vmatmul.mubr.bf16.gmra.mxu0 %v12906_v4  ;;  %7708 = vmatprep.subr.bf16.mxu1 %v13052_v60 }
 0x29b   :  { %20638 = vst [vmem:[#allocation31_spill] sm:$0xff] %v15995_v35  ;;  %v6156_v34 = vadd.f32 %v6155_v11, %v20639_v53  ;;  %v16004_v10 = vadd.f32 %v6504_v17, %v6152_v49  ;;  %6789 = vmatprep.mubr.bf16.mxu0 %v12914_v20  ;;  %v12912_v53 = vld [vmem:[%s20473_s0 + $0x6e0] ss:$72 sps:$4 sm:$0xff]   ;;  %v13055_v20 = vld [vmem:[%s20472_s1 + $0x704] ss:$8 sps:$4 sm:$0xff]  }
 0x29c   :  { %v6157_v59 = vpop.f32.mrf.mxu0  ;;  %v6508_v39 = vpop.f32.mrf.mxu1  ;;  %7133 = vmatmul.mubr.bf16.gmra.mxu1 %v12909_v47  ;;  %v20643_v49 = vld [vmem:[#allocation34_spill] sm:$0xff] }
 0x29d   :  { %20640 = vst [vmem:[#allocation32_spill] sm:$0xff] %v16004_v10  ;;  %v6158_v4 = vadd.f32 %v6157_v59, %v20641_v48  ;;  %v16010_v19 = vadd.f32 %v6508_v39, %v6156_v34  ;;  %7142 = vmatprep.mubr.bf16.mxu1 %v12920_v24  ;;  %7709 = vmatpush1.bf16.msra.mxu1 %v13050_v40  ;;  %v12923_v34 = vld [vmem:[%s20473_s0 + $0x774] ss:$72 sps:$4 sm:$0xff]   ;;  %v13053_v24 = vld [vmem:[%s20472_s1 + $0x700] ss:$8 sps:$4 sm:$0xff]  }
 0x29e   :  { %v6159_v26 = vpop.f32.mrf.mxu0  ;;  %v6510_v35 = vpop.f32.mrf.mxu1  ;;  %v12918_v40 = vld [vmem:[%s20473_s0 + $0x6e8] ss:$72 sps:$4 sm:$0xff]   ;;  %7710 = vmatprep.subr.bf16.mxu1 %v13055_v20 }
 0x29f   :  { %20642 = vst [vmem:[#allocation33_spill] sm:$0xff] %v16010_v19  ;;  %v6160_v11 = vadd.f32 %v6159_v26, %v20643_v49  ;;  %v16019_v47 = vadd.f32 %v6510_v35, %v6158_v4  ;;  %v20645_v59 = vld [vmem:[#allocation35_spill] sm:$0xff]  ;;  %v12926_v35 = vld [vmem:[%s20473_s0 + $0x77c] ss:$72 sps:$4 sm:$0xff]   ;;  %v13059_v20 = vld [vmem:[%s20472_s1 + $0x690] ss:$8 sps:$4 sm:$0xff]  }
 0x2a0   :  { %v6161_v17 = vpop.f32.mrf.mxu0  ;;  %v6512_v60 = vpop.f32.mrf.mxu1  ;;  %v13067_v49 = vld [vmem:[%s20472_s1 + $0x7f4] ss:$8 sps:$4 sm:$0xff]  }
 0x2a1   :  { %20644 = vst [vmem:[#allocation34_spill] sm:$0xff] %v16019_v47  ;;  %v6162_v39 = vadd.f32 %v6161_v17, %v20645_v59  ;;  %v16031_v48 = vadd.f32 %v6512_v60, %v6160_v11  ;;  %7711 = vmatpush1.bf16.msra.mxu1 %v13053_v24  ;;  %v20647_v47 = vld [vmem:[#allocation36_spill] sm:$0xff] }
 0x2a2   :  { %v6165_v4 = vpop.f32.mrf.mxu0  ;;  %v6514_v26 = vpop.f32.mrf.mxu1  ;;  %6790 = vmatmul.mubr.bf16.gmra.mxu0 %v12912_v53  ;;  %v13061_v11 = vld [vmem:[%s20472_s1 + $0x694] ss:$8 sps:$4 sm:$0xff]   ;;  %v13065_v53 = vld [vmem:[%s20472_s1 + $0x7f0] ss:$8 sps:$4 sm:$0xff]   ;;  %7712 = vmatprep.subr.bf16.mxu1 %v13067_v49 }
 0x2a3   :  { %20646 = vst [vmem:[#allocation35_spill] sm:$0xff] %v16031_v48  ;;  %v6166_v19 = vadd.f32 %v6165_v4, %v20647_v47  ;;  %v16040_v10 = vadd.f32 %v6514_v26, %v6162_v39  ;;  %6799 = vmatprep.mubr.bf16.mxu0 %v12923_v34  ;;  %v20649_v47 = vld [vmem:[#allocation37_spill] sm:$0xff]  ;;  %7371 = vmatprep.subr.bf16.mxu0 %v13061_v11  ;;  %v13070_v26 = vld [vmem:[%s20472_s1 + $0x7e4] ss:$8 sps:$4 sm:$0xff]  }
 0x2a4   :  { %v6167_v24 = vpop.f32.mrf.mxu0  ;;  %v6518_v17 = vpop.f32.mrf.mxu1  ;;  %7143 = vmatmul.mubr.bf16.gmra.mxu1 %v12918_v40  ;;  %v12921_v4 = vld [vmem:[%s20473_s0 + $0x770] ss:$72 sps:$4 sm:$0xff]   ;;  %7372 = vmatpush2.bf16.msra.mxu0 %v13059_v20  ;;  %v20651_v40 = vld [vmem:[#allocation38_spill] sm:$0xff] }
 0x2a5   :  { %20648 = vst [vmem:[#allocation36_spill] sm:$0xff] %v16040_v10  ;;  %v6168_v60 = vadd.f32 %v6167_v24, %v20649_v47  ;;  %v16052_v59 = vadd.f32 %v6518_v17, %v6166_v19  ;;  %7152 = vmatprep.mubr.bf16.mxu1 %v12926_v35  ;;  %7713 = vmatpush2.bf16.msra.mxu1 %v13065_v53  ;;  %v12929_v19 = vld [vmem:[%s20473_s0 + $0x804] ss:$72 sps:$4 sm:$0xff]   ;;  %v13068_v35 = vld [vmem:[%s20472_s1 + $0x7e0] ss:$8 sps:$4 sm:$0xff]  }
 0x2a6   :  { %v6169_v34 = vpop.f32.mrf.mxu0  ;;  %v6520_v39 = vpop.f32.mrf.mxu1  ;;  %v12924_v20 = vld [vmem:[%s20473_s0 + $0x778] ss:$72 sps:$4 sm:$0xff]   ;;  %7714 = vmatprep.subr.bf16.mxu1 %v13070_v26  ;;  %v20653_v53 = vld [vmem:[#allocation39_spill] sm:$0xff] }
 0x2a7   :  { %20650 = vst [vmem:[#allocation37_spill] sm:$0xff] %v16052_v59  ;;  %v6170_v49 = vadd.f32 %v6169_v34, %v20651_v40  ;;  %v16061_v10 = vadd.f32 %v6520_v39, %v6168_v60  ;;  %v12935_v60 = vld [vmem:[%s20473_s0 + $0x80c] ss:$72 sps:$4 sm:$0xff]   ;;  %v13077_v26 = vld [vmem:[%s20472_s1 + $0x7d0] ss:$8 sps:$4 sm:$0xff]  }
 0x2a8   :  { %v6171_v11 = vpop.f32.mrf.mxu0  ;;  %v6522_v24 = vpop.f32.mrf.mxu1  ;;  %v13079_v40 = vld [vmem:[%s20472_s1 + $0x7d4] ss:$8 sps:$4 sm:$0xff]  }
 0x2a9   :  { %20652 = vst [vmem:[#allocation38_spill] sm:$0xff] %v16061_v10  ;;  %v6172_v17 = vadd.f32 %v6171_v11, %v20653_v53  ;;  %v16073_v47 = vadd.f32 %v6522_v24, %v6170_v49  ;;  %7715 = vmatpush2.bf16.msra.mxu1 %v13068_v35  ;;  %v20655_v10 = vld [vmem:[#allocation40_spill] sm:$0xff]  ;;  %v20657_v24 = vld [vmem:[#allocation41_spill] sm:$0xff] }
 0x2aa   :  { %v6175_v34 = vpop.f32.mrf.mxu0  ;;  %v6524_v39 = vpop.f32.mrf.mxu1  ;;  %6800 = vmatmul.mubr.bf16.gmra.mxu0 %v12921_v4  ;;  %7716 = vmatprep.subr.bf16.mxu1 %v13079_v40 }
 0x2ab   :  { %20654 = vst [vmem:[#allocation39_spill] sm:$0xff] %v16073_v47  ;;  %v6176_v59 = vadd.f32 %v6175_v34, %v20655_v10  ;;  %v16082_v48 = vadd.f32 %v6524_v39, %v6172_v17  ;;  %6809 = vmatprep.mubr.bf16.mxu0 %v12929_v19  ;;  %v12927_v10 = vld [vmem:[%s20473_s0 + $0x800] ss:$72 sps:$4 sm:$0xff]   ;;  %v13082_v19 = vld [vmem:[%s20472_s1 + $0x7c4] ss:$8 sps:$4 sm:$0xff]  }
 0x2ac   :  { %v6177_v49 = vpop.f32.mrf.mxu0  ;;  %v6528_v11 = vpop.f32.mrf.mxu1  ;;  %7153 = vmatmul.mubr.bf16.gmra.mxu1 %v12924_v20  ;;  %v20659_v17 = vld [vmem:[#allocation42_spill] sm:$0xff] }
 0x2ad   :  { %20656 = vst [vmem:[#allocation40_spill] sm:$0xff] %v16082_v48  ;;  %v6178_v4 = vadd.f32 %v6177_v49, %v20657_v24  ;;  %v16088_v35 = vadd.f32 %v6528_v11, %v6176_v59  ;;  %7162 = vmatprep.mubr.bf16.mxu1 %v12935_v60  ;;  %7717 = vmatpush2.bf16.msra.mxu1 %v13077_v26  ;;  %v12938_v59 = vld [vmem:[%s20473_s0 + $0x894] ss:$72 sps:$4 sm:$0xff]   ;;  %v13080_v60 = vld [vmem:[%s20472_s1 + $0x7c0] ss:$8 sps:$4 sm:$0xff]  }
 0x2ae   :  { %v6179_v53 = vpop.f32.mrf.mxu0  ;;  %v6530_v47 = vpop.f32.mrf.mxu1  ;;  %v12933_v26 = vld [vmem:[%s20473_s0 + $0x808] ss:$72 sps:$4 sm:$0xff]   ;;  %7718 = vmatprep.subr.bf16.mxu1 %v13082_v19 }
 0x2af   :  { %20658 = vst [vmem:[#allocation41_spill] sm:$0xff] %v16088_v35  ;;  %v6180_v34 = vadd.f32 %v6179_v53, %v20659_v17  ;;  %v16097_v20 = vadd.f32 %v6530_v47, %v6178_v4  ;;  %v20661_v49 = vld [vmem:[#allocation43_spill] sm:$0xff]  ;;  %v12941_v47 = vld [vmem:[%s20473_s0 + $0x89c] ss:$72 sps:$4 sm:$0xff]  }
 0x2b0   :  { %v6181_v39 = vpop.f32.mrf.mxu0  ;;  %v6532_v40 = vpop.f32.mrf.mxu1  ;;  %v13094_v17 = vld [vmem:[%s20472_s1 + $0x7b4] ss:$8 sps:$4 sm:$0xff]   ;;  %v13086_v19 = vld [vmem:[%s20472_s1 + $0x680] ss:$8 sps:$4 sm:$0xff]  }
 0x2b1   :  { %20660 = vst [vmem:[#allocation42_spill] sm:$0xff] %v16097_v20  ;;  %v6182_v11 = vadd.f32 %v6181_v39, %v20661_v49  ;;  %v16109_v24 = vadd.f32 %v6532_v40, %v6180_v34  ;;  %7719 = vmatpush2.bf16.msra.mxu1 %v13080_v60  ;;  %v20663_v20 = vld [vmem:[#allocation44_spill] sm:$0xff]  ;;  %v13088_v34 = vld [vmem:[%s20472_s1 + $0x684] ss:$8 sps:$4 sm:$0xff]  }
 0x2b2   :  { %v6185_v4 = vpop.f32.mrf.mxu0  ;;  %v6534_v53 = vpop.f32.mrf.mxu1  ;;  %6810 = vmatmul.mubr.bf16.gmra.mxu0 %v12927_v10  ;;  %v13092_v10 = vld [vmem:[%s20472_s1 + $0x7b0] ss:$8 sps:$4 sm:$0xff]   ;;  %7720 = vmatprep.subr.bf16.mxu1 %v13094_v17 }
 0x2b3   :  { %20662 = vst [vmem:[#allocation43_spill] sm:$0xff] %v16109_v24  ;;  %v6186_v35 = vadd.f32 %v6185_v4, %v20663_v20  ;;  %v16118_v48 = vadd.f32 %v6534_v53, %v6182_v11  ;;  %6819 = vmatprep.mubr.bf16.mxu0 %v12938_v59  ;;  %v20665_v20 = vld [vmem:[#allocation45_spill] sm:$0xff]  ;;  %7373 = vmatprep.subr.bf16.mxu0 %v13088_v34  ;;  %v13097_v53 = vld [vmem:[%s20472_s1 + $0x7a4] ss:$8 sps:$4 sm:$0xff]  }
 0x2b4   :  { %v6187_v60 = vpop.f32.mrf.mxu0  ;;  %v6538_v39 = vpop.f32.mrf.mxu1  ;;  %7163 = vmatmul.mubr.bf16.gmra.mxu1 %v12933_v26  ;;  %v12936_v4 = vld [vmem:[%s20473_s0 + $0x890] ss:$72 sps:$4 sm:$0xff]   ;;  %7374 = vmatpush2.bf16.msra.mxu0 %v13086_v19  ;;  %v20667_v26 = vld [vmem:[#allocation46_spill] sm:$0xff] }
 0x2b5   :  { %20664 = vst [vmem:[#allocation44_spill] sm:$0xff] %v16118_v48  ;;  %v6188_v40 = vadd.f32 %v6187_v60, %v20665_v20  ;;  %v16130_v49 = vadd.f32 %v6538_v39, %v6186_v35  ;;  %7172 = vmatprep.mubr.bf16.mxu1 %v12941_v47  ;;  %7721 = vmatpush2.bf16.msra.mxu1 %v13092_v10  ;;  %v12944_v35 = vld [vmem:[%s20473_s0 + $0x924] ss:$72 sps:$4 sm:$0xff]   ;;  %v13095_v47 = vld [vmem:[%s20472_s1 + $0x7a0] ss:$8 sps:$4 sm:$0xff]  }
 0x2b6   :  { %v6189_v59 = vpop.f32.mrf.mxu0  ;;  %v6540_v11 = vpop.f32.mrf.mxu1  ;;  %v12939_v19 = vld [vmem:[%s20473_s0 + $0x898] ss:$72 sps:$4 sm:$0xff]   ;;  %7722 = vmatprep.subr.bf16.mxu1 %v13097_v53  ;;  %v20669_v10 = vld [vmem:[#allocation47_spill] sm:$0xff] }
 0x2b7   :  { %20666 = vst [vmem:[#allocation45_spill] sm:$0xff] %v16130_v49  ;;  %v6190_v17 = vadd.f32 %v6189_v59, %v20667_v26  ;;  %v16139_v48 = vadd.f32 %v6540_v11, %v6188_v40  ;;  %v12950_v40 = vld [vmem:[%s20473_s0 + $0x92c] ss:$72 sps:$4 sm:$0xff]   ;;  %v13104_v53 = vld [vmem:[%s20472_s1 + $0x790] ss:$8 sps:$4 sm:$0xff]  }
 0x2b8   :  { %v6191_v34 = vpop.f32.mrf.mxu0  ;;  %v6542_v60 = vpop.f32.mrf.mxu1  ;;  %v13106_v26 = vld [vmem:[%s20472_s1 + $0x794] ss:$8 sps:$4 sm:$0xff]  }
 0x2b9   :  { %20668 = vst [vmem:[#allocation46_spill] sm:$0xff] %v16139_v48  ;;  %v6192_v39 = vadd.f32 %v6191_v34, %v20669_v10  ;;  %v16151_v20 = vadd.f32 %v6542_v60, %v6190_v17  ;;  %7723 = vmatpush2.bf16.msra.mxu1 %v13095_v47  ;;  %v20671_v48 = vld [vmem:[#allocation48_spill] sm:$0xff]  ;;  %v20673_v60 = vld [vmem:[#allocation49_spill] sm:$0xff] }
 0x2ba   :  { %v6195_v59 = vpop.f32.mrf.mxu0  ;;  %v6544_v11 = vpop.f32.mrf.mxu1  ;;  %6820 = vmatmul.mubr.bf16.gmra.mxu0 %v12936_v4  ;;  %7724 = vmatprep.subr.bf16.mxu1 %v13106_v26 }
 0x2bb   :  { %20670 = vst [vmem:[#allocation47_spill] sm:$0xff] %v16151_v20  ;;  %v6196_v49 = vadd.f32 %v6195_v59, %v20671_v48  ;;  %v16160_v24 = vadd.f32 %v6544_v11, %v6192_v39  ;;  %6829 = vmatprep.mubr.bf16.mxu0 %v12944_v35  ;;  %v12942_v48 = vld [vmem:[%s20473_s0 + $0x920] ss:$72 sps:$4 sm:$0xff]   ;;  %v13109_v35 = vld [vmem:[%s20472_s1 + $0x784] ss:$8 sps:$4 sm:$0xff]  }
 0x2bc   :  { %v6197_v17 = vpop.f32.mrf.mxu0  ;;  %v6548_v34 = vpop.f32.mrf.mxu1  ;;  %7173 = vmatmul.mubr.bf16.gmra.mxu1 %v12939_v19  ;;  %v20675_v39 = vld [vmem:[#allocation50_spill] sm:$0xff] }
 0x2bd   :  { %20672 = vst [vmem:[#allocation48_spill] sm:$0xff] %v16160_v24  ;;  %v6198_v4 = vadd.f32 %v6197_v17, %v20673_v60  ;;  %v16166_v47 = vadd.f32 %v6548_v34, %v6196_v49  ;;  %7182 = vmatprep.mubr.bf16.mxu1 %v12950_v40  ;;  %7725 = vmatpush2.bf16.msra.mxu1 %v13104_v53  ;;  %v12953_v49 = vld [vmem:[%s20473_s0 + $0x9b4] ss:$72 sps:$4 sm:$0xff]   ;;  %v13107_v40 = vld [vmem:[%s20472_s1 + $0x780] ss:$8 sps:$4 sm:$0xff]  }
 0x2be   :  { %v6199_v10 = vpop.f32.mrf.mxu0  ;;  %v6550_v20 = vpop.f32.mrf.mxu1  ;;  %v12948_v53 = vld [vmem:[%s20473_s0 + $0x928] ss:$72 sps:$4 sm:$0xff]   ;;  %7726 = vmatprep.subr.bf16.mxu1 %v13109_v35  ;;  %v13115_v35 = vld [vmem:[%s20472_s1 + $0x874] ss:$8 sps:$4 sm:$0xff]  }
 0x2bf   :  { %20674 = vst [vmem:[#allocation49_spill] sm:$0xff] %v16166_v47  ;;  %v6200_v59 = vadd.f32 %v6199_v10, %v20675_v39  ;;  %v16175_v19 = vadd.f32 %v6550_v20, %v6198_v4  ;;  %v20677_v17 = vld [vmem:[#allocation51_spill] sm:$0xff]  ;;  %v12956_v20 = vld [vmem:[%s20473_s0 + $0x9bc] ss:$72 sps:$4 sm:$0xff]   ;;  %v20679_v39 = vld [vmem:[#allocation52_spill] sm:$0xff]  ;;  %8049 = vmatprep.subr.bf16.mxu0 %v13115_v35 }
 0x2c0   :  { %v6201_v11 = vpop.f32.mrf.mxu0  ;;  %v6552_v26 = vpop.f32.mrf.mxu1  ;;  %v20689_v24 = vld [vmem:[#allocation57_spill] sm:$0xff] }
 0x2c1   :  { %20676 = vst [vmem:[#allocation50_spill] sm:$0xff] %v16175_v19  ;;  %v6202_v34 = vadd.f32 %v6201_v11, %v20677_v17  ;;  %v16187_v60 = vadd.f32 %v6552_v26, %v6200_v59  ;;  %7727 = vmatpush2.bf16.msra.mxu1 %v13107_v40  ;;  %v20681_v26 = vld [vmem:[#allocation53_spill] sm:$0xff] }
 0x2c2   :  { %v6205_v4 = vpop.f32.mrf.mxu0  ;;  %v6554_v10 = vpop.f32.mrf.mxu1  ;;  %6830 = vmatmul.mubr.bf16.gmra.mxu0 %v12942_v48 }
 0x2c3   :  { %20678 = vst [vmem:[#allocation51_spill] sm:$0xff] %v16187_v60  ;;  %v6206_v19 = vadd.f32 %v6205_v4, %v20679_v39  ;;  %v16193_v47 = vadd.f32 %v6554_v10, %v6202_v34  ;;  %6839 = vmatprep.mubr.bf16.mxu0 %v12953_v49  ;;  %v12951_v34 = vld [vmem:[%s20473_s0 + $0x9b0] ss:$72 sps:$4 sm:$0xff]   ;;  %v20683_v49 = vld [vmem:[#allocation54_spill] sm:$0xff] }
 0x2c4   :  { %v6207_v11 = vpop.f32.mrf.mxu0  ;;  %v6558_v59 = vpop.f32.mrf.mxu1  ;;  %7183 = vmatmul.mubr.bf16.gmra.mxu1 %v12948_v53  ;;  %v12959_v53 = vld [vmem:[%s20473_s0 + $0xa44] ss:$72 sps:$4 sm:$0xff]  }
 0x2c5   :  { %20680 = vst [vmem:[#allocation52_spill] sm:$0xff] %v16193_v47  ;;  %v6208_v17 = vadd.f32 %v6207_v11, %v20681_v26  ;;  %v16199_v60 = vadd.f32 %v6558_v59, %v6206_v19  ;;  %7192 = vmatprep.mubr.bf16.mxu1 %v12956_v20  ;;  %v12954_v19 = vld [vmem:[%s20473_s0 + $0x9b8] ss:$72 sps:$4 sm:$0xff]   ;;  %v20685_v20 = vld [vmem:[#allocation55_spill] sm:$0xff] }
 0x2c6   :  { %v6209_v48 = vpop.f32.mrf.mxu0  ;;  %v6560_v40 = vpop.f32.mrf.mxu1  ;;  %v12965_v26 = vld [vmem:[%s20473_s0 + $0xa4c] ss:$72 sps:$4 sm:$0xff]  }
 0x2c7   :  { %20682 = vst [vmem:[#allocation53_spill] sm:$0xff] %v16199_v60  ;;  %v6210_v4 = vadd.f32 %v6209_v48, %v20683_v49  ;;  %v16205_v10 = vadd.f32 %v6560_v40, %v6208_v17  ;;  %v20687_v40 = vld [vmem:[#allocation56_spill] sm:$0xff] }
 0x2c8   :  { %v6211_v39 = vpop.f32.mrf.mxu0  ;;  %v6562_v11 = vpop.f32.mrf.mxu1 }
 0x2c9   :  { %20684 = vst [vmem:[#allocation54_spill] sm:$0xff] %v16205_v10  ;;  %v6212_v35 = vadd.f32 %v6211_v39, %v20685_v20  ;;  %v16214_v59 = vadd.f32 %v6562_v11, %v6210_v4  ;;  %v12957_v20 = vld [vmem:[%s20473_s0 + $0xa40] ss:$72 sps:$4 sm:$0xff]  }
 0x2ca   :  { %v6215_v17 = vpop.f32.mrf.mxu0  ;;  %v6564_v48 = vpop.f32.mrf.mxu1  ;;  %6840 = vmatmul.mubr.bf16.gmra.mxu0 %v12951_v34  ;;  %v20691_v34 = vld [vmem:[#allocation58_spill] sm:$0xff] }
 0x2cb   :  { %20686 = vst [vmem:[#allocation55_spill] sm:$0xff] %v16214_v59  ;;  %v6216_v49 = vadd.f32 %v6215_v17, %v20687_v40  ;;  %v16220_v10 = vadd.f32 %v6564_v48, %v6212_v35  ;;  %6849 = vmatprep.mubr.bf16.mxu0 %v12959_v53  ;;  %v12968_v53 = vld [vmem:[%s20473_s0 + $0xad4] ss:$72 sps:$4 sm:$0xff]  }
 0x2cc   :  { %v6217_v60 = vpop.f32.mrf.mxu0  ;;  %v6568_v47 = vpop.f32.mrf.mxu1  ;;  %7193 = vmatmul.mubr.bf16.gmra.mxu1 %v12954_v19  ;;  %v12971_v48 = vld [vmem:[%s20473_s0 + $0xadc] ss:$72 sps:$4 sm:$0xff]  }
 0x2cd   :  { %20688 = vst [vmem:[#allocation56_spill] sm:$0xff] %v16220_v10  ;;  %v6218_v9 = vadd.f32 %v6217_v60, %v20689_v24  ;;  %v16223_v39 = vadd.f32 %v6568_v47, %v6216_v49  ;;  %7202 = vmatprep.mubr.bf16.mxu1 %v12965_v26  ;;  %v12963_v24 = vld [vmem:[%s20473_s0 + $0xa48] ss:$72 sps:$4 sm:$0xff]  }
 0x2ce   :  { %v6219_v4 = vpop.f32.mrf.mxu0  ;;  %v6570_v11 = vpop.f32.mrf.mxu1  ;;  %v20693_v47 = vld [vmem:[#allocation59_spill] sm:$0xff]  ;;  %v20695_v49 = vld [vmem:[#allocation60_spill] sm:$0xff] }
 0x2cf   :  { %20690 = vst [vmem:[#allocation57_spill] sm:$0xff] %v16223_v39  ;;  %v6220_v59 = vadd.f32 %v6219_v4, %v20691_v34  ;;  %v16229_v17 = vadd.f32 %v6570_v11, %v6218_v9  ;;  %v20697_v39 = vld [vmem:[#allocation61_spill] sm:$0xff] }
 0x2d0   :  { %v6221_v19 = vpop.f32.mrf.mxu0  ;;  %v6572_v35 = vpop.f32.mrf.mxu1 }
 0x2d1   :  { %20692 = vst [vmem:[#allocation58_spill] sm:$0xff] %v16229_v17  ;;  %v6222_v60 = vadd.f32 %v6221_v19, %v20693_v47  ;;  %v16238_v26 = vadd.f32 %v6572_v35, %v6220_v59  ;;  %v12966_v47 = vld [vmem:[%s20473_s0 + $0xad0] ss:$72 sps:$4 sm:$0xff]  }
 0x2d2   :  { %v6225_v9 = vpop.f32.mrf.mxu0  ;;  %v6574_v40 = vpop.f32.mrf.mxu1  ;;  %6850 = vmatmul.mubr.bf16.gmra.mxu0 %v12957_v20  ;;  %v20699_v20 = vld [vmem:[#allocation62_spill] sm:$0xff] }
 0x2d3   :  { %20694 = vst [vmem:[#allocation59_spill] sm:$0xff] %v16238_v26  ;;  %v6226_v4 = vadd.f32 %v6225_v9, %v20695_v49  ;;  %v16244_v11 = vadd.f32 %v6574_v40, %v6222_v60  ;;  %6859 = vmatprep.mubr.bf16.mxu0 %v12968_v53  ;;  %v12974_v53 = vld [vmem:[%s20473_s0 + $0xb64] ss:$72 sps:$4 sm:$0xff]  }
 0x2d4   :  { %v6227_v34 = vpop.f32.mrf.mxu0  ;;  %v6578_v17 = vpop.f32.mrf.mxu1  ;;  %7203 = vmatmul.mubr.bf16.gmra.mxu1 %v12963_v24  ;;  %v12980_v49 = vld [vmem:[%s20473_s0 + $0xb6c] ss:$72 sps:$4 sm:$0xff]  }
 0x2d5   :  { %20696 = vst [vmem:[#allocation60_spill] sm:$0xff] %v16244_v11  ;;  %v6228_v10 = vadd.f32 %v6227_v34, %v20697_v39  ;;  %v16247_v19 = vadd.f32 %v6578_v17, %v6226_v4  ;;  %7212 = vmatprep.mubr.bf16.mxu1 %v12971_v48  ;;  %v12969_v39 = vld [vmem:[%s20473_s0 + $0xad8] ss:$72 sps:$4 sm:$0xff]   ;;  %v20701_v17 = vld [vmem:[#allocation63_spill] sm:$0xff]  ;;  %v20703_v34 = vld [vmem:[#allocation64_spill] sm:$0xff] }
 0x2d6   :  { %v6229_v59 = vpop.f32.mrf.mxu0  ;;  %v6580_v35 = vpop.f32.mrf.mxu1 }
 0x2d7   :  { %20698 = vst [vmem:[#allocation61_spill] sm:$0xff] %v16247_v19  ;;  %v6230_v26 = vadd.f32 %v6229_v59, %v20699_v20  ;;  %v16253_v9 = vadd.f32 %v6580_v35, %v6228_v10  ;;  %v20705_v19 = vld [vmem:[#allocation65_spill] sm:$0xff] }
 0x2d8   :  { %v6231_v24 = vpop.f32.mrf.mxu0  ;;  %v6582_v60 = vpop.f32.mrf.mxu1 }
 0x2d9   :  { %20700 = vst [vmem:[#allocation62_spill] sm:$0xff] %v16253_v9  ;;  %v6232_v48 = vadd.f32 %v6231_v24, %v20701_v17  ;;  %v16262_v40 = vadd.f32 %v6582_v60, %v6230_v26  ;;  %v12972_v17 = vld [vmem:[%s20473_s0 + $0xb60] ss:$72 sps:$4 sm:$0xff]  }
 0x2da   :  { %v6235_v10 = vpop.f32.mrf.mxu0  ;;  %v6584_v4 = vpop.f32.mrf.mxu1  ;;  %6860 = vmatmul.mubr.bf16.gmra.mxu0 %v12966_v47  ;;  %v20707_v47 = vld [vmem:[#allocation66_spill] sm:$0xff] }
 0x2db   :  { %20702 = vst [vmem:[#allocation63_spill] sm:$0xff] %v16262_v40  ;;  %v6236_v59 = vadd.f32 %v6235_v10, %v20703_v34  ;;  %v16268_v35 = vadd.f32 %v6584_v4, %v6232_v48  ;;  %6869 = vmatprep.mubr.bf16.mxu0 %v12974_v53  ;;  %v12983_v53 = vld [vmem:[%s20473_s0 + $0xbf4] ss:$72 sps:$4 sm:$0xff]  }
 0x2dc   :  { %v6237_v20 = vpop.f32.mrf.mxu0  ;;  %v6588_v9 = vpop.f32.mrf.mxu1  ;;  %7213 = vmatmul.mubr.bf16.gmra.mxu1 %v12969_v39  ;;  %v12986_v34 = vld [vmem:[%s20473_s0 + $0xbfc] ss:$72 sps:$4 sm:$0xff]  }
 0x2dd   :  { %20704 = vst [vmem:[#allocation64_spill] sm:$0xff] %v16268_v35  ;;  %v6238_v11 = vadd.f32 %v6237_v20, %v20705_v19  ;;  %v16271_v24 = vadd.f32 %v6588_v9, %v6236_v59  ;;  %7222 = vmatprep.mubr.bf16.mxu1 %v12980_v49  ;;  %v12978_v19 = vld [vmem:[%s20473_s0 + $0xb68] ss:$72 sps:$4 sm:$0xff]  }
 0x2de   :  { %v6239_v26 = vpop.f32.mrf.mxu0  ;;  %v6590_v60 = vpop.f32.mrf.mxu1  ;;  %v20709_v9 = vld [vmem:[#allocation67_spill] sm:$0xff]  ;;  %v20711_v20 = vld [vmem:[#allocation68_spill] sm:$0xff] }
 0x2df   :  { %20706 = vst [vmem:[#allocation65_spill] sm:$0xff] %v16271_v24  ;;  %v6240_v40 = vadd.f32 %v6239_v26, %v20707_v47  ;;  %v16277_v10 = vadd.f32 %v6590_v60, %v6238_v11  ;;  %v20713_v24 = vld [vmem:[#allocation69_spill] sm:$0xff] }
 0x2e0   :  { %v6241_v39 = vpop.f32.mrf.mxu0  ;;  %v6592_v48 = vpop.f32.mrf.mxu1 }
 0x2e1   :  { %20708 = vst [vmem:[#allocation66_spill] sm:$0xff] %v16277_v10  ;;  %v6242_v49 = vadd.f32 %v6241_v39, %v20709_v9  ;;  %v16286_v4 = vadd.f32 %v6592_v48, %v6240_v40  ;;  %v12981_v9 = vld [vmem:[%s20473_s0 + $0xbf0] ss:$72 sps:$4 sm:$0xff]  }
 0x2e2   :  { %v6245_v11 = vpop.f32.mrf.mxu0  ;;  %v6594_v59 = vpop.f32.mrf.mxu1  ;;  %6870 = vmatmul.mubr.bf16.gmra.mxu0 %v12972_v17  ;;  %v20715_v17 = vld [vmem:[#allocation70_spill] sm:$0xff] }
 0x2e3   :  { %20710 = vst [vmem:[#allocation67_spill] sm:$0xff] %v16286_v4  ;;  %v6246_v26 = vadd.f32 %v6245_v11, %v20711_v20  ;;  %v16292_v60 = vadd.f32 %v6594_v59, %v6242_v49  ;;  %6879 = vmatprep.mubr.bf16.mxu0 %v12983_v53  ;;  %v12989_v53 = vld [vmem:[%s20473_s0 + $0xc84] ss:$72 sps:$4 sm:$0xff]  }
 0x2e4   :  { %v6247_v47 = vpop.f32.mrf.mxu0  ;;  %v6598_v10 = vpop.f32.mrf.mxu1  ;;  %7223 = vmatmul.mubr.bf16.gmra.mxu1 %v12978_v19  ;;  %v12995_v20 = vld [vmem:[%s20473_s0 + $0xc8c] ss:$72 sps:$4 sm:$0xff]  }
 0x2e5   :  { %20712 = vst [vmem:[#allocation68_spill] sm:$0xff] %v16292_v60  ;;  %v6248_v35 = vadd.f32 %v6247_v47, %v20713_v24  ;;  %v16295_v39 = vadd.f32 %v6598_v10, %v6246_v26  ;;  %7232 = vmatprep.mubr.bf16.mxu1 %v12986_v34  ;;  %v12984_v24 = vld [vmem:[%s20473_s0 + $0xbf8] ss:$72 sps:$4 sm:$0xff]   ;;  %v20717_v10 = vld [vmem:[#allocation71_spill] sm:$0xff]  ;;  %v20719_v47 = vld [vmem:[#allocation72_spill] sm:$0xff] }
 0x2e6   :  { %v6249_v40 = vpop.f32.mrf.mxu0  ;;  %v6600_v48 = vpop.f32.mrf.mxu1 }
 0x2e7   :  { %20714 = vst [vmem:[#allocation69_spill] sm:$0xff] %v16295_v39  ;;  %v6250_v4 = vadd.f32 %v6249_v40, %v20715_v17  ;;  %v16301_v11 = vadd.f32 %v6600_v48, %v6248_v35  ;;  %v20721_v39 = vld [vmem:[#allocation73_spill] sm:$0xff] }
 0x2e8   :  { %v6251_v19 = vpop.f32.mrf.mxu0  ;;  %v6602_v49 = vpop.f32.mrf.mxu1 }
 0x2e9   :  { %20716 = vst [vmem:[#allocation70_spill] sm:$0xff] %v16301_v11  ;;  %v6252_v34 = vadd.f32 %v6251_v19, %v20717_v10  ;;  %v16310_v59 = vadd.f32 %v6602_v49, %v6250_v4  ;;  %v12987_v10 = vld [vmem:[%s20473_s0 + $0xc80] ss:$72 sps:$4 sm:$0xff]  }
 0x2ea   :  { %v6255_v35 = vpop.f32.mrf.mxu0  ;;  %v6604_v26 = vpop.f32.mrf.mxu1  ;;  %6880 = vmatmul.mubr.bf16.gmra.mxu0 %v12981_v9  ;;  %v20723_v9 = vld [vmem:[#allocation74_spill] sm:$0xff] }
 0x2eb   :  { %20718 = vst [vmem:[#allocation71_spill] sm:$0xff] %v16310_v59  ;;  %v6256_v40 = vadd.f32 %v6255_v35, %v20719_v47  ;;  %v16316_v48 = vadd.f32 %v6604_v26, %v6252_v34  ;;  %6889 = vmatprep.mubr.bf16.mxu0 %v12989_v53  ;;  %v12998_v53 = vld [vmem:[%s20473_s0 + $0xd14] ss:$72 sps:$4 sm:$0xff]  }
 0x2ec   :  { %v6257_v17 = vpop.f32.mrf.mxu0  ;;  %v6608_v11 = vpop.f32.mrf.mxu1  ;;  %7233 = vmatmul.mubr.bf16.gmra.mxu1 %v12984_v24  ;;  %v13001_v47 = vld [vmem:[%s20473_s0 + $0xd1c] ss:$72 sps:$4 sm:$0xff]  }
 0x2ed   :  { %20720 = vst [vmem:[#allocation72_spill] sm:$0xff] %v16316_v48  ;;  %v6258_v60 = vadd.f32 %v6257_v17, %v20721_v39  ;;  %v16319_v19 = vadd.f32 %v6608_v11, %v6256_v40  ;;  %7242 = vmatprep.mubr.bf16.mxu1 %v12995_v20  ;;  %v12993_v39 = vld [vmem:[%s20473_s0 + $0xc88] ss:$72 sps:$4 sm:$0xff]  }
 0x2ee   :  { %v6259_v4 = vpop.f32.mrf.mxu0  ;;  %v6610_v49 = vpop.f32.mrf.mxu1  ;;  %v20725_v11 = vld [vmem:[#allocation75_spill] sm:$0xff]  ;;  %v20727_v17 = vld [vmem:[#allocation76_spill] sm:$0xff] }
 0x2ef   :  { %20722 = vst [vmem:[#allocation73_spill] sm:$0xff] %v16319_v19  ;;  %v6260_v59 = vadd.f32 %v6259_v4, %v20723_v9  ;;  %v16325_v35 = vadd.f32 %v6610_v49, %v6258_v60  ;;  %v20728_v19 = vld [vmem:[#allocation77_spill] sm:$0xff] }
 0x2f0   :  { %v6261_v24 = vpop.f32.mrf.mxu0  ;;  %v6612_v34 = vpop.f32.mrf.mxu1 }
 0x2f1   :  { %20724 = vst [vmem:[#allocation74_spill] sm:$0xff] %v16325_v35  ;;  %v6262_v20 = vadd.f32 %v6261_v24, %v20725_v11  ;;  %v16334_v26 = vadd.f32 %v6612_v34, %v6260_v59  ;;  %v12996_v11 = vld [vmem:[%s20473_s0 + $0xd10] ss:$72 sps:$4 sm:$0xff]  }
 0x2f2   :  { %v6265_v60 = vpop.f32.mrf.mxu0  ;;  %v6614_v40 = vpop.f32.mrf.mxu1  ;;  %6890 = vmatmul.mubr.bf16.gmra.mxu0 %v12987_v10  ;;  %v20730_v10 = vld [vmem:[#allocation78_spill] sm:$0xff] }
 0x2f3   :  { %20726 = vst [vmem:[#allocation75_spill] sm:$0xff] %v16334_v26  ;;  %v6266_v4 = vadd.f32 %v6265_v60, %v20727_v17  ;;  %v16340_v49 = vadd.f32 %v6614_v40, %v6262_v20  ;;  %6899 = vmatprep.mubr.bf16.mxu0 %v12998_v53  ;;  %v13004_v53 = vld [vmem:[%s20473_s0 + $0xda4] ss:$72 sps:$4 sm:$0xff]  }
 0x2f4   :  { %v6267_v9 = vpop.f32.mrf.mxu0  ;;  %v6618_v35 = vpop.f32.mrf.mxu1  ;;  %7243 = vmatmul.mubr.bf16.gmra.mxu1 %v12993_v39  ;;  %v13010_v40 = vld [vmem:[%s20473_s0 + $0xdac] ss:$72 sps:$4 sm:$0xff]  }
 0x2f5   :  { %v6268_v48 = vadd.f32 %v6267_v9, %v20728_v19  ;;  %v16343_v24 = vadd.f32 %v6618_v35, %v6266_v4  ;;  %7252 = vmatprep.mubr.bf16.mxu1 %v13001_v47  ;;  %v12999_v19 = vld [vmem:[%s20473_s0 + $0xd18] ss:$72 sps:$4 sm:$0xff]   ;;  %v20732_v4 = vld [vmem:[#allocation79_spill] sm:$0xff] }
 0x2f6   :  { %v6269_v59 = vpop.f32.mrf.mxu0  ;;  %v6620_v34 = vpop.f32.mrf.mxu1 }
 0x2f7   :  { %20729 = vst [vmem:[#allocation76_spill] sm:$0xff] %v16343_v24  ;;  %v6270_v26 = vadd.f32 %v6269_v59, %v20730_v10  ;;  %v16349_v60 = vadd.f32 %v6620_v34, %v6268_v48 }
 0x2f8   :  { %v6271_v39 = vpop.f32.mrf.mxu0  ;;  %v6622_v20 = vpop.f32.mrf.mxu1 }
 0x2f9   :  { %20731 = vst [vmem:[#allocation77_spill] sm:$0xff] %v16349_v60  ;;  %v6272_v35 = vadd.f32 %v6271_v39, %v15404_v15  ;;  %v16358_v47 = vadd.f32 %v6622_v20, %v6270_v26  ;;  %v20733_v60 = vld [vmem:[#allocation80_spill] sm:$0xff]  ;;  %v13002_v20 = vld [vmem:[%s20473_s0 + $0xda0] ss:$72 sps:$4 sm:$0xff]  }
 0x2fa   :  { %v6275_v48 = vpop.f32.mrf.mxu0  ;;  %v6624_v17 = vpop.f32.mrf.mxu1  ;;  %6900 = vmatmul.mubr.bf16.gmra.mxu0 %v12996_v11 }
 0x2fb   :  { %v6276_v9 = vadd.f32 %v6275_v48, %v20732_v4  ;;  %v16364_v59 = vadd.f32 %v6624_v17, %v6272_v35  ;;  %6909 = vmatprep.mubr.bf16.mxu0 %v13004_v53  ;;  %v13019_v53 = vld [vmem:[%s20473_s0 + $0xe34] ss:$72 sps:$4 sm:$0xff]  }
 0x2fc   :  { %v6277_v34 = vpop.f32.mrf.mxu0  ;;  %v6628_v10 = vpop.f32.mrf.mxu1  ;;  %7253 = vmatmul.mubr.bf16.gmra.mxu1 %v12999_v19 }
 0x2fd   :  { %v6278_v24 = vadd.f32 %v6277_v34, %v20733_v60  ;;  %v16367_v15 = vadd.f32 %v6628_v10, %v6276_v9  ;;  %7262 = vmatprep.mubr.bf16.mxu1 %v13010_v40  ;;  %v13008_v60 = vld [vmem:[%s20473_s0 + $0xda8] ss:$72 sps:$4 sm:$0xff]  }
 0x2fe   :  { %v6279_v26 = vpop.f32.mrf.mxu0  ;;  %v6630_v39 = vpop.f32.mrf.mxu1 }
 0x2ff   :  { %v6280_v11 = vadd.f32 %v6279_v26, %v15422_v14  ;;  %v16373_v48 = vadd.f32 %v6630_v39, %v6278_v24  ;;  %v13022_v14 = vld [vmem:[%s20473_s0 + $0xe3c] ss:$72 sps:$4 sm:$0xff]  }
 0x300   :  { %v6281_v19 = vpop.f32.mrf.mxu0  ;;  %v6632_v35 = vpop.f32.mrf.mxu1 }
 0x301   :  { %v6282_v40 = vadd.f32 %v6281_v19, %v15427_v42  ;;  %v16382_v17 = vadd.f32 %v6632_v35, %v6280_v11  ;;  %v13017_v35 = vld [vmem:[%s20473_s0 + $0xe30] ss:$72 sps:$4 sm:$0xff]  }
 0x302   :  { %v6634_v24 = vpop.f32.mrf.mxu1  ;;  %v6671_v4 = vpop.f32.mrf.mxu0  ;;  %6910 = vmatmul.mubr.bf16.gmra.mxu0 %v13002_v20 }
 0x303   :  { %v16387_v9 = vadd.f32 %v6634_v24, %v6282_v40  ;;  %v6672_v34 = vadd.f32 %v6671_v4, %v15431_v44  ;;  %6919 = vmatprep.mubr.bf16.mxu0 %v13019_v53  ;;  %v13031_v44 = vld [vmem:[%s20473_s0 + $0xec4] ss:$72 sps:$4 sm:$0xff]  }
 0x304   :  { %v6673_v10 = vpop.f32.mrf.mxu0  ;;  %v7024_v26 = vpop.f32.mrf.mxu1  ;;  %7263 = vmatmul.mubr.bf16.gmra.mxu1 %v13008_v60 }
 0x305   :  { %v6674_v39 = vadd.f32 %v6673_v10, %v15437_v43  ;;  %v16391_v42 = vadd.f32 %v7024_v26, %v6672_v34  ;;  %7272 = vmatprep.mubr.bf16.mxu1 %v13022_v14  ;;  %v13020_v43 = vld [vmem:[%s20473_s0 + $0xe38] ss:$72 sps:$4 sm:$0xff]  }
 0x306   :  { %v6675_v11 = vpop.f32.mrf.mxu0  ;;  %v7026_v19 = vpop.f32.mrf.mxu1 }
 0x307   :  { %v6676_v20 = vadd.f32 %v6675_v11, %v15446_v41  ;;  %v16397_v40 = vadd.f32 %v7026_v19, %v6674_v39  ;;  %v13037_v41 = vld [vmem:[%s20473_s0 + $0xecc] ss:$72 sps:$4 sm:$0xff]  }
 0x308   :  { %v6677_v53 = vpop.f32.mrf.mxu0  ;;  %v7028_v60 = vpop.f32.mrf.mxu1 }
 0x309   :  { %v6678_v14 = vadd.f32 %v6677_v53, %v15452_v16  ;;  %v16406_v24 = vadd.f32 %v7028_v60, %v6676_v20 }
 0x30a   :  { %v6681_v4 = vpop.f32.mrf.mxu0  ;;  %6920 = vmatmul.mubr.bf16.gmra.mxu0 %v13017_v35  ;;  %v7030_v34 = vpop.f32.mrf.mxu1  ;;  %v13029_v35 = vld [vmem:[%s20473_s0 + $0xec0] ss:$72 sps:$4 sm:$0xff]  }
 0x30b   :  { %v6682_v10 = vadd.f32 %v6681_v4, %v15455_v3  ;;  %v16412_v26 = vadd.f32 %v7030_v34, %v6678_v14  ;;  %6929 = vmatprep.mubr.bf16.mxu0 %v13031_v44  ;;  %v13046_v44 = vld [vmem:[%s20473_s0 + $0xf54] ss:$72 sps:$4 sm:$0xff]  }
 0x30c   :  { %v6683_v39 = vpop.f32.mrf.mxu0  ;;  %v7034_v11 = vpop.f32.mrf.mxu1  ;;  %7273 = vmatmul.mubr.bf16.gmra.mxu1 %v13020_v43 }
 0x30d   :  { %v6684_v19 = vadd.f32 %v6683_v39, %v15461_v8  ;;  %v16415_v16 = vadd.f32 %v7034_v11, %v6682_v10  ;;  %7282 = vmatprep.mubr.bf16.mxu1 %v13037_v41  ;;  %v13035_v8 = vld [vmem:[%s20473_s0 + $0xec8] ss:$72 sps:$4 sm:$0xff]  }
 0x30e   :  { %v6685_v20 = vpop.f32.mrf.mxu0  ;;  %v7036_v53 = vpop.f32.mrf.mxu1 }
 0x30f   :  { %v6686_v60 = vadd.f32 %v6685_v20, %v15470_v36  ;;  %v16421_v3 = vadd.f32 %v7036_v53, %v6684_v19  ;;  %v13049_v36 = vld [vmem:[%s20473_s0 + $0xf5c] ss:$72 sps:$4 sm:$0xff]  }
 0x310   :  { %v6687_v43 = vpop.f32.mrf.mxu0  ;;  %v7038_v14 = vpop.f32.mrf.mxu1 }
 0x311   :  { %v6688_v41 = vadd.f32 %v6687_v43, %v15476_v1  ;;  %v16430_v4 = vadd.f32 %v7038_v14, %v6686_v60 }
 0x312   :  { %v6691_v34 = vpop.f32.mrf.mxu0  ;;  %6930 = vmatmul.mubr.bf16.gmra.mxu0 %v13029_v35  ;;  %v7040_v10 = vpop.f32.mrf.mxu1  ;;  %v13044_v35 = vld [vmem:[%s20473_s0 + $0xf50] ss:$72 sps:$4 sm:$0xff]  }
 0x313   :  { %v6692_v39 = vadd.f32 %v6691_v34, %v15479_v23  ;;  %v16436_v11 = vadd.f32 %v7040_v10, %v6688_v41  ;;  %6939 = vmatprep.mubr.bf16.mxu0 %v13046_v44  ;;  %v13058_v44 = vld [vmem:[%s20473_s0 + $0xfe4] ss:$72 sps:$4 sm:$0xff]  }
 0x314   :  { %v6693_v19 = vpop.f32.mrf.mxu0  ;;  %v7044_v20 = vpop.f32.mrf.mxu1  ;;  %7283 = vmatmul.mubr.bf16.gmra.mxu1 %v13035_v8 }
 0x315   :  { %v6694_v53 = vadd.f32 %v6693_v19, %v15485_v28  ;;  %v16439_v1 = vadd.f32 %v7044_v20, %v6692_v39  ;;  %7292 = vmatprep.mubr.bf16.mxu1 %v13049_v36  ;;  %v13047_v28 = vld [vmem:[%s20473_s0 + $0xf58] ss:$72 sps:$4 sm:$0xff]  }
 0x316   :  { %v6695_v60 = vpop.f32.mrf.mxu0  ;;  %v7046_v43 = vpop.f32.mrf.mxu1 }
 0x317   :  { %v6696_v14 = vadd.f32 %v6695_v60, %v15494_v31  ;;  %v16445_v23 = vadd.f32 %v7046_v43, %v6694_v53  ;;  %v13064_v31 = vld [vmem:[%s20473_s0 + $0xfec] ss:$72 sps:$4 sm:$0xff]  }
 0x318   :  { %v6697_v8 = vpop.f32.mrf.mxu0  ;;  %v7048_v41 = vpop.f32.mrf.mxu1 }
 0x319   :  { %v6698_v36 = vadd.f32 %v6697_v8, %v15500_v22  ;;  %v16454_v34 = vadd.f32 %v7048_v41, %v6696_v14 }
 0x31a   :  { %v6701_v10 = vpop.f32.mrf.mxu0  ;;  %6940 = vmatmul.mubr.bf16.gmra.mxu0 %v13044_v35  ;;  %v7050_v39 = vpop.f32.mrf.mxu1  ;;  %v13056_v35 = vld [vmem:[%s20473_s0 + $0xfe0] ss:$72 sps:$4 sm:$0xff]  }
 0x31b   :  { %v6702_v19 = vadd.f32 %v6701_v10, %v15503_v46  ;;  %v16460_v20 = vadd.f32 %v7050_v39, %v6698_v36  ;;  %6949 = vmatprep.mubr.bf16.mxu0 %v13058_v44  ;;  %v13073_v44 = vld [vmem:[%s20473_s0 + $0x1074] ss:$72 sps:$4 sm:$0xff]  }
 0x31c   :  { %v6703_v53 = vpop.f32.mrf.mxu0  ;;  %v7054_v60 = vpop.f32.mrf.mxu1  ;;  %7293 = vmatmul.mubr.bf16.gmra.mxu1 %v13047_v28 }
 0x31d   :  { %v6704_v43 = vadd.f32 %v6703_v53, %v15509_v51  ;;  %v16463_v22 = vadd.f32 %v7054_v60, %v6702_v19  ;;  %7302 = vmatprep.mubr.bf16.mxu1 %v13064_v31  ;;  %v13062_v51 = vld [vmem:[%s20473_s0 + $0xfe8] ss:$72 sps:$4 sm:$0xff]  }
 0x31e   :  { %v6705_v14 = vpop.f32.mrf.mxu0  ;;  %v7056_v8 = vpop.f32.mrf.mxu1 }
 0x31f   :  { %v6706_v41 = vadd.f32 %v6705_v14, %v15518_v30  ;;  %v16469_v46 = vadd.f32 %v7056_v8, %v6704_v43  ;;  %v13076_v30 = vld [vmem:[%s20473_s0 + $0x107c] ss:$72 sps:$4 sm:$0xff]  }
 0x320   :  { %v6707_v28 = vpop.f32.mrf.mxu0  ;;  %v7058_v36 = vpop.f32.mrf.mxu1 }
 0x321   :  { %v6708_v31 = vadd.f32 %v6707_v28, %v15524_v2  ;;  %v16478_v10 = vadd.f32 %v7058_v36, %v6706_v41 }
 0x322   :  { %v6711_v39 = vpop.f32.mrf.mxu0  ;;  %6950 = vmatmul.mubr.bf16.gmra.mxu0 %v13056_v35  ;;  %v7060_v19 = vpop.f32.mrf.mxu1  ;;  %v13071_v35 = vld [vmem:[%s20473_s0 + $0x1070] ss:$72 sps:$4 sm:$0xff]  }
 0x323   :  { %v6712_v53 = vadd.f32 %v6711_v39, %v15527_v6  ;;  %v16484_v60 = vadd.f32 %v7060_v19, %v6708_v31  ;;  %6959 = vmatprep.mubr.bf16.mxu0 %v13073_v44  ;;  %v13085_v44 = vld [vmem:[%s20473_s0 + $0x1104] ss:$72 sps:$4 sm:$0xff]  }
 0x324   :  { %v6713_v43 = vpop.f32.mrf.mxu0  ;;  %v7064_v14 = vpop.f32.mrf.mxu1  ;;  %7303 = vmatmul.mubr.bf16.gmra.mxu1 %v13062_v51 }
 0x325   :  { %v6714_v8 = vadd.f32 %v6713_v43, %v15533_v13  ;;  %v16487_v2 = vadd.f32 %v7064_v14, %v6712_v53  ;;  %7312 = vmatprep.mubr.bf16.mxu1 %v13076_v30  ;;  %v13074_v13 = vld [vmem:[%s20473_s0 + $0x1078] ss:$72 sps:$4 sm:$0xff]  }
 0x326   :  { %v6715_v41 = vpop.f32.mrf.mxu0  ;;  %v7066_v28 = vpop.f32.mrf.mxu1 }
 0x327   :  { %v6716_v36 = vadd.f32 %v6715_v41, %v15542_v58  ;;  %v16493_v6 = vadd.f32 %v7066_v28, %v6714_v8  ;;  %v13091_v58 = vld [vmem:[%s20473_s0 + $0x110c] ss:$72 sps:$4 sm:$0xff]  }
 0x328   :  { %v6717_v51 = vpop.f32.mrf.mxu0  ;;  %v7068_v31 = vpop.f32.mrf.mxu1 }
 0x329   :  { %v6718_v30 = vadd.f32 %v6717_v51, %v15548_v55  ;;  %v16502_v39 = vadd.f32 %v7068_v31, %v6716_v36 }
 0x32a   :  { %v6721_v19 = vpop.f32.mrf.mxu0  ;;  %6960 = vmatmul.mubr.bf16.gmra.mxu0 %v13071_v35  ;;  %v7070_v53 = vpop.f32.mrf.mxu1  ;;  %v13083_v35 = vld [vmem:[%s20473_s0 + $0x1100] ss:$72 sps:$4 sm:$0xff]  }
 0x32b   :  { %v6722_v43 = vadd.f32 %v6721_v19, %v15551_v32  ;;  %v16508_v14 = vadd.f32 %v7070_v53, %v6718_v30  ;;  %6969 = vmatprep.mubr.bf16.mxu0 %v13085_v44  ;;  %v13100_v44 = vld [vmem:[%s20473_s0 + $0x1194] ss:$72 sps:$4 sm:$0xff]  }
 0x32c   :  { %v6723_v8 = vpop.f32.mrf.mxu0  ;;  %v7074_v41 = vpop.f32.mrf.mxu1  ;;  %7313 = vmatmul.mubr.bf16.gmra.mxu1 %v13074_v13 }
 0x32d   :  { %v6724_v28 = vadd.f32 %v6723_v8, %v15557_v38  ;;  %v16511_v55 = vadd.f32 %v7074_v41, %v6722_v43  ;;  %7322 = vmatprep.mubr.bf16.mxu1 %v13091_v58  ;;  %v13089_v38 = vld [vmem:[%s20473_s0 + $0x1108] ss:$72 sps:$4 sm:$0xff]  }
 0x32e   :  { %v6725_v36 = vpop.f32.mrf.mxu0  ;;  %v7076_v51 = vpop.f32.mrf.mxu1 }
 0x32f   :  { %v6726_v31 = vadd.f32 %v6725_v36, %v15566_v50  ;;  %v16517_v32 = vadd.f32 %v7076_v51, %v6724_v28  ;;  %v13103_v50 = vld [vmem:[%s20473_s0 + $0x119c] ss:$72 sps:$4 sm:$0xff]  }
 0x330   :  { %v6727_v13 = vpop.f32.mrf.mxu0  ;;  %v7078_v30 = vpop.f32.mrf.mxu1 }
 0x331   :  { %v6728_v58 = vadd.f32 %v6727_v13, %v15572_v62  ;;  %v16526_v19 = vadd.f32 %v7078_v30, %v6726_v31 }
 0x332   :  { %v6731_v53 = vpop.f32.mrf.mxu0  ;;  %6970 = vmatmul.mubr.bf16.gmra.mxu0 %v13083_v35  ;;  %v7080_v43 = vpop.f32.mrf.mxu1  ;;  %v13098_v35 = vld [vmem:[%s20473_s0 + $0x1190] ss:$72 sps:$4 sm:$0xff]  }
 0x333   :  { %v6732_v8 = vadd.f32 %v6731_v53, %v15575_v61  ;;  %v16532_v41 = vadd.f32 %v7080_v43, %v6728_v58  ;;  %6979 = vmatprep.mubr.bf16.mxu0 %v13100_v44  ;;  %v13112_v44 = vld [vmem:[%s20473_s0 + $0x34] ss:$72 sps:$4 sm:$0xff]  }
 0x334   :  { %v6733_v28 = vpop.f32.mrf.mxu0  ;;  %v7084_v36 = vpop.f32.mrf.mxu1  ;;  %7323 = vmatmul.mubr.bf16.gmra.mxu1 %v13089_v38 }
 0x335   :  { %v6734_v51 = vadd.f32 %v6733_v28, %v15581_v5  ;;  %v16535_v62 = vadd.f32 %v7084_v36, %v6732_v8  ;;  %7332 = vmatprep.mubr.bf16.mxu1 %v13103_v50  ;;  %v13101_v5 = vld [vmem:[%s20473_s0 + $0x1198] ss:$72 sps:$4 sm:$0xff]  }
 0x336   :  { %v6735_v31 = vpop.f32.mrf.mxu0  ;;  %v7086_v13 = vpop.f32.mrf.mxu1 }
 0x337   :  { %v6736_v30 = vadd.f32 %v6735_v31, %v15590_v27  ;;  %v16541_v61 = vadd.f32 %v7086_v13, %v6734_v51  ;;  %v13118_v27 = vld [vmem:[%s20473_s0 + $0x3c] ss:$72 sps:$4 sm:$0xff]  }
 0x338   :  { %v6737_v38 = vpop.f32.mrf.mxu0  ;;  %v7088_v58 = vpop.f32.mrf.mxu1 }
 0x339   :  { %v6738_v50 = vadd.f32 %v6737_v38, %v15596_v18  ;;  %v16550_v53 = vadd.f32 %v7088_v58, %v6736_v30 }
 0x33a   :  { %v6741_v43 = vpop.f32.mrf.mxu0  ;;  %6980 = vmatmul.mubr.bf16.gmra.mxu0 %v13098_v35  ;;  %v7090_v8 = vpop.f32.mrf.mxu1  ;;  %v13110_v35 = vld [vmem:[%s20473_s0 + $0x30] ss:$72 sps:$4 sm:$0xff]  }
 0x33b   :  { %v6742_v28 = vadd.f32 %v6741_v43, %v15599_v29  ;;  %v16556_v36 = vadd.f32 %v7090_v8, %v6738_v50  ;;  %7375 = vmatprep.mubr.bf16.mxu0 %v13112_v44  ;;  %v13113_v44 = vld [vmem:[%s20472_s1 + $0x870] ss:$8 sps:$4 sm:$0xff]  }
 0x33c   :  { %v6743_v51 = vpop.f32.mrf.mxu0  ;;  %v7094_v31 = vpop.f32.mrf.mxu1  ;;  %7333 = vmatmul.mubr.bf16.gmra.mxu1 %v13101_v5 }
 0x33d   :  { %v6744_v13 = vadd.f32 %v6743_v51, %v15605_v37  ;;  %v16559_v18 = vadd.f32 %v7094_v31, %v6742_v28  ;;  %7728 = vmatprep.mubr.bf16.mxu1 %v13118_v27  ;;  %v13121_v37 = vld [vmem:[%s20473_s0 + $0xc4] ss:$72 sps:$4 sm:$0xff]   ;;  %v13116_v27 = vld [vmem:[%s20473_s0 + $0x38] ss:$72 sps:$4 sm:$0xff]  }
 0x33e   :  { %v6745_v30 = vpop.f32.mrf.mxu0  ;;  %v7096_v38 = vpop.f32.mrf.mxu1  ;;  %v13124_v28 = vld [vmem:[%s20473_s0 + $0xcc] ss:$72 sps:$4 sm:$0xff]  }
 0x33f   :  { %v6746_v58 = vadd.f32 %v6745_v30, %v15620_v12  ;;  %v16565_v29 = vadd.f32 %v7096_v38, %v6744_v13  ;;  %v13130_v12 = vld [vmem:[%s20472_s1 + $0x864] ss:$8 sps:$4 sm:$0xff]   ;;  %v13128_v38 = vld [vmem:[%s20472_s1 + $0x860] ss:$8 sps:$4 sm:$0xff]  }
 0x340   :  { %v6747_v5 = vpop.f32.mrf.mxu0  ;;  %v7098_v50 = vpop.f32.mrf.mxu1 }
 0x341   :  { %v6748_v43 = vadd.f32 %v6747_v5, %v15626_v0  ;;  %v16580_v8 = vadd.f32 %v7098_v50, %v6746_v58  ;;  %v13145_v5 = vld [vmem:[%s20472_s1 + $0x854] ss:$8 sps:$4 sm:$0xff]  }
 0x342   :  { %v6751_v51 = vpop.f32.mrf.mxu0  ;;  %v7100_v31 = vpop.f32.mrf.mxu1  ;;  %7376 = vmatmul.mubr.bf16.vlgmr.msra.gmra.mxu0 %v13110_v35 }
 0x343   :  { %v6752_v13 = vadd.f32 %v6751_v51, %v15635_v54  ;;  %v16586_v30 = vadd.f32 %v7100_v31, %v6748_v43  ;;  %8050 = vmatpush1.bf16.msra.mxu0 %v13113_v44  ;;  %7385 = vmatprep.mubr.bf16.mxu0 %v13121_v37  ;;  %v13119_v37 = vld [vmem:[%s20473_s0 + $0xc0] ss:$72 sps:$4 sm:$0xff]  }
 0x344   :  { %v6753_v0 = vpop.f32.mrf.mxu0  ;;  %v7104_v58 = vpop.f32.mrf.mxu1  ;;  %7729 = vmatmul.mubr.bf16.vlgmr.msra.gmra.mxu1 %v13116_v27  ;;  %8051 = vmatprep.subr.bf16.mxu0 %v13130_v12  ;;  %v13127_v27 = vld [vmem:[%s20473_s0 + $0x154] ss:$72 sps:$4 sm:$0xff]   ;;  %v13122_v31 = vld [vmem:[%s20473_s0 + $0xc8] ss:$72 sps:$4 sm:$0xff]  }
 0x345   :  { %v6754_v35 = vadd.f32 %v6753_v0, %v15641_v57  ;;  %v16595_v50 = vadd.f32 %v7104_v58, %v6752_v13  ;;  %7738 = vmatprep.mubr.bf16.mxu1 %v13124_v28  ;;  %v13143_v57 = vld [vmem:[%s20472_s1 + $0x850] ss:$8 sps:$4 sm:$0xff]  }
 0x346   :  { %v6755_v54 = vpop.f32.mrf.mxu0  ;;  %v7106_v44 = vpop.f32.mrf.mxu1 }
 0x347   :  { %v6756_v43 = vadd.f32 %v6755_v54, %v15656_v7  ;;  %v16601_v51 = vadd.f32 %v7106_v44, %v6754_v35  ;;  %8052 = vmatpush1.bf16.msra.mxu0 %v13128_v38  ;;  %v13160_v7 = vld [vmem:[%s20472_s1 + $0x844] ss:$8 sps:$4 sm:$0xff]  }
 0x348   :  { %v6757_v12 = vpop.f32.mrf.mxu0  ;;  %v7108_v28 = vpop.f32.mrf.mxu1  ;;  %8053 = vmatprep.subr.bf16.mxu0 %v13145_v5  ;;  %v13133_v38 = vld [vmem:[%s20473_s0 + $0x15c] ss:$72 sps:$4 sm:$0xff]   ;;  %v13158_v5 = vld [vmem:[%s20472_s1 + $0x840] ss:$8 sps:$4 sm:$0xff]  }
 0x349   :  { %v6758_v13 = vadd.f32 %v6757_v12, %v15662_v52  ;;  %v16616_v0 = vadd.f32 %v7108_v28, %v6756_v43  ;;  %v13175_v12 = vld [vmem:[%s20472_s1 + $0x834] ss:$8 sps:$4 sm:$0xff]  }
 0x34a   :  { %v6761_v58 = vpop.f32.mrf.mxu0  ;;  %v7110_v35 = vpop.f32.mrf.mxu1  ;;  %7386 = vmatmul.mubr.bf16.gmra.mxu0 %v13119_v37 }
 0x34b   :  { %v6762_v54 = vadd.f32 %v6761_v58, %v15671_v33  ;;  %v16622_v44 = vadd.f32 %v7110_v35, %v6758_v13  ;;  %7395 = vmatprep.mubr.bf16.mxu0 %v13127_v27  ;;  %8054 = vmatpush1.bf16.msra.mxu0 %v13143_v57  ;;  %v13125_v57 = vld [vmem:[%s20473_s0 + $0x150] ss:$72 sps:$4 sm:$0xff]  }
 0x34c   :  { %v6763_v52 = vpop.f32.mrf.mxu0  ;;  %v7114_v43 = vpop.f32.mrf.mxu1  ;;  %7739 = vmatmul.mubr.bf16.gmra.mxu1 %v13122_v31  ;;  %8055 = vmatprep.subr.bf16.mxu0 %v13160_v7  ;;  %v13136_v31 = vld [vmem:[%s20473_s0 + $0x1e4] ss:$72 sps:$4 sm:$0xff]   ;;  %v13131_v35 = vld [vmem:[%s20473_s0 + $0x158] ss:$72 sps:$4 sm:$0xff]  }
 0x34d   :  { %v6764_v37 = vadd.f32 %v6763_v52, %v15677_v25  ;;  %v16631_v28 = vadd.f32 %v7114_v43, %v6762_v54  ;;  %7748 = vmatprep.mubr.bf16.mxu1 %v13133_v38  ;;  %v13173_v25 = vld [vmem:[%s20472_s1 + $0x830] ss:$8 sps:$4 sm:$0xff]  }
 0x34e   :  { %v6765_v33 = vpop.f32.mrf.mxu0  ;;  %v7116_v27 = vpop.f32.mrf.mxu1 }
 0x34f   :  { %v6766_v13 = vadd.f32 %v6765_v33, %v15692_v63  ;;  %v16637_v58 = vadd.f32 %v7116_v27, %v6764_v37  ;;  %8056 = vmatpush1.bf16.msra.mxu0 %v13158_v5  ;;  %v13190_v63 = vld [vmem:[%s20472_s1 + $0x824] ss:$8 sps:$4 sm:$0xff]  }
 0x350   :  { %v6767_v7 = vpop.f32.mrf.mxu0  ;;  %v7118_v38 = vpop.f32.mrf.mxu1  ;;  %8057 = vmatprep.subr.bf16.mxu0 %v13175_v12  ;;  %v13139_v5 = vld [vmem:[%s20473_s0 + $0x1ec] ss:$72 sps:$4 sm:$0xff]   ;;  %v13188_v12 = vld [vmem:[%s20472_s1 + $0x820] ss:$8 sps:$4 sm:$0xff]  }
 0x351   :  { %20734 = vst [vmem:[#allocation78_spill] sm:$0xff] %v16637_v58  ;;  %v6768_v54 = vadd.f32 %v6767_v7, %v15698_v21  ;;  %v16652_v52 = vadd.f32 %v7118_v38, %v6766_v13  ;;  %v13205_v7 = vld [vmem:[%s20472_s1 + $0x814] ss:$8 sps:$4 sm:$0xff]  }
 0x352   :  { %v6771_v43 = vpop.f32.mrf.mxu0  ;;  %v7120_v37 = vpop.f32.mrf.mxu1  ;;  %7396 = vmatmul.mubr.bf16.gmra.mxu0 %v13125_v57 }
 0x353   :  { %20735 = vst [vmem:[#allocation79_spill] sm:$0xff] %v16652_v52  ;;  %v6772_v33 = vadd.f32 %v6771_v43, %v15707_v45  ;;  %v16658_v27 = vadd.f32 %v7120_v37, %v6768_v54  ;;  %7405 = vmatprep.mubr.bf16.mxu0 %v13136_v31  ;;  %8058 = vmatpush1.bf16.msra.mxu0 %v13173_v25  ;;  %v13134_v25 = vld [vmem:[%s20473_s0 + $0x1e0] ss:$72 sps:$4 sm:$0xff]   ;;  %v20738_v54 = vld [vmem:[#allocation81_spill] sm:$0xff] }
 0x354   :  { %v6773_v21 = vpop.f32.mrf.mxu0  ;;  %v7124_v13 = vpop.f32.mrf.mxu1  ;;  %7749 = vmatmul.mubr.bf16.gmra.mxu1 %v13131_v35  ;;  %8059 = vmatprep.subr.bf16.mxu0 %v13190_v63  ;;  %v13142_v35 = vld [vmem:[%s20473_s0 + $0x274] ss:$72 sps:$4 sm:$0xff]  }
 0x355   :  { %20736 = vst [vmem:[#allocation80_spill] sm:$0xff] %v16658_v27  ;;  %v6774_v57 = vadd.f32 %v6773_v21, %v15713_v56  ;;  %v16667_v38 = vadd.f32 %v7124_v13, %v6772_v33  ;;  %7758 = vmatprep.mubr.bf16.mxu1 %v13139_v5  ;;  %v13203_v56 = vld [vmem:[%s20472_s1 + $0x810] ss:$8 sps:$4 sm:$0xff]   ;;  %v13220_v21 = vld [vmem:[%s20472_s1 + $0x804] ss:$8 sps:$4 sm:$0xff]  }
 0x356   :  { %v6775_v45 = vpop.f32.mrf.mxu0  ;;  %v7126_v31 = vpop.f32.mrf.mxu1  ;;  %v13137_v33 = vld [vmem:[%s20473_s0 + $0x1e8] ss:$72 sps:$4 sm:$0xff]   ;;  %v20740_v13 = vld [vmem:[#allocation82_spill] sm:$0xff] }
 0x357   :  { %20737 = vst [vmem:[#allocation84_spill] sm:$0xff] %v16667_v38  ;;  %v6776_v43 = vadd.f32 %v6775_v45, %v20738_v54  ;;  %v16673_v37 = vadd.f32 %v7126_v31, %v6774_v57  ;;  %8060 = vmatpush1.bf16.msra.mxu0 %v13188_v12  ;;  %v13148_v12 = vld [vmem:[%s20473_s0 + $0x27c] ss:$72 sps:$4 sm:$0xff]  }
 0x358   :  { %v6777_v63 = vpop.f32.mrf.mxu0  ;;  %v7128_v5 = vpop.f32.mrf.mxu1  ;;  %8061 = vmatprep.subr.bf16.mxu0 %v13205_v7  ;;  %v13218_v7 = vld [vmem:[%s20472_s1 + $0x800] ss:$8 sps:$4 sm:$0xff]  }
 0x359   :  { %20739 = vst [vmem:[#allocation81_spill] sm:$0xff] %v16673_v37  ;;  %v6778_v57 = vadd.f32 %v6777_v63, %v20740_v13  ;;  %v16688_v45 = vadd.f32 %v7128_v5, %v6776_v43  ;;  %v20742_v37 = vld [vmem:[#allocation2_spill] sm:$0xff]  ;;  %v13235_v5 = vld [vmem:[%s20472_s1 + $0x8f4] ss:$8 sps:$4 sm:$0xff]   ;;  %v20744_v13 = vld [vmem:[#allocation3_spill] sm:$0xff] }
 0x35a   :  { %v6781_v31 = vpop.f32.mrf.mxu0  ;;  %v7130_v54 = vpop.f32.mrf.mxu1  ;;  %7406 = vmatmul.mubr.bf16.gmra.mxu0 %v13134_v25 }
 0x35b   :  { %20741 = vst [vmem:[#allocation82_spill] sm:$0xff] %v16688_v45  ;;  %v6782_v38 = vadd.f32 %v6781_v31, %v20742_v37  ;;  %v16694_v27 = vadd.f32 %v7130_v54, %v6778_v57  ;;  %7415 = vmatprep.mubr.bf16.mxu0 %v13142_v35  ;;  %8062 = vmatpush1.bf16.msra.mxu0 %v13203_v56  ;;  %v13140_v56 = vld [vmem:[%s20473_s0 + $0x270] ss:$72 sps:$4 sm:$0xff]  }
 0x35c   :  { %v6783_v63 = vpop.f32.mrf.mxu0  ;;  %v7134_v43 = vpop.f32.mrf.mxu1  ;;  %7759 = vmatmul.mubr.bf16.gmra.mxu1 %v13137_v33  ;;  %8063 = vmatprep.subr.bf16.mxu0 %v13220_v21  ;;  %v20746_v57 = vld [vmem:[#allocation4_spill] sm:$0xff]  ;;  %v13151_v33 = vld [vmem:[%s20473_s0 + $0x304] ss:$72 sps:$4 sm:$0xff]  }
 0x35d   :  { %20743 = vst [vmem:[#allocation2_spill] sm:$0xff] %v16694_v27  ;;  %v6784_v25 = vadd.f32 %v6783_v63, %v20744_v13  ;;  %v16703_v45 = vadd.f32 %v7134_v43, %v6782_v38  ;;  %7768 = vmatprep.mubr.bf16.mxu1 %v13148_v12  ;;  %v13233_v38 = vld [vmem:[%s20472_s1 + $0x8f0] ss:$8 sps:$4 sm:$0xff]   ;;  %v13250_v43 = vld [vmem:[%s20472_s1 + $0x8e4] ss:$8 sps:$4 sm:$0xff]  }
 0x35e   :  { %v6785_v37 = vpop.f32.mrf.mxu0  ;;  %v7136_v35 = vpop.f32.mrf.mxu1  ;;  %v13146_v63 = vld [vmem:[%s20473_s0 + $0x278] ss:$72 sps:$4 sm:$0xff]  }
 0x35f   :  { %20745 = vst [vmem:[#allocation3_spill] sm:$0xff] %v16703_v45  ;;  %v6786_v31 = vadd.f32 %v6785_v37, %v20746_v57  ;;  %v16709_v54 = vadd.f32 %v7136_v35, %v6784_v25  ;;  %8064 = vmatpush1.bf16.msra.mxu0 %v13218_v7  ;;  %v20748_v13 = vld [vmem:[#allocation5_spill] sm:$0xff]  ;;  %v13154_v7 = vld [vmem:[%s20473_s0 + $0x30c] ss:$72 sps:$4 sm:$0xff]  }
 0x360   :  { %v6787_v21 = vpop.f32.mrf.mxu0  ;;  %v7138_v12 = vpop.f32.mrf.mxu1  ;;  %8065 = vmatprep.subr.bf16.mxu0 %v13235_v5  ;;  %v13248_v5 = vld [vmem:[%s20472_s1 + $0x8e0] ss:$8 sps:$4 sm:$0xff]  }
 0x361   :  { %20747 = vst [vmem:[#allocation4_spill] sm:$0xff] %v16709_v54  ;;  %v6788_v25 = vadd.f32 %v6787_v21, %v20748_v13  ;;  %v16724_v37 = vadd.f32 %v7138_v12, %v6786_v31  ;;  %v20750_v54 = vld [vmem:[#allocation6_spill] sm:$0xff]  ;;  %v13265_v12 = vld [vmem:[%s20472_s1 + $0x8d4] ss:$8 sps:$4 sm:$0xff]   ;;  %v20752_v13 = vld [vmem:[#allocation83_spill] sm:$0xff] }
 0x362   :  { %v6791_v35 = vpop.f32.mrf.mxu0  ;;  %v7140_v57 = vpop.f32.mrf.mxu1  ;;  %7416 = vmatmul.mubr.bf16.gmra.mxu0 %v13140_v56 }
 0x363   :  { %20749 = vst [vmem:[#allocation5_spill] sm:$0xff] %v16724_v37  ;;  %v6792_v45 = vadd.f32 %v6791_v35, %v20750_v54  ;;  %v16730_v27 = vadd.f32 %v7140_v57, %v6788_v25  ;;  %7425 = vmatprep.mubr.bf16.mxu0 %v13151_v33  ;;  %8066 = vmatpush2.bf16.msra.mxu0 %v13233_v38  ;;  %v13149_v38 = vld [vmem:[%s20473_s0 + $0x300] ss:$72 sps:$4 sm:$0xff]  }
 0x364   :  { %v6793_v21 = vpop.f32.mrf.mxu0  ;;  %v7144_v31 = vpop.f32.mrf.mxu1  ;;  %7769 = vmatmul.mubr.bf16.gmra.mxu1 %v13146_v63  ;;  %8067 = vmatprep.subr.bf16.mxu0 %v13250_v43  ;;  %v20754_v25 = vld [vmem:[#allocation7_spill] sm:$0xff]  ;;  %v13157_v63 = vld [vmem:[%s20473_s0 + $0x394] ss:$72 sps:$4 sm:$0xff]  }
 0x365   :  { %20751 = vst [vmem:[#allocation6_spill] sm:$0xff] %v16730_v27  ;;  %v6794_v56 = vadd.f32 %v6793_v21, %v20752_v13  ;;  %v16739_v37 = vadd.f32 %v7144_v31, %v6792_v45  ;;  %7778 = vmatprep.mubr.bf16.mxu1 %v13154_v7  ;;  %v13263_v45 = vld [vmem:[%s20472_s1 + $0x8d0] ss:$8 sps:$4 sm:$0xff]  }
 0x366   :  { %v6795_v54 = vpop.f32.mrf.mxu0  ;;  %v7146_v33 = vpop.f32.mrf.mxu1  ;;  %v13152_v21 = vld [vmem:[%s20473_s0 + $0x308] ss:$72 sps:$4 sm:$0xff]  }
 0x367   :  { %20753 = vst [vmem:[#allocation83_spill] sm:$0xff] %v16739_v37  ;;  %v6796_v35 = vadd.f32 %v6795_v54, %v20754_v25  ;;  %v16745_v57 = vadd.f32 %v7146_v33, %v6794_v56  ;;  %8068 = vmatpush2.bf16.msra.mxu0 %v13248_v5  ;;  %v20756_v31 = vld [vmem:[#allocation8_spill] sm:$0xff]  ;;  %v13163_v54 = vld [vmem:[%s20473_s0 + $0x39c] ss:$72 sps:$4 sm:$0xff]  }
 0x368   :  { %v6797_v43 = vpop.f32.mrf.mxu0  ;;  %v7148_v7 = vpop.f32.mrf.mxu1  ;;  %8069 = vmatprep.subr.bf16.mxu0 %v13265_v12  ;;  %v20758_v25 = vld [vmem:[#allocation9_spill] sm:$0xff]  ;;  %v20760_v12 = vld [vmem:[#allocation10_spill] sm:$0xff] }
 0x369   :  { %20755 = vst [vmem:[#allocation7_spill] sm:$0xff] %v16745_v57  ;;  %v6798_v13 = vadd.f32 %v6797_v43, %v20756_v31  ;;  %v16757_v56 = vadd.f32 %v7148_v7, %v6796_v35 }
 0x36a   :  { %v6801_v5 = vpop.f32.mrf.mxu0  ;;  %v7150_v33 = vpop.f32.mrf.mxu1  ;;  %7426 = vmatmul.mubr.bf16.gmra.mxu0 %v13149_v38  ;;  %v13155_v38 = vld [vmem:[%s20473_s0 + $0x390] ss:$72 sps:$4 sm:$0xff]  }
 0x36b   :  { %20757 = vst [vmem:[#allocation8_spill] sm:$0xff] %v16757_v56  ;;  %v6802_v57 = vadd.f32 %v6801_v5, %v20758_v25  ;;  %v16763_v37 = vadd.f32 %v7150_v33, %v6798_v13  ;;  %7435 = vmatprep.mubr.bf16.mxu0 %v13157_v63  ;;  %8070 = vmatpush2.bf16.msra.mxu0 %v13263_v45  ;;  %v20762_v56 = vld [vmem:[#allocation11_spill] sm:$0xff] }
 0x36c   :  { %v6803_v27 = vpop.f32.mrf.mxu0  ;;  %v7154_v52 = vpop.f32.mrf.mxu1  ;;  %7779 = vmatmul.mubr.bf16.gmra.mxu1 %v13152_v21  ;;  %v13166_v63 = vld [vmem:[%s20473_s0 + $0x424] ss:$72 sps:$4 sm:$0xff]  }
 0x36d   :  { %20759 = vst [vmem:[#allocation9_spill] sm:$0xff] %v16763_v37  ;;  %v6804_v43 = vadd.f32 %v6803_v27, %v20760_v12  ;;  %v16766_v35 = vadd.f32 %v7154_v52, %v6802_v57  ;;  %7788 = vmatprep.mubr.bf16.mxu1 %v13163_v54  ;;  %v13161_v52 = vld [vmem:[%s20473_s0 + $0x398] ss:$72 sps:$4 sm:$0xff]   ;;  %v20764_v27 = vld [vmem:[#allocation12_spill] sm:$0xff] }
 0x36e   :  { %v6805_v7 = vpop.f32.mrf.mxu0  ;;  %v7156_v31 = vpop.f32.mrf.mxu1  ;;  %v20766_v12 = vld [vmem:[#allocation13_spill] sm:$0xff] }
 0x36f   :  { %20761 = vst [vmem:[#allocation10_spill] sm:$0xff] %v16766_v35  ;;  %v6806_v5 = vadd.f32 %v6805_v7, %v20762_v56  ;;  %v16772_v13 = vadd.f32 %v7156_v31, %v6804_v43  ;;  %v13169_v56 = vld [vmem:[%s20473_s0 + $0x42c] ss:$72 sps:$4 sm:$0xff]   ;;  %v13278_v31 = vld [vmem:[%s20472_s1 + $0x8c0] ss:$8 sps:$4 sm:$0xff]  }
 0x370   :  { %v6807_v45 = vpop.f32.mrf.mxu0  ;;  %v7158_v21 = vpop.f32.mrf.mxu1  ;;  %v20776_v35 = vld [vmem:[#allocation18_spill] sm:$0xff] }
 0x371   :  { %20763 = vst [vmem:[#allocation11_spill] sm:$0xff] %v16772_v13  ;;  %v6808_v57 = vadd.f32 %v6807_v45, %v20764_v27  ;;  %v16781_v54 = vadd.f32 %v7158_v21, %v6806_v5  ;;  %v13280_v5 = vld [vmem:[%s20472_s1 + $0x8c4] ss:$8 sps:$4 sm:$0xff]  }
 0x372   :  { %v6811_v33 = vpop.f32.mrf.mxu0  ;;  %v7160_v25 = vpop.f32.mrf.mxu1  ;;  %7436 = vmatmul.mubr.bf16.gmra.mxu0 %v13155_v38  ;;  %v20768_v27 = vld [vmem:[#allocation14_spill] sm:$0xff]  ;;  %8071 = vmatprep.subr.bf16.mxu0 %v13280_v5  ;;  %v20772_v5 = vld [vmem:[#allocation16_spill] sm:$0xff] }
 0x373   :  { %20765 = vst [vmem:[#allocation12_spill] sm:$0xff] %v16781_v54  ;;  %v6812_v43 = vadd.f32 %v6811_v33, %v20766_v12  ;;  %v16787_v7 = vadd.f32 %v7160_v25, %v6808_v57  ;;  %7445 = vmatprep.mubr.bf16.mxu0 %v13166_v63  ;;  %v13164_v63 = vld [vmem:[%s20473_s0 + $0x420] ss:$72 sps:$4 sm:$0xff]   ;;  %8072 = vmatpush2.bf16.msra.mxu0 %v13278_v31  ;;  %v13178_v31 = vld [vmem:[%s20473_s0 + $0x4bc] ss:$72 sps:$4 sm:$0xff]  }
 0x374   :  { %v6813_v45 = vpop.f32.mrf.mxu0  ;;  %v7164_v21 = vpop.f32.mrf.mxu1  ;;  %7789 = vmatmul.mubr.bf16.gmra.mxu1 %v13161_v52  ;;  %v20770_v33 = vld [vmem:[#allocation15_spill] sm:$0xff]  ;;  %v13172_v52 = vld [vmem:[%s20473_s0 + $0x4b4] ss:$72 sps:$4 sm:$0xff]  }
 0x375   :  { %20767 = vst [vmem:[#allocation13_spill] sm:$0xff] %v16787_v7  ;;  %v6814_v54 = vadd.f32 %v6813_v45, %v20768_v27  ;;  %v16796_v13 = vadd.f32 %v7164_v21, %v6812_v43  ;;  %7798 = vmatprep.mubr.bf16.mxu1 %v13169_v56  ;;  %v13167_v56 = vld [vmem:[%s20473_s0 + $0x428] ss:$72 sps:$4 sm:$0xff]  }
 0x376   :  { %v6815_v38 = vpop.f32.mrf.mxu0  ;;  %v7166_v57 = vpop.f32.mrf.mxu1 }
 0x377   :  { %20769 = vst [vmem:[#allocation14_spill] sm:$0xff] %v16796_v13  ;;  %v6816_v25 = vadd.f32 %v6815_v38, %v20770_v33  ;;  %v16802_v12 = vadd.f32 %v7166_v57, %v6814_v54  ;;  %v20774_v57 = vld [vmem:[#allocation17_spill] sm:$0xff] }
 0x378   :  { %v6817_v45 = vpop.f32.mrf.mxu0  ;;  %v7168_v43 = vpop.f32.mrf.mxu1 }
 0x379   :  { %20771 = vst [vmem:[#allocation15_spill] sm:$0xff] %v16802_v12  ;;  %v6818_v21 = vadd.f32 %v6817_v45, %v20772_v5  ;;  %v16811_v27 = vadd.f32 %v7168_v43, %v6816_v25  ;;  %v13170_v5 = vld [vmem:[%s20473_s0 + $0x4b0] ss:$72 sps:$4 sm:$0xff]  }
 0x37a   :  { %v6821_v54 = vpop.f32.mrf.mxu0  ;;  %v7170_v38 = vpop.f32.mrf.mxu1  ;;  %7446 = vmatmul.mubr.bf16.gmra.mxu0 %v13164_v63  ;;  %v20778_v63 = vld [vmem:[#allocation19_spill] sm:$0xff] }
 0x37b   :  { %20773 = vst [vmem:[#allocation16_spill] sm:$0xff] %v16811_v27  ;;  %v6822_v33 = vadd.f32 %v6821_v54, %v20774_v57  ;;  %v16817_v12 = vadd.f32 %v7170_v38, %v6818_v21  ;;  %7455 = vmatprep.mubr.bf16.mxu0 %v13172_v52  ;;  %v13181_v52 = vld [vmem:[%s20473_s0 + $0x544] ss:$72 sps:$4 sm:$0xff]  }
 0x37c   :  { %v6823_v13 = vpop.f32.mrf.mxu0  ;;  %v7174_v7 = vpop.f32.mrf.mxu1  ;;  %7799 = vmatmul.mubr.bf16.gmra.mxu1 %v13167_v56  ;;  %v13184_v38 = vld [vmem:[%s20473_s0 + $0x54c] ss:$72 sps:$4 sm:$0xff]  }
 0x37d   :  { %20775 = vst [vmem:[#allocation17_spill] sm:$0xff] %v16817_v12  ;;  %v6824_v37 = vadd.f32 %v6823_v13, %v20776_v35  ;;  %v16820_v45 = vadd.f32 %v7174_v7, %v6822_v33  ;;  %7808 = vmatprep.mubr.bf16.mxu1 %v13178_v31  ;;  %v13176_v35 = vld [vmem:[%s20473_s0 + $0x4b8] ss:$72 sps:$4 sm:$0xff]   ;;  %v20780_v13 = vld [vmem:[#allocation20_spill] sm:$0xff] }
 0x37e   :  { %v6825_v25 = vpop.f32.mrf.mxu0  ;;  %v7176_v43 = vpop.f32.mrf.mxu1  ;;  %v20782_v33 = vld [vmem:[#allocation21_spill] sm:$0xff] }
 0x37f   :  { %20777 = vst [vmem:[#allocation18_spill] sm:$0xff] %v16820_v45  ;;  %v6826_v27 = vadd.f32 %v6825_v25, %v20778_v63  ;;  %v16826_v54 = vadd.f32 %v7176_v43, %v6824_v37  ;;  %v13293_v63 = vld [vmem:[%s20472_s1 + $0x8b0] ss:$8 sps:$4 sm:$0xff]   ;;  %v20792_v45 = vld [vmem:[#allocation26_spill] sm:$0xff] }
 0x380   :  { %v6827_v56 = vpop.f32.mrf.mxu0  ;;  %v7178_v21 = vpop.f32.mrf.mxu1 }
 0x381   :  { %20779 = vst [vmem:[#allocation19_spill] sm:$0xff] %v16826_v54  ;;  %v6828_v7 = vadd.f32 %v6827_v56, %v20780_v13  ;;  %v16835_v31 = vadd.f32 %v7178_v21, %v6826_v27  ;;  %v13295_v27 = vld [vmem:[%s20472_s1 + $0x8b4] ss:$8 sps:$4 sm:$0xff]   ;;  %v20784_v13 = vld [vmem:[#allocation22_spill] sm:$0xff] }
 0x382   :  { %v6831_v37 = vpop.f32.mrf.mxu0  ;;  %v7180_v57 = vpop.f32.mrf.mxu1  ;;  %7456 = vmatmul.mubr.bf16.gmra.mxu0 %v13170_v5  ;;  %8073 = vmatprep.subr.bf16.mxu0 %v13295_v27  ;;  %v20788_v27 = vld [vmem:[#allocation24_spill] sm:$0xff] }
 0x383   :  { %20781 = vst [vmem:[#allocation20_spill] sm:$0xff] %v16835_v31  ;;  %v6832_v25 = vadd.f32 %v6831_v37, %v20782_v33  ;;  %v16841_v43 = vadd.f32 %v7180_v57, %v6828_v7  ;;  %7465 = vmatprep.mubr.bf16.mxu0 %v13181_v52  ;;  %v13179_v52 = vld [vmem:[%s20473_s0 + $0x540] ss:$72 sps:$4 sm:$0xff]   ;;  %8074 = vmatpush2.bf16.msra.mxu0 %v13293_v63  ;;  %v13193_v63 = vld [vmem:[%s20473_s0 + $0x5dc] ss:$72 sps:$4 sm:$0xff]  }
 0x384   :  { %v6833_v56 = vpop.f32.mrf.mxu0  ;;  %v7184_v21 = vpop.f32.mrf.mxu1  ;;  %7809 = vmatmul.mubr.bf16.gmra.mxu1 %v13176_v35  ;;  %v20786_v37 = vld [vmem:[#allocation23_spill] sm:$0xff]  ;;  %v13187_v35 = vld [vmem:[%s20473_s0 + $0x5d4] ss:$72 sps:$4 sm:$0xff]  }
 0x385   :  { %20783 = vst [vmem:[#allocation21_spill] sm:$0xff] %v16841_v43  ;;  %v6834_v31 = vadd.f32 %v6833_v56, %v20784_v13  ;;  %v16850_v54 = vadd.f32 %v7184_v21, %v6832_v25  ;;  %7818 = vmatprep.mubr.bf16.mxu1 %v13184_v38  ;;  %v13182_v38 = vld [vmem:[%s20473_s0 + $0x548] ss:$72 sps:$4 sm:$0xff]  }
 0x386   :  { %v6835_v5 = vpop.f32.mrf.mxu0  ;;  %v7186_v7 = vpop.f32.mrf.mxu1 }
 0x387   :  { %20785 = vst [vmem:[#allocation22_spill] sm:$0xff] %v16850_v54  ;;  %v6836_v57 = vadd.f32 %v6835_v5, %v20786_v37  ;;  %v16856_v33 = vadd.f32 %v7186_v7, %v6834_v31  ;;  %v20790_v7 = vld [vmem:[#allocation25_spill] sm:$0xff] }
 0x388   :  { %v6837_v56 = vpop.f32.mrf.mxu0  ;;  %v7188_v25 = vpop.f32.mrf.mxu1 }
 0x389   :  { %20787 = vst [vmem:[#allocation23_spill] sm:$0xff] %v16856_v33  ;;  %v6838_v21 = vadd.f32 %v6837_v56, %v20788_v27  ;;  %v16865_v13 = vadd.f32 %v7188_v25, %v6836_v57  ;;  %v13185_v27 = vld [vmem:[%s20473_s0 + $0x5d0] ss:$72 sps:$4 sm:$0xff]  }
 0x38a   :  { %v6841_v31 = vpop.f32.mrf.mxu0  ;;  %v7190_v5 = vpop.f32.mrf.mxu1  ;;  %7466 = vmatmul.mubr.bf16.gmra.mxu0 %v13179_v52  ;;  %v20794_v52 = vld [vmem:[#allocation27_spill] sm:$0xff] }
 0x38b   :  { %20789 = vst [vmem:[#allocation24_spill] sm:$0xff] %v16865_v13  ;;  %v6842_v37 = vadd.f32 %v6841_v31, %v20790_v7  ;;  %v16871_v33 = vadd.f32 %v7190_v5, %v6838_v21  ;;  %7475 = vmatprep.mubr.bf16.mxu0 %v13187_v35  ;;  %v13196_v35 = vld [vmem:[%s20473_s0 + $0x664] ss:$72 sps:$4 sm:$0xff]  }
 0x38c   :  { %v6843_v54 = vpop.f32.mrf.mxu0  ;;  %v7194_v43 = vpop.f32.mrf.mxu1  ;;  %7819 = vmatmul.mubr.bf16.gmra.mxu1 %v13182_v38  ;;  %v13199_v5 = vld [vmem:[%s20473_s0 + $0x66c] ss:$72 sps:$4 sm:$0xff]  }
 0x38d   :  { %20791 = vst [vmem:[#allocation25_spill] sm:$0xff] %v16871_v33  ;;  %v6844_v12 = vadd.f32 %v6843_v54, %v20792_v45  ;;  %v16874_v56 = vadd.f32 %v7194_v43, %v6842_v37  ;;  %7828 = vmatprep.mubr.bf16.mxu1 %v13193_v63  ;;  %v13191_v45 = vld [vmem:[%s20473_s0 + $0x5d8] ss:$72 sps:$4 sm:$0xff]   ;;  %v20796_v54 = vld [vmem:[#allocation28_spill] sm:$0xff]  ;;  %v20482_v37 = vmov 0  }
 0x38e   :  { %v6845_v57 = vpop.f32.mrf.mxu0  ;;  %v7196_v25 = vpop.f32.mrf.mxu1  ;;  %8729 = vmatprep.subr.bf16.mxu1 %v20482_v37  ;;  %v20800_v37 = vld [vmem:[#allocation30_spill] sm:$0xff] }
 0x38f   :  { %20793 = vst [vmem:[#allocation26_spill] sm:$0xff] %v16874_v56  ;;  %v6846_v13 = vadd.f32 %v6845_v57, %v20794_v52  ;;  %v16880_v31 = vadd.f32 %v7196_v25, %v6844_v12  ;;  %v13308_v57 = vld [vmem:[%s20475_s3 + $0x38] sm:$0xff]  }
 0x390   :  { %v6847_v38 = vpop.f32.mrf.mxu0  ;;  %v7198_v21 = vpop.f32.mrf.mxu1  ;;  %v20798_v25 = vld [vmem:[#allocation29_spill] sm:$0xff]  ;;  %8730 = vmatpush1.bf16.msra.mxu1 %v13308_v57  ;;  %v20805_v57 = vld [vmem:[#allocation32_spill] sm:$0xff] }
 0x391   :  { %20795 = vst [vmem:[#allocation27_spill] sm:$0xff] %v16880_v31  ;;  %v6848_v43 = vadd.f32 %v6847_v38, %v20796_v54  ;;  %v16889_v63 = vadd.f32 %v7198_v21, %v6846_v13  ;;  %v13309_v13 = vld [vmem:[%s20472_s1 + $0x8a0] ss:$8 sps:$4 sm:$0xff]  }
 0x392   :  { %v6851_v12 = vpop.f32.mrf.mxu0  ;;  %v7200_v7 = vpop.f32.mrf.mxu1  ;;  %7476 = vmatmul.mubr.bf16.gmra.mxu0 %v13185_v27  ;;  %v13311_v27 = vld [vmem:[%s20472_s1 + $0x8a4] ss:$8 sps:$4 sm:$0xff]   ;;  %v13194_v54 = vld [vmem:[%s20473_s0 + $0x660] ss:$72 sps:$4 sm:$0xff]  }
 0x393   :  { %20797 = vst [vmem:[#allocation28_spill] sm:$0xff] %v16889_v63  ;;  %v6852_v52 = vadd.f32 %v6851_v12, %v20798_v25  ;;  %v16899_v31 = vadd.f32 %v7200_v7, %v6848_v43  ;;  %7485 = vmatprep.mubr.bf16.mxu0 %v13196_v35  ;;  %8075 = vmatprep.subr.bf16.mxu0 %v13311_v27  ;;  %v20802_v25 = vmov 0  }
 0x394   :  { %v6853_v38 = vpop.f32.mrf.mxu0  ;;  %v7204_v21 = vpop.f32.mrf.mxu1  ;;  %7829 = vmatmul.mubr.bf16.gmra.mxu1 %v13191_v45  ;;  %8731 = vmatprep.subr.bf16.mxu1 %v20802_v25  ;;  %v13202_v45 = vld [vmem:[%s20473_s0 + $0x6f4] ss:$72 sps:$4 sm:$0xff]  }
 0x395   :  { %20799 = vst [vmem:[#allocation29_spill] sm:$0xff] %v16899_v31  ;;  %v6854_v12 = vadd.f32 %v6853_v38, %v20800_v37  ;;  %v16911_v43 = vadd.f32 %v7204_v21, %v6852_v52  ;;  %7838 = vmatprep.mubr.bf16.mxu1 %v13199_v5  ;;  %v20803_v31 = vld [vmem:[#allocation31_spill] sm:$0xff]  ;;  %8076 = vmatpush2.bf16.msra.mxu0 %v13309_v13 }
 0x396   :  { %v6855_v35 = vpop.f32.mrf.mxu0  ;;  %v7206_v7 = vpop.f32.mrf.mxu1  ;;  %v13197_v5 = vld [vmem:[%s20473_s0 + $0x668] ss:$72 sps:$4 sm:$0xff]  }
 0x397   :  { %20801 = vst [vmem:[#allocation30_spill] sm:$0xff] %v16911_v43  ;;  %v6856_v63 = vadd.f32 %v6855_v35, %v20803_v31  ;;  %v16915_v56 = vadd.f32 %v7206_v7, %v6854_v12  ;;  %v13208_v31 = vld [vmem:[%s20473_s0 + $0x6fc] ss:$72 sps:$4 sm:$0xff]  }
 0x398   :  { %v6857_v33 = vpop.f32.mrf.mxu0  ;;  %v7208_v37 = vpop.f32.mrf.mxu1  ;;  %v20807_v12 = vld [vmem:[#allocation33_spill] sm:$0xff] }
 0x399   :  { %20804 = vst [vmem:[#allocation31_spill] sm:$0xff] %v16915_v56  ;;  %v6858_v52 = vadd.f32 %v6857_v33, %v20805_v57  ;;  %v16924_v27 = vadd.f32 %v7208_v37, %v6856_v63  ;;  %v13200_v33 = vld [vmem:[%s20473_s0 + $0x6f0] ss:$72 sps:$4 sm:$0xff]   ;;  %v20809_v63 = vld [vmem:[#allocation34_spill] sm:$0xff] }
 0x39a   :  { %v6861_v38 = vpop.f32.mrf.mxu0  ;;  %v7210_v21 = vpop.f32.mrf.mxu1  ;;  %7486 = vmatmul.mubr.bf16.gmra.mxu0 %v13194_v54  ;;  %v20811_v54 = vld [vmem:[#allocation35_spill] sm:$0xff] }
 0x39b   :  { %20806 = vst [vmem:[#allocation32_spill] sm:$0xff] %v16924_v27  ;;  %v6862_v35 = vadd.f32 %v6861_v38, %v20807_v12  ;;  %v16930_v13 = vadd.f32 %v7210_v21, %v6858_v52  ;;  %7495 = vmatprep.mubr.bf16.mxu0 %v13202_v45  ;;  %v13211_v45 = vld [vmem:[%s20473_s0 + $0x784] ss:$72 sps:$4 sm:$0xff]   ;;  %v13206_v21 = vld [vmem:[%s20473_s0 + $0x6f8] ss:$72 sps:$4 sm:$0xff]   ;;  %v20813_v12 = vld [vmem:[#allocation36_spill] sm:$0xff] }
 0x39c   :  { %v6863_v7 = vpop.f32.mrf.mxu0  ;;  %v7214_v56 = vpop.f32.mrf.mxu1  ;;  %7839 = vmatmul.mubr.bf16.gmra.mxu1 %v13197_v5 }
 0x39d   :  { %20808 = vst [vmem:[#allocation33_spill] sm:$0xff] %v16930_v13  ;;  %v6864_v37 = vadd.f32 %v6863_v7, %v20809_v63  ;;  %v16936_v57 = vadd.f32 %v7214_v56, %v6862_v35  ;;  %7848 = vmatprep.mubr.bf16.mxu1 %v13208_v31  ;;  %v20815_v63 = vld [vmem:[#allocation37_spill] sm:$0xff] }
 0x39e   :  { %v6865_v27 = vpop.f32.mrf.mxu0  ;;  %v7216_v43 = vpop.f32.mrf.mxu1 }
 0x39f   :  { %20810 = vst [vmem:[#allocation34_spill] sm:$0xff] %v16936_v57  ;;  %v6866_v58 = vadd.f32 %v6865_v27, %v20811_v54  ;;  %v16939_v38 = vadd.f32 %v7216_v43, %v6864_v37  ;;  %v13214_v27 = vld [vmem:[%s20473_s0 + $0x78c] ss:$72 sps:$4 sm:$0xff]   ;;  %v20825_v57 = vld [vmem:[#allocation42_spill] sm:$0xff] }
 0x3a0   :  { %v6867_v5 = vpop.f32.mrf.mxu0  ;;  %v7218_v52 = vpop.f32.mrf.mxu1  ;;  %v13324_v43 = vld [vmem:[%s20475_s3 + $0x30] sm:$0xff]  }
 0x3a1   :  { %20812 = vst [vmem:[#allocation35_spill] sm:$0xff] %v16939_v38  ;;  %v6868_v56 = vadd.f32 %v6867_v5, %v20813_v12  ;;  %v16948_v35 = vadd.f32 %v7218_v52, %v6866_v58  ;;  %8732 = vmatpush1.bf16.msra.mxu1 %v13324_v43  ;;  %v13325_v58 = vld [vmem:[%s20472_s1 + $0x890] ss:$8 sps:$4 sm:$0xff]   ;;  %v13327_v5 = vld [vmem:[%s20472_s1 + $0x894] ss:$8 sps:$4 sm:$0xff]  }
 0x3a2   :  { %v6871_v31 = vpop.f32.mrf.mxu0  ;;  %v7220_v7 = vpop.f32.mrf.mxu1  ;;  %7496 = vmatmul.mubr.bf16.gmra.mxu0 %v13200_v33  ;;  %8733 = vmatprep.subr.bf16.mxu1 %v20802_v25  ;;  %v20817_v33 = vld [vmem:[#allocation38_spill] sm:$0xff] }
 0x3a3   :  { %20814 = vst [vmem:[#allocation36_spill] sm:$0xff] %v16948_v35  ;;  %v6872_v37 = vadd.f32 %v6871_v31, %v20815_v63  ;;  %v16957_v54 = vadd.f32 %v7220_v7, %v6868_v56  ;;  %7505 = vmatprep.mubr.bf16.mxu0 %v13211_v45  ;;  %8077 = vmatprep.subr.bf16.mxu0 %v13327_v5  ;;  %v13209_v43 = vld [vmem:[%s20473_s0 + $0x780] ss:$72 sps:$4 sm:$0xff]   ;;  %v20821_v5 = vld [vmem:[#allocation40_spill] sm:$0xff] }
 0x3a4   :  { %v6873_v52 = vpop.f32.mrf.mxu0  ;;  %v7224_v12 = vpop.f32.mrf.mxu1  ;;  %7849 = vmatmul.mubr.bf16.gmra.mxu1 %v13206_v21  ;;  %8078 = vmatpush2.bf16.msra.mxu0 %v13325_v58  ;;  %v20819_v7 = vld [vmem:[#allocation39_spill] sm:$0xff]  ;;  %v13217_v21 = vld [vmem:[%s20473_s0 + $0x814] ss:$72 sps:$4 sm:$0xff]  }
 0x3a5   :  { %20816 = vst [vmem:[#allocation37_spill] sm:$0xff] %v16957_v54  ;;  %v6874_v35 = vadd.f32 %v6873_v52, %v20817_v33  ;;  %v16967_v31 = vadd.f32 %v7224_v12, %v6872_v37  ;;  %7858 = vmatprep.mubr.bf16.mxu1 %v13214_v27  ;;  %v13212_v27 = vld [vmem:[%s20473_s0 + $0x788] ss:$72 sps:$4 sm:$0xff]   ;;  %v13223_v58 = vld [vmem:[%s20473_s0 + $0x81c] ss:$72 sps:$4 sm:$0xff]  }
 0x3a6   :  { %v6875_v45 = vpop.f32.mrf.mxu0  ;;  %v7226_v56 = vpop.f32.mrf.mxu1 }
 0x3a7   :  { %20818 = vst [vmem:[#allocation38_spill] sm:$0xff] %v16967_v31  ;;  %v6876_v63 = vadd.f32 %v6875_v45, %v20819_v7  ;;  %v16973_v54 = vadd.f32 %v7226_v56, %v6874_v35  ;;  %v20823_v56 = vld [vmem:[#allocation41_spill] sm:$0xff] }
 0x3a8   :  { %v6877_v52 = vpop.f32.mrf.mxu0  ;;  %v7228_v37 = vpop.f32.mrf.mxu1 }
 0x3a9   :  { %20820 = vst [vmem:[#allocation39_spill] sm:$0xff] %v16973_v54  ;;  %v6878_v12 = vadd.f32 %v6877_v52, %v20821_v5  ;;  %v16982_v33 = vadd.f32 %v7228_v37, %v6876_v63  ;;  %v13215_v5 = vld [vmem:[%s20473_s0 + $0x810] ss:$72 sps:$4 sm:$0xff]  }
 0x3aa   :  { %v6881_v35 = vpop.f32.mrf.mxu0  ;;  %v7230_v45 = vpop.f32.mrf.mxu1  ;;  %7506 = vmatmul.mubr.bf16.gmra.mxu0 %v13209_v43  ;;  %v20827_v43 = vld [vmem:[#allocation43_spill] sm:$0xff] }
 0x3ab   :  { %20822 = vst [vmem:[#allocation40_spill] sm:$0xff] %v16982_v33  ;;  %v6882_v7 = vadd.f32 %v6881_v35, %v20823_v56  ;;  %v16988_v54 = vadd.f32 %v7230_v45, %v6878_v12  ;;  %7515 = vmatprep.mubr.bf16.mxu0 %v13217_v21  ;;  %v13226_v21 = vld [vmem:[%s20473_s0 + $0x8a4] ss:$72 sps:$4 sm:$0xff]  }
 0x3ac   :  { %v6883_v31 = vpop.f32.mrf.mxu0  ;;  %v7234_v38 = vpop.f32.mrf.mxu1  ;;  %7859 = vmatmul.mubr.bf16.gmra.mxu1 %v13212_v27  ;;  %v13229_v45 = vld [vmem:[%s20473_s0 + $0x8ac] ss:$72 sps:$4 sm:$0xff]  }
 0x3ad   :  { %20824 = vst [vmem:[#allocation41_spill] sm:$0xff] %v16988_v54  ;;  %v6884_v13 = vadd.f32 %v6883_v31, %v20825_v57  ;;  %v16991_v52 = vadd.f32 %v7234_v38, %v6882_v7  ;;  %7868 = vmatprep.mubr.bf16.mxu1 %v13223_v58  ;;  %v13221_v57 = vld [vmem:[%s20473_s0 + $0x818] ss:$72 sps:$4 sm:$0xff]   ;;  %v20829_v38 = vld [vmem:[#allocation44_spill] sm:$0xff] }
 0x3ae   :  { %v6885_v63 = vpop.f32.mrf.mxu0  ;;  %v7236_v37 = vpop.f32.mrf.mxu1 }
 0x3af   :  { %20826 = vst [vmem:[#allocation42_spill] sm:$0xff] %v16991_v52  ;;  %v6886_v33 = vadd.f32 %v6885_v63, %v20827_v43  ;;  %v16997_v35 = vadd.f32 %v7236_v37, %v6884_v13  ;;  %v13340_v13 = vld [vmem:[%s20475_s3 + $0x28] sm:$0xff]   ;;  %v20831_v63 = vld [vmem:[#allocation45_spill] sm:$0xff]  ;;  %v20841_v52 = vld [vmem:[#allocation50_spill] sm:$0xff] }
 0x3b0   :  { %v6887_v27 = vpop.f32.mrf.mxu0  ;;  %v7238_v12 = vpop.f32.mrf.mxu1  ;;  %8734 = vmatpush1.bf16.msra.mxu1 %v13340_v13  ;;  %v13224_v13 = vld [vmem:[%s20473_s0 + $0x8a0] ss:$72 sps:$4 sm:$0xff]  }
 0x3b1   :  { %20828 = vst [vmem:[#allocation43_spill] sm:$0xff] %v16997_v35  ;;  %v6888_v31 = vadd.f32 %v6887_v27, %v20829_v38  ;;  %v17006_v58 = vadd.f32 %v7238_v12, %v6886_v33  ;;  %v13341_v33 = vld [vmem:[%s20472_s1 + $0x880] ss:$8 sps:$4 sm:$0xff]   ;;  %v13343_v27 = vld [vmem:[%s20472_s1 + $0x884] ss:$8 sps:$4 sm:$0xff]   ;;  %8735 = vmatprep.subr.bf16.mxu1 %v20802_v25 }
 0x3b2   :  { %v6891_v56 = vpop.f32.mrf.mxu0  ;;  %v7240_v7 = vpop.f32.mrf.mxu1  ;;  %7516 = vmatmul.mubr.bf16.gmra.mxu0 %v13215_v5  ;;  %v20833_v5 = vld [vmem:[#allocation46_spill] sm:$0xff]  ;;  %8079 = vmatprep.subr.bf16.mxu0 %v13343_v27  ;;  %v20837_v27 = vld [vmem:[#allocation48_spill] sm:$0xff] }
 0x3b3   :  { %20830 = vst [vmem:[#allocation44_spill] sm:$0xff] %v17006_v58  ;;  %v6892_v37 = vadd.f32 %v6891_v56, %v20831_v63  ;;  %v17015_v43 = vadd.f32 %v7240_v7, %v6888_v31  ;;  %7525 = vmatprep.mubr.bf16.mxu0 %v13226_v21  ;;  %8080 = vmatpush2.bf16.msra.mxu0 %v13341_v33  ;;  %v20835_v7 = vld [vmem:[#allocation47_spill] sm:$0xff]  ;;  %v13238_v33 = vld [vmem:[%s20473_s0 + $0x93c] ss:$72 sps:$4 sm:$0xff]  }
 0x3b4   :  { %v6893_v12 = vpop.f32.mrf.mxu0  ;;  %v7244_v38 = vpop.f32.mrf.mxu1  ;;  %7869 = vmatmul.mubr.bf16.gmra.mxu1 %v13221_v57  ;;  %v13232_v57 = vld [vmem:[%s20473_s0 + $0x934] ss:$72 sps:$4 sm:$0xff]  }
 0x3b5   :  { %20832 = vst [vmem:[#allocation45_spill] sm:$0xff] %v17015_v43  ;;  %v6894_v58 = vadd.f32 %v6893_v12, %v20833_v5  ;;  %v17025_v56 = vadd.f32 %v7244_v38, %v6892_v37  ;;  %7878 = vmatprep.mubr.bf16.mxu1 %v13229_v45  ;;  %v13227_v45 = vld [vmem:[%s20473_s0 + $0x8a8] ss:$72 sps:$4 sm:$0xff]  }
 0x3b6   :  { %v6895_v21 = vpop.f32.mrf.mxu0  ;;  %v7246_v31 = vpop.f32.mrf.mxu1 }
 0x3b7   :  { %20834 = vst [vmem:[#allocation46_spill] sm:$0xff] %v17025_v56  ;;  %v6896_v63 = vadd.f32 %v6895_v21, %v20835_v7  ;;  %v17031_v43 = vadd.f32 %v7246_v31, %v6894_v58  ;;  %v20839_v31 = vld [vmem:[#allocation49_spill] sm:$0xff] }
 0x3b8   :  { %v6897_v12 = vpop.f32.mrf.mxu0  ;;  %v7248_v37 = vpop.f32.mrf.mxu1 }
 0x3b9   :  { %20836 = vst [vmem:[#allocation47_spill] sm:$0xff] %v17031_v43  ;;  %v6898_v38 = vadd.f32 %v6897_v12, %v20837_v27  ;;  %v17040_v5 = vadd.f32 %v7248_v37, %v6896_v63  ;;  %v13230_v27 = vld [vmem:[%s20473_s0 + $0x930] ss:$72 sps:$4 sm:$0xff]  }
 0x3ba   :  { %v6901_v58 = vpop.f32.mrf.mxu0  ;;  %v7250_v21 = vpop.f32.mrf.mxu1  ;;  %7526 = vmatmul.mubr.bf16.gmra.mxu0 %v13224_v13  ;;  %v20843_v13 = vld [vmem:[#allocation51_spill] sm:$0xff] }
 0x3bb   :  { %20838 = vst [vmem:[#allocation48_spill] sm:$0xff] %v17040_v5  ;;  %v6902_v7 = vadd.f32 %v6901_v58, %v20839_v31  ;;  %v17046_v43 = vadd.f32 %v7250_v21, %v6898_v38  ;;  %7535 = vmatprep.mubr.bf16.mxu0 %v13232_v57  ;;  %v13241_v57 = vld [vmem:[%s20473_s0 + $0x9c4] ss:$72 sps:$4 sm:$0xff]  }
 0x3bc   :  { %v6903_v56 = vpop.f32.mrf.mxu0  ;;  %v7254_v35 = vpop.f32.mrf.mxu1  ;;  %7879 = vmatmul.mubr.bf16.gmra.mxu1 %v13227_v45  ;;  %v13244_v21 = vld [vmem:[%s20473_s0 + $0x9cc] ss:$72 sps:$4 sm:$0xff]  }
 0x3bd   :  { %20840 = vst [vmem:[#allocation49_spill] sm:$0xff] %v17046_v43  ;;  %v6904_v54 = vadd.f32 %v6903_v56, %v20841_v52  ;;  %v17049_v12 = vadd.f32 %v7254_v35, %v6902_v7  ;;  %7888 = vmatprep.mubr.bf16.mxu1 %v13238_v33  ;;  %v13236_v52 = vld [vmem:[%s20473_s0 + $0x938] ss:$72 sps:$4 sm:$0xff]   ;;  %v20845_v35 = vld [vmem:[#allocation52_spill] sm:$0xff] }
 0x3be   :  { %v6905_v63 = vpop.f32.mrf.mxu0  ;;  %v7256_v37 = vpop.f32.mrf.mxu1 }
 0x3bf   :  { %20842 = vst [vmem:[#allocation50_spill] sm:$0xff] %v17049_v12  ;;  %v6906_v5 = vadd.f32 %v6905_v63, %v20843_v13  ;;  %v17055_v58 = vadd.f32 %v7256_v37, %v6904_v54  ;;  %v13356_v54 = vld [vmem:[%s20475_s3 + $0x20] sm:$0xff]   ;;  %v20847_v63 = vld [vmem:[#allocation53_spill] sm:$0xff] }
 0x3c0   :  { %v6907_v45 = vpop.f32.mrf.mxu0  ;;  %v7258_v38 = vpop.f32.mrf.mxu1  ;;  %8736 = vmatpush1.bf16.msra.mxu1 %v13356_v54 }
 0x3c1   :  { %20844 = vst [vmem:[#allocation51_spill] sm:$0xff] %v17055_v58  ;;  %v6908_v56 = vadd.f32 %v6907_v45, %v20845_v35  ;;  %v17064_v33 = vadd.f32 %v7258_v38, %v6906_v5  ;;  %8737 = vmatprep.subr.bf16.mxu1 %v20802_v25  ;;  %v20849_v38 = vld [vmem:[#allocation54_spill] sm:$0xff] }
 0x3c2   :  { %v6911_v31 = vpop.f32.mrf.mxu0  ;;  %v7260_v7 = vpop.f32.mrf.mxu1  ;;  %7536 = vmatmul.mubr.bf16.gmra.mxu0 %v13230_v27  ;;  %v13239_v27 = vld [vmem:[%s20473_s0 + $0x9c0] ss:$72 sps:$4 sm:$0xff]  }
 0x3c3   :  { %20846 = vst [vmem:[#allocation52_spill] sm:$0xff] %v17064_v33  ;;  %v6912_v37 = vadd.f32 %v6911_v31, %v20847_v63  ;;  %v17073_v13 = vadd.f32 %v7260_v7, %v6908_v56  ;;  %7545 = vmatprep.mubr.bf16.mxu0 %v13241_v57  ;;  %v20851_v56 = vld [vmem:[#allocation55_spill] sm:$0xff]  ;;  %v20853_v63 = vld [vmem:[#allocation56_spill] sm:$0xff] }
 0x3c4   :  { %v6913_v45 = vpop.f32.mrf.mxu0  ;;  %v7264_v5 = vpop.f32.mrf.mxu1  ;;  %7889 = vmatmul.mubr.bf16.gmra.mxu1 %v13236_v52  ;;  %v13247_v52 = vld [vmem:[%s20473_s0 + $0xa54] ss:$72 sps:$4 sm:$0xff]  }
 0x3c5   :  { %20848 = vst [vmem:[#allocation53_spill] sm:$0xff] %v17073_v13  ;;  %v6914_v35 = vadd.f32 %v6913_v45, %v20849_v38  ;;  %v17077_v33 = vadd.f32 %v7264_v5, %v6912_v37  ;;  %7898 = vmatprep.mubr.bf16.mxu1 %v13244_v21  ;;  %v13242_v21 = vld [vmem:[%s20473_s0 + $0x9c8] ss:$72 sps:$4 sm:$0xff]   ;;  %v20855_v38 = vld [vmem:[#allocation57_spill] sm:$0xff]  ;;  %v20857_v13 = vld [vmem:[#allocation58_spill] sm:$0xff] }
 0x3c6   :  { %v6915_v58 = vpop.f32.mrf.mxu0  ;;  %v7266_v12 = vpop.f32.mrf.mxu1 }
 0x3c7   :  { %20850 = vst [vmem:[#allocation54_spill] sm:$0xff] %v17077_v33  ;;  %v6916_v31 = vadd.f32 %v6915_v58, %v20851_v56  ;;  %v17083_v57 = vadd.f32 %v7266_v12, %v6914_v35  ;;  %v13253_v58 = vld [vmem:[%s20473_s0 + $0xa5c] ss:$72 sps:$4 sm:$0xff]  }
 0x3c8   :  { %v6917_v54 = vpop.f32.mrf.mxu0  ;;  %v7268_v7 = vpop.f32.mrf.mxu1 }
 0x3c9   :  { %20852 = vst [vmem:[#allocation55_spill] sm:$0xff] %v17083_v57  ;;  %v6918_v37 = vadd.f32 %v6917_v54, %v20853_v63  ;;  %v17092_v45 = vadd.f32 %v7268_v7, %v6916_v31  ;;  %v13245_v63 = vld [vmem:[%s20473_s0 + $0xa50] ss:$72 sps:$4 sm:$0xff]  }
 0x3ca   :  { %v6921_v12 = vpop.f32.mrf.mxu0  ;;  %v7270_v5 = vpop.f32.mrf.mxu1  ;;  %7546 = vmatmul.mubr.bf16.gmra.mxu0 %v13239_v27  ;;  %v20859_v27 = vld [vmem:[#allocation59_spill] sm:$0xff] }
 0x3cb   :  { %20854 = vst [vmem:[#allocation56_spill] sm:$0xff] %v17092_v45  ;;  %v6922_v35 = vadd.f32 %v6921_v12, %v20855_v38  ;;  %v17098_v56 = vadd.f32 %v7270_v5, %v6918_v37  ;;  %7555 = vmatprep.mubr.bf16.mxu0 %v13247_v52  ;;  %v13256_v52 = vld [vmem:[%s20473_s0 + $0xae4] ss:$72 sps:$4 sm:$0xff]  }
 0x3cc   :  { %v6923_v57 = vpop.f32.mrf.mxu0  ;;  %v7274_v33 = vpop.f32.mrf.mxu1  ;;  %7899 = vmatmul.mubr.bf16.gmra.mxu1 %v13242_v21  ;;  %v13259_v5 = vld [vmem:[%s20473_s0 + $0xaec] ss:$72 sps:$4 sm:$0xff]  }
 0x3cd   :  { %20856 = vst [vmem:[#allocation57_spill] sm:$0xff] %v17098_v56  ;;  %v6924_v43 = vadd.f32 %v6923_v57, %v20857_v13  ;;  %v17101_v54 = vadd.f32 %v7274_v33, %v6922_v35  ;;  %7908 = vmatprep.mubr.bf16.mxu1 %v13253_v58  ;;  %v13251_v33 = vld [vmem:[%s20473_s0 + $0xa58] ss:$72 sps:$4 sm:$0xff]   ;;  %v20861_v13 = vld [vmem:[#allocation60_spill] sm:$0xff] }
 0x3ce   :  { %v6925_v31 = vpop.f32.mrf.mxu0  ;;  %v7276_v7 = vpop.f32.mrf.mxu1 }
 0x3cf   :  { %20858 = vst [vmem:[#allocation58_spill] sm:$0xff] %v17101_v54  ;;  %v6926_v45 = vadd.f32 %v6925_v31, %v20859_v27  ;;  %v17107_v12 = vadd.f32 %v7276_v7, %v6924_v43  ;;  %v13363_v43 = vld [vmem:[%s20475_s3 + $0x18] sm:$0xff]  }
 0x3d0   :  { %v6927_v21 = vpop.f32.mrf.mxu0  ;;  %v7278_v37 = vpop.f32.mrf.mxu1  ;;  %v20863_v31 = vld [vmem:[#allocation61_spill] sm:$0xff]  ;;  %8738 = vmatpush1.bf16.msra.mxu1 %v13363_v43 }
 0x3d1   :  { %20860 = vst [vmem:[#allocation59_spill] sm:$0xff] %v17107_v12  ;;  %v6928_v57 = vadd.f32 %v6927_v21, %v20861_v13  ;;  %v17116_v58 = vadd.f32 %v7278_v37, %v6926_v45  ;;  %8739 = vmatprep.subr.bf16.mxu1 %v20802_v25  ;;  %v20865_v37 = vld [vmem:[#allocation62_spill] sm:$0xff] }
 0x3d2   :  { %v6931_v38 = vpop.f32.mrf.mxu0  ;;  %v7280_v35 = vpop.f32.mrf.mxu1  ;;  %7556 = vmatmul.mubr.bf16.gmra.mxu0 %v13245_v63  ;;  %v13254_v63 = vld [vmem:[%s20473_s0 + $0xae0] ss:$72 sps:$4 sm:$0xff]  }
 0x3d3   :  { %20862 = vst [vmem:[#allocation60_spill] sm:$0xff] %v17116_v58  ;;  %v6932_v7 = vadd.f32 %v6931_v38, %v20863_v31  ;;  %v17125_v27 = vadd.f32 %v7280_v35, %v6928_v57  ;;  %7565 = vmatprep.mubr.bf16.mxu0 %v13256_v52  ;;  %v20867_v57 = vld [vmem:[#allocation63_spill] sm:$0xff]  ;;  %v20869_v31 = vld [vmem:[#allocation64_spill] sm:$0xff] }
 0x3d4   :  { %v6933_v21 = vpop.f32.mrf.mxu0  ;;  %v7284_v45 = vpop.f32.mrf.mxu1  ;;  %7909 = vmatmul.mubr.bf16.gmra.mxu1 %v13251_v33  ;;  %v13262_v33 = vld [vmem:[%s20473_s0 + $0xb74] ss:$72 sps:$4 sm:$0xff]  }
 0x3d5   :  { %20864 = vst [vmem:[#allocation61_spill] sm:$0xff] %v17125_v27  ;;  %v6934_v13 = vadd.f32 %v6933_v21, %v20865_v37  ;;  %v17129_v58 = vadd.f32 %v7284_v45, %v6932_v7  ;;  %7918 = vmatprep.mubr.bf16.mxu1 %v13259_v5  ;;  %v13257_v5 = vld [vmem:[%s20473_s0 + $0xae8] ss:$72 sps:$4 sm:$0xff]   ;;  %v20871_v37 = vld [vmem:[#allocation65_spill] sm:$0xff]  ;;  %v20873_v27 = vld [vmem:[#allocation66_spill] sm:$0xff] }
 0x3d6   :  { %v6935_v12 = vpop.f32.mrf.mxu0  ;;  %v7286_v54 = vpop.f32.mrf.mxu1 }
 0x3d7   :  { %20866 = vst [vmem:[#allocation62_spill] sm:$0xff] %v17129_v58  ;;  %v6936_v38 = vadd.f32 %v6935_v12, %v20867_v57  ;;  %v17135_v52 = vadd.f32 %v7286_v54, %v6934_v13  ;;  %v13268_v12 = vld [vmem:[%s20473_s0 + $0xb7c] ss:$72 sps:$4 sm:$0xff]  }
 0x3d8   :  { %v6937_v43 = vpop.f32.mrf.mxu0  ;;  %v7288_v35 = vpop.f32.mrf.mxu1 }
 0x3d9   :  { %20868 = vst [vmem:[#allocation63_spill] sm:$0xff] %v17135_v52  ;;  %v6938_v7 = vadd.f32 %v6937_v43, %v20869_v31  ;;  %v17144_v21 = vadd.f32 %v7288_v35, %v6936_v38  ;;  %v13260_v31 = vld [vmem:[%s20473_s0 + $0xb70] ss:$72 sps:$4 sm:$0xff]  }
 0x3da   :  { %v6941_v54 = vpop.f32.mrf.mxu0  ;;  %v7290_v45 = vpop.f32.mrf.mxu1  ;;  %7566 = vmatmul.mubr.bf16.gmra.mxu0 %v13254_v63  ;;  %v20875_v63 = vld [vmem:[#allocation67_spill] sm:$0xff] }
 0x3db   :  { %20870 = vst [vmem:[#allocation64_spill] sm:$0xff] %v17144_v21  ;;  %v6942_v13 = vadd.f32 %v6941_v54, %v20871_v37  ;;  %v17150_v57 = vadd.f32 %v7290_v45, %v6938_v7  ;;  %7575 = vmatprep.mubr.bf16.mxu0 %v13262_v33  ;;  %v13271_v33 = vld [vmem:[%s20473_s0 + $0xc04] ss:$72 sps:$4 sm:$0xff]  }
 0x3dc   :  { %v6943_v52 = vpop.f32.mrf.mxu0  ;;  %v7294_v58 = vpop.f32.mrf.mxu1  ;;  %7919 = vmatmul.mubr.bf16.gmra.mxu1 %v13257_v5  ;;  %v13274_v45 = vld [vmem:[%s20473_s0 + $0xc0c] ss:$72 sps:$4 sm:$0xff]  }
 0x3dd   :  { %20872 = vst [vmem:[#allocation65_spill] sm:$0xff] %v17150_v57  ;;  %v6944_v56 = vadd.f32 %v6943_v52, %v20873_v27  ;;  %v17153_v43 = vadd.f32 %v7294_v58, %v6942_v13  ;;  %7928 = vmatprep.mubr.bf16.mxu1 %v13268_v12  ;;  %v13266_v58 = vld [vmem:[%s20473_s0 + $0xb78] ss:$72 sps:$4 sm:$0xff]   ;;  %v20877_v27 = vld [vmem:[#allocation68_spill] sm:$0xff] }
 0x3de   :  { %v6945_v38 = vpop.f32.mrf.mxu0  ;;  %v7296_v35 = vpop.f32.mrf.mxu1 }
 0x3df   :  { %20874 = vst [vmem:[#allocation66_spill] sm:$0xff] %v17153_v43  ;;  %v6946_v21 = vadd.f32 %v6945_v38, %v20875_v63  ;;  %v17159_v54 = vadd.f32 %v7296_v35, %v6944_v56  ;;  %v13370_v56 = vld [vmem:[%s20475_s3 + $0x10] sm:$0xff]   ;;  %v20879_v38 = vld [vmem:[#allocation69_spill] sm:$0xff] }
 0x3e0   :  { %v6947_v5 = vpop.f32.mrf.mxu0  ;;  %v7298_v7 = vpop.f32.mrf.mxu1  ;;  %8740 = vmatpush1.bf16.msra.mxu1 %v13370_v56 }
 0x3e1   :  { %20876 = vst [vmem:[#allocation67_spill] sm:$0xff] %v17159_v54  ;;  %v6948_v52 = vadd.f32 %v6947_v5, %v20877_v27  ;;  %v17168_v12 = vadd.f32 %v7298_v7, %v6946_v21  ;;  %8741 = vmatprep.subr.bf16.mxu1 %v20802_v25  ;;  %v20881_v7 = vld [vmem:[#allocation70_spill] sm:$0xff] }
 0x3e2   :  { %v6951_v37 = vpop.f32.mrf.mxu0  ;;  %v7300_v13 = vpop.f32.mrf.mxu1  ;;  %7576 = vmatmul.mubr.bf16.gmra.mxu0 %v13260_v31  ;;  %v13269_v31 = vld [vmem:[%s20473_s0 + $0xc00] ss:$72 sps:$4 sm:$0xff]  }
 0x3e3   :  { %20878 = vst [vmem:[#allocation68_spill] sm:$0xff] %v17168_v12  ;;  %v6952_v35 = vadd.f32 %v6951_v37, %v20879_v38  ;;  %v17177_v63 = vadd.f32 %v7300_v13, %v6948_v52  ;;  %7585 = vmatprep.mubr.bf16.mxu0 %v13271_v33  ;;  %v20883_v52 = vld [vmem:[#allocation71_spill] sm:$0xff]  ;;  %v20885_v38 = vld [vmem:[#allocation72_spill] sm:$0xff] }
 0x3e4   :  { %v6953_v5 = vpop.f32.mrf.mxu0  ;;  %v7304_v21 = vpop.f32.mrf.mxu1  ;;  %7929 = vmatmul.mubr.bf16.gmra.mxu1 %v13266_v58  ;;  %v13277_v58 = vld [vmem:[%s20473_s0 + $0xc94] ss:$72 sps:$4 sm:$0xff]  }
 0x3e5   :  { %20880 = vst [vmem:[#allocation69_spill] sm:$0xff] %v17177_v63  ;;  %v6954_v27 = vadd.f32 %v6953_v5, %v20881_v7  ;;  %v17181_v12 = vadd.f32 %v7304_v21, %v6952_v35  ;;  %7938 = vmatprep.mubr.bf16.mxu1 %v13274_v45  ;;  %v13272_v45 = vld [vmem:[%s20473_s0 + $0xc08] ss:$72 sps:$4 sm:$0xff]   ;;  %v20887_v7 = vld [vmem:[#allocation73_spill] sm:$0xff]  ;;  %v20888_v63 = vld [vmem:[#allocation74_spill] sm:$0xff] }
 0x3e6   :  { %v6955_v54 = vpop.f32.mrf.mxu0  ;;  %v7306_v43 = vpop.f32.mrf.mxu1 }
 0x3e7   :  { %20882 = vst [vmem:[#allocation70_spill] sm:$0xff] %v17181_v12  ;;  %v6956_v37 = vadd.f32 %v6955_v54, %v20883_v52  ;;  %v17187_v33 = vadd.f32 %v7306_v43, %v6954_v27  ;;  %v13283_v54 = vld [vmem:[%s20473_s0 + $0xc9c] ss:$72 sps:$4 sm:$0xff]  }
 0x3e8   :  { %v6957_v56 = vpop.f32.mrf.mxu0  ;;  %v7308_v13 = vpop.f32.mrf.mxu1 }
 0x3e9   :  { %20884 = vst [vmem:[#allocation71_spill] sm:$0xff] %v17187_v33  ;;  %v6958_v35 = vadd.f32 %v6957_v56, %v20885_v38  ;;  %v17196_v5 = vadd.f32 %v7308_v13, %v6956_v37  ;;  %v13275_v38 = vld [vmem:[%s20473_s0 + $0xc90] ss:$72 sps:$4 sm:$0xff]  }
 0x3ea   :  { %v6961_v43 = vpop.f32.mrf.mxu0  ;;  %v7310_v21 = vpop.f32.mrf.mxu1  ;;  %7586 = vmatmul.mubr.bf16.gmra.mxu0 %v13269_v31  ;;  %v20889_v31 = vld [vmem:[#allocation75_spill] sm:$0xff] }
 0x3eb   :  { %20886 = vst [vmem:[#allocation72_spill] sm:$0xff] %v17196_v5  ;;  %v6962_v27 = vadd.f32 %v6961_v43, %v20887_v7  ;;  %v17202_v52 = vadd.f32 %v7310_v21, %v6958_v35  ;;  %7595 = vmatprep.mubr.bf16.mxu0 %v13277_v58  ;;  %v13286_v58 = vld [vmem:[%s20473_s0 + $0xd24] ss:$72 sps:$4 sm:$0xff]  }
 0x3ec   :  { %v6963_v33 = vpop.f32.mrf.mxu0  ;;  %v7314_v12 = vpop.f32.mrf.mxu1  ;;  %7939 = vmatmul.mubr.bf16.gmra.mxu1 %v13272_v45 }
 0x3ed   :  { %v6964_v57 = vadd.f32 %v6963_v33, %v20888_v63  ;;  %v17205_v56 = vadd.f32 %v7314_v12, %v6962_v27  ;;  %7948 = vmatprep.mubr.bf16.mxu1 %v13283_v54  ;;  %v13281_v12 = vld [vmem:[%s20473_s0 + $0xc98] ss:$72 sps:$4 sm:$0xff]   ;;  %v13289_v54 = vld [vmem:[%s20473_s0 + $0xd2c] ss:$72 sps:$4 sm:$0xff]  }
 0x3ee   :  { %v6965_v37 = vpop.f32.mrf.mxu0  ;;  %v7316_v13 = vpop.f32.mrf.mxu1  ;;  %v20892_v27 = vld [vmem:[#allocation76_spill] sm:$0xff] }
 0x3ef   :  { %v6966_v5 = vadd.f32 %v6965_v37, %v20889_v31  ;;  %v17211_v43 = vadd.f32 %v7316_v13, %v6964_v57  ;;  %v13377_v57 = vld [vmem:[%s20475_s3 + $0x8] sm:$0xff]   ;;  %v20893_v31 = vld [vmem:[#allocation77_spill] sm:$0xff] }
 0x3f0   :  { %v6967_v45 = vpop.f32.mrf.mxu0  ;;  %v7318_v35 = vpop.f32.mrf.mxu1  ;;  %8742 = vmatpush1.bf16.msra.mxu1 %v13377_v57 }
 0x3f1   :  { %20890 = vst [vmem:[#allocation73_spill] sm:$0xff] %v17211_v43  ;;  %v6968_v63 = vadd.f32 %v6967_v45, %v16340_v49  ;;  %v17220_v33 = vadd.f32 %v7318_v35, %v6966_v5  ;;  %8743 = vmatprep.subr.bf16.mxu1 %v20802_v25 }
 0x3f2   :  { %v6971_v21 = vpop.f32.mrf.mxu0  ;;  %v7320_v7 = vpop.f32.mrf.mxu1  ;;  %7596 = vmatmul.mubr.bf16.gmra.mxu0 %v13275_v38  ;;  %v13284_v38 = vld [vmem:[%s20473_s0 + $0xd20] ss:$72 sps:$4 sm:$0xff]  }
 0x3f3   :  { %20891 = vst [vmem:[#allocation74_spill] sm:$0xff] %v17220_v33  ;;  %v6972_v37 = vadd.f32 %v6971_v21, %v20892_v27  ;;  %v17229_v13 = vadd.f32 %v7320_v7, %v6968_v63  ;;  %7605 = vmatprep.mubr.bf16.mxu0 %v13286_v58 }
 0x3f4   :  { %v6973_v49 = vpop.f32.mrf.mxu0  ;;  %v7324_v5 = vpop.f32.mrf.mxu1  ;;  %7949 = vmatmul.mubr.bf16.gmra.mxu1 %v13281_v12  ;;  %v13292_v12 = vld [vmem:[%s20473_s0 + $0xdb4] ss:$72 sps:$4 sm:$0xff]  }
 0x3f5   :  { %v6974_v45 = vadd.f32 %v6973_v49, %v20893_v31  ;;  %v17233_v35 = vadd.f32 %v7324_v5, %v6972_v37  ;;  %7958 = vmatprep.mubr.bf16.mxu1 %v13289_v54  ;;  %v13287_v54 = vld [vmem:[%s20473_s0 + $0xd28] ss:$72 sps:$4 sm:$0xff]  }
 0x3f6   :  { %v6975_v33 = vpop.f32.mrf.mxu0  ;;  %v7326_v43 = vpop.f32.mrf.mxu1 }
 0x3f7   :  { %v6976_v63 = vadd.f32 %v6975_v33, %v16358_v47  ;;  %v17239_v58 = vadd.f32 %v7326_v43, %v6974_v45  ;;  %v13298_v47 = vld [vmem:[%s20473_s0 + $0xdbc] ss:$72 sps:$4 sm:$0xff]  }
 0x3f8   :  { %v6977_v57 = vpop.f32.mrf.mxu0  ;;  %v7328_v21 = vpop.f32.mrf.mxu1 }
 0x3f9   :  { %v6978_v7 = vadd.f32 %v6977_v57, %v16364_v59  ;;  %v17248_v27 = vadd.f32 %v7328_v21, %v6976_v63  ;;  %v13290_v21 = vld [vmem:[%s20473_s0 + $0xdb0] ss:$72 sps:$4 sm:$0xff]  }
 0x3fa   :  { %v6981_v43 = vpop.f32.mrf.mxu0  ;;  %v7330_v33 = vpop.f32.mrf.mxu1  ;;  %7606 = vmatmul.mubr.bf16.gmra.mxu0 %v13284_v38 }
 0x3fb   :  { %v6982_v37 = vadd.f32 %v6981_v43, %v16367_v15  ;;  %v17254_v49 = vadd.f32 %v7330_v33, %v6978_v7  ;;  %7615 = vmatprep.mubr.bf16.mxu0 %v13292_v12  ;;  %v13301_v12 = vld [vmem:[%s20473_s0 + $0xe44] ss:$72 sps:$4 sm:$0xff]  }
 0x3fc   :  { %v6983_v5 = vpop.f32.mrf.mxu0  ;;  %v7334_v31 = vpop.f32.mrf.mxu1  ;;  %7959 = vmatmul.mubr.bf16.gmra.mxu1 %v13287_v54  ;;  %v13384_v33 = vld [vmem:[%s20475_s3] sm:$0xff]  }
 0x3fd   :  { %v6984_v45 = vadd.f32 %v6983_v5, %v16373_v48  ;;  %v17257_v59 = vadd.f32 %v7334_v31, %v6982_v37  ;;  %7968 = vmatprep.mubr.bf16.mxu1 %v13298_v47  ;;  %v13296_v48 = vld [vmem:[%s20473_s0 + $0xdb8] ss:$72 sps:$4 sm:$0xff]   ;;  %8744 = vmatpush1.bf16.msra.mxu1 %v13384_v33 }
 0x3fe   :  { %v6985_v63 = vpop.f32.mrf.mxu0  ;;  %v7336_v57 = vpop.f32.mrf.mxu1  ;;  %8745 = vmatprep.subr.bf16.mxu1 %v20802_v25 }
 0x3ff   :  { %v6986_v38 = vadd.f32 %v6985_v63, %v16382_v17  ;;  %v17263_v15 = vadd.f32 %v7336_v57, %v6984_v45  ;;  %v13304_v17 = vld [vmem:[%s20473_s0 + $0xe4c] ss:$72 sps:$4 sm:$0xff]  }
 0x400   :  { %v6987_v54 = vpop.f32.mrf.mxu0  ;;  %v7338_v7 = vpop.f32.mrf.mxu1 }
 0x401   :  { %v6988_v47 = vadd.f32 %v6987_v54, %v16387_v9  ;;  %v17272_v43 = vadd.f32 %v7338_v7, %v6986_v38 }
 0x402   :  { %v7340_v37 = vpop.f32.mrf.mxu1  ;;  %v7377_v5 = vpop.f32.mrf.mxu0  ;;  %7616 = vmatmul.mubr.bf16.gmra.mxu0 %v13290_v21  ;;  %v13299_v21 = vld [vmem:[%s20473_s0 + $0xe40] ss:$72 sps:$4 sm:$0xff]  }
 0x403   :  { %v17280_v31 = vadd.f32 %v7340_v37, %v6988_v47  ;;  %v7378_v45 = vadd.f32 %v7377_v5, %v16391_v42  ;;  %7625 = vmatprep.mubr.bf16.mxu0 %v13301_v12 }
 0x404   :  { %v7379_v9 = vpop.f32.mrf.mxu0  ;;  %v7730_v63 = vpop.f32.mrf.mxu1  ;;  %7969 = vmatmul.mubr.bf16.gmra.mxu1 %v13296_v48  ;;  %v13307_v48 = vld [vmem:[%s20473_s0 + $0xed4] ss:$72 sps:$4 sm:$0xff]  }
 0x405   :  { %v7380_v57 = vadd.f32 %v7379_v9, %v16397_v40  ;;  %v17285_v38 = vadd.f32 %v7730_v63, %v7378_v45  ;;  %7978 = vmatprep.mubr.bf16.mxu1 %v13304_v17  ;;  %v13302_v40 = vld [vmem:[%s20473_s0 + $0xe48] ss:$72 sps:$4 sm:$0xff]  }
 0x406   :  { %v7381_v54 = vpop.f32.mrf.mxu0  ;;  %v7732_v7 = vpop.f32.mrf.mxu1 }
 0x407   :  { %v7382_v42 = vadd.f32 %v7381_v54, %v16406_v24  ;;  %v17291_v12 = vadd.f32 %v7732_v7, %v7380_v57  ;;  %v13314_v24 = vld [vmem:[%s20473_s0 + $0xedc] ss:$72 sps:$4 sm:$0xff]  }
 0x408   :  { %v7383_v47 = vpop.f32.mrf.mxu0  ;;  %v7734_v33 = vpop.f32.mrf.mxu1 }
 0x409   :  { %v7384_v17 = vadd.f32 %v7383_v47, %v16412_v26  ;;  %v17300_v37 = vadd.f32 %v7734_v33, %v7382_v42 }
 0x40a   :  { %v7387_v5 = vpop.f32.mrf.mxu0  ;;  %7626 = vmatmul.mubr.bf16.gmra.mxu0 %v13299_v21  ;;  %v7736_v45 = vpop.f32.mrf.mxu1  ;;  %v13305_v21 = vld [vmem:[%s20473_s0 + $0xed0] ss:$72 sps:$4 sm:$0xff]  }
 0x40b   :  { %v7388_v9 = vadd.f32 %v7387_v5, %v16415_v16  ;;  %v17306_v63 = vadd.f32 %v7736_v45, %v7384_v17  ;;  %7635 = vmatprep.mubr.bf16.mxu0 %v13307_v48  ;;  %v13317_v48 = vld [vmem:[%s20473_s0 + $0xf64] ss:$72 sps:$4 sm:$0xff]   ;;  %v13391_v45 = vld [vmem:[%s20475_s3 + $0x78] sm:$0xff]  }
 0x40c   :  { %v7389_v57 = vpop.f32.mrf.mxu0  ;;  %v7740_v54 = vpop.f32.mrf.mxu1  ;;  %7979 = vmatmul.mubr.bf16.gmra.mxu1 %v13302_v40 }
 0x40d   :  { %v7390_v7 = vadd.f32 %v7389_v57, %v16421_v3  ;;  %v17309_v26 = vadd.f32 %v7740_v54, %v7388_v9  ;;  %7988 = vmatprep.mubr.bf16.mxu1 %v13314_v24  ;;  %v13312_v3 = vld [vmem:[%s20473_s0 + $0xed8] ss:$72 sps:$4 sm:$0xff]   ;;  %8746 = vmatpush2.bf16.msra.mxu1 %v13391_v45 }
 0x40e   :  { %v7391_v42 = vpop.f32.mrf.mxu0  ;;  %v7742_v47 = vpop.f32.mrf.mxu1  ;;  %8747 = vmatprep.subr.bf16.mxu1 %v20802_v25 }
 0x40f   :  { %v7392_v33 = vadd.f32 %v7391_v42, %v16430_v4  ;;  %v17315_v16 = vadd.f32 %v7742_v47, %v7390_v7  ;;  %v13320_v4 = vld [vmem:[%s20473_s0 + $0xf6c] ss:$72 sps:$4 sm:$0xff]  }
 0x410   :  { %v7393_v40 = vpop.f32.mrf.mxu0  ;;  %v7744_v17 = vpop.f32.mrf.mxu1 }
 0x411   :  { %v7394_v24 = vadd.f32 %v7393_v40, %v16436_v11  ;;  %v17324_v5 = vadd.f32 %v7744_v17, %v7392_v33 }
 0x412   :  { %v7397_v9 = vpop.f32.mrf.mxu0  ;;  %7636 = vmatmul.mubr.bf16.gmra.mxu0 %v13305_v21  ;;  %v7746_v57 = vpop.f32.mrf.mxu1 }
 0x413   :  { %v7398_v54 = vadd.f32 %v7397_v9, %v16439_v1  ;;  %v17333_v7 = vadd.f32 %v7746_v57, %v7394_v24  ;;  %7645 = vmatprep.mubr.bf16.mxu0 %v13317_v48  ;;  %v13315_v1 = vld [vmem:[%s20473_s0 + $0xf60] ss:$72 sps:$4 sm:$0xff]  }
 0x414   :  { %v7399_v11 = vpop.f32.mrf.mxu0  ;;  %v7750_v42 = vpop.f32.mrf.mxu1  ;;  %7989 = vmatmul.mubr.bf16.gmra.mxu1 %v13312_v3  ;;  %v13323_v3 = vld [vmem:[%s20473_s0 + $0xff4] ss:$72 sps:$4 sm:$0xff]  }
 0x415   :  { %v7400_v47 = vadd.f32 %v7399_v11, %v16445_v23  ;;  %v17337_v33 = vadd.f32 %v7750_v42, %v7398_v54  ;;  %7998 = vmatprep.mubr.bf16.mxu1 %v13320_v4  ;;  %v13318_v23 = vld [vmem:[%s20473_s0 + $0xf68] ss:$72 sps:$4 sm:$0xff]  }
 0x416   :  { %v7401_v40 = vpop.f32.mrf.mxu0  ;;  %v7752_v17 = vpop.f32.mrf.mxu1 }
 0x417   :  { %v7402_v21 = vadd.f32 %v7401_v40, %v16454_v34  ;;  %v17343_v48 = vadd.f32 %v7752_v17, %v7400_v47  ;;  %v13330_v34 = vld [vmem:[%s20473_s0 + $0xffc] ss:$72 sps:$4 sm:$0xff]  }
 0x418   :  { %v7403_v24 = vpop.f32.mrf.mxu0  ;;  %v7754_v45 = vpop.f32.mrf.mxu1 }
 0x419   :  { %v7404_v4 = vadd.f32 %v7403_v24, %v16460_v20  ;;  %v17352_v9 = vadd.f32 %v7754_v45, %v7402_v21 }
 0x41a   :  { %v7407_v57 = vpop.f32.mrf.mxu0  ;;  %7646 = vmatmul.mubr.bf16.gmra.mxu0 %v13315_v1  ;;  %v7756_v54 = vpop.f32.mrf.mxu1  ;;  %v13321_v1 = vld [vmem:[%s20473_s0 + $0xff0] ss:$72 sps:$4 sm:$0xff]  }
 0x41b   :  { %v7408_v11 = vadd.f32 %v7407_v57, %v16463_v22  ;;  %v17358_v42 = vadd.f32 %v7756_v54, %v7404_v4  ;;  %7655 = vmatprep.mubr.bf16.mxu0 %v13323_v3  ;;  %v13333_v3 = vld [vmem:[%s20473_s0 + $0x1084] ss:$72 sps:$4 sm:$0xff]   ;;  %v13398_v54 = vld [vmem:[%s20475_s3 + $0x70] sm:$0xff]  }
 0x41c   :  { %v7409_v47 = vpop.f32.mrf.mxu0  ;;  %v7760_v40 = vpop.f32.mrf.mxu1  ;;  %7999 = vmatmul.mubr.bf16.gmra.mxu1 %v13318_v23 }
 0x41d   :  { %v7410_v17 = vadd.f32 %v7409_v47, %v16469_v46  ;;  %v17361_v20 = vadd.f32 %v7760_v40, %v7408_v11  ;;  %8008 = vmatprep.mubr.bf16.mxu1 %v13330_v34  ;;  %v13328_v46 = vld [vmem:[%s20473_s0 + $0xff8] ss:$72 sps:$4 sm:$0xff]   ;;  %8748 = vmatpush2.bf16.msra.mxu1 %v13398_v54 }
 0x41e   :  { %v7411_v21 = vpop.f32.mrf.mxu0  ;;  %v7762_v24 = vpop.f32.mrf.mxu1  ;;  %8749 = vmatprep.subr.bf16.mxu1 %v20802_v25 }
 0x41f   :  { %v7412_v45 = vadd.f32 %v7411_v21, %v16478_v10  ;;  %v17367_v22 = vadd.f32 %v7762_v24, %v7410_v17  ;;  %v13336_v10 = vld [vmem:[%s20473_s0 + $0x108c] ss:$72 sps:$4 sm:$0xff]  }
 0x420   :  { %v7413_v23 = vpop.f32.mrf.mxu0  ;;  %v7764_v4 = vpop.f32.mrf.mxu1 }
 0x421   :  { %v7414_v34 = vadd.f32 %v7413_v23, %v16484_v60  ;;  %v17376_v57 = vadd.f32 %v7764_v4, %v7412_v45  ;;  %v13339_v23 = vld [vmem:[%s20473_s0 + $0x1114] ss:$72 sps:$4 sm:$0xff]  }
 0x422   :  { %v7417_v11 = vpop.f32.mrf.mxu0  ;;  %7656 = vmatmul.mubr.bf16.gmra.mxu0 %v13321_v1  ;;  %v7766_v47 = vpop.f32.mrf.mxu1 }
 0x423   :  { %v17385_v40 = vadd.f32 %v7417_v11, %v16487_v2  ;;  %v17387_v17 = vadd.f32 %v7766_v47, %v7414_v34  ;;  %7665 = vmatprep.mubr.bf16.mxu0 %v13333_v3  ;;  %v13331_v2 = vld [vmem:[%s20473_s0 + $0x1080] ss:$72 sps:$4 sm:$0xff]  }
 0x424   :  { %v7419_v60 = vpop.f32.mrf.mxu0  ;;  %v17389_v21 = vpop.f32.mrf.mxu1  ;;  %8009 = vmatmul.mubr.bf16.gmra.mxu1 %v13328_v46 }
 0x425   :  { %v17393_v24 = vadd.f32 %v7419_v60, %v16493_v6  ;;  %8018 = vmatprep.mubr.bf16.mxu1 %v13336_v10  ;;  %v13334_v6 = vld [vmem:[%s20473_s0 + $0x1088] ss:$72 sps:$4 sm:$0xff]   ;;  %v13346_v10 = vld [vmem:[%s20473_s0 + $0x111c] ss:$72 sps:$4 sm:$0xff]  }
 0x426   :  { %v7421_v45 = vpop.f32.mrf.mxu0  ;;  %v17395_v1 = vpop.f32.mrf.mxu1 }
 0x427   :  { %v17401_v3 = vadd.f32 %v7421_v45, %v16502_v39 }
 0x428   :  { %v7423_v4 = vpop.f32.mrf.mxu0  ;;  %v17406_v46 = vpop.f32.mrf.mxu1 }
 0x429   :  { %v17412_v34 = vadd.f32 %v7423_v4, %v16508_v14 }
 0x42a   :  { %v7427_v39 = vpop.f32.mrf.mxu0  ;;  %7666 = vmatmul.mubr.bf16.gmra.mxu0 %v13331_v2  ;;  %v17417_v54 = vpop.f32.mrf.mxu1  ;;  %v13337_v2 = vld [vmem:[%s20473_s0 + $0x1110] ss:$72 sps:$4 sm:$0xff]  }
 0x42b   :  { %20894 = vst [vmem:[#allocation75_spill] sm:$0xff] %v17417_v54  ;;  %v17420_v11 = vadd.f32 %v7427_v39, %v16511_v55  ;;  %7675 = vmatprep.mubr.bf16.mxu0 %v13339_v23  ;;  %v13349_v55 = vld [vmem:[%s20473_s0 + $0x11a4] ss:$72 sps:$4 sm:$0xff]  }
 0x42c   :  { %v7429_v47 = vpop.f32.mrf.mxu0  ;;  %v17422_v60 = vpop.f32.mrf.mxu1  ;;  %8019 = vmatmul.mubr.bf16.gmra.mxu1 %v13334_v6  ;;  %v13352_v39 = vld [vmem:[%s20473_s0 + $0x11ac] ss:$72 sps:$4 sm:$0xff]  }
 0x42d   :  { %v17425_v45 = vadd.f32 %v7429_v47, %v16517_v32  ;;  %8028 = vmatprep.mubr.bf16.mxu1 %v13346_v10  ;;  %v13344_v32 = vld [vmem:[%s20473_s0 + $0x1118] ss:$72 sps:$4 sm:$0xff]  }
 0x42e   :  { %v7431_v14 = vpop.f32.mrf.mxu0  ;;  %v17427_v4 = vpop.f32.mrf.mxu1 }
 0x42f   :  { %20895 = vst [vmem:[#allocation76_spill] sm:$0xff] %v17427_v4  ;;  %v17433_v54 = vadd.f32 %v7431_v14, %v16526_v19  ;;  %v13405_v19 = vld [vmem:[%s20475_s3 + $0x68] sm:$0xff]  }
 0x430   :  { %v7433_v23 = vpop.f32.mrf.mxu0  ;;  %v17438_v6 = vpop.f32.mrf.mxu1  ;;  %8750 = vmatpush2.bf16.msra.mxu1 %v13405_v19 }
 0x431   :  { %20896 = vst [vmem:[#allocation77_spill] sm:$0xff] %v17433_v54  ;;  %20897 = vst [vmem:[#allocation85_spill] sm:$0xff] %v17438_v6  ;;  %v17444_v10 = vadd.f32 %v7433_v23, %v16532_v41  ;;  %8751 = vmatprep.subr.bf16.mxu1 %v20802_v25 }
 0x432   :  { %v7437_v47 = vpop.f32.mrf.mxu0  ;;  %7676 = vmatmul.mubr.bf16.gmra.mxu0 %v13337_v2  ;;  %v17452_v14 = vpop.f32.mrf.mxu1 }
 0x433   :  { %20898 = vst [vmem:[#allocation86_spill] sm:$0xff] %v17444_v10  ;;  %v17455_v6 = vadd.f32 %v7437_v47, %v16535_v62  ;;  %7685 = vmatprep.mubr.bf16.mxu0 %v13349_v55  ;;  %v13347_v62 = vld [vmem:[%s20473_s0 + $0x11a0] ss:$72 sps:$4 sm:$0xff]   ;;  %v13355_v55 = vld [vmem:[%s20473_s0 + $0x44] ss:$72 sps:$4 sm:$0xff]  }
 0x434   :  { %v7439_v54 = vpop.f32.mrf.mxu0  ;;  %v17457_v41 = vpop.f32.mrf.mxu1  ;;  %8029 = vmatmul.mubr.bf16.gmra.mxu1 %v13344_v32 }
 0x435   :  { %v17461_v23 = vadd.f32 %v7439_v54, %v16541_v61  ;;  %8038 = vmatprep.mubr.bf16.mxu1 %v13352_v39  ;;  %v13350_v61 = vld [vmem:[%s20473_s0 + $0x11a8] ss:$72 sps:$4 sm:$0xff]  }
 0x436   :  { %v7441_v10 = vpop.f32.mrf.mxu0  ;;  %v17463_v4 = vpop.f32.mrf.mxu1 }
 0x437   :  { %20899 = vst [vmem:[#allocation87_spill] sm:$0xff] %v17461_v23  ;;  %20900 = vst [vmem:[#allocation88_spill] sm:$0xff] %v17463_v4  ;;  %v17469_v2 = vadd.f32 %v7441_v10, %v16550_v53 }
 0x438   :  { %v7443_v32 = vpop.f32.mrf.mxu0  ;;  %v17474_v19 = vpop.f32.mrf.mxu1 }
 0x439   :  { %20901 = vst [vmem:[#allocation89_spill] sm:$0xff] %v17469_v2  ;;  %20902 = vst [vmem:[#allocation90_spill] sm:$0xff] %v17474_v19  ;;  %v17480_v54 = vadd.f32 %v7443_v32, %v16556_v36  ;;  %v13353_v36 = vld [vmem:[%s20473_s0 + $0x40] ss:$72 sps:$4 sm:$0xff]  }
 0x43a   :  { %v7447_v39 = vpop.f32.mrf.mxu0  ;;  %7686 = vmatmul.mubr.bf16.gmra.mxu0 %v13347_v62  ;;  %v17482_v47 = vpop.f32.mrf.mxu1 }
 0x43b   :  { %v17485_v53 = vadd.f32 %v7447_v39, %v16559_v18  ;;  %8081 = vmatprep.mubr.bf16.mxu0 %v13355_v55  ;;  %v13359_v18 = vld [vmem:[%s20473_s0 + $0xd4] ss:$72 sps:$4 sm:$0xff]  }
 0x43c   :  { %v7449_v10 = vpop.f32.mrf.mxu0  ;;  %v17487_v2 = vpop.f32.mrf.mxu1  ;;  %8039 = vmatmul.mubr.bf16.gmra.mxu1 %v13350_v61  ;;  %v13412_v61 = vld [vmem:[%s20475_s3 + $0x60] sm:$0xff]  }
 0x43d   :  { %v17490_v19 = vadd.f32 %v7449_v10, %v16565_v29  ;;  %8752 = vmatpush2.bf16.msra.mxu1 %v13412_v61 }
 0x43e   :  { %v7451_v4 = vpop.f32.mrf.mxu0  ;;  %v17492_v23 = vpop.f32.mrf.mxu1  ;;  %8753 = vmatprep.subr.bf16.mxu1 %v20802_v25 }
 0x43f   :  { %v17498_v62 = vadd.f32 %v7451_v4, %v16580_v8 }
 0x440   :  { %v7453_v55 = vpop.f32.mrf.mxu0  ;;  %v17503_v32 = vpop.f32.mrf.mxu1 }
 0x441   :  { %20903 = vst [vmem:[#allocation91_spill] sm:$0xff] %v17498_v62  ;;  %v17506_v29 = vadd.f32 %v7453_v55, %v16586_v30 }
 0x442   :  { %v7457_v39 = vpop.f32.mrf.mxu0  ;;  %v17511_v10 = vpop.f32.mrf.mxu1  ;;  %8082 = vmatmul.mubr.bf16.vlgmr.msra.gmra.mxu0 %v13353_v36  ;;  %v13357_v36 = vld [vmem:[%s20473_s0 + $0xd0] ss:$72 sps:$4 sm:$0xff]  }
 0x443   :  { %20904 = vst [vmem:[#allocation92_spill] sm:$0xff] %v17506_v29  ;;  %20905 = vst [vmem:[#allocation93_spill] sm:$0xff] %v17511_v10  ;;  %v17514_v8 = vadd.f32 %v7457_v39, %v16595_v50  ;;  %8091 = vmatprep.mubr.bf16.mxu0 %v13359_v18  ;;  %v13362_v18 = vld [vmem:[%s20473_s0 + $0x164] ss:$72 sps:$4 sm:$0xff]  }
 0x444   :  { %v7459_v4 = vpop.f32.mrf.mxu0  ;;  %v17516_v62 = vpop.f32.mrf.mxu1 }
 0x445   :  { %20906 = vst [vmem:[#allocation94_spill] sm:$0xff] %v17514_v8  ;;  %20907 = vst [vmem:[#allocation95_spill] sm:$0xff] %v17516_v62  ;;  %v17520_v30 = vadd.f32 %v7459_v4, %v16601_v51 }
 0x446   :  { %v7461_v55 = vpop.f32.mrf.mxu0  ;;  %v17522_v29 = vpop.f32.mrf.mxu1 }
 0x447   :  { %20908 = vst [vmem:[#allocation96_spill] sm:$0xff] %v17520_v30  ;;  %20909 = vst [vmem:[#allocation97_spill] sm:$0xff] %v17522_v29  ;;  %v17528_v50 = vadd.f32 %v7461_v55, %v16616_v0 }
 0x448   :  { %v7463_v61 = vpop.f32.mrf.mxu0  ;;  %v17533_v39 = vpop.f32.mrf.mxu1 }
 0x449   :  { %20910 = vst [vmem:[#allocation98_spill] sm:$0xff] %v17528_v50  ;;  %20911 = vst [vmem:[#allocation99_spill] sm:$0xff] %v17533_v39  ;;  %v17536_v51 = vadd.f32 %v7463_v61, %v16622_v44  ;;  %v20916_v50 = vld [vmem:[#allocation78_spill] sm:$0xff]  ;;  %v20919_v61 = vld [vmem:[#allocation79_spill] sm:$0xff] }
 0x44a   :  { %v7467_v4 = vpop.f32.mrf.mxu0  ;;  %v17538_v30 = vpop.f32.mrf.mxu1  ;;  %8092 = vmatmul.mubr.bf16.gmra.mxu0 %v13357_v36  ;;  %v13360_v44 = vld [vmem:[%s20473_s0 + $0x160] ss:$72 sps:$4 sm:$0xff]  }
 0x44b   :  { %20912 = vst [vmem:[#allocation100_spill] sm:$0xff] %v17536_v51  ;;  %20913 = vst [vmem:[#allocation101_spill] sm:$0xff] %v17538_v30  ;;  %v17541_v29 = vadd.f32 %v7467_v4, %v16631_v28  ;;  %8101 = vmatprep.mubr.bf16.mxu0 %v13362_v18  ;;  %v13366_v28 = vld [vmem:[%s20473_s0 + $0x1f4] ss:$72 sps:$4 sm:$0xff]  }
 0x44c   :  { %v7469_v0 = vpop.f32.mrf.mxu0  ;;  %v17543_v55 = vpop.f32.mrf.mxu1  ;;  %v20922_v4 = vld [vmem:[#allocation80_spill] sm:$0xff] }
 0x44d   :  { %20914 = vst [vmem:[#allocation102_spill] sm:$0xff] %v17541_v29  ;;  %20915 = vst [vmem:[#allocation103_spill] sm:$0xff] %v17543_v55  ;;  %v17546_v62 = vadd.f32 %v7469_v0, %v20916_v50  ;;  %v13419_v0 = vld [vmem:[%s20475_s3 + $0x58] sm:$0xff]  }
 0x44e   :  { %v7471_v8 = vpop.f32.mrf.mxu0  ;;  %v17548_v10 = vpop.f32.mrf.mxu1  ;;  %8754 = vmatpush2.bf16.msra.mxu1 %v13419_v0 }
 0x44f   :  { %20917 = vst [vmem:[#allocation78_spill] sm:$0xff] %v17546_v62  ;;  %20918 = vst [vmem:[#allocation104_spill] sm:$0xff] %v17548_v10  ;;  %v17554_v30 = vadd.f32 %v7471_v8, %v20919_v61  ;;  %v20925_v8 = vld [vmem:[#allocation84_spill] sm:$0xff]  ;;  %8755 = vmatprep.subr.bf16.mxu1 %v20802_v25 }
 0x450   :  { %v7473_v36 = vpop.f32.mrf.mxu0  ;;  %v17559_v18 = vpop.f32.mrf.mxu1 }
 0x451   :  { %20920 = vst [vmem:[#allocation79_spill] sm:$0xff] %v17554_v30  ;;  %20921 = vst [vmem:[#allocation105_spill] sm:$0xff] %v17559_v18  ;;  %v17562_v50 = vadd.f32 %v7473_v36, %v20922_v4  ;;  %v20928_v36 = vld [vmem:[#allocation81_spill] sm:$0xff] }
 0x452   :  { %v7477_v10 = vpop.f32.mrf.mxu0  ;;  %v17567_v62 = vpop.f32.mrf.mxu1  ;;  %8102 = vmatmul.mubr.bf16.gmra.mxu0 %v13360_v44  ;;  %v13364_v44 = vld [vmem:[%s20473_s0 + $0x1f0] ss:$72 sps:$4 sm:$0xff]  }
 0x453   :  { %20923 = vst [vmem:[#allocation80_spill] sm:$0xff] %v17562_v50  ;;  %20924 = vst [vmem:[#allocation106_spill] sm:$0xff] %v17567_v62  ;;  %v17570_v61 = vadd.f32 %v7477_v10, %v20925_v8  ;;  %8111 = vmatprep.mubr.bf16.mxu0 %v13366_v28  ;;  %v20931_v62 = vld [vmem:[#allocation82_spill] sm:$0xff] }
 0x454   :  { %v7479_v30 = vpop.f32.mrf.mxu0  ;;  %v17572_v55 = vpop.f32.mrf.mxu1  ;;  %v13369_v28 = vld [vmem:[%s20473_s0 + $0x284] ss:$72 sps:$4 sm:$0xff]  }
 0x455   :  { %20926 = vst [vmem:[#allocation84_spill] sm:$0xff] %v17570_v61  ;;  %20927 = vst [vmem:[#allocation107_spill] sm:$0xff] %v17572_v55  ;;  %v17576_v4 = vadd.f32 %v7479_v30, %v20928_v36  ;;  %v20934_v55 = vld [vmem:[#allocation2_spill] sm:$0xff] }
 0x456   :  { %v7481_v50 = vpop.f32.mrf.mxu0  ;;  %v17578_v18 = vpop.f32.mrf.mxu1 }
 0x457   :  { %20929 = vst [vmem:[#allocation81_spill] sm:$0xff] %v17576_v4  ;;  %20930 = vst [vmem:[#allocation108_spill] sm:$0xff] %v17578_v18  ;;  %v17584_v10 = vadd.f32 %v7481_v50, %v20931_v62  ;;  %v20937_v18 = vld [vmem:[#allocation3_spill] sm:$0xff] }
 0x458   :  { %v7483_v0 = vpop.f32.mrf.mxu0  ;;  %v17589_v8 = vpop.f32.mrf.mxu1 }
 0x459   :  { %20932 = vst [vmem:[#allocation82_spill] sm:$0xff] %v17584_v10  ;;  %20933 = vst [vmem:[#allocation109_spill] sm:$0xff] %v17589_v8  ;;  %v17592_v30 = vadd.f32 %v7483_v0, %v20934_v55  ;;  %v20940_v10 = vld [vmem:[#allocation4_spill] sm:$0xff]  ;;  %v13367_v55 = vld [vmem:[%s20473_s0 + $0x280] ss:$72 sps:$4 sm:$0xff]  }
 0x45a   :  { %v7487_v36 = vpop.f32.mrf.mxu0  ;;  %v17594_v4 = vpop.f32.mrf.mxu1  ;;  %8112 = vmatmul.mubr.bf16.gmra.mxu0 %v13364_v44  ;;  %v20943_v0 = vld [vmem:[#allocation5_spill] sm:$0xff] }
 0x45b   :  { %20935 = vst [vmem:[#allocation2_spill] sm:$0xff] %v17592_v30  ;;  %20936 = vst [vmem:[#allocation110_spill] sm:$0xff] %v17594_v4  ;;  %v17597_v61 = vadd.f32 %v7487_v36, %v20937_v18  ;;  %8121 = vmatprep.mubr.bf16.mxu0 %v13369_v28  ;;  %v13373_v18 = vld [vmem:[%s20473_s0 + $0x314] ss:$72 sps:$4 sm:$0xff]   ;;  %v20946_v36 = vld [vmem:[#allocation6_spill] sm:$0xff] }
 0x45c   :  { %v7489_v62 = vpop.f32.mrf.mxu0  ;;  %v17599_v50 = vpop.f32.mrf.mxu1 }
 0x45d   :  { %20938 = vst [vmem:[#allocation3_spill] sm:$0xff] %v17597_v61  ;;  %20939 = vst [vmem:[#allocation111_spill] sm:$0xff] %v17599_v50  ;;  %v17602_v29 = vadd.f32 %v7489_v62, %v20940_v10  ;;  %v13426_v62 = vld [vmem:[%s20475_s3 + $0x50] sm:$0xff]  }
 0x45e   :  { %v7491_v51 = vpop.f32.mrf.mxu0  ;;  %v17604_v39 = vpop.f32.mrf.mxu1  ;;  %8756 = vmatpush2.bf16.msra.mxu1 %v13426_v62 }
 0x45f   :  { %20941 = vst [vmem:[#allocation4_spill] sm:$0xff] %v17602_v29  ;;  %20942 = vst [vmem:[#allocation112_spill] sm:$0xff] %v17604_v39  ;;  %v17610_v4 = vadd.f32 %v7491_v51, %v20943_v0  ;;  %v20949_v51 = vld [vmem:[#allocation83_spill] sm:$0xff]  ;;  %8757 = vmatprep.subr.bf16.mxu1 %v20802_v25 }
 0x460   :  { %v7493_v44 = vpop.f32.mrf.mxu0  ;;  %v17615_v28 = vpop.f32.mrf.mxu1 }
 0x461   :  { %20944 = vst [vmem:[#allocation5_spill] sm:$0xff] %v17610_v4  ;;  %20945 = vst [vmem:[#allocation113_spill] sm:$0xff] %v17615_v28  ;;  %v17618_v10 = vadd.f32 %v7493_v44, %v20946_v36  ;;  %v20952_v44 = vld [vmem:[#allocation7_spill] sm:$0xff] }
 0x462   :  { %v7497_v39 = vpop.f32.mrf.mxu0  ;;  %v17623_v29 = vpop.f32.mrf.mxu1  ;;  %8122 = vmatmul.mubr.bf16.gmra.mxu0 %v13367_v55  ;;  %v13371_v55 = vld [vmem:[%s20473_s0 + $0x310] ss:$72 sps:$4 sm:$0xff]  }
 0x463   :  { %20947 = vst [vmem:[#allocation6_spill] sm:$0xff] %v17618_v10  ;;  %20948 = vst [vmem:[#allocation114_spill] sm:$0xff] %v17623_v29  ;;  %v17626_v0 = vadd.f32 %v7497_v39, %v20949_v51  ;;  %8131 = vmatprep.mubr.bf16.mxu0 %v13373_v18  ;;  %v20955_v29 = vld [vmem:[#allocation8_spill] sm:$0xff]  ;;  %v13376_v18 = vld [vmem:[%s20473_s0 + $0x3a4] ss:$72 sps:$4 sm:$0xff]  }
 0x464   :  { %v7499_v4 = vpop.f32.mrf.mxu0  ;;  %v17628_v50 = vpop.f32.mrf.mxu1 }
 0x465   :  { %20950 = vst [vmem:[#allocation83_spill] sm:$0xff] %v17626_v0  ;;  %20951 = vst [vmem:[#allocation115_spill] sm:$0xff] %v17628_v50  ;;  %v17632_v36 = vadd.f32 %v7499_v4, %v20952_v44  ;;  %v20957_v50 = vld [vmem:[#allocation9_spill] sm:$0xff] }
 0x466   :  { %v7501_v10 = vpop.f32.mrf.mxu0  ;;  %v17634_v28 = vpop.f32.mrf.mxu1 }
 0x467   :  { %20953 = vst [vmem:[#allocation7_spill] sm:$0xff] %v17632_v36  ;;  %20954 = vst [vmem:[#allocation116_spill] sm:$0xff] %v17634_v28  ;;  %v17640_v39 = vadd.f32 %v7501_v10, %v20955_v29  ;;  %v20960_v28 = vld [vmem:[#allocation10_spill] sm:$0xff] }
 0x468   :  { %v7503_v62 = vpop.f32.mrf.mxu0  ;;  %v17645_v51 = vpop.f32.mrf.mxu1 }
 0x469   :  { %20956 = vst [vmem:[#allocation8_spill] sm:$0xff] %v17640_v39  ;;  %v17648_v4 = vadd.f32 %v7503_v62, %v20957_v50  ;;  %v20963_v39 = vld [vmem:[#allocation11_spill] sm:$0xff]  ;;  %v20966_v62 = vld [vmem:[#allocation12_spill] sm:$0xff] }
 0x46a   :  { %v7507_v44 = vpop.f32.mrf.mxu0  ;;  %v17650_v36 = vpop.f32.mrf.mxu1  ;;  %8132 = vmatmul.mubr.bf16.gmra.mxu0 %v13371_v55  ;;  %v13374_v50 = vld [vmem:[%s20473_s0 + $0x3a0] ss:$72 sps:$4 sm:$0xff]  }
 0x46b   :  { %20958 = vst [vmem:[#allocation9_spill] sm:$0xff] %v17648_v4  ;;  %20959 = vst [vmem:[#allocation117_spill] sm:$0xff] %v17650_v36  ;;  %v17653_v0 = vadd.f32 %v7507_v44, %v20960_v28  ;;  %8141 = vmatprep.mubr.bf16.mxu0 %v13376_v18  ;;  %v13380_v28 = vld [vmem:[%s20473_s0 + $0x434] ss:$72 sps:$4 sm:$0xff]  }
 0x46c   :  { %v7509_v29 = vpop.f32.mrf.mxu0  ;;  %v17655_v10 = vpop.f32.mrf.mxu1  ;;  %v20969_v44 = vld [vmem:[#allocation13_spill] sm:$0xff] }
 0x46d   :  { %20961 = vst [vmem:[#allocation10_spill] sm:$0xff] %v17653_v0  ;;  %20962 = vst [vmem:[#allocation118_spill] sm:$0xff] %v17655_v10  ;;  %v17658_v61 = vadd.f32 %v7509_v29, %v20963_v39  ;;  %v13433_v29 = vld [vmem:[%s20475_s3 + $0x48] sm:$0xff]  }
 0x46e   :  { %v7511_v30 = vpop.f32.mrf.mxu0  ;;  %v17660_v8 = vpop.f32.mrf.mxu1  ;;  %8758 = vmatpush2.bf16.msra.mxu1 %v13433_v29 }
 0x46f   :  { %20964 = vst [vmem:[#allocation11_spill] sm:$0xff] %v17658_v61  ;;  %20965 = vst [vmem:[#allocation119_spill] sm:$0xff] %v17660_v8  ;;  %v17666_v36 = vadd.f32 %v7511_v30, %v20966_v62  ;;  %v20972_v30 = vld [vmem:[#allocation14_spill] sm:$0xff]  ;;  %8759 = vmatprep.subr.bf16.mxu1 %v20802_v25  ;;  %v20981_v25 = vld [vmem:[#allocation17_spill] sm:$0xff] }
 0x470   :  { %v7513_v55 = vpop.f32.mrf.mxu0  ;;  %v17671_v18 = vpop.f32.mrf.mxu1 }
 0x471   :  { %20967 = vst [vmem:[#allocation12_spill] sm:$0xff] %v17666_v36  ;;  %20968 = vst [vmem:[#allocation120_spill] sm:$0xff] %v17671_v18  ;;  %v17674_v39 = vadd.f32 %v7513_v55, %v20969_v44  ;;  %v20975_v55 = vld [vmem:[#allocation15_spill] sm:$0xff] }
 0x472   :  { %v7517_v8 = vpop.f32.mrf.mxu0  ;;  %v17679_v61 = vpop.f32.mrf.mxu1  ;;  %8142 = vmatmul.mubr.bf16.gmra.mxu0 %v13374_v50  ;;  %v13378_v50 = vld [vmem:[%s20473_s0 + $0x430] ss:$72 sps:$4 sm:$0xff]  }
 0x473   :  { %20970 = vst [vmem:[#allocation13_spill] sm:$0xff] %v17674_v39  ;;  %20971 = vst [vmem:[#allocation121_spill] sm:$0xff] %v17679_v61  ;;  %v17682_v62 = vadd.f32 %v7517_v8, %v20972_v30  ;;  %8151 = vmatprep.mubr.bf16.mxu0 %v13380_v28  ;;  %v20978_v61 = vld [vmem:[#allocation16_spill] sm:$0xff]  ;;  %v13383_v28 = vld [vmem:[%s20473_s0 + $0x4c4] ss:$72 sps:$4 sm:$0xff]  }
 0x474   :  { %v7519_v36 = vpop.f32.mrf.mxu0  ;;  %v17684_v10 = vpop.f32.mrf.mxu1 }
 0x475   :  { %20973 = vst [vmem:[#allocation14_spill] sm:$0xff] %v17682_v62  ;;  %20974 = vst [vmem:[#allocation122_spill] sm:$0xff] %v17684_v10  ;;  %v17688_v44 = vadd.f32 %v7519_v36, %v20975_v55 }
 0x476   :  { %v7521_v39 = vpop.f32.mrf.mxu0  ;;  %v17690_v18 = vpop.f32.mrf.mxu1 }
 0x477   :  { %20976 = vst [vmem:[#allocation15_spill] sm:$0xff] %v17688_v44  ;;  %20977 = vst [vmem:[#allocation123_spill] sm:$0xff] %v17690_v18  ;;  %v17696_v8 = vadd.f32 %v7521_v39, %v20978_v61  ;;  %v20984_v18 = vld [vmem:[#allocation18_spill] sm:$0xff] }
 0x478   :  { %v7523_v29 = vpop.f32.mrf.mxu0  ;;  %v17701_v30 = vpop.f32.mrf.mxu1 }
 0x479   :  { %20979 = vst [vmem:[#allocation16_spill] sm:$0xff] %v17696_v8  ;;  %20980 = vst [vmem:[#allocation124_spill] sm:$0xff] %v17701_v30  ;;  %v17704_v36 = vadd.f32 %v7523_v29, %v20981_v25  ;;  %v20987_v8 = vld [vmem:[#allocation19_spill] sm:$0xff]  ;;  %v20990_v25 = vld [vmem:[#allocation20_spill] sm:$0xff] }
 0x47a   :  { %v7527_v55 = vpop.f32.mrf.mxu0  ;;  %v17706_v44 = vpop.f32.mrf.mxu1  ;;  %8152 = vmatmul.mubr.bf16.gmra.mxu0 %v13378_v50  ;;  %v13381_v29 = vld [vmem:[%s20473_s0 + $0x4c0] ss:$72 sps:$4 sm:$0xff]  }
 0x47b   :  { %20982 = vst [vmem:[#allocation17_spill] sm:$0xff] %v17704_v36  ;;  %20983 = vst [vmem:[#allocation125_spill] sm:$0xff] %v17706_v44  ;;  %v17709_v10 = vadd.f32 %v7527_v55, %v20984_v18  ;;  %8161 = vmatprep.mubr.bf16.mxu0 %v13383_v28  ;;  %v13387_v18 = vld [vmem:[%s20473_s0 + $0x554] ss:$72 sps:$4 sm:$0xff]  }
 0x47c   :  { %v7529_v61 = vpop.f32.mrf.mxu0  ;;  %v17711_v39 = vpop.f32.mrf.mxu1  ;;  %v20993_v55 = vld [vmem:[#allocation21_spill] sm:$0xff] }
 0x47d   :  { %20985 = vst [vmem:[#allocation18_spill] sm:$0xff] %v17709_v10  ;;  %20986 = vst [vmem:[#allocation126_spill] sm:$0xff] %v17711_v39  ;;  %v17714_v62 = vadd.f32 %v7529_v61, %v20987_v8  ;;  %v13440_v61 = vld [vmem:[%s20475_s3 + $0x40] sm:$0xff]  }
 0x47e   :  { %v7531_v0 = vpop.f32.mrf.mxu0  ;;  %v17716_v4 = vpop.f32.mrf.mxu1  ;;  %8760 = vmatpush2.bf16.msra.mxu1 %v13440_v61 }
 0x47f   :  { %20988 = vst [vmem:[#allocation19_spill] sm:$0xff] %v17714_v62  ;;  %20989 = vst [vmem:[#allocation127_spill] sm:$0xff] %v17716_v4  ;;  %v17722_v44 = vadd.f32 %v7531_v0, %v20990_v25  ;;  %v20996_v0 = vld [vmem:[#allocation22_spill] sm:$0xff] }
 0x480   :  { %v7533_v50 = vpop.f32.mrf.mxu0  ;;  %v17727_v28 = vpop.f32.mrf.mxu1 }
 0x481   :  { %20991 = vst [vmem:[#allocation20_spill] sm:$0xff] %v17722_v44  ;;  %20992 = vst [vmem:[#allocation128_spill] sm:$0xff] %v17727_v28  ;;  %v17730_v8 = vadd.f32 %v7533_v50, %v20993_v55  ;;  %v20999_v28 = vld [vmem:[#allocation23_spill] sm:$0xff] }
 0x482   :  { %v7537_v4 = vpop.f32.mrf.mxu0  ;;  %v17735_v62 = vpop.f32.mrf.mxu1  ;;  %8162 = vmatmul.mubr.bf16.gmra.mxu0 %v13381_v29 }
 0x483   :  { %20994 = vst [vmem:[#allocation21_spill] sm:$0xff] %v17730_v8  ;;  %20995 = vst [vmem:[#allocation129_spill] sm:$0xff] %v17735_v62  ;;  %v17738_v25 = vadd.f32 %v7537_v4, %v20996_v0  ;;  %8171 = vmatprep.mubr.bf16.mxu0 %v13387_v18  ;;  %v13385_v8 = vld [vmem:[%s20473_s0 + $0x550] ss:$72 sps:$4 sm:$0xff]   ;;  %v13390_v4 = vld [vmem:[%s20473_s0 + $0x5e4] ss:$72 sps:$4 sm:$0xff]  }
 0x484   :  { %v7539_v44 = vpop.f32.mrf.mxu0  ;;  %v17740_v39 = vpop.f32.mrf.mxu1  ;;  %v21002_v62 = vld [vmem:[#allocation24_spill] sm:$0xff]  ;;  %v21005_v0 = vld [vmem:[#allocation25_spill] sm:$0xff] }
 0x485   :  { %20997 = vst [vmem:[#allocation22_spill] sm:$0xff] %v17738_v25  ;;  %20998 = vst [vmem:[#allocation130_spill] sm:$0xff] %v17740_v39  ;;  %v17743_v10 = vadd.f32 %v7539_v44, %v20999_v28 }
 0x486   :  { %v7541_v50 = vpop.f32.mrf.mxu0  ;;  %v17745_v55 = vpop.f32.mrf.mxu1 }
 0x487   :  { %21000 = vst [vmem:[#allocation23_spill] sm:$0xff] %v17743_v10  ;;  %21001 = vst [vmem:[#allocation131_spill] sm:$0xff] %v17745_v55  ;;  %v17751_v29 = vadd.f32 %v7541_v50, %v21002_v62  ;;  %v21008_v55 = vld [vmem:[#allocation26_spill] sm:$0xff] }
 0x488   :  { %v7543_v18 = vpop.f32.mrf.mxu0  ;;  %v17756_v61 = vpop.f32.mrf.mxu1 }
 0x489   :  { %21003 = vst [vmem:[#allocation24_spill] sm:$0xff] %v17751_v29  ;;  %21004 = vst [vmem:[#allocation132_spill] sm:$0xff] %v17756_v61  ;;  %v17759_v44 = vadd.f32 %v7543_v18, %v21005_v0  ;;  %v21011_v29 = vld [vmem:[#allocation27_spill] sm:$0xff]  ;;  %v21014_v0 = vld [vmem:[#allocation28_spill] sm:$0xff] }
 0x48a   :  { %v7547_v28 = vpop.f32.mrf.mxu0  ;;  %v17761_v10 = vpop.f32.mrf.mxu1  ;;  %8172 = vmatmul.mubr.bf16.gmra.mxu0 %v13385_v8  ;;  %v13388_v18 = vld [vmem:[%s20473_s0 + $0x5e0] ss:$72 sps:$4 sm:$0xff]   ;;  %v13394_v8 = vld [vmem:[%s20473_s0 + $0x674] ss:$72 sps:$4 sm:$0xff]  }
 0x48b   :  { %21006 = vst [vmem:[#allocation25_spill] sm:$0xff] %v17759_v44  ;;  %21007 = vst [vmem:[#allocation133_spill] sm:$0xff] %v17761_v10  ;;  %v17764_v39 = vadd.f32 %v7547_v28, %v21008_v55  ;;  %8181 = vmatprep.mubr.bf16.mxu0 %v13390_v4  ;;  %v21017_v28 = vld [vmem:[#allocation29_spill] sm:$0xff] }
 0x48c   :  { %v7549_v62 = vpop.f32.mrf.mxu0  ;;  %v17766_v50 = vpop.f32.mrf.mxu1 }
 0x48d   :  { %21009 = vst [vmem:[#allocation26_spill] sm:$0xff] %v17764_v39  ;;  %21010 = vst [vmem:[#allocation134_spill] sm:$0xff] %v17766_v50  ;;  %v17769_v25 = vadd.f32 %v7549_v62, %v21011_v29 }
 0x48e   :  { %v7551_v36 = vpop.f32.mrf.mxu0  ;;  %v17771_v30 = vpop.f32.mrf.mxu1 }
 0x48f   :  { %21012 = vst [vmem:[#allocation27_spill] sm:$0xff] %v17769_v25  ;;  %21013 = vst [vmem:[#allocation135_spill] sm:$0xff] %v17771_v30  ;;  %v17777_v10 = vadd.f32 %v7551_v36, %v21014_v0  ;;  %v21020_v30 = vld [vmem:[#allocation30_spill] sm:$0xff] }
 0x490   :  { %v7553_v55 = vpop.f32.mrf.mxu0  ;;  %v17782_v4 = vpop.f32.mrf.mxu1 }
 0x491   :  { %21015 = vst [vmem:[#allocation28_spill] sm:$0xff] %v17777_v10  ;;  %21016 = vst [vmem:[#allocation136_spill] sm:$0xff] %v17782_v4  ;;  %v17785_v29 = vadd.f32 %v7553_v55, %v21017_v28  ;;  %v21023_v10 = vld [vmem:[#allocation31_spill] sm:$0xff]  ;;  %v13392_v55 = vld [vmem:[%s20473_s0 + $0x670] ss:$72 sps:$4 sm:$0xff]  }
 0x492   :  { %v7557_v62 = vpop.f32.mrf.mxu0  ;;  %v17787_v25 = vpop.f32.mrf.mxu1  ;;  %8182 = vmatmul.mubr.bf16.gmra.mxu0 %v13388_v18  ;;  %v21026_v28 = vld [vmem:[#allocation32_spill] sm:$0xff] }
 0x493   :  { %21018 = vst [vmem:[#allocation29_spill] sm:$0xff] %v17785_v29  ;;  %21019 = vst [vmem:[#allocation137_spill] sm:$0xff] %v17787_v25  ;;  %v17790_v50 = vadd.f32 %v7557_v62, %v21020_v30  ;;  %8191 = vmatprep.mubr.bf16.mxu0 %v13394_v8  ;;  %v13397_v30 = vld [vmem:[%s20473_s0 + $0x704] ss:$72 sps:$4 sm:$0xff]   ;;  %v21029_v62 = vld [vmem:[#allocation33_spill] sm:$0xff] }
 0x494   :  { %v7559_v36 = vpop.f32.mrf.mxu0  ;;  %v17792_v0 = vpop.f32.mrf.mxu1 }
 0x495   :  { %21021 = vst [vmem:[#allocation30_spill] sm:$0xff] %v17790_v50  ;;  %21022 = vst [vmem:[#allocation138_spill] sm:$0xff] %v17792_v0  ;;  %v17795_v39 = vadd.f32 %v7559_v36, %v21023_v10 }
 0x496   :  { %v7561_v44 = vpop.f32.mrf.mxu0  ;;  %v17797_v61 = vpop.f32.mrf.mxu1 }
 0x497   :  { %21024 = vst [vmem:[#allocation31_spill] sm:$0xff] %v17795_v39  ;;  %21025 = vst [vmem:[#allocation139_spill] sm:$0xff] %v17797_v61  ;;  %v17803_v25 = vadd.f32 %v7561_v44, %v21026_v28  ;;  %v21032_v61 = vld [vmem:[#allocation34_spill] sm:$0xff] }
 0x498   :  { %v7563_v18 = vpop.f32.mrf.mxu0  ;;  %v17808_v8 = vpop.f32.mrf.mxu1 }
 0x499   :  { %21027 = vst [vmem:[#allocation32_spill] sm:$0xff] %v17803_v25  ;;  %21028 = vst [vmem:[#allocation140_spill] sm:$0xff] %v17808_v8  ;;  %v17811_v10 = vadd.f32 %v7563_v18, %v21029_v62  ;;  %v21035_v25 = vld [vmem:[#allocation35_spill] sm:$0xff]  ;;  %v21038_v62 = vld [vmem:[#allocation36_spill] sm:$0xff] }
 0x49a   :  { %v7567_v36 = vpop.f32.mrf.mxu0  ;;  %v17813_v39 = vpop.f32.mrf.mxu1  ;;  %8192 = vmatmul.mubr.bf16.gmra.mxu0 %v13392_v55  ;;  %v13395_v18 = vld [vmem:[%s20473_s0 + $0x700] ss:$72 sps:$4 sm:$0xff]  }
 0x49b   :  { %21030 = vst [vmem:[#allocation33_spill] sm:$0xff] %v17811_v10  ;;  %21031 = vst [vmem:[#allocation141_spill] sm:$0xff] %v17813_v39  ;;  %v17816_v0 = vadd.f32 %v7567_v36, %v21032_v61  ;;  %8201 = vmatprep.mubr.bf16.mxu0 %v13397_v30  ;;  %v13401_v61 = vld [vmem:[%s20473_s0 + $0x794] ss:$72 sps:$4 sm:$0xff]  }
 0x49c   :  { %v7569_v44 = vpop.f32.mrf.mxu0  ;;  %v17818_v28 = vpop.f32.mrf.mxu1  ;;  %v21041_v36 = vld [vmem:[#allocation37_spill] sm:$0xff] }
 0x49d   :  { %21033 = vst [vmem:[#allocation34_spill] sm:$0xff] %v17816_v0  ;;  %21034 = vst [vmem:[#allocation142_spill] sm:$0xff] %v17818_v28  ;;  %v17821_v50 = vadd.f32 %v7569_v44, %v21035_v25 }
 0x49e   :  { %v7571_v29 = vpop.f32.mrf.mxu0  ;;  %v17823_v4 = vpop.f32.mrf.mxu1 }
 0x49f   :  { %21036 = vst [vmem:[#allocation35_spill] sm:$0xff] %v17821_v50  ;;  %21037 = vst [vmem:[#allocation143_spill] sm:$0xff] %v17823_v4  ;;  %v17829_v39 = vadd.f32 %v7571_v29, %v21038_v62  ;;  %v21044_v4 = vld [vmem:[#allocation38_spill] sm:$0xff] }
 0x4a0   :  { %v7573_v55 = vpop.f32.mrf.mxu0  ;;  %v17834_v30 = vpop.f32.mrf.mxu1 }
 0x4a1   :  { %21039 = vst [vmem:[#allocation36_spill] sm:$0xff] %v17829_v39  ;;  %21040 = vst [vmem:[#allocation144_spill] sm:$0xff] %v17834_v30  ;;  %v17837_v25 = vadd.f32 %v7573_v55, %v21041_v36  ;;  %v21047_v39 = vld [vmem:[#allocation39_spill] sm:$0xff]  ;;  %v13399_v55 = vld [vmem:[%s20473_s0 + $0x790] ss:$72 sps:$4 sm:$0xff]  }
 0x4a2   :  { %v7577_v44 = vpop.f32.mrf.mxu0  ;;  %v17839_v50 = vpop.f32.mrf.mxu1  ;;  %8202 = vmatmul.mubr.bf16.gmra.mxu0 %v13395_v18  ;;  %v21050_v36 = vld [vmem:[#allocation40_spill] sm:$0xff] }
 0x4a3   :  { %21042 = vst [vmem:[#allocation37_spill] sm:$0xff] %v17837_v25  ;;  %21043 = vst [vmem:[#allocation145_spill] sm:$0xff] %v17839_v50  ;;  %v17842_v28 = vadd.f32 %v7577_v44, %v21044_v4  ;;  %8211 = vmatprep.mubr.bf16.mxu0 %v13401_v61  ;;  %v13404_v4 = vld [vmem:[%s20473_s0 + $0x824] ss:$72 sps:$4 sm:$0xff]   ;;  %v21053_v44 = vld [vmem:[#allocation41_spill] sm:$0xff] }
 0x4a4   :  { %v7579_v29 = vpop.f32.mrf.mxu0  ;;  %v17844_v62 = vpop.f32.mrf.mxu1 }
 0x4a5   :  { %21045 = vst [vmem:[#allocation38_spill] sm:$0xff] %v17842_v28  ;;  %21046 = vst [vmem:[#allocation146_spill] sm:$0xff] %v17844_v62  ;;  %v17847_v0 = vadd.f32 %v7579_v29, %v21047_v39 }
 0x4a6   :  { %v7581_v10 = vpop.f32.mrf.mxu0  ;;  %v17849_v8 = vpop.f32.mrf.mxu1 }
 0x4a7   :  { %21048 = vst [vmem:[#allocation39_spill] sm:$0xff] %v17847_v0  ;;  %21049 = vst [vmem:[#allocation147_spill] sm:$0xff] %v17849_v8  ;;  %v17855_v50 = vadd.f32 %v7581_v10, %v21050_v36  ;;  %v21056_v8 = vld [vmem:[#allocation42_spill] sm:$0xff] }
 0x4a8   :  { %v7583_v18 = vpop.f32.mrf.mxu0  ;;  %v17860_v61 = vpop.f32.mrf.mxu1 }
 0x4a9   :  { %21051 = vst [vmem:[#allocation40_spill] sm:$0xff] %v17855_v50  ;;  %21052 = vst [vmem:[#allocation148_spill] sm:$0xff] %v17860_v61  ;;  %v17863_v39 = vadd.f32 %v7583_v18, %v21053_v44  ;;  %v21059_v50 = vld [vmem:[#allocation43_spill] sm:$0xff]  ;;  %v21062_v44 = vld [vmem:[#allocation44_spill] sm:$0xff] }
 0x4aa   :  { %v7587_v29 = vpop.f32.mrf.mxu0  ;;  %v17865_v0 = vpop.f32.mrf.mxu1  ;;  %8212 = vmatmul.mubr.bf16.gmra.mxu0 %v13399_v55  ;;  %v13402_v18 = vld [vmem:[%s20473_s0 + $0x820] ss:$72 sps:$4 sm:$0xff]  }
 0x4ab   :  { %21054 = vst [vmem:[#allocation41_spill] sm:$0xff] %v17863_v39  ;;  %21055 = vst [vmem:[#allocation149_spill] sm:$0xff] %v17865_v0  ;;  %v17868_v62 = vadd.f32 %v7587_v29, %v21056_v8  ;;  %8221 = vmatprep.mubr.bf16.mxu0 %v13404_v4  ;;  %v13408_v8 = vld [vmem:[%s20473_s0 + $0x8b4] ss:$72 sps:$4 sm:$0xff]  }
 0x4ac   :  { %v7589_v10 = vpop.f32.mrf.mxu0  ;;  %v17870_v36 = vpop.f32.mrf.mxu1  ;;  %v21065_v29 = vld [vmem:[#allocation45_spill] sm:$0xff] }
 0x4ad   :  { %21057 = vst [vmem:[#allocation42_spill] sm:$0xff] %v17868_v62  ;;  %21058 = vst [vmem:[#allocation150_spill] sm:$0xff] %v17870_v36  ;;  %v17873_v28 = vadd.f32 %v7589_v10, %v21059_v50 }
 0x4ae   :  { %v7591_v25 = vpop.f32.mrf.mxu0  ;;  %v17875_v30 = vpop.f32.mrf.mxu1 }
 0x4af   :  { %21060 = vst [vmem:[#allocation43_spill] sm:$0xff] %v17873_v28  ;;  %21061 = vst [vmem:[#allocation151_spill] sm:$0xff] %v17875_v30  ;;  %v17881_v0 = vadd.f32 %v7591_v25, %v21062_v44  ;;  %v21068_v30 = vld [vmem:[#allocation46_spill] sm:$0xff] }
 0x4b0   :  { %v7593_v55 = vpop.f32.mrf.mxu0  ;;  %v17886_v4 = vpop.f32.mrf.mxu1 }
 0x4b1   :  { %21063 = vst [vmem:[#allocation44_spill] sm:$0xff] %v17881_v0  ;;  %21064 = vst [vmem:[#allocation152_spill] sm:$0xff] %v17886_v4  ;;  %v17889_v50 = vadd.f32 %v7593_v55, %v21065_v29  ;;  %v21071_v0 = vld [vmem:[#allocation47_spill] sm:$0xff]  ;;  %v13406_v55 = vld [vmem:[%s20473_s0 + $0x8b0] ss:$72 sps:$4 sm:$0xff]  }
 0x4b2   :  { %v7597_v10 = vpop.f32.mrf.mxu0  ;;  %v17891_v28 = vpop.f32.mrf.mxu1  ;;  %8222 = vmatmul.mubr.bf16.gmra.mxu0 %v13402_v18  ;;  %v21074_v29 = vld [vmem:[#allocation48_spill] sm:$0xff] }
 0x4b3   :  { %21066 = vst [vmem:[#allocation45_spill] sm:$0xff] %v17889_v50  ;;  %21067 = vst [vmem:[#allocation153_spill] sm:$0xff] %v17891_v28  ;;  %v17894_v36 = vadd.f32 %v7597_v10, %v21068_v30  ;;  %8231 = vmatprep.mubr.bf16.mxu0 %v13408_v8  ;;  %v13411_v30 = vld [vmem:[%s20473_s0 + $0x944] ss:$72 sps:$4 sm:$0xff]   ;;  %v21077_v10 = vld [vmem:[#allocation49_spill] sm:$0xff] }
 0x4b4   :  { %v7599_v25 = vpop.f32.mrf.mxu0  ;;  %v17896_v44 = vpop.f32.mrf.mxu1 }
 0x4b5   :  { %21069 = vst [vmem:[#allocation46_spill] sm:$0xff] %v17894_v36  ;;  %21070 = vst [vmem:[#allocation154_spill] sm:$0xff] %v17896_v44  ;;  %v17899_v62 = vadd.f32 %v7599_v25, %v21071_v0 }
 0x4b6   :  { %v7601_v39 = vpop.f32.mrf.mxu0  ;;  %v17901_v61 = vpop.f32.mrf.mxu1 }
 0x4b7   :  { %21072 = vst [vmem:[#allocation47_spill] sm:$0xff] %v17899_v62  ;;  %21073 = vst [vmem:[#allocation155_spill] sm:$0xff] %v17901_v61  ;;  %v17907_v28 = vadd.f32 %v7601_v39, %v21074_v29  ;;  %v21080_v61 = vld [vmem:[#allocation50_spill] sm:$0xff] }
 0x4b8   :  { %v7603_v18 = vpop.f32.mrf.mxu0  ;;  %v17912_v8 = vpop.f32.mrf.mxu1 }
 0x4b9   :  { %21075 = vst [vmem:[#allocation48_spill] sm:$0xff] %v17907_v28  ;;  %21076 = vst [vmem:[#allocation156_spill] sm:$0xff] %v17912_v8  ;;  %v17915_v0 = vadd.f32 %v7603_v18, %v21077_v10  ;;  %v21083_v28 = vld [vmem:[#allocation51_spill] sm:$0xff]  ;;  %v21086_v10 = vld [vmem:[#allocation52_spill] sm:$0xff] }
 0x4ba   :  { %v7607_v25 = vpop.f32.mrf.mxu0  ;;  %v17917_v62 = vpop.f32.mrf.mxu1  ;;  %8232 = vmatmul.mubr.bf16.gmra.mxu0 %v13406_v55  ;;  %v13409_v18 = vld [vmem:[%s20473_s0 + $0x940] ss:$72 sps:$4 sm:$0xff]  }
 0x4bb   :  { %21078 = vst [vmem:[#allocation49_spill] sm:$0xff] %v17915_v0  ;;  %21079 = vst [vmem:[#allocation157_spill] sm:$0xff] %v17917_v62  ;;  %v17920_v44 = vadd.f32 %v7607_v25, %v21080_v61  ;;  %8241 = vmatprep.mubr.bf16.mxu0 %v13411_v30  ;;  %v13415_v61 = vld [vmem:[%s20473_s0 + $0x9d4] ss:$72 sps:$4 sm:$0xff]  }
 0x4bc   :  { %v7609_v39 = vpop.f32.mrf.mxu0  ;;  %v17922_v29 = vpop.f32.mrf.mxu1  ;;  %v21089_v25 = vld [vmem:[#allocation53_spill] sm:$0xff] }
 0x4bd   :  { %21081 = vst [vmem:[#allocation50_spill] sm:$0xff] %v17920_v44  ;;  %21082 = vst [vmem:[#allocation158_spill] sm:$0xff] %v17922_v29  ;;  %v17925_v36 = vadd.f32 %v7609_v39, %v21083_v28 }
 0x4be   :  { %v7611_v50 = vpop.f32.mrf.mxu0  ;;  %v17927_v4 = vpop.f32.mrf.mxu1 }
 0x4bf   :  { %21084 = vst [vmem:[#allocation51_spill] sm:$0xff] %v17925_v36  ;;  %21085 = vst [vmem:[#allocation159_spill] sm:$0xff] %v17927_v4  ;;  %v17933_v62 = vadd.f32 %v7611_v50, %v21086_v10  ;;  %v21092_v4 = vld [vmem:[#allocation54_spill] sm:$0xff] }
 0x4c0   :  { %v7613_v55 = vpop.f32.mrf.mxu0  ;;  %v17938_v30 = vpop.f32.mrf.mxu1 }
 0x4c1   :  { %21087 = vst [vmem:[#allocation52_spill] sm:$0xff] %v17933_v62  ;;  %21088 = vst [vmem:[#allocation160_spill] sm:$0xff] %v17938_v30  ;;  %v17941_v28 = vadd.f32 %v7613_v55, %v21089_v25  ;;  %v21095_v62 = vld [vmem:[#allocation55_spill] sm:$0xff]  ;;  %v13413_v55 = vld [vmem:[%s20473_s0 + $0x9d0] ss:$72 sps:$4 sm:$0xff]  }
 0x4c2   :  { %v7617_v39 = vpop.f32.mrf.mxu0  ;;  %v17943_v36 = vpop.f32.mrf.mxu1  ;;  %8242 = vmatmul.mubr.bf16.gmra.mxu0 %v13409_v18  ;;  %v21098_v25 = vld [vmem:[#allocation56_spill] sm:$0xff] }
 0x4c3   :  { %21090 = vst [vmem:[#allocation53_spill] sm:$0xff] %v17941_v28  ;;  %21091 = vst [vmem:[#allocation161_spill] sm:$0xff] %v17943_v36  ;;  %v17946_v29 = vadd.f32 %v7617_v39, %v21092_v4  ;;  %8251 = vmatprep.mubr.bf16.mxu0 %v13415_v61  ;;  %v13418_v4 = vld [vmem:[%s20473_s0 + $0xa64] ss:$72 sps:$4 sm:$0xff]   ;;  %v21101_v39 = vld [vmem:[#allocation57_spill] sm:$0xff] }
 0x4c4   :  { %v7619_v50 = vpop.f32.mrf.mxu0  ;;  %v17948_v10 = vpop.f32.mrf.mxu1 }
 0x4c5   :  { %21093 = vst [vmem:[#allocation54_spill] sm:$0xff] %v17946_v29  ;;  %21094 = vst [vmem:[#allocation162_spill] sm:$0xff] %v17948_v10  ;;  %v17951_v44 = vadd.f32 %v7619_v50, %v21095_v62 }
 0x4c6   :  { %v7621_v0 = vpop.f32.mrf.mxu0  ;;  %v17953_v8 = vpop.f32.mrf.mxu1 }
 0x4c7   :  { %21096 = vst [vmem:[#allocation55_spill] sm:$0xff] %v17951_v44  ;;  %21097 = vst [vmem:[#allocation163_spill] sm:$0xff] %v17953_v8  ;;  %v17959_v36 = vadd.f32 %v7621_v0, %v21098_v25  ;;  %v21104_v8 = vld [vmem:[#allocation58_spill] sm:$0xff] }
 0x4c8   :  { %v7623_v18 = vpop.f32.mrf.mxu0  ;;  %v17964_v61 = vpop.f32.mrf.mxu1 }
 0x4c9   :  { %21099 = vst [vmem:[#allocation56_spill] sm:$0xff] %v17959_v36  ;;  %21100 = vst [vmem:[#allocation164_spill] sm:$0xff] %v17964_v61  ;;  %v17967_v62 = vadd.f32 %v7623_v18, %v21101_v39  ;;  %v21107_v36 = vld [vmem:[#allocation59_spill] sm:$0xff]  ;;  %v21110_v39 = vld [vmem:[#allocation60_spill] sm:$0xff] }
 0x4ca   :  { %v7627_v50 = vpop.f32.mrf.mxu0  ;;  %v17969_v44 = vpop.f32.mrf.mxu1  ;;  %8252 = vmatmul.mubr.bf16.gmra.mxu0 %v13413_v55  ;;  %v13416_v18 = vld [vmem:[%s20473_s0 + $0xa60] ss:$72 sps:$4 sm:$0xff]  }
 0x4cb   :  { %21102 = vst [vmem:[#allocation57_spill] sm:$0xff] %v17967_v62  ;;  %21103 = vst [vmem:[#allocation165_spill] sm:$0xff] %v17969_v44  ;;  %v17972_v10 = vadd.f32 %v7627_v50, %v21104_v8  ;;  %8261 = vmatprep.mubr.bf16.mxu0 %v13418_v4  ;;  %v13422_v8 = vld [vmem:[%s20473_s0 + $0xaf4] ss:$72 sps:$4 sm:$0xff]  }
 0x4cc   :  { %v7629_v0 = vpop.f32.mrf.mxu0  ;;  %v17974_v25 = vpop.f32.mrf.mxu1  ;;  %v21113_v50 = vld [vmem:[#allocation61_spill] sm:$0xff] }
 0x4cd   :  { %21105 = vst [vmem:[#allocation58_spill] sm:$0xff] %v17972_v10  ;;  %21106 = vst [vmem:[#allocation166_spill] sm:$0xff] %v17974_v25  ;;  %v17977_v29 = vadd.f32 %v7629_v0, %v21107_v36 }
 0x4ce   :  { %v7631_v28 = vpop.f32.mrf.mxu0  ;;  %v17979_v30 = vpop.f32.mrf.mxu1 }
 0x4cf   :  { %21108 = vst [vmem:[#allocation59_spill] sm:$0xff] %v17977_v29  ;;  %21109 = vst [vmem:[#allocation167_spill] sm:$0xff] %v17979_v30  ;;  %v17985_v44 = vadd.f32 %v7631_v28, %v21110_v39  ;;  %v21116_v30 = vld [vmem:[#allocation62_spill] sm:$0xff] }
 0x4d0   :  { %v7633_v55 = vpop.f32.mrf.mxu0  ;;  %v17990_v4 = vpop.f32.mrf.mxu1 }
 0x4d1   :  { %21111 = vst [vmem:[#allocation60_spill] sm:$0xff] %v17985_v44  ;;  %21112 = vst [vmem:[#allocation168_spill] sm:$0xff] %v17990_v4  ;;  %v17993_v36 = vadd.f32 %v7633_v55, %v21113_v50  ;;  %v21119_v44 = vld [vmem:[#allocation63_spill] sm:$0xff]  ;;  %v13420_v55 = vld [vmem:[%s20473_s0 + $0xaf0] ss:$72 sps:$4 sm:$0xff]  }
 0x4d2   :  { %v7637_v0 = vpop.f32.mrf.mxu0  ;;  %v17995_v29 = vpop.f32.mrf.mxu1  ;;  %8262 = vmatmul.mubr.bf16.gmra.mxu0 %v13416_v18  ;;  %v21122_v50 = vld [vmem:[#allocation64_spill] sm:$0xff] }
 0x4d3   :  { %21114 = vst [vmem:[#allocation61_spill] sm:$0xff] %v17993_v36  ;;  %21115 = vst [vmem:[#allocation169_spill] sm:$0xff] %v17995_v29  ;;  %v17998_v25 = vadd.f32 %v7637_v0, %v21116_v30  ;;  %8271 = vmatprep.mubr.bf16.mxu0 %v13422_v8  ;;  %v13425_v30 = vld [vmem:[%s20473_s0 + $0xb84] ss:$72 sps:$4 sm:$0xff]   ;;  %v21125_v0 = vld [vmem:[#allocation65_spill] sm:$0xff] }
 0x4d4   :  { %v7639_v28 = vpop.f32.mrf.mxu0  ;;  %v18000_v39 = vpop.f32.mrf.mxu1 }
 0x4d5   :  { %21117 = vst [vmem:[#allocation62_spill] sm:$0xff] %v17998_v25  ;;  %21118 = vst [vmem:[#allocation170_spill] sm:$0xff] %v18000_v39  ;;  %v18003_v10 = vadd.f32 %v7639_v28, %v21119_v44 }
 0x4d6   :  { %v7641_v62 = vpop.f32.mrf.mxu0  ;;  %v18005_v61 = vpop.f32.mrf.mxu1 }
 0x4d7   :  { %21120 = vst [vmem:[#allocation63_spill] sm:$0xff] %v18003_v10  ;;  %21121 = vst [vmem:[#allocation171_spill] sm:$0xff] %v18005_v61  ;;  %v18011_v29 = vadd.f32 %v7641_v62, %v21122_v50  ;;  %v21128_v61 = vld [vmem:[#allocation66_spill] sm:$0xff] }
 0x4d8   :  { %v7643_v18 = vpop.f32.mrf.mxu0  ;;  %v18016_v8 = vpop.f32.mrf.mxu1 }
 0x4d9   :  { %21123 = vst [vmem:[#allocation64_spill] sm:$0xff] %v18011_v29  ;;  %21124 = vst [vmem:[#allocation172_spill] sm:$0xff] %v18016_v8  ;;  %v18019_v44 = vadd.f32 %v7643_v18, %v21125_v0  ;;  %v21131_v29 = vld [vmem:[#allocation67_spill] sm:$0xff]  ;;  %v21134_v0 = vld [vmem:[#allocation68_spill] sm:$0xff] }
 0x4da   :  { %v7647_v28 = vpop.f32.mrf.mxu0  ;;  %v18021_v10 = vpop.f32.mrf.mxu1  ;;  %8272 = vmatmul.mubr.bf16.gmra.mxu0 %v13420_v55  ;;  %v13423_v18 = vld [vmem:[%s20473_s0 + $0xb80] ss:$72 sps:$4 sm:$0xff]  }
 0x4db   :  { %21126 = vst [vmem:[#allocation65_spill] sm:$0xff] %v18019_v44  ;;  %21127 = vst [vmem:[#allocation173_spill] sm:$0xff] %v18021_v10  ;;  %v18024_v39 = vadd.f32 %v7647_v28, %v21128_v61  ;;  %8281 = vmatprep.mubr.bf16.mxu0 %v13425_v30  ;;  %v13429_v61 = vld [vmem:[%s20473_s0 + $0xc14] ss:$72 sps:$4 sm:$0xff]  }
 0x4dc   :  { %v7649_v62 = vpop.f32.mrf.mxu0  ;;  %v18026_v50 = vpop.f32.mrf.mxu1  ;;  %v21136_v28 = vld [vmem:[#allocation69_spill] sm:$0xff] }
 0x4dd   :  { %21129 = vst [vmem:[#allocation66_spill] sm:$0xff] %v18024_v39  ;;  %21130 = vst [vmem:[#allocation174_spill] sm:$0xff] %v18026_v50  ;;  %v18029_v25 = vadd.f32 %v7649_v62, %v21131_v29 }
 0x4de   :  { %v7651_v36 = vpop.f32.mrf.mxu0  ;;  %v18031_v4 = vpop.f32.mrf.mxu1 }
 0x4df   :  { %21132 = vst [vmem:[#allocation67_spill] sm:$0xff] %v18029_v25  ;;  %21133 = vst [vmem:[#allocation175_spill] sm:$0xff] %v18031_v4  ;;  %v18037_v10 = vadd.f32 %v7651_v36, %v21134_v0  ;;  %v21138_v4 = vld [vmem:[#allocation70_spill] sm:$0xff] }
 0x4e0   :  { %v7653_v55 = vpop.f32.mrf.mxu0  ;;  %v18042_v30 = vpop.f32.mrf.mxu1 }
 0x4e1   :  { %21135 = vst [vmem:[#allocation68_spill] sm:$0xff] %v18037_v10  ;;  %v18045_v29 = vadd.f32 %v7653_v55, %v21136_v28  ;;  %v21141_v10 = vld [vmem:[#allocation71_spill] sm:$0xff]  ;;  %v13427_v55 = vld [vmem:[%s20473_s0 + $0xc10] ss:$72 sps:$4 sm:$0xff]  }
 0x4e2   :  { %v7657_v62 = vpop.f32.mrf.mxu0  ;;  %v18047_v25 = vpop.f32.mrf.mxu1  ;;  %8282 = vmatmul.mubr.bf16.gmra.mxu0 %v13423_v18  ;;  %v21144_v28 = vld [vmem:[#allocation72_spill] sm:$0xff] }
 0x4e3   :  { %21137 = vst [vmem:[#allocation69_spill] sm:$0xff] %v18047_v25  ;;  %v18050_v50 = vadd.f32 %v7657_v62, %v21138_v4  ;;  %8291 = vmatprep.mubr.bf16.mxu0 %v13429_v61  ;;  %v13432_v4 = vld [vmem:[%s20473_s0 + $0xca4] ss:$72 sps:$4 sm:$0xff]  }
 0x4e4   :  { %v7659_v36 = vpop.f32.mrf.mxu0  ;;  %v18052_v0 = vpop.f32.mrf.mxu1 }
 0x4e5   :  { %21139 = vst [vmem:[#allocation70_spill] sm:$0xff] %v18050_v50  ;;  %21140 = vst [vmem:[#allocation176_spill] sm:$0xff] %v18052_v0  ;;  %v18055_v39 = vadd.f32 %v7659_v36, %v21141_v10 }
 0x4e6   :  { %v7661_v44 = vpop.f32.mrf.mxu0  ;;  %v18057_v8 = vpop.f32.mrf.mxu1 }
 0x4e7   :  { %21142 = vst [vmem:[#allocation71_spill] sm:$0xff] %v18055_v39  ;;  %21143 = vst [vmem:[#allocation177_spill] sm:$0xff] %v18057_v8  ;;  %v18063_v25 = vadd.f32 %v7661_v44, %v21144_v28 }
 0x4e8   :  { %v7663_v18 = vpop.f32.mrf.mxu0  ;;  %v18068_v61 = vpop.f32.mrf.mxu1 }
 0x4e9   :  { %21145 = vst [vmem:[#allocation72_spill] sm:$0xff] %v18063_v25  ;;  %v18071_v10 = vadd.f32 %v7663_v18, %v17202_v52  ;;  %v21149_v25 = vld [vmem:[#allocation73_spill] sm:$0xff]  ;;  %v13430_v52 = vld [vmem:[%s20473_s0 + $0xca0] ss:$72 sps:$4 sm:$0xff]  }
 0x4ea   :  { %v7667_v62 = vpop.f32.mrf.mxu0  ;;  %v18073_v36 = vpop.f32.mrf.mxu1  ;;  %8292 = vmatmul.mubr.bf16.gmra.mxu0 %v13427_v55  ;;  %v21152_v18 = vld [vmem:[#allocation74_spill] sm:$0xff] }
 0x4eb   :  { %21146 = vst [vmem:[#allocation178_spill] sm:$0xff] %v18073_v36  ;;  %v18076_v8 = vadd.f32 %v7667_v62, %v17205_v56  ;;  %8301 = vmatprep.mubr.bf16.mxu0 %v13432_v4  ;;  %v13436_v56 = vld [vmem:[%s20473_s0 + $0xd34] ss:$72 sps:$4 sm:$0xff]  }
 0x4ec   :  { %v7669_v44 = vpop.f32.mrf.mxu0  ;;  %v18078_v28 = vpop.f32.mrf.mxu1 }
 0x4ed   :  { %21147 = vst [vmem:[#allocation179_spill] sm:$0xff] %v18076_v8  ;;  %21148 = vst [vmem:[#allocation180_spill] sm:$0xff] %v18078_v28  ;;  %v18081_v39 = vadd.f32 %v7669_v44, %v21149_v25 }
 0x4ee   :  { %v7671_v0 = vpop.f32.mrf.mxu0  ;;  %v18083_v50 = vpop.f32.mrf.mxu1 }
 0x4ef   :  { %21150 = vst [vmem:[#allocation73_spill] sm:$0xff] %v18081_v39  ;;  %21151 = vst [vmem:[#allocation181_spill] sm:$0xff] %v18083_v50  ;;  %v18089_v36 = vadd.f32 %v7671_v0, %v21152_v18 }
 0x4f0   :  { %v7673_v55 = vpop.f32.mrf.mxu0  ;;  %v18094_v4 = vpop.f32.mrf.mxu1 }
 0x4f1   :  { %21153 = vst [vmem:[#allocation74_spill] sm:$0xff] %v18089_v36  ;;  %v18097_v25 = vadd.f32 %v7673_v55, %v17229_v13  ;;  %v13434_v13 = vld [vmem:[%s20473_s0 + $0xd30] ss:$72 sps:$4 sm:$0xff]  }
 0x4f2   :  { %v7677_v62 = vpop.f32.mrf.mxu0  ;;  %v18099_v44 = vpop.f32.mrf.mxu1  ;;  %8302 = vmatmul.mubr.bf16.gmra.mxu0 %v13430_v52 }
 0x4f3   :  { %v7678_v50 = vadd.f32 %v7677_v62, %v17233_v35  ;;  %8311 = vmatprep.mubr.bf16.mxu0 %v13436_v56  ;;  %v13439_v35 = vld [vmem:[%s20473_s0 + $0xdc4] ss:$72 sps:$4 sm:$0xff]  }
 0x4f4   :  { %v7679_v39 = vpop.f32.mrf.mxu0  ;;  %v8030_v0 = vpop.f32.mrf.mxu1 }
 0x4f5   :  { %v18103_v18 = vadd.f32 %v7679_v39, %v17239_v58  ;;  %v18105_v36 = vadd.f32 %v8030_v0, %v7678_v50 }
 0x4f6   :  { %v7681_v28 = vpop.f32.mrf.mxu0  ;;  %v18107_v8 = vpop.f32.mrf.mxu1 }
 0x4f7   :  { %21154 = vst [vmem:[#allocation182_spill] sm:$0xff] %v18105_v36  ;;  %21155 = vst [vmem:[#allocation183_spill] sm:$0xff] %v18107_v8  ;;  %v18113_v55 = vadd.f32 %v7681_v28, %v17248_v27 }
 0x4f8   :  { %v7683_v52 = vpop.f32.mrf.mxu0  ;;  %v18118_v56 = vpop.f32.mrf.mxu1 }
 0x4f9   :  { %21156 = vst [vmem:[#allocation184_spill] sm:$0xff] %v18113_v55  ;;  %v18121_v58 = vadd.f32 %v7683_v52, %v17254_v49  ;;  %v13437_v49 = vld [vmem:[%s20473_s0 + $0xdc0] ss:$72 sps:$4 sm:$0xff]  }
 0x4fa   :  { %v7687_v39 = vpop.f32.mrf.mxu0  ;;  %v18123_v50 = vpop.f32.mrf.mxu1  ;;  %8312 = vmatmul.mubr.bf16.gmra.mxu0 %v13434_v13 }
 0x4fb   :  { %21157 = vst [vmem:[#allocation185_spill] sm:$0xff] %v18121_v58  ;;  %v7688_v62 = vadd.f32 %v7687_v39, %v17257_v59  ;;  %8321 = vmatprep.mubr.bf16.mxu0 %v13439_v35  ;;  %v13443_v59 = vld [vmem:[%s20473_s0 + $0xe54] ss:$72 sps:$4 sm:$0xff]  }
 0x4fc   :  { %v7689_v0 = vpop.f32.mrf.mxu0  ;;  %v8040_v27 = vpop.f32.mrf.mxu1 }
 0x4fd   :  { %v7690_v28 = vadd.f32 %v7689_v0, %v17263_v15  ;;  %v18127_v36 = vadd.f32 %v8040_v27, %v7688_v62 }
 0x4fe   :  { %v7691_v55 = vpop.f32.mrf.mxu0  ;;  %v8042_v8 = vpop.f32.mrf.mxu1 }
 0x4ff   :  { %v7692_v52 = vadd.f32 %v7691_v55, %v17272_v43  ;;  %v18133_v58 = vadd.f32 %v8042_v8, %v7690_v28  ;;  %v13441_v8 = vld [vmem:[%s20473_s0 + $0xe50] ss:$72 sps:$4 sm:$0xff]  }
 0x500   :  { %v7693_v13 = vpop.f32.mrf.mxu0  ;;  %v8044_v35 = vpop.f32.mrf.mxu1 }
 0x501   :  { %21158 = vst [vmem:[#allocation186_spill] sm:$0xff] %v18133_v58  ;;  %v18139_v15 = vadd.f32 %v7693_v13, %v17280_v31  ;;  %v18141_v39 = vadd.f32 %v8044_v35, %v7692_v52  ;;  %v13446_v31 = vld [vmem:[%s20473_s0 + $0xee4] ss:$72 sps:$4 sm:$0xff]  }
 0x502   :  { %v8083_v62 = vpop.f32.mrf.mxu0  ;;  %8322 = vmatmul.mubr.bf16.gmra.mxu0 %v13437_v49 }
 0x503   :  { %21159 = vst [vmem:[#allocation187_spill] sm:$0xff] %v18141_v39  ;;  %8331 = vmatprep.mubr.bf16.mxu0 %v13443_v59  ;;  %v8084_v27 = vadd.f32 %v8083_v62, %v17285_v38 }
 0x504   :  { %v8085_v0 = vpop.f32.mrf.mxu0 }
 0x505   :  { %v8086_v55 = vadd.f32 %v8085_v0, %v17291_v12  ;;  %v8402_v13 = vmax.f32 %v8084_v27, 0.0 }
 0x506   :  { %v8087_v43 = vpop.f32.mrf.mxu0 }
 0x507   :  { %v8088_v28 = vadd.f32 %v8087_v43, %v17300_v37  ;;  %v8403_v38 = vmax.f32 %v8086_v55, 0.0  ;;  %v13444_v43 = vld [vmem:[%s20473_s0 + $0xee0] ss:$72 sps:$4 sm:$0xff]  }
 0x508   :  { %v8089_v52 = vpop.f32.mrf.mxu0 }
 0x509   :  { %v8404_v49 = vmax.f32 %v8088_v28, 0.0  ;;  %v8090_v59 = vadd.f32 %v8089_v52, %v17306_v63  ;;  %v13449_v63 = vld [vmem:[%s20473_s0 + $0xf74] ss:$72 sps:$4 sm:$0xff]  }
 0x50a   :  { %v8093_v35 = vpop.f32.mrf.mxu0  ;;  %8332 = vmatmul.mubr.bf16.gmra.mxu0 %v13441_v8 }
 0x50b   :  { %v8530_v62 = vpack.c.bf16 %v8404_v49, %v8402_v13  ;;  %v8405_v39 = vmax.f32 %v8090_v59, 0.0  ;;  %8341 = vmatprep.mubr.bf16.mxu0 %v13446_v31  ;;  %v8094_v12 = vadd.f32 %v8093_v35, %v17309_v26  ;;  %v13447_v35 = vld [vmem:[%s20473_s0 + $0xf70] ss:$72 sps:$4 sm:$0xff]  }
 0x50c   :  { %v8095_v58 = vpop.f32.mrf.mxu0 }
 0x50d   :  { %v8531_v0 = vpack.c.bf16 %v8405_v39, %v8403_v38  ;;  %v8096_v27 = vadd.f32 %v8095_v58, %v17315_v16  ;;  %v8406_v55 = vmax.f32 %v8094_v12, 0.0 }
 0x50e   :  { %v8097_v37 = vpop.f32.mrf.mxu0 }
 0x50f   :  { %v8098_v28 = vadd.f32 %v8097_v37, %v17324_v5  ;;  %8761 = vmatprep.mubr.bf16.mxu1 %v8531_v0  ;;  %v8407_v52 = vmax.f32 %v8096_v27, 0.0 }
 0x510   :  { %v8099_v8 = vpop.f32.mrf.mxu0  ;;  %8762 = vmatmul.mubr.bf16.vlgmr.msra.gmra.mxu1 %v8530_v62 }
 0x511   :  { %v8408_v31 = vmax.f32 %v8098_v28, 0.0  ;;  %v8100_v26 = vadd.f32 %v8099_v8, %v17333_v7  ;;  %v13452_v7 = vld [vmem:[%s20473_s0 + $0x1004] ss:$72 sps:$4 sm:$0xff]  }
 0x512   :  { %v8103_v39 = vpop.f32.mrf.mxu0  ;;  %8342 = vmatmul.mubr.bf16.gmra.mxu0 %v13444_v43 }
 0x513   :  { %v8532_v13 = vpack.c.bf16 %v8408_v31, %v8406_v55  ;;  %v8409_v49 = vmax.f32 %v8100_v26, 0.0  ;;  %8351 = vmatprep.mubr.bf16.mxu0 %v13449_v63  ;;  %v8104_v5 = vadd.f32 %v8103_v39, %v17337_v33  ;;  %v13450_v31 = vld [vmem:[%s20473_s0 + $0x1000] ss:$72 sps:$4 sm:$0xff]  }
 0x514   :  { %v8105_v16 = vpop.f32.mrf.mxu0 }
 0x515   :  { %v8533_v58 = vpack.c.bf16 %v8409_v49, %v8407_v52  ;;  %v8106_v38 = vadd.f32 %v8105_v16, %v17343_v48  ;;  %v8410_v0 = vmax.f32 %v8104_v5, 0.0  ;;  %v7771_v5 = vadd.f32 %v17389_v21, %v17385_v40  ;;  %v21160_v40 = vld [vmem:[#allocation75_spill] sm:$0xff] }
 0x516   :  { %v8107_v59 = vpop.f32.mrf.mxu0  ;;  %v7777_v21 = vadd.f32 %v21160_v40, %v17412_v34  ;;  %v21167_v40 = vld [vmem:[#allocation89_spill] sm:$0xff] }
 0x517   :  { %v8108_v62 = vadd.f32 %v8107_v59, %v17352_v9  ;;  %8769 = vmatprep.mubr.bf16.mxu1 %v8533_v58  ;;  %v8411_v27 = vmax.f32 %v8106_v38, 0.0  ;;  %v7775_v38 = vadd.f32 %v17406_v46, %v17401_v3 }
 0x518   :  { %v8109_v12 = vpop.f32.mrf.mxu0  ;;  %8770 = vmatmul.mubr.bf16.gmra.mxu1 %v8532_v13 }
 0x519   :  { %v8412_v37 = vmax.f32 %v8108_v62, 0.0  ;;  %v8110_v33 = vadd.f32 %v8109_v12, %v17358_v42  ;;  %v13455_v42 = vld [vmem:[%s20473_s0 + $0x1094] ss:$72 sps:$4 sm:$0xff]  }
 0x51a   :  { %v8113_v43 = vpop.f32.mrf.mxu0  ;;  %8352 = vmatmul.mubr.bf16.gmra.mxu0 %v13447_v35  ;;  %v7773_v35 = vadd.f32 %v17395_v1, %v17393_v24  ;;  %v13458_v24 = vld [vmem:[%s20473_s0 + $0x1124] ss:$72 sps:$4 sm:$0xff]  }
 0x51b   :  { %v8534_v28 = vpack.c.bf16 %v8412_v37, %v8410_v0  ;;  %v8413_v63 = vmax.f32 %v8110_v33, 0.0  ;;  %8361 = vmatprep.mubr.bf16.mxu0 %v13452_v7  ;;  %v8114_v9 = vadd.f32 %v8113_v43, %v17361_v20 }
 0x51c   :  { %v8115_v48 = vpop.f32.mrf.mxu0 }
 0x51d   :  { %v8535_v8 = vpack.c.bf16 %v8413_v63, %v8411_v27  ;;  %v8116_v26 = vadd.f32 %v8115_v48, %v17367_v22  ;;  %v8414_v13 = vmax.f32 %v8114_v9, 0.0  ;;  %v7781_v27 = vadd.f32 %v17422_v60, %v17420_v11  ;;  %v21161_v9 = vld [vmem:[#allocation76_spill] sm:$0xff] }
 0x51e   :  { %v8117_v55 = vpop.f32.mrf.mxu0 }
 0x51f   :  { %v8118_v39 = vadd.f32 %v8117_v55, %v17376_v57  ;;  %8777 = vmatprep.mubr.bf16.mxu1 %v8535_v8  ;;  %v8415_v58 = vmax.f32 %v8116_v26, 0.0  ;;  %v7783_v8 = vadd.f32 %v21161_v9, %v17425_v45  ;;  %v21162_v55 = vld [vmem:[#allocation77_spill] sm:$0xff] }
 0x520   :  { %v8119_v52 = vpop.f32.mrf.mxu0  ;;  %8778 = vmatmul.mubr.bf16.gmra.mxu1 %v8534_v28  ;;  %v13461_v45 = vld [vmem:[%s20473_s0 + $0x11b4] ss:$72 sps:$4 sm:$0xff]  }
 0x521   :  { %v8416_v49 = vmax.f32 %v8118_v39, 0.0  ;;  %v8120_v20 = vadd.f32 %v8119_v52, %v17387_v17  ;;  %v13453_v17 = vld [vmem:[%s20473_s0 + $0x1090] ss:$72 sps:$4 sm:$0xff]  }
 0x522   :  { %v8123_v16 = vpop.f32.mrf.mxu0  ;;  %8362 = vmatmul.mubr.bf16.gmra.mxu0 %v13450_v31  ;;  %v21163_v31 = vld [vmem:[#allocation85_spill] sm:$0xff] }
 0x523   :  { %v8536_v22 = vpack.c.bf16 %v8416_v49, %v8414_v13  ;;  %v8417_v59 = vmax.f32 %v8120_v20, 0.0  ;;  %8371 = vmatprep.mubr.bf16.mxu0 %v13455_v42  ;;  %v8124_v62 = vadd.f32 %v8123_v16, %v7771_v5  ;;  %v7785_v26 = vadd.f32 %v21163_v31, %v21162_v55  ;;  %v13456_v13 = vld [vmem:[%s20473_s0 + $0x1120] ss:$72 sps:$4 sm:$0xff]  }
 0x524   :  { %v8125_v57 = vpop.f32.mrf.mxu0  ;;  %v21164_v49 = vld [vmem:[#allocation86_spill] sm:$0xff] }
 0x525   :  { %v8537_v7 = vpack.c.bf16 %v8417_v59, %v8415_v58  ;;  %v8126_v0 = vadd.f32 %v8125_v57, %v7773_v35  ;;  %v8418_v3 = vmax.f32 %v8124_v62, 0.0  ;;  %v7787_v11 = vadd.f32 %v17452_v14, %v21164_v49 }
 0x526   :  { %v8127_v12 = vpop.f32.mrf.mxu0  ;;  %v7791_v57 = vadd.f32 %v17457_v41, %v17455_v6  ;;  %v7797_v6 = vadd.f32 %v17482_v47, %v17480_v54  ;;  %v7803_v54 = vadd.f32 %v17492_v23, %v17490_v19  ;;  %v21169_v47 = vld [vmem:[#allocation91_spill] sm:$0xff] }
 0x527   :  { %v8128_v37 = vadd.f32 %v8127_v12, %v7775_v38  ;;  %8785 = vmatprep.mubr.bf16.mxu1 %v8537_v7  ;;  %v8419_v28 = vmax.f32 %v8126_v0, 0.0  ;;  %v21165_v7 = vld [vmem:[#allocation87_spill] sm:$0xff]  ;;  %v21166_v12 = vld [vmem:[#allocation88_spill] sm:$0xff]  ;;  %v7805_v31 = vadd.f32 %v17503_v32, %v21169_v47 }
 0x528   :  { %v8129_v1 = vpop.f32.mrf.mxu0  ;;  %8786 = vmatmul.mubr.bf16.gmra.mxu1 %v8536_v22  ;;  %v21173_v23 = vld [vmem:[#allocation95_spill] sm:$0xff] }
 0x529   :  { %v8420_v46 = vmax.f32 %v8128_v37, 0.0  ;;  %v8130_v33 = vadd.f32 %v8129_v1, %v7777_v21  ;;  %v21168_v21 = vld [vmem:[#allocation90_spill] sm:$0xff]  ;;  %v21184_v47 = vld [vmem:[#allocation79_spill] sm:$0xff] }
 0x52a   :  { %v8133_v43 = vpop.f32.mrf.mxu0  ;;  %8372 = vmatmul.mubr.bf16.gmra.mxu0 %v13453_v17  ;;  %v7793_v17 = vadd.f32 %v21166_v12, %v21165_v7  ;;  %v7795_v0 = vadd.f32 %v21168_v21, %v21167_v40  ;;  %v21178_v21 = vld [vmem:[#allocation100_spill] sm:$0xff] }
 0x52b   :  { %v8538_v63 = vpack.c.bf16 %v8420_v46, %v8418_v3  ;;  %v8421_v34 = vmax.f32 %v8130_v33, 0.0  ;;  %8381 = vmatprep.mubr.bf16.mxu0 %v13458_v24  ;;  %v8134_v42 = vadd.f32 %v8133_v43, %v7781_v27  ;;  %v13459_v3 = vld [vmem:[%s20473_s0 + $0x11b0] ss:$72 sps:$4 sm:$0xff]  }
 0x52c   :  { %v8135_v48 = vpop.f32.mrf.mxu0 }
 0x52d   :  { %v8539_v39 = vpack.c.bf16 %v8421_v34, %v8419_v28  ;;  %v8136_v60 = vadd.f32 %v8135_v48, %v7783_v8  ;;  %v8422_v5 = vmax.f32 %v8134_v42, 0.0  ;;  %v7801_v34 = vadd.f32 %v17487_v2, %v17485_v53 }
 0x52e   :  { %v8137_v52 = vpop.f32.mrf.mxu0 }
 0x52f   :  { %v8138_v20 = vadd.f32 %v8137_v52, %v7785_v26  ;;  %8793 = vmatprep.mubr.bf16.mxu1 %v8539_v39  ;;  %v8423_v35 = vmax.f32 %v8136_v60, 0.0  ;;  %v21170_v52 = vld [vmem:[#allocation92_spill] sm:$0xff] }
 0x530   :  { %v8139_v16 = vpop.f32.mrf.mxu0  ;;  %8794 = vmatmul.mubr.bf16.gmra.mxu1 %v8538_v63 }
 0x531   :  { %v8424_v58 = vmax.f32 %v8138_v20, 0.0  ;;  %v8140_v22 = vadd.f32 %v8139_v16, %v7787_v11 }
 0x532   :  { %v8143_v59 = vpop.f32.mrf.mxu0  ;;  %8382 = vmatmul.mubr.bf16.gmra.mxu0 %v13456_v13  ;;  %v21171_v13 = vld [vmem:[#allocation93_spill] sm:$0xff] }
 0x533   :  { %v8540_v38 = vpack.c.bf16 %v8424_v58, %v8422_v5  ;;  %v8425_v14 = vmax.f32 %v8140_v22, 0.0  ;;  %8391 = vmatprep.mubr.bf16.mxu0 %v13461_v45  ;;  %v8144_v24 = vadd.f32 %v8143_v59, %v7791_v57  ;;  %v7807_v49 = vadd.f32 %v21171_v13, %v21170_v52  ;;  %v21172_v5 = vld [vmem:[#allocation94_spill] sm:$0xff]  ;;  %v21174_v57 = vld [vmem:[#allocation96_spill] sm:$0xff] }
 0x534   :  { %v8145_v62 = vpop.f32.mrf.mxu0  ;;  %v7811_v19 = vadd.f32 %v21173_v23, %v21172_v5  ;;  %v21186_v13 = vld [vmem:[#allocation80_spill] sm:$0xff] }
 0x535   :  { %v8541_v37 = vpack.c.bf16 %v8425_v14, %v8423_v35  ;;  %v8146_v41 = vadd.f32 %v8145_v62, %v7793_v17  ;;  %v8426_v43 = vmax.f32 %v8144_v24, 0.0  ;;  %v21175_v35 = vld [vmem:[#allocation97_spill] sm:$0xff]  ;;  %v21176_v14 = vld [vmem:[#allocation98_spill] sm:$0xff]  ;;  %v21177_v62 = vld [vmem:[#allocation99_spill] sm:$0xff] }
 0x536   :  { %v8147_v1 = vpop.f32.mrf.mxu0  ;;  %v7815_v7 = vadd.f32 %v21177_v62, %v21176_v14  ;;  %v21188_v23 = vld [vmem:[#allocation84_spill] sm:$0xff]  ;;  %v21192_v62 = vld [vmem:[#allocation82_spill] sm:$0xff] }
 0x537   :  { %v8148_v46 = vadd.f32 %v8147_v1, %v7795_v0  ;;  %8801 = vmatprep.mubr.bf16.mxu1 %v8541_v37  ;;  %v8427_v48 = vmax.f32 %v8146_v41, 0.0  ;;  %v21179_v0 = vld [vmem:[#allocation101_spill] sm:$0xff] }
 0x538   :  { %v8149_v33 = vpop.f32.mrf.mxu0  ;;  %8802 = vmatmul.mubr.bf16.gmra.mxu1 %v8540_v38  ;;  %v7813_v38 = vadd.f32 %v21175_v35, %v21174_v57  ;;  %v7817_v37 = vadd.f32 %v21179_v0, %v21178_v21  ;;  %v21190_v35 = vld [vmem:[#allocation81_spill] sm:$0xff]  ;;  %v21194_v0 = vld [vmem:[#allocation2_spill] sm:$0xff] }
 0x539   :  { %v8428_v27 = vmax.f32 %v8148_v46, 0.0  ;;  %v8150_v28 = vadd.f32 %v8149_v33, %v7797_v6 }
 0x53a   :  { %v8153_v63 = vpop.f32.mrf.mxu0  ;;  %8392 = vmatmul.mubr.bf16.gmra.mxu0 %v13459_v3 }
 0x53b   :  { %v8542_v9 = vpack.c.bf16 %v8428_v27, %v8426_v43  ;;  %v8429_v8 = vmax.f32 %v8150_v28, 0.0  ;;  %v8154_v39 = vadd.f32 %v8153_v63, %v7801_v34  ;;  %v21180_v43 = vld [vmem:[#allocation102_spill] sm:$0xff]  ;;  %v21181_v27 = vld [vmem:[#allocation103_spill] sm:$0xff] }
 0x53c   :  { %v8155_v55 = vpop.f32.mrf.mxu0  ;;  %v7821_v28 = vadd.f32 %v21181_v27, %v21180_v43  ;;  %v21196_v27 = vld [vmem:[#allocation3_spill] sm:$0xff] }
 0x53d   :  { %v8543_v26 = vpack.c.bf16 %v8429_v8, %v8427_v48  ;;  %v8156_v11 = vadd.f32 %v8155_v55, %v7803_v54  ;;  %v8430_v53 = vmax.f32 %v8154_v39, 0.0  ;;  %v21182_v8 = vld [vmem:[#allocation78_spill] sm:$0xff]  ;;  %v21183_v55 = vld [vmem:[#allocation104_spill] sm:$0xff] }
 0x53e   :  { %v8157_v42 = vpop.f32.mrf.mxu0  ;;  %v7823_v54 = vadd.f32 %v21183_v55, %v21182_v8  ;;  %v21198_v55 = vld [vmem:[#allocation4_spill] sm:$0xff] }
 0x53f   :  { %v8158_v60 = vadd.f32 %v8157_v42, %v7805_v31  ;;  %8809 = vmatprep.mubr.bf16.mxu1 %v8543_v26  ;;  %v8431_v58 = vmax.f32 %v8156_v11, 0.0  ;;  %v21185_v31 = vld [vmem:[#allocation105_spill] sm:$0xff] }
 0x540   :  { %v8159_v2 = vpop.f32.mrf.mxu0  ;;  %8810 = vmatmul.mubr.bf16.gmra.mxu1 %v8542_v9  ;;  %v7825_v26 = vadd.f32 %v21185_v31, %v21184_v47  ;;  %v21200_v31 = vld [vmem:[#allocation5_spill] sm:$0xff] }
 0x541   :  { %v8432_v20 = vmax.f32 %v8158_v60, 0.0  ;;  %v8160_v45 = vadd.f32 %v8159_v2, %v7807_v49  ;;  %v21187_v49 = vld [vmem:[#allocation106_spill] sm:$0xff] }
 0x542   :  { %v8163_v16 = vpop.f32.mrf.mxu0  ;;  %v7827_v11 = vadd.f32 %v21187_v49, %v21186_v13  ;;  %v21202_v49 = vld [vmem:[#allocation6_spill] sm:$0xff] }
 0x543   :  { %v8544_v32 = vpack.c.bf16 %v8432_v20, %v8430_v53  ;;  %v8433_v22 = vmax.f32 %v8160_v45, 0.0  ;;  %v8164_v17 = vadd.f32 %v8163_v16, %v7811_v19  ;;  %v21189_v19 = vld [vmem:[#allocation107_spill] sm:$0xff] }
 0x544   :  { %v8165_v59 = vpop.f32.mrf.mxu0 }
 0x545   :  { %v8545_v12 = vpack.c.bf16 %v8433_v22, %v8431_v58  ;;  %v8166_v24 = vadd.f32 %v8165_v59, %v7813_v38  ;;  %v8434_v6 = vmax.f32 %v8164_v17, 0.0  ;;  %v7831_v58 = vadd.f32 %v21189_v19, %v21188_v23  ;;  %v21191_v38 = vld [vmem:[#allocation108_spill] sm:$0xff]  ;;  %v21204_v19 = vld [vmem:[#allocation83_spill] sm:$0xff] }
 0x546   :  { %v8167_v40 = vpop.f32.mrf.mxu0  ;;  %v7833_v14 = vadd.f32 %v21191_v38, %v21190_v35  ;;  %v21206_v38 = vld [vmem:[#allocation7_spill] sm:$0xff] }
 0x547   :  { %v8168_v1 = vadd.f32 %v8167_v40, %v7815_v7  ;;  %8817 = vmatprep.mubr.bf16.mxu1 %v8545_v12  ;;  %v8435_v63 = vmax.f32 %v8166_v24, 0.0  ;;  %v21193_v7 = vld [vmem:[#allocation109_spill] sm:$0xff] }
 0x548   :  { %v8169_v3 = vpop.f32.mrf.mxu0  ;;  %8818 = vmatmul.mubr.bf16.gmra.mxu1 %v8544_v32  ;;  %v7835_v12 = vadd.f32 %v21193_v7, %v21192_v62  ;;  %v21208_v7 = vld [vmem:[#allocation8_spill] sm:$0xff] }
 0x549   :  { %v8436_v41 = vmax.f32 %v8168_v1, 0.0  ;;  %v8170_v46 = vadd.f32 %v8169_v3, %v7817_v37  ;;  %v21195_v37 = vld [vmem:[#allocation110_spill] sm:$0xff] }
 0x54a   :  { %v8173_v33 = vpop.f32.mrf.mxu0  ;;  %v7837_v24 = vadd.f32 %v21195_v37, %v21194_v0  ;;  %v21209_v0 = vld [vmem:[#allocation9_spill] sm:$0xff] }
 0x54b   :  { %v8546_v34 = vpack.c.bf16 %v8436_v41, %v8434_v6  ;;  %v8437_v48 = vmax.f32 %v8170_v46, 0.0  ;;  %v8174_v42 = vadd.f32 %v8173_v33, %v7821_v28  ;;  %v21197_v28 = vld [vmem:[#allocation111_spill] sm:$0xff]  ;;  %v21210_v37 = vld [vmem:[#allocation117_spill] sm:$0xff] }
 0x54c   :  { %v8175_v9 = vpop.f32.mrf.mxu0 }
 0x54d   :  { %v8547_v39 = vpack.c.bf16 %v8437_v48, %v8435_v63  ;;  %v8176_v60 = vadd.f32 %v8175_v9, %v7823_v54  ;;  %v8438_v20 = vmax.f32 %v8174_v42, 0.0  ;;  %v7841_v63 = vadd.f32 %v21197_v28, %v21196_v27  ;;  %v21199_v54 = vld [vmem:[#allocation112_spill] sm:$0xff]  ;;  %v21211_v27 = vld [vmem:[#allocation10_spill] sm:$0xff] }
 0x54e   :  { %v8177_v52 = vpop.f32.mrf.mxu0  ;;  %v7843_v47 = vadd.f32 %v21199_v54, %v21198_v55  ;;  %v21212_v28 = vld [vmem:[#allocation118_spill] sm:$0xff]  ;;  %v21214_v55 = vld [vmem:[#allocation119_spill] sm:$0xff] }
 0x54f   :  { %v8178_v2 = vadd.f32 %v8177_v52, %v7825_v26  ;;  %8825 = vmatprep.mubr.bf16.mxu1 %v8547_v39  ;;  %v8439_v32 = vmax.f32 %v8176_v60, 0.0  ;;  %v21201_v26 = vld [vmem:[#allocation113_spill] sm:$0xff] }
 0x550   :  { %v8179_v53 = vpop.f32.mrf.mxu0  ;;  %8826 = vmatmul.mubr.bf16.gmra.mxu1 %v8546_v34  ;;  %v7845_v39 = vadd.f32 %v21201_v26, %v21200_v31  ;;  %v21216_v31 = vld [vmem:[#allocation120_spill] sm:$0xff] }
 0x551   :  { %v8440_v45 = vmax.f32 %v8178_v2, 0.0  ;;  %v8180_v16 = vadd.f32 %v8179_v53, %v7827_v11  ;;  %v21203_v11 = vld [vmem:[#allocation114_spill] sm:$0xff] }
 0x552   :  { %v8183_v5 = vpop.f32.mrf.mxu0  ;;  %v7847_v60 = vadd.f32 %v21203_v11, %v21202_v49  ;;  %v21218_v49 = vld [vmem:[#allocation121_spill] sm:$0xff] }
 0x553   :  { %v8548_v22 = vpack.c.bf16 %v8440_v45, %v8438_v20  ;;  %v8441_v59 = vmax.f32 %v8180_v16, 0.0  ;;  %v8184_v40 = vadd.f32 %v8183_v5, %v7831_v58  ;;  %v21205_v58 = vld [vmem:[#allocation115_spill] sm:$0xff] }
 0x554   :  { %v8185_v57 = vpop.f32.mrf.mxu0 }
 0x555   :  { %v8549_v17 = vpack.c.bf16 %v8441_v59, %v8439_v32  ;;  %v8186_v1 = vadd.f32 %v8185_v57, %v7833_v14  ;;  %v8442_v41 = vmax.f32 %v8184_v40, 0.0  ;;  %v7851_v32 = vadd.f32 %v21205_v58, %v21204_v19  ;;  %v21207_v14 = vld [vmem:[#allocation116_spill] sm:$0xff]  ;;  %v21220_v19 = vld [vmem:[#allocation122_spill] sm:$0xff] }
 0x556   :  { %v8187_v21 = vpop.f32.mrf.mxu0  ;;  %v7853_v62 = vadd.f32 %v21207_v14, %v21206_v38  ;;  %v21222_v38 = vld [vmem:[#allocation123_spill] sm:$0xff] }
 0x557   :  { %v8188_v3 = vadd.f32 %v8187_v21, %v7835_v12  ;;  %8833 = vmatprep.mubr.bf16.mxu1 %v8549_v17  ;;  %v8443_v34 = vmax.f32 %v8186_v1, 0.0  ;;  %v7855_v12 = vadd.f32 %v17645_v51, %v21208_v7  ;;  %v21224_v7 = vld [vmem:[#allocation124_spill] sm:$0xff] }
 0x558   :  { %v8189_v6 = vpop.f32.mrf.mxu0  ;;  %8834 = vmatmul.mubr.bf16.gmra.mxu1 %v8548_v22 }
 0x559   :  { %v8444_v46 = vmax.f32 %v8188_v3, 0.0  ;;  %v8190_v33 = vadd.f32 %v8189_v6, %v7837_v24  ;;  %v7857_v24 = vadd.f32 %v21210_v37, %v21209_v0  ;;  %v21225_v0 = vld [vmem:[#allocation17_spill] sm:$0xff] }
 0x55a   :  { %v8193_v43 = vpop.f32.mrf.mxu0  ;;  %v21226_v37 = vld [vmem:[#allocation125_spill] sm:$0xff] }
 0x55b   :  { %v8550_v48 = vpack.c.bf16 %v8444_v46, %v8442_v41  ;;  %v8445_v9 = vmax.f32 %v8190_v33, 0.0  ;;  %v8194_v52 = vadd.f32 %v8193_v43, %v7841_v63  ;;  %v7861_v63 = vadd.f32 %v21212_v28, %v21211_v27  ;;  %v21227_v27 = vld [vmem:[#allocation18_spill] sm:$0xff] }
 0x55c   :  { %v8195_v8 = vpop.f32.mrf.mxu0  ;;  %v21228_v28 = vld [vmem:[#allocation126_spill] sm:$0xff] }
 0x55d   :  { %v8551_v42 = vpack.c.bf16 %v8445_v9, %v8443_v34  ;;  %v8196_v2 = vadd.f32 %v8195_v8, %v7843_v47  ;;  %v8446_v45 = vmax.f32 %v8194_v52, 0.0  ;;  %v21213_v8 = vld [vmem:[#allocation11_spill] sm:$0xff]  ;;  %v21215_v47 = vld [vmem:[#allocation12_spill] sm:$0xff] }
 0x55e   :  { %v8197_v13 = vpop.f32.mrf.mxu0  ;;  %v7863_v54 = vadd.f32 %v21214_v55, %v21213_v8  ;;  %v7865_v26 = vadd.f32 %v21216_v31, %v21215_v47  ;;  %v21229_v8 = vld [vmem:[#allocation19_spill] sm:$0xff]  ;;  %v21231_v47 = vld [vmem:[#allocation20_spill] sm:$0xff] }
 0x55f   :  { %v8198_v53 = vadd.f32 %v8197_v13, %v7845_v39  ;;  %8841 = vmatprep.mubr.bf16.mxu1 %v8551_v42  ;;  %v8447_v22 = vmax.f32 %v8196_v2, 0.0  ;;  %v21217_v13 = vld [vmem:[#allocation13_spill] sm:$0xff]  ;;  %v21230_v55 = vld [vmem:[#allocation127_spill] sm:$0xff]  ;;  %v21232_v31 = vld [vmem:[#allocation128_spill] sm:$0xff] }
 0x560   :  { %v8199_v20 = vpop.f32.mrf.mxu0  ;;  %8842 = vmatmul.mubr.bf16.gmra.mxu1 %v8550_v48  ;;  %v7867_v11 = vadd.f32 %v21218_v49, %v21217_v13  ;;  %v21233_v13 = vld [vmem:[#allocation21_spill] sm:$0xff] }
 0x561   :  { %v8448_v16 = vmax.f32 %v8198_v53, 0.0  ;;  %v8200_v5 = vadd.f32 %v8199_v20, %v7847_v60  ;;  %v21234_v49 = vld [vmem:[#allocation129_spill] sm:$0xff] }
 0x562   :  { %v8203_v23 = vpop.f32.mrf.mxu0 }
 0x563   :  { %v8552_v59 = vpack.c.bf16 %v8448_v16, %v8446_v45  ;;  %v8449_v57 = vmax.f32 %v8200_v5, 0.0  ;;  %v8204_v40 = vadd.f32 %v8203_v23, %v7851_v32  ;;  %v21219_v23 = vld [vmem:[#allocation14_spill] sm:$0xff] }
 0x564   :  { %v8205_v35 = vpop.f32.mrf.mxu0  ;;  %v7871_v58 = vadd.f32 %v21220_v19, %v21219_v23  ;;  %v21235_v23 = vld [vmem:[#allocation22_spill] sm:$0xff] }
 0x565   :  { %v8553_v17 = vpack.c.bf16 %v8449_v57, %v8447_v22  ;;  %v8206_v1 = vadd.f32 %v8205_v35, %v7853_v62  ;;  %v8450_v41 = vmax.f32 %v8204_v40, 0.0  ;;  %v21221_v35 = vld [vmem:[#allocation15_spill] sm:$0xff]  ;;  %v21223_v62 = vld [vmem:[#allocation16_spill] sm:$0xff]  ;;  %v21236_v19 = vld [vmem:[#allocation130_spill] sm:$0xff] }
 0x566   :  { %v8207_v21 = vpop.f32.mrf.mxu0  ;;  %v7873_v14 = vadd.f32 %v21222_v38, %v21221_v35  ;;  %v21237_v35 = vld [vmem:[#allocation23_spill] sm:$0xff] }
 0x567   :  { %v8208_v3 = vadd.f32 %v8207_v21, %v7855_v12  ;;  %8849 = vmatprep.mubr.bf16.mxu1 %v8553_v17  ;;  %v8451_v34 = vmax.f32 %v8206_v1, 0.0  ;;  %v7875_v12 = vadd.f32 %v21224_v7, %v21223_v62  ;;  %v21238_v38 = vld [vmem:[#allocation131_spill] sm:$0xff]  ;;  %v21239_v62 = vld [vmem:[#allocation24_spill] sm:$0xff] }
 0x568   :  { %v8209_v6 = vpop.f32.mrf.mxu0  ;;  %8850 = vmatmul.mubr.bf16.gmra.mxu1 %v8552_v59  ;;  %v21240_v7 = vld [vmem:[#allocation132_spill] sm:$0xff] }
 0x569   :  { %v8452_v46 = vmax.f32 %v8208_v3, 0.0  ;;  %v8210_v33 = vadd.f32 %v8209_v6, %v7857_v24  ;;  %v7877_v24 = vadd.f32 %v21226_v37, %v21225_v0  ;;  %v21241_v0 = vld [vmem:[#allocation25_spill] sm:$0xff] }
 0x56a   :  { %v8213_v43 = vpop.f32.mrf.mxu0  ;;  %v21242_v37 = vld [vmem:[#allocation133_spill] sm:$0xff] }
 0x56b   :  { %v8554_v51 = vpack.c.bf16 %v8452_v46, %v8450_v41  ;;  %v8453_v48 = vmax.f32 %v8210_v33, 0.0  ;;  %v8214_v42 = vadd.f32 %v8213_v43, %v7861_v63  ;;  %v7881_v63 = vadd.f32 %v21228_v28, %v21227_v27  ;;  %v21243_v27 = vld [vmem:[#allocation26_spill] sm:$0xff] }
 0x56c   :  { %v8215_v9 = vpop.f32.mrf.mxu0  ;;  %v21244_v28 = vld [vmem:[#allocation134_spill] sm:$0xff] }
 0x56d   :  { %v8555_v39 = vpack.c.bf16 %v8453_v48, %v8451_v34  ;;  %v8216_v60 = vadd.f32 %v8215_v9, %v7863_v54  ;;  %v8454_v20 = vmax.f32 %v8214_v42, 0.0  ;;  %v7883_v54 = vadd.f32 %v21230_v55, %v21229_v8  ;;  %v21245_v8 = vld [vmem:[#allocation27_spill] sm:$0xff] }
 0x56e   :  { %v8217_v52 = vpop.f32.mrf.mxu0  ;;  %v21246_v55 = vld [vmem:[#allocation135_spill] sm:$0xff] }
 0x56f   :  { %v8218_v2 = vadd.f32 %v8217_v52, %v7865_v26  ;;  %8857 = vmatprep.mubr.bf16.mxu1 %v8555_v39  ;;  %v8455_v32 = vmax.f32 %v8216_v60, 0.0  ;;  %v7885_v26 = vadd.f32 %v21232_v31, %v21231_v47  ;;  %v21247_v47 = vld [vmem:[#allocation28_spill] sm:$0xff] }
 0x570   :  { %v8219_v53 = vpop.f32.mrf.mxu0  ;;  %8858 = vmatmul.mubr.bf16.gmra.mxu1 %v8554_v51  ;;  %v21248_v31 = vld [vmem:[#allocation136_spill] sm:$0xff] }
 0x571   :  { %v8456_v45 = vmax.f32 %v8218_v2, 0.0  ;;  %v8220_v16 = vadd.f32 %v8219_v53, %v7867_v11  ;;  %v7887_v11 = vadd.f32 %v21234_v49, %v21233_v13  ;;  %v21249_v13 = vld [vmem:[#allocation29_spill] sm:$0xff] }
 0x572   :  { %v8223_v5 = vpop.f32.mrf.mxu0  ;;  %v21250_v49 = vld [vmem:[#allocation137_spill] sm:$0xff] }
 0x573   :  { %v8556_v22 = vpack.c.bf16 %v8456_v45, %v8454_v20  ;;  %v8457_v59 = vmax.f32 %v8220_v16, 0.0  ;;  %v8224_v40 = vadd.f32 %v8223_v5, %v7871_v58  ;;  %v7891_v58 = vadd.f32 %v21236_v19, %v21235_v23  ;;  %v21251_v23 = vld [vmem:[#allocation30_spill] sm:$0xff] }
 0x574   :  { %v8225_v57 = vpop.f32.mrf.mxu0  ;;  %v21252_v19 = vld [vmem:[#allocation138_spill] sm:$0xff] }
 0x575   :  { %v8557_v17 = vpack.c.bf16 %v8457_v59, %v8455_v32  ;;  %v8226_v1 = vadd.f32 %v8225_v57, %v7873_v14  ;;  %v8458_v41 = vmax.f32 %v8224_v40, 0.0  ;;  %v7893_v14 = vadd.f32 %v21238_v38, %v21237_v35  ;;  %v21253_v35 = vld [vmem:[#allocation31_spill] sm:$0xff] }
 0x576   :  { %v8227_v21 = vpop.f32.mrf.mxu0  ;;  %v21254_v38 = vld [vmem:[#allocation139_spill] sm:$0xff] }
 0x577   :  { %v8228_v3 = vadd.f32 %v8227_v21, %v7875_v12  ;;  %8865 = vmatprep.mubr.bf16.mxu1 %v8557_v17  ;;  %v8459_v34 = vmax.f32 %v8226_v1, 0.0  ;;  %v7895_v12 = vadd.f32 %v21240_v7, %v21239_v62  ;;  %v21255_v62 = vld [vmem:[#allocation32_spill] sm:$0xff] }
 0x578   :  { %v8229_v6 = vpop.f32.mrf.mxu0  ;;  %8866 = vmatmul.mubr.bf16.gmra.mxu1 %v8556_v22  ;;  %v21256_v7 = vld [vmem:[#allocation140_spill] sm:$0xff] }
 0x579   :  { %v8460_v46 = vmax.f32 %v8228_v3, 0.0  ;;  %v8230_v33 = vadd.f32 %v8229_v6, %v7877_v24  ;;  %v7897_v24 = vadd.f32 %v21242_v37, %v21241_v0  ;;  %v21257_v0 = vld [vmem:[#allocation33_spill] sm:$0xff] }
 0x57a   :  { %v8233_v43 = vpop.f32.mrf.mxu0  ;;  %v21258_v37 = vld [vmem:[#allocation141_spill] sm:$0xff] }
 0x57b   :  { %v8558_v51 = vpack.c.bf16 %v8460_v46, %v8458_v41  ;;  %v8461_v48 = vmax.f32 %v8230_v33, 0.0  ;;  %v8234_v42 = vadd.f32 %v8233_v43, %v7881_v63  ;;  %v7901_v63 = vadd.f32 %v21244_v28, %v21243_v27  ;;  %v21259_v27 = vld [vmem:[#allocation34_spill] sm:$0xff] }
 0x57c   :  { %v8235_v9 = vpop.f32.mrf.mxu0  ;;  %v21260_v28 = vld [vmem:[#allocation142_spill] sm:$0xff] }
 0x57d   :  { %v8559_v39 = vpack.c.bf16 %v8461_v48, %v8459_v34  ;;  %v8236_v60 = vadd.f32 %v8235_v9, %v7883_v54  ;;  %v8462_v20 = vmax.f32 %v8234_v42, 0.0  ;;  %v7903_v54 = vadd.f32 %v21246_v55, %v21245_v8  ;;  %v21261_v8 = vld [vmem:[#allocation35_spill] sm:$0xff] }
 0x57e   :  { %v8237_v52 = vpop.f32.mrf.mxu0  ;;  %v21262_v55 = vld [vmem:[#allocation143_spill] sm:$0xff] }
 0x57f   :  { %v8238_v2 = vadd.f32 %v8237_v52, %v7885_v26  ;;  %8873 = vmatprep.mubr.bf16.mxu1 %v8559_v39  ;;  %v8463_v32 = vmax.f32 %v8236_v60, 0.0  ;;  %v7905_v26 = vadd.f32 %v21248_v31, %v21247_v47  ;;  %v21263_v47 = vld [vmem:[#allocation36_spill] sm:$0xff] }
 0x580   :  { %v8239_v53 = vpop.f32.mrf.mxu0  ;;  %8874 = vmatmul.mubr.bf16.gmra.mxu1 %v8558_v51  ;;  %v21264_v31 = vld [vmem:[#allocation144_spill] sm:$0xff] }
 0x581   :  { %v8464_v45 = vmax.f32 %v8238_v2, 0.0  ;;  %v8240_v16 = vadd.f32 %v8239_v53, %v7887_v11  ;;  %v7907_v11 = vadd.f32 %v21250_v49, %v21249_v13  ;;  %v21265_v13 = vld [vmem:[#allocation37_spill] sm:$0xff] }
 0x582   :  { %v8243_v5 = vpop.f32.mrf.mxu0  ;;  %v21266_v49 = vld [vmem:[#allocation145_spill] sm:$0xff] }
 0x583   :  { %v8560_v22 = vpack.c.bf16 %v8464_v45, %v8462_v20  ;;  %v8465_v59 = vmax.f32 %v8240_v16, 0.0  ;;  %v8244_v40 = vadd.f32 %v8243_v5, %v7891_v58  ;;  %v7911_v58 = vadd.f32 %v21252_v19, %v21251_v23  ;;  %v21267_v23 = vld [vmem:[#allocation38_spill] sm:$0xff] }
 0x584   :  { %v8245_v57 = vpop.f32.mrf.mxu0  ;;  %v21268_v19 = vld [vmem:[#allocation146_spill] sm:$0xff] }
 0x585   :  { %v8561_v17 = vpack.c.bf16 %v8465_v59, %v8463_v32  ;;  %v8246_v1 = vadd.f32 %v8245_v57, %v7893_v14  ;;  %v8466_v41 = vmax.f32 %v8244_v40, 0.0  ;;  %v7913_v14 = vadd.f32 %v21254_v38, %v21253_v35  ;;  %v21269_v35 = vld [vmem:[#allocation39_spill] sm:$0xff] }
 0x586   :  { %v8247_v21 = vpop.f32.mrf.mxu0  ;;  %v21270_v38 = vld [vmem:[#allocation147_spill] sm:$0xff] }
 0x587   :  { %v8248_v3 = vadd.f32 %v8247_v21, %v7895_v12  ;;  %8881 = vmatprep.mubr.bf16.mxu1 %v8561_v17  ;;  %v8467_v34 = vmax.f32 %v8246_v1, 0.0  ;;  %v7915_v12 = vadd.f32 %v21256_v7, %v21255_v62  ;;  %v21271_v62 = vld [vmem:[#allocation40_spill] sm:$0xff] }
 0x588   :  { %v8249_v6 = vpop.f32.mrf.mxu0  ;;  %8882 = vmatmul.mubr.bf16.gmra.mxu1 %v8560_v22  ;;  %v21272_v7 = vld [vmem:[#allocation148_spill] sm:$0xff] }
 0x589   :  { %v8468_v46 = vmax.f32 %v8248_v3, 0.0  ;;  %v8250_v33 = vadd.f32 %v8249_v6, %v7897_v24  ;;  %v7917_v24 = vadd.f32 %v21258_v37, %v21257_v0  ;;  %v21273_v0 = vld [vmem:[#allocation41_spill] sm:$0xff] }
 0x58a   :  { %v8253_v43 = vpop.f32.mrf.mxu0  ;;  %v21274_v37 = vld [vmem:[#allocation149_spill] sm:$0xff] }
 0x58b   :  { %v8562_v51 = vpack.c.bf16 %v8468_v46, %v8466_v41  ;;  %v8469_v48 = vmax.f32 %v8250_v33, 0.0  ;;  %v8254_v42 = vadd.f32 %v8253_v43, %v7901_v63  ;;  %v7921_v63 = vadd.f32 %v21260_v28, %v21259_v27  ;;  %v21275_v27 = vld [vmem:[#allocation42_spill] sm:$0xff] }
 0x58c   :  { %v8255_v9 = vpop.f32.mrf.mxu0  ;;  %v21276_v28 = vld [vmem:[#allocation150_spill] sm:$0xff] }
 0x58d   :  { %v8563_v39 = vpack.c.bf16 %v8469_v48, %v8467_v34  ;;  %v8256_v60 = vadd.f32 %v8255_v9, %v7903_v54  ;;  %v8470_v20 = vmax.f32 %v8254_v42, 0.0  ;;  %v7923_v54 = vadd.f32 %v21262_v55, %v21261_v8  ;;  %v21277_v8 = vld [vmem:[#allocation43_spill] sm:$0xff] }
 0x58e   :  { %v8257_v52 = vpop.f32.mrf.mxu0  ;;  %v21278_v55 = vld [vmem:[#allocation151_spill] sm:$0xff] }
 0x58f   :  { %v8258_v2 = vadd.f32 %v8257_v52, %v7905_v26  ;;  %8889 = vmatprep.mubr.bf16.mxu1 %v8563_v39  ;;  %v8471_v32 = vmax.f32 %v8256_v60, 0.0  ;;  %v7925_v26 = vadd.f32 %v21264_v31, %v21263_v47  ;;  %v21279_v47 = vld [vmem:[#allocation44_spill] sm:$0xff] }
 0x590   :  { %v8259_v53 = vpop.f32.mrf.mxu0  ;;  %8890 = vmatmul.mubr.bf16.gmra.mxu1 %v8562_v51  ;;  %v21280_v31 = vld [vmem:[#allocation152_spill] sm:$0xff] }
 0x591   :  { %v8472_v45 = vmax.f32 %v8258_v2, 0.0  ;;  %v8260_v16 = vadd.f32 %v8259_v53, %v7907_v11  ;;  %v7927_v11 = vadd.f32 %v21266_v49, %v21265_v13  ;;  %v21281_v13 = vld [vmem:[#allocation45_spill] sm:$0xff] }
 0x592   :  { %v8263_v5 = vpop.f32.mrf.mxu0  ;;  %v21282_v49 = vld [vmem:[#allocation153_spill] sm:$0xff] }
 0x593   :  { %v8564_v22 = vpack.c.bf16 %v8472_v45, %v8470_v20  ;;  %v8473_v59 = vmax.f32 %v8260_v16, 0.0  ;;  %v8264_v40 = vadd.f32 %v8263_v5, %v7911_v58  ;;  %v7931_v58 = vadd.f32 %v21268_v19, %v21267_v23  ;;  %v21284_v23 = vld [vmem:[#allocation154_spill] sm:$0xff] }
 0x594   :  { %v8265_v57 = vpop.f32.mrf.mxu0 }
 0x595   :  { %v8565_v17 = vpack.c.bf16 %v8473_v59, %v8471_v32  ;;  %v8266_v1 = vadd.f32 %v8265_v57, %v7913_v14  ;;  %v8474_v41 = vmax.f32 %v8264_v40, 0.0  ;;  %v7933_v14 = vadd.f32 %v21270_v38, %v21269_v35  ;;  %v21289_v38 = vld [vmem:[#allocation49_spill] sm:$0xff] }
 0x596   :  { %v8267_v21 = vpop.f32.mrf.mxu0 }
 0x597   :  { %v8268_v3 = vadd.f32 %v8267_v21, %v7915_v12  ;;  %8897 = vmatprep.mubr.bf16.mxu1 %v8565_v17  ;;  %v8475_v34 = vmax.f32 %v8266_v1, 0.0  ;;  %v7935_v12 = vadd.f32 %v21272_v7, %v21271_v62 }
 0x598   :  { %v8269_v6 = vpop.f32.mrf.mxu0  ;;  %8898 = vmatmul.mubr.bf16.gmra.mxu1 %v8564_v22 }
 0x599   :  { %v8476_v46 = vmax.f32 %v8268_v3, 0.0  ;;  %v8270_v33 = vadd.f32 %v8269_v6, %v7917_v24  ;;  %v7937_v24 = vadd.f32 %v21274_v37, %v21273_v0 }
 0x59a   :  { %v8273_v43 = vpop.f32.mrf.mxu0 }
 0x59b   :  { %v8566_v51 = vpack.c.bf16 %v8476_v46, %v8474_v41  ;;  %v8477_v48 = vmax.f32 %v8270_v33, 0.0  ;;  %v8274_v42 = vadd.f32 %v8273_v43, %v7921_v63  ;;  %v7941_v63 = vadd.f32 %v21276_v28, %v21275_v27  ;;  %v21299_v28 = vld [vmem:[#allocation54_spill] sm:$0xff] }
 0x59c   :  { %v8275_v9 = vpop.f32.mrf.mxu0 }
 0x59d   :  { %v8567_v39 = vpack.c.bf16 %v8477_v48, %v8475_v34  ;;  %v8276_v60 = vadd.f32 %v8275_v9, %v7923_v54  ;;  %v8478_v20 = vmax.f32 %v8274_v42, 0.0  ;;  %v7943_v54 = vadd.f32 %v21278_v55, %v21277_v8  ;;  %v21303_v55 = vld [vmem:[#allocation56_spill] sm:$0xff] }
 0x59e   :  { %v8277_v52 = vpop.f32.mrf.mxu0 }
 0x59f   :  { %v8278_v2 = vadd.f32 %v8277_v52, %v7925_v26  ;;  %8905 = vmatprep.mubr.bf16.mxu1 %v8567_v39  ;;  %v8479_v32 = vmax.f32 %v8276_v60, 0.0  ;;  %v7945_v26 = vadd.f32 %v21280_v31, %v21279_v47 }
 0x5a0   :  { %v8279_v53 = vpop.f32.mrf.mxu0  ;;  %8906 = vmatmul.mubr.bf16.gmra.mxu1 %v8566_v51 }
 0x5a1   :  { %v8480_v45 = vmax.f32 %v8278_v2, 0.0  ;;  %v8280_v16 = vadd.f32 %v8279_v53, %v7927_v11  ;;  %v7947_v11 = vadd.f32 %v21282_v49, %v21281_v13  ;;  %v21307_v13 = vld [vmem:[#allocation58_spill] sm:$0xff] }
 0x5a2   :  { %v8283_v5 = vpop.f32.mrf.mxu0  ;;  %v21308_v49 = vld [vmem:[#allocation166_spill] sm:$0xff] }
 0x5a3   :  { %v8568_v22 = vpack.c.bf16 %v8480_v45, %v8478_v20  ;;  %v8481_v59 = vmax.f32 %v8280_v16, 0.0  ;;  %v8284_v40 = vadd.f32 %v8283_v5, %v7931_v58  ;;  %v21283_v5 = vld [vmem:[#allocation46_spill] sm:$0xff]  ;;  %v21285_v58 = vld [vmem:[#allocation47_spill] sm:$0xff] }
 0x5a4   :  { %v8285_v57 = vpop.f32.mrf.mxu0  ;;  %v7951_v19 = vadd.f32 %v21284_v23, %v21283_v5  ;;  %v21313_v23 = vld [vmem:[#allocation61_spill] sm:$0xff] }
 0x5a5   :  { %v8569_v17 = vpack.c.bf16 %v8481_v59, %v8479_v32  ;;  %v8286_v1 = vadd.f32 %v8285_v57, %v7933_v14  ;;  %v8482_v41 = vmax.f32 %v8284_v40, 0.0  ;;  %v21286_v32 = vld [vmem:[#allocation155_spill] sm:$0xff]  ;;  %v21287_v59 = vld [vmem:[#allocation48_spill] sm:$0xff]  ;;  %v21290_v14 = vld [vmem:[#allocation157_spill] sm:$0xff] }
 0x5a6   :  { %v8287_v21 = vpop.f32.mrf.mxu0  ;;  %v21288_v57 = vld [vmem:[#allocation156_spill] sm:$0xff]  ;;  %v7957_v62 = vadd.f32 %v21290_v14, %v21289_v38 }
 0x5a7   :  { %v8288_v3 = vadd.f32 %v8287_v21, %v7935_v12  ;;  %8913 = vmatprep.mubr.bf16.mxu1 %v8569_v17  ;;  %v8483_v34 = vmax.f32 %v8286_v1, 0.0  ;;  %v7955_v35 = vadd.f32 %v21288_v57, %v21287_v59  ;;  %v21291_v12 = vld [vmem:[#allocation50_spill] sm:$0xff]  ;;  %v21294_v1 = vld [vmem:[#allocation159_spill] sm:$0xff] }
 0x5a8   :  { %v8289_v6 = vpop.f32.mrf.mxu0  ;;  %8914 = vmatmul.mubr.bf16.gmra.mxu1 %v8568_v22  ;;  %v7953_v22 = vadd.f32 %v21286_v32, %v21285_v58  ;;  %v21292_v17 = vld [vmem:[#allocation158_spill] sm:$0xff]  ;;  %v21314_v58 = vld [vmem:[#allocation169_spill] sm:$0xff] }
 0x5a9   :  { %v8484_v46 = vmax.f32 %v8288_v3, 0.0  ;;  %v8290_v33 = vadd.f32 %v8289_v6, %v7937_v24  ;;  %v7961_v40 = vadd.f32 %v21292_v17, %v21291_v12  ;;  %v21293_v24 = vld [vmem:[#allocation51_spill] sm:$0xff]  ;;  %v21295_v6 = vld [vmem:[#allocation52_spill] sm:$0xff]  ;;  %v21315_v32 = vld [vmem:[#allocation62_spill] sm:$0xff] }
 0x5aa   :  { %v8293_v43 = vpop.f32.mrf.mxu0  ;;  %v7963_v3 = vadd.f32 %v21294_v1, %v21293_v24  ;;  %v21316_v59 = vld [vmem:[#allocation170_spill] sm:$0xff]  ;;  %v21318_v12 = vld [vmem:[#allocation171_spill] sm:$0xff]  ;;  %v21321_v1 = vld [vmem:[#allocation65_spill] sm:$0xff] }
 0x5ab   :  { %v8570_v51 = vpack.c.bf16 %v8484_v46, %v8482_v41  ;;  %v8485_v48 = vmax.f32 %v8290_v33, 0.0  ;;  %v8294_v42 = vadd.f32 %v8293_v43, %v7941_v63  ;;  %v21296_v41 = vld [vmem:[#allocation160_spill] sm:$0xff]  ;;  %v21297_v33 = vld [vmem:[#allocation53_spill] sm:$0xff]  ;;  %v21300_v63 = vld [vmem:[#allocation162_spill] sm:$0xff]  ;;  %v18394_v57 = vadd.f32 %v21316_v59, %v21315_v32 }
 0x5ac   :  { %v8295_v9 = vpop.f32.mrf.mxu0  ;;  %v7965_v46 = vadd.f32 %v21296_v41, %v21295_v6  ;;  %v21298_v43 = vld [vmem:[#allocation161_spill] sm:$0xff]  ;;  %v21335_v32 = vld [vmem:[#allocation72_spill] sm:$0xff]  ;;  %v21336_v59 = vld [vmem:[#allocation178_spill] sm:$0xff] }
 0x5ad   :  { %v8571_v39 = vpack.c.bf16 %v8485_v48, %v8483_v34  ;;  %v8296_v60 = vadd.f32 %v8295_v9, %v7943_v54  ;;  %v8486_v20 = vmax.f32 %v8294_v42, 0.0  ;;  %v18358_v27 = vadd.f32 %v21298_v43, %v21297_v33  ;;  %v21301_v48 = vld [vmem:[#allocation55_spill] sm:$0xff]  ;;  %v21304_v54 = vld [vmem:[#allocation164_spill] sm:$0xff]  ;;  %v21306_v42 = vld [vmem:[#allocation165_spill] sm:$0xff] }
 0x5ae   :  { %v8297_v52 = vpop.f32.mrf.mxu0  ;;  %v18362_v34 = vadd.f32 %v21300_v63, %v21299_v28  ;;  %v21302_v9 = vld [vmem:[#allocation163_spill] sm:$0xff]  ;;  %v18370_v47 = vadd.f32 %v21304_v54, %v21303_v55  ;;  %v21322_v6 = vld [vmem:[#allocation173_spill] sm:$0xff]  ;;  %v21323_v33 = vld [vmem:[#allocation66_spill] sm:$0xff] }
 0x5af   :  { %v8298_v2 = vadd.f32 %v8297_v52, %v7945_v26  ;;  %8921 = vmatprep.mubr.bf16.mxu1 %v8571_v39  ;;  %v8487_v21 = vmax.f32 %v8296_v60, 0.0  ;;  %v18366_v8 = vadd.f32 %v21302_v9, %v21301_v48  ;;  %v21305_v39 = vld [vmem:[#allocation57_spill] sm:$0xff]  ;;  %v21309_v60 = vld [vmem:[#allocation59_spill] sm:$0xff]  ;;  %v18406_v41 = vadd.f32 %v21322_v6, %v21321_v1  ;;  %v21324_v43 = vld [vmem:[#allocation174_spill] sm:$0xff] }
 0x5b0   :  { %v8299_v53 = vpop.f32.mrf.mxu0  ;;  %8922 = vmatmul.mubr.bf16.gmra.mxu1 %v8570_v51  ;;  %v18374_v52 = vadd.f32 %v21306_v42, %v21305_v39  ;;  %v18410_v28 = vadd.f32 %v21324_v43, %v21323_v33  ;;  %v21325_v48 = vlaneseq  ;;  %v21327_v55 = vld [vmem:[#allocation67_spill] sm:$0xff]  ;;  %v21329_v39 = vld [vmem:[#allocation68_spill] sm:$0xff]  ;;  %v21340_v6 = vld [vmem:[#allocation181_spill] sm:$0xff] }
 0x5b1   :  { %v8488_v45 = vmax.f32 %v8298_v2, 0.0  ;;  %v8300_v16 = vadd.f32 %v8299_v53, %v7947_v11  ;;  %v18378_v11 = vadd.f32 %v21308_v49, %v21307_v13  ;;  %v21310_v2 = vld [vmem:[#allocation167_spill] sm:$0xff]  ;;  %v18421_v42 = vadd.f32 %v18042_v30, %v21329_v39  ;;  %v21330_v13 = vld [vmem:[#allocation69_spill] sm:$0xff] }
 0x5b2   :  { %v8303_v7 = vpop.f32.mrf.mxu0  ;;  %v18382_v53 = vadd.f32 %v21310_v2, %v21309_v60  ;;  %v18413_v9 = vand.u32 127, %v21325_v48  ;;  %v21328_v54 = vld [vmem:[#allocation175_spill] sm:$0xff]  ;;  %v18425_v49 = vadd.f32 %v21330_v13, %v18045_v29  ;;  %v21331_v60 = vld [vmem:[#allocation70_spill] sm:$0xff]  ;;  %v18437_v30 = vadd.f32 %v18068_v61, %v21335_v32  ;;  %v21339_v61 = vld [vmem:[#allocation73_spill] sm:$0xff] }
 0x5b3   :  { %v8572_v0 = vpack.c.bf16 %v8488_v45, %v8486_v20  ;;  %v8489_v37 = vmax.f32 %v8300_v16, 0.0  ;;  %v8304_v26 = vadd.f32 %v8303_v7, %v7951_v19  ;;  %v21311_v20 = vld [vmem:[#allocation60_spill] sm:$0xff]  ;;  %v18390_v19 = vadd.f32 %v21314_v58, %v21313_v23  ;;  %v21317_v7 = vld [vmem:[#allocation63_spill] sm:$0xff]  ;;  %v18489_v39 = vld [vmem:[%s20476_s5 + $0x18] sm:$0xff]  }
 0x5b4   :  { %v8305_v51 = vpop.f32.mrf.mxu0  ;;  %v21312_v45 = vld [vmem:[#allocation168_spill] sm:$0xff]  ;;  %v18398_v17 = vadd.f32 %v21318_v12, %v21317_v7  ;;  %21326 = vst [vmem:[#allocation75_spill] sm:$0xff] %v18413_v9  ;;  %v21333_v2 = vld [vmem:[#allocation71_spill] sm:$0xff]  ;;  %v18441_v29 = vadd.f32 %v21336_v59, %v18071_v10  ;;  %vm9532_vm0 = vcmp.lt.s32.totalorder %v18413_v9, 3  ;;  %vm9599_vm1 = vcmp.ge.s32.totalorder %v18413_v9, 3  ;;  %v21341_v10 = vld [vmem:[#allocation74_spill] sm:$0xff] }
 0x5b5   :  { %v8573_v31 = vpack.c.bf16 %v8489_v37, %v8487_v21  ;;  %v18386_v16 = vadd.f32 %v21312_v45, %v21311_v20  ;;  %v8306_v38 = vadd.f32 %v8305_v51, %v7953_v22  ;;  %v21319_v21 = vld [vmem:[#allocation64_spill] sm:$0xff]  ;;  %v8490_v22 = vmax.f32 %v8304_v26, 0.0  ;;  %v21334_v20 = vld [vmem:[#allocation177_spill] sm:$0xff] }
 0x5b6   :  { %v8307_v5 = vpop.f32.mrf.mxu0  ;;  %v21320_v37 = vld [vmem:[#allocation172_spill] sm:$0xff]  ;;  %v18433_v45 = vadd.f32 %v21334_v20, %v21333_v2  ;;  %v18454_v33 = vadd.f32 %v21340_v6, %v21339_v61  ;;  %v18458_v43 = vadd.f32 %v18094_v4, %v21341_v10  ;;  %v21344_v4 = vld [vmem:[#allocation185_spill] sm:$0xff] }
 0x5b7   :  { %v8308_v14 = vadd.f32 %v8307_v5, %v7955_v35  ;;  %8929 = vmatprep.mubr.bf16.mxu1 %v8573_v31  ;;  %v18402_v24 = vadd.f32 %v21320_v37, %v21319_v21  ;;  %v18417_v31 = vadd.f32 %v21328_v54, %v21327_v55  ;;  %v8491_v5 = vmax.f32 %v8306_v38, 0.0  ;;  %v21338_v7 = vld [vmem:[#allocation180_spill] sm:$0xff]  ;;  %v11955_v38 = vld [vmem:[%s20476_s5] sm:$0xff]  }
 0x5b8   :  { %v8309_v63 = vpop.f32.mrf.mxu0  ;;  %8930 = vmatmul.mubr.bf16.gmra.mxu1 %v8572_v0  ;;  %v21332_v0 = vld [vmem:[#allocation176_spill] sm:$0xff]  ;;  %v18479_v54 = vadd.f32 %v18123_v50, %v21344_v4 }
 0x5b9   :  { %v8492_v35 = vmax.f32 %v8308_v14, 0.0  ;;  %v8310_v51 = vadd.f32 %v8309_v63, %v7957_v62  ;;  %v18429_v26 = vadd.f32 %v21332_v0, %v21331_v60  ;;  %v21337_v14 = vld [vmem:[#allocation179_spill] sm:$0xff]  ;;  %v18462_v63 = vadd.f32 %v18099_v44, %v18097_v25  ;;  %v21343_v48 = vld [vmem:[#allocation184_spill] sm:$0xff]  ;;  %v8046_v0 = vpop.f32.mrf.mxu1 }
 0x5ba   :  { %v8313_v62 = vpop.f32.mrf.mxu0  ;;  %v18445_v12 = vadd.f32 %v21338_v7, %v21337_v14  ;;  %v18475_v55 = vadd.f32 %v18118_v56, %v21343_v48  ;;  %v11956_v56 = vunpack.c.l.bf16 %v11955_v38  ;;  %v13722_v60 = vmov 0.0  }
 0x5bb   :  { %v8574_v23 = vpack.c.bf16 %v8492_v35, %v8490_v22  ;;  %v8493_v58 = vmax.f32 %v8310_v51, 0.0  ;;  %v8314_v1 = vadd.f32 %v8313_v62, %v7961_v40  ;;  %v21342_v40 = vld [vmem:[#allocation183_spill] sm:$0xff]  ;;  %v18493_v50 = vsel %vm9532_vm0, 1.0, %v13722_v60 }
 0x5bc   :  { %v8315_v21 = vpop.f32.mrf.mxu0  ;;  %v18466_v22 = vadd.f32 %v21342_v40, %v18103_v18  ;;  %v18471_v51 = vld [vmem:[%s20476_s5 + $0x8] sm:$0xff]   ;;  %v18484_v18 = vld [vmem:[%s20476_s5 + $0x10] sm:$0xff]   ;;  %v11968_v7 = vunpack.c.l.bf16 %v18489_v39  ;;  %v18515_v6 = vmul.f32 %v11956_v56, %v18493_v50 }
 0x5bd   :  { %v8575_v37 = vpack.c.bf16 %v8493_v58, %v8491_v5  ;;  %v8316_v25 = vadd.f32 %v8315_v21, %v7963_v3  ;;  %v18497_v3 = vsel %vm9599_vm1, 1.0, %v13722_v60  ;;  %v8494_v62 = vmax.f32 %v8314_v1, 0.0 }
 0x5be   :  { %v8317_v35 = vpop.f32.mrf.mxu0  ;;  %v11960_v5 = vunpack.c.l.bf16 %v18471_v51  ;;  %v11961_v32 = vunpack.c.h.bf16 %v18471_v51  ;;  %v11964_v59 = vunpack.c.l.bf16 %v18484_v18  ;;  %v11965_v14 = vunpack.c.h.bf16 %v18484_v18 }
 0x5bf   :  { %v8318_v44 = vadd.f32 %v8317_v35, %v7965_v46  ;;  %8937 = vmatprep.mubr.bf16.mxu1 %v8575_v37  ;;  %v11957_v46 = vunpack.c.h.bf16 %v11955_v38  ;;  %v8495_v21 = vmax.f32 %v8316_v25, 0.0  ;;  %v18512_v38 = vadd.f32 %v8046_v0, %v18139_v15  ;;  %v18531_v15 = vld [vmem:[%s20476_s5 + $0x28] sm:$0xff]  }
 0x5c0   :  { %v8319_v13 = vpop.f32.mrf.mxu0  ;;  %8938 = vmatmul.mubr.bf16.gmra.mxu1 %v8574_v23  ;;  %v18504_v23 = vld [vmem:[%s20476_s5 + $0x20] sm:$0xff]   ;;  %v18518_v10 = vmul.f32 %v11956_v56, %v18497_v3  ;;  %v18526_v4 = vmul.f32 %v11960_v5, %v18497_v3  ;;  %v18537_v18 = vmul.f32 %v11964_v59, %v18497_v3  ;;  %v18551_v0 = vmul.f32 %v11968_v7, %v18497_v3 }
 0x5c1   :  { %v8496_v2 = vmax.f32 %v8318_v44, 0.0  ;;  %v8320_v20 = vadd.f32 %v8319_v13, %v18358_v27  ;;  %v11969_v27 = vunpack.c.h.bf16 %v18489_v39  ;;  %21345 = vst [vmem:[#allocation76_spill] sm:$0xff] %v18512_v38  ;;  %v20484_v40 = vunpack.c.l.bf16 %v18504_v23  ;;  %v18546_v13 = vld [vmem:[%s20476_s5 + $0x30] sm:$0xff]  }
 0x5c2   :  { %v8323_v58 = vpop.f32.mrf.mxu0  ;;  %v18523_v48 = vmul.f32 %v11957_v46, %v18497_v3  ;;  %v18534_v44 = vmul.f32 %v11961_v32, %v18497_v3  ;;  %v20486_v39 = vunpack.c.h.bf16 %v18504_v23 }
 0x5c3   :  { %v8576_v37 = vpack.c.bf16 %v8496_v2, %v8494_v62  ;;  %v8497_v1 = vmax.f32 %v8320_v20, 0.0  ;;  %v8324_v51 = vadd.f32 %v8323_v58, %v18362_v34  ;;  %v18540_v34 = vmul.f32 %v11965_v14, %v18497_v3 }
 0x5c4   :  { %v8325_v61 = vpop.f32.mrf.mxu0  ;;  %v18554_v62 = vmul.f32 %v11969_v27, %v18497_v3  ;;  %v18557_v20 = vmul.f32 %v11957_v46, %v18493_v50  ;;  %v18562_v58 = vmul.f32 %v20484_v40, %v18497_v3  ;;  %v18577_v40 = vmul.f32 %v11961_v32, %v18493_v50 }
 0x5c5   :  { %v8577_v35 = vpack.c.bf16 %v8497_v1, %v8495_v21  ;;  %v8326_v56 = vadd.f32 %v8325_v61, %v18366_v8  ;;  %v18569_v21 = vld [vmem:[%s20476_s5 + $0x38] sm:$0xff]   ;;  %v8498_v1 = vmax.f32 %v8324_v51, 0.0  ;;  %v18592_v32 = vmul.f32 %v11964_v59, %v18493_v50 }
 0x5c6   :  { %v8327_v25 = vpop.f32.mrf.mxu0  ;;  %v18607_v8 = vmul.f32 %v11965_v14, %v18493_v50  ;;  %v21352_v59 = vunpack.c.l.bf16 %v18546_v13  ;;  %v18628_v14 = vmul.f32 %v11969_v27, %v18493_v50  ;;  %v18647_v27 = vld [vmem:[%s20476_s5 + $0x50] sm:$0xff]  }
 0x5c7   :  { %v8328_v60 = vadd.f32 %v8327_v25, %v18370_v47  ;;  %8945 = vmatprep.mubr.bf16.mxu1 %v8577_v35  ;;  %v18574_v25 = vmul.f32 %v11960_v5, %v18493_v50  ;;  %v18582_v47 = vmul.f32 %v20486_v39, %v18497_v3  ;;  %v8499_v51 = vmax.f32 %v8326_v56, 0.0  ;;  %v18589_v5 = vld [vmem:[%s20476_s5 + $0x40] sm:$0xff]   ;;  %21346 = vst [vmem:[#allocation77_spill] sm:$0xff] %v18592_v32 }
 0x5c8   :  { %v8329_v2 = vpop.f32.mrf.mxu0  ;;  %8946 = vmatmul.mubr.bf16.gmra.mxu1 %v8576_v37  ;;  %v21347_v39 = vunpack.c.l.bf16 %v18531_v15  ;;  %v21349_v56 = vunpack.c.h.bf16 %v18531_v15  ;;  %21351 = vst [vmem:[#allocation87_spill] sm:$0xff] %v18607_v8  ;;  %v18612_v38 = vmul.f32 %v21352_v59, %v18497_v3  ;;  %21356 = vst [vmem:[#allocation91_spill] sm:$0xff] %v18628_v14 }
 0x5c9   :  { %v8500_v61 = vmax.f32 %v8328_v60, 0.0  ;;  %v8330_v37 = vadd.f32 %v8329_v2, %v18374_v52  ;;  %21361 = vst [vmem:[#allocation94_spill] sm:$0xff] %v18647_v27 }
 0x5ca   :  { %v8333_v35 = vpop.f32.mrf.mxu0  ;;  %v18597_v46 = vmul.f32 %v21347_v39, %v18497_v3  ;;  %21353 = vst [vmem:[#allocation88_spill] sm:$0xff] %v18612_v38  ;;  %v18617_v39 = vld [vmem:[%s20476_s5 + $0x48] sm:$0xff]   ;;  %v21357_v38 = vunpack.c.h.bf16 %v18546_v13 }
 0x5cb   :  { %v8578_v60 = vpack.c.bf16 %v8500_v61, %v8498_v1  ;;  %v8501_v9 = vmax.f32 %v8330_v37, 0.0  ;;  %v18602_v1 = vmul.f32 %v21349_v56, %v18497_v3  ;;  %v8334_v52 = vadd.f32 %v8333_v35, %v18378_v11  ;;  %21354 = vst [vmem:[#allocation89_spill] sm:$0xff] %v18617_v39 }
 0x5cc   :  { %v8335_v2 = vpop.f32.mrf.mxu0  ;;  %21348 = vst [vmem:[#allocation85_spill] sm:$0xff] %v18597_v46  ;;  %v18625_v11 = vmul.f32 %v11968_v7, %v18493_v50  ;;  %v18637_v8 = vmul.f32 %v21357_v38, %v18497_v3  ;;  %v21359_v7 = vunpack.c.l.bf16 %v18569_v21  ;;  %v21364_v38 = vunpack.c.h.bf16 %v18569_v21 }
 0x5cd   :  { %21350 = vst [vmem:[#allocation86_spill] sm:$0xff] %v18602_v1  ;;  %v8579_v37 = vpack.c.bf16 %v8501_v9, %v8499_v51  ;;  %v18622_v9 = vld [vmem:[%s20477_s4] ss:$0 sm:$0xff]  ;;  %v8336_v59 = vadd.f32 %v8335_v2, %v18382_v53  ;;  %v8502_v35 = vmax.f32 %v8334_v52, 0.0  ;;  %v21368_v52 = vunpack.c.l.bf16 %v18589_v5 }
 0x5ce   :  { %v8337_v56 = vpop.f32.mrf.mxu0  ;;  %21355 = vst [vmem:[#allocation90_spill] sm:$0xff] %v18625_v11  ;;  %21358 = vst [vmem:[#allocation92_spill] sm:$0xff] %v18637_v8  ;;  %v18642_v11 = vmul.f32 %v21359_v7, %v18497_v3  ;;  %v21376_v1 = vunpack.c.h.bf16 %v18531_v15 }
 0x5cf   :  { %v8338_v61 = vadd.f32 %v8337_v56, %v18386_v16  ;;  %8953 = vmatprep.mubr.bf16.mxu1 %v8579_v37  ;;  %v21362_v16 = vunpack.c.l.bf16 %v18504_v23  ;;  %v18657_v37 = vmul.f32 %v21364_v38, %v18497_v3  ;;  %v21366_v38 = vunpack.c.h.bf16 %v18504_v23 }
 0x5d0   :  { %21360 = vst [vmem:[#allocation93_spill] sm:$0xff] %v18642_v11  ;;  %v8339_v51 = vpop.f32.mrf.mxu0  ;;  %v8763_v53 = vpop.f32.mrf.mxu1  ;;  %8954 = vmatmul.mubr.bf16.gmra.mxu1 %v8578_v60  ;;  %v8503_v7 = vmax.f32 %v8336_v59, 0.0 }
 0x5d1   :  { %v18652_v2 = vmul.f32 %v21362_v16, %v18493_v50  ;;  %21365 = vst [vmem:[#allocation96_spill] sm:$0xff] %v18657_v37  ;;  %v8504_v11 = vmax.f32 %v8338_v61, 0.0  ;;  %v8340_v14 = vadd.f32 %v8339_v51, %v18390_v19  ;;  %v18663_v60 = vadd.f32 %v18622_v9, %v8763_v53  ;;  %v18668_v16 = vld [vmem:[%s20478_s6] sm:$0xff] }
 0x5d2   :  { %v8765_v8 = vpop.f32.mrf.mxu1  ;;  %v18673_v56 = vmul.f32 %v21366_v38, %v18493_v50  ;;  %v18678_v61 = vmul.f32 %v21368_v52, %v18497_v3  ;;  %v21370_v19 = vunpack.c.h.bf16 %v18589_v5  ;;  %v18711_v53 = vmul.f32 %v21376_v1, %v18493_v50 }
 0x5d3   :  { %21363 = vst [vmem:[#allocation95_spill] sm:$0xff] %v18652_v2  ;;  %v8343_v2 = vpop.f32.mrf.mxu0  ;;  %v8580_v37 = vpack.c.bf16 %v8504_v11, %v8502_v35  ;;  %v8505_v8 = vmax.f32 %v8340_v14, 0.0  ;;  %v9858_v23 = vand.u32 2147483647, %v18663_v60  ;;  %v10506_v38 = vsub.f32 %v18663_v60, %v18668_v16  ;;  %v18706_v35 = vld [vmem:[%s20478_s6 + $0x8] sm:$0xff] }
 0x5d4   :  { %21367 = vst [vmem:[#allocation97_spill] sm:$0xff] %v18673_v56  ;;  %21369 = vst [vmem:[#allocation98_spill] sm:$0xff] %v18678_v61  ;;  %v18683_v51 = vmul.f32 %v21370_v19, %v18497_v3  ;;  %v8766_v52 = vpop.f32.mrf.mxu1  ;;  %v21372_v61 = vunpack.c.l.bf16 %v18531_v15  ;;  %v21374_v19 = vunpack.c.l.bf16 %v18617_v39  ;;  %v21382_v15 = vunpack.c.l.bf16 %v18647_v27 }
 0x5d5   :  { %v8345_v56 = vpop.f32.mrf.mxu0  ;;  %v8581_v11 = vpack.c.bf16 %v8505_v8, %v8503_v7  ;;  %v18701_v14 = vadd.f32 %v18622_v9, %v8766_v52  ;;  %21377 = vst [vmem:[#allocation102_spill] sm:$0xff] %v18711_v53  ;;  %v8344_v7 = vadd.f32 %v8343_v2, %v18394_v57 }
 0x5d6   :  { %21371 = vst [vmem:[#allocation99_spill] sm:$0xff] %v18683_v51  ;;  %v18693_v32 = vmul.f32 %v21372_v61, %v18493_v50  ;;  %v18698_v59 = vmul.f32 %v21374_v19, %v18497_v3  ;;  %v21378_v61 = vunpack.c.h.bf16 %v18617_v39  ;;  %v9922_v19 = vsub.f32 0.0, %v9858_v23  ;;  %v8768_v52 = vpop.f32.mrf.mxu1 }
 0x5d7   :  { %v8347_v8 = vpop.f32.mrf.mxu0  ;;  %v18727_v1 = vmul.f32 %v21382_v15, %v18497_v3  ;;  %v10570_v23 = vand.u32 2147483647, %v10506_v38  ;;  %v8346_v57 = vadd.f32 %v8345_v56, %v18398_v17  ;;  %v11797_v2 = vpack.c.bf16 %v18701_v14, %v18663_v60  ;;  %8961 = vmatprep.mubr.bf16.mxu1 %v8581_v11 }
 0x5d8   :  { %21373 = vst [vmem:[#allocation100_spill] sm:$0xff] %v18693_v32  ;;  %21375 = vst [vmem:[#allocation101_spill] sm:$0xff] %v18698_v59  ;;  %v18716_v32 = vmul.f32 %v21378_v61, %v18497_v3  ;;  %v21380_v59 = vunpack.c.l.bf16 %v18546_v13  ;;  %v18732_v61 = vld [vmem:[%s20476_s5 + $0x58] sm:$0xff]   ;;  %v9859_v15 = vand.u32 2147483647, %v18701_v14  ;;  %v8771_v53 = vpop.f32.mrf.mxu1  ;;  %8962 = vmatmul.mubr.bf16.gmra.mxu1 %v8580_v37  ;;  %v21387_v17 = vunpack.c.h.bf16 %v18546_v13  ;;  %v18761_v37 = vld [vmem:[%s20478_s6 + $0x10] sm:$0xff] }
 0x5d9   :  { %21383 = vst [vmem:[#allocation104_spill] sm:$0xff] %v18727_v1  ;;  %21384 = vst [vmem:[#allocation79_spill] sm:$0xff] %v18732_v61  ;;  %v10507_v1 = vsub.f32 %v18701_v14, %v18706_v35  ;;  %v8348_v38 = vadd.f32 %v8347_v8, %v18402_v24  ;;  %v10634_v24 = vmul.f32 %v10570_v23, %v18518_v10  ;;  %v8507_v8 = vmax.f32 %v8346_v57, 0.0 }
 0x5da   :  { %21379 = vst [vmem:[#allocation103_spill] sm:$0xff] %v18716_v32  ;;  %v18722_v51 = vmul.f32 %v21380_v59, %v18493_v50  ;;  %v21385_v59 = vunpack.c.h.bf16 %v18647_v27  ;;  %v8349_v32 = vpop.f32.mrf.mxu0  ;;  %v18748_v56 = vmul.f32 %v21387_v17, %v18493_v50  ;;  %11798 = vst [vmem:[%s20479_s7] sm:$0xff] %v11797_v2   ;;  %v9923_v17 = vsub.f32 0.0, %v9859_v15  ;;  %v8773_v2 = vpop.f32.mrf.mxu1 }
 0x5db   :  { %v8350_v11 = vadd.f32 %v8349_v32, %v18406_v41  ;;  %v10571_v27 = vand.u32 2147483647, %v10507_v1  ;;  %v8508_v41 = vmax.f32 %v8348_v38, 0.0  ;;  %v21389_v1 = vunpack.c.l.bf16 %v18732_v61 }
 0x5dc   :  { %21381 = vst [vmem:[#allocation78_spill] sm:$0xff] %v18722_v51  ;;  %v18740_v52 = vmul.f32 %v21385_v59, %v18497_v3  ;;  %v9986_v51 = vmul.f32 1.442695, %v9922_v19  ;;  %21388 = vst [vmem:[#allocation80_spill] sm:$0xff] %v18748_v56  ;;  %v18756_v19 = vadd.f32 %v18622_v9, %v8771_v53  ;;  %v8506_v59 = vmax.f32 %v8344_v7, 0.0  ;;  %v8353_v56 = vpop.f32.mrf.mxu0 }
 0x5dd   :  { %v8509_v32 = vmax.f32 %v8350_v11, 0.0  ;;  %v9988_v53 = vmul.f32 1.442695, %v9923_v17  ;;  %v18772_v2 = vmul.f32 %v21389_v1, %v18497_v3  ;;  %v20491_v10 = vunpack.c.h.bf16 %v18732_v61 }
 0x5de   :  { %21386 = vst [vmem:[#allocation105_spill] sm:$0xff] %v18740_v52  ;;  %13462 = vpow2.f32 %v9986_v51  ;;  %v10635_v52 = vmul.f32 %v10571_v27, %v18523_v48  ;;  %v9860_v39 = vand.u32 2147483647, %v18756_v19  ;;  %v10508_v46 = vsub.f32 %v18756_v19, %v18761_v37  ;;  %v8355_v13 = vpop.f32.mrf.mxu0  ;;  %v8774_v51 = vpop.f32.mrf.mxu1  ;;  %v18778_v48 = vld [vmem:[%s20476_s5 + $0x60] sm:$0xff]  }
 0x5df   :  { %v8582_v7 = vpack.c.bf16 %v8508_v41, %v8506_v59  ;;  %v8583_v15 = vpack.c.bf16 %v8509_v32, %v8507_v8  ;;  %21390 = vst [vmem:[#allocation106_spill] sm:$0xff] %v18772_v2  ;;  %13464 = vpow2.f32 %v9988_v53  ;;  %v8354_v59 = vadd.f32 %v8353_v56, %v18410_v28  ;;  %v18787_v8 = vld [vmem:[%s20478_s6 + $0x18] sm:$0xff] }
 0x5e0   :  { %v10698_v27 = vadd.f32 %v10635_v52, %v10634_v24  ;;  %v9924_v23 = vsub.f32 0.0, %v9860_v39  ;;  %v10572_v57 = vand.u32 2147483647, %v10508_v46  ;;  %v8357_v38 = vpop.f32.mrf.mxu0  ;;  %v8776_v11 = vpop.f32.mrf.mxu1  ;;  %v18782_v17 = vadd.f32 %v18622_v9, %v8774_v51 }
 0x5e1   :  { %v8358_v41 = vadd.f32 %v8357_v38, %v18421_v42  ;;  %8969 = vmatprep.mubr.bf16.mxu1 %v8583_v15  ;;  %v21391_v52 = vunpack.c.l.bf16 %v18569_v21  ;;  %v21392_v32 = vunpack.c.h.bf16 %v18569_v21  ;;  %v20494_v51 = vunpack.c.l.bf16 %v18778_v48 }
 0x5e2   :  { %v9990_v46 = vmul.f32 1.442695, %v9924_v23  ;;  %v10636_v24 = vmul.f32 %v10572_v57, %v18526_v4  ;;  %v8359_v28 = vpop.f32.mrf.mxu0  ;;  %v8779_v56 = vpop.f32.mrf.mxu1  ;;  %8970 = vmatmul.mubr.bf16.gmra.mxu1 %v8582_v7  ;;  %v8356_v42 = vadd.f32 %v8355_v13, %v18417_v31  ;;  %v11802_v15 = vpack.c.bf16 %v18782_v17, %v18756_v19 }
 0x5e3   :  { %v18793_v39 = vmul.f32 %v21391_v52, %v18493_v50  ;;  %v18799_v53 = vmul.f32 %v21392_v32, %v18493_v50  ;;  %v21394_v1 = vunpack.c.l.bf16 %v18589_v5  ;;  %v18813_v4 = vmul.f32 %v20491_v10, %v18497_v3 }
 0x5e4   :  { %13466 = vpow2.f32 %v9990_v46  ;;  %v10699_v21 = vadd.f32 %v10698_v27, %v10636_v24  ;;  %v9861_v7 = vand.u32 2147483647, %v18782_v17  ;;  %v10509_v31 = vsub.f32 %v18782_v17, %v18787_v8  ;;  %v8363_v13 = vpop.f32.mrf.mxu0  ;;  %v8781_v57 = vpop.f32.mrf.mxu1  ;;  %12082 = vst [vmem:[%s20479_s7 + $0x8] sm:$0xff] %v11802_v15   ;;  %v18828_v27 = vld [vmem:[%s20478_s6 + $0x20] sm:$0xff] }
 0x5e5   :  { %21393 = vst [vmem:[#allocation84_spill] sm:$0xff] %v18799_v53  ;;  %v18808_v23 = vmul.f32 %v21394_v1, %v18493_v50  ;;  %21396 = vst [vmem:[#allocation81_spill] sm:$0xff] %v18813_v4  ;;  %v8510_v38 = vmax.f32 %v8354_v59, 0.0  ;;  %v8512_v11 = vmax.f32 %v8358_v41, 0.0  ;;  %v8360_v52 = vadd.f32 %v8359_v28, %v18425_v49 }
 0x5e6   :  { %v18823_v32 = vadd.f32 %v18622_v9, %v8779_v56  ;;  %v9666_v46 = vmax.f32 %v18663_v60, 0.0  ;;  %v9925_v24 = vsub.f32 0.0, %v9861_v7  ;;  %v10573_v1 = vand.u32 2147483647, %v10509_v31  ;;  %v8365_v59 = vpop.f32.mrf.mxu0  ;;  %v8782_v57 = vpop.f32.mrf.mxu1 }
 0x5e7   :  { %21395 = vst [vmem:[#allocation107_spill] sm:$0xff] %v18808_v23  ;;  %v18834_v41 = vmul.f32 %v20494_v51, %v18497_v3  ;;  %v9730_v49 = vmul.f32 %v18668_v16, %v18663_v60  ;;  %v8511_v28 = vmax.f32 %v8356_v42, 0.0  ;;  %v8584_v56 = vpack.c.bf16 %v8512_v11, %v8510_v38 }
 0x5e8   :  { %v8513_v15 = vmax.f32 %v8360_v52, 0.0  ;;  %v9992_v10 = vmul.f32 1.442695, %v9925_v24  ;;  %v10637_v61 = vmul.f32 %v10573_v1, %v18534_v44  ;;  %v9862_v23 = vand.u32 2147483647, %v18823_v32  ;;  %v8367_v31 = vpop.f32.mrf.mxu0  ;;  %v8784_v4 = vpop.f32.mrf.mxu1 }
 0x5e9   :  { %v10510_v7 = vsub.f32 %v18823_v32, %v18828_v27  ;;  %v8364_v51 = vadd.f32 %v8363_v13, %v18429_v26  ;;  %v21397_v60 = vunpack.c.h.bf16 %v18589_v5  ;;  %v8366_v4 = vadd.f32 %v8365_v59, %v18433_v45  ;;  %v18856_v26 = vld [vmem:[%s20478_s6 + $0x28] sm:$0xff] }
 0x5ea   :  { %v8585_v2 = vpack.c.bf16 %v8513_v15, %v8511_v28  ;;  %13468 = vpow2.f32 %v9992_v10  ;;  %v10700_v44 = vadd.f32 %v10699_v21, %v10637_v61  ;;  %v9926_v11 = vsub.f32 0.0, %v9862_v23  ;;  %v8369_v52 = vpop.f32.mrf.mxu0  ;;  %v8787_v24 = vpop.f32.mrf.mxu1 }
 0x5eb   :  { %v13463_v53 = vpop.eup %13462  ;;  %v18846_v16 = vmul.f32 %v21397_v60, %v18493_v50  ;;  %v10574_v1 = vand.u32 2147483647, %v10510_v7  ;;  %v18851_v28 = vadd.f32 %v18622_v9, %v8782_v57  ;;  %v8368_v5 = vadd.f32 %v8367_v31, %v18437_v30  ;;  %v18877_v31 = vld [vmem:[%s20478_s6 + $0x30] sm:$0xff] }
 0x5ec   :  { %v10114_v38 = vadd.f32 1.0, %v13463_v53  ;;  %8977 = vmatprep.mubr.bf16.mxu1 %v8585_v2  ;;  %v18859_v53 = vsub.f32 %v9666_v46, %v9730_v49  ;;  %v9994_v61 = vmul.f32 1.442695, %v9926_v11  ;;  %v8370_v10 = vadd.f32 %v8369_v52, %v18441_v29  ;;  %v8373_v23 = vpop.f32.mrf.mxu0  ;;  %v8789_v45 = vpop.f32.mrf.mxu1 }
 0x5ed   :  { %8978 = vmatmul.mubr.bf16.gmra.mxu1 %v8584_v56  ;;  %v13465_v21 = vpop.eup %13464  ;;  %v10638_v13 = vmul.f32 %v10574_v1, %v18537_v18  ;;  %v8514_v59 = vmax.f32 %v8364_v51, 0.0  ;;  %v11807_v57 = vpack.c.bf16 %v18851_v28, %v18823_v32  ;;  %v18866_v15 = vadd.f32 %v18622_v9, %v8787_v24 }
 0x5ee   :  { %13470 = vlog2.f32 %v10114_v38  ;;  %v10115_v30 = vadd.f32 1.0, %v13465_v21  ;;  %v9863_v2 = vand.u32 2147483647, %v18851_v28  ;;  %v10511_v29 = vsub.f32 %v18851_v28, %v18856_v26  ;;  %v8375_v46 = vpop.f32.mrf.mxu0  ;;  %v8790_v49 = vpop.f32.mrf.mxu1 }
 0x5ef   :  { %13472 = vpow2.f32 %v9994_v61  ;;  %v10701_v56 = vadd.f32 %v10700_v44, %v10638_v13  ;;  %v8515_v7 = vmax.f32 %v8366_v4, 0.0  ;;  %12083 = vst [vmem:[%s20479_s7 + $0x10] sm:$0xff] %v11807_v57   ;;  %v8516_v18 = vmax.f32 %v8368_v5, 0.0 }
 0x5f0   :  { %v8517_v51 = vmax.f32 %v8370_v10, 0.0  ;;  %v9667_v60 = vmax.f32 %v18701_v14, 0.0  ;;  %13474 = vlog2.f32 %v10115_v30  ;;  %v9927_v38 = vsub.f32 0.0, %v9863_v2  ;;  %v8377_v52 = vpop.f32.mrf.mxu0  ;;  %v8792_v24 = vpop.f32.mrf.mxu1 }
 0x5f1   :  { %v10575_v11 = vand.u32 2147483647, %v10511_v29  ;;  %v13467_v44 = vpop.eup %13466  ;;  %v18882_v1 = vmul.f32 %v18706_v35, %v18701_v14  ;;  %v8586_v4 = vpack.c.bf16 %v8516_v18, %v8514_v59  ;;  %v9864_v61 = vand.u32 2147483647, %v18866_v15 }
 0x5f2   :  { %v8587_v5 = vpack.c.bf16 %v8517_v51, %v8515_v7  ;;  %v10116_v10 = vadd.f32 1.0, %v13467_v44  ;;  %v9996_v45 = vmul.f32 1.442695, %v9927_v38  ;;  %v10512_v13 = vsub.f32 %v18866_v15, %v18877_v31  ;;  %v8379_v57 = vpop.f32.mrf.mxu0  ;;  %v8795_v30 = vpop.f32.mrf.mxu1  ;;  %v18900_v51 = vld [vmem:[%s20478_s6 + $0x38] sm:$0xff] }
 0x5f3   :  { %v10639_v21 = vmul.f32 %v10575_v11, %v18540_v34  ;;  %v18891_v29 = vmul.f32 %v18761_v37, %v18756_v19  ;;  %v9928_v35 = vsub.f32 0.0, %v9864_v61  ;;  %v8374_v59 = vadd.f32 %v8373_v23, %v18445_v12 }
 0x5f4   :  { %8985 = vmatprep.mubr.bf16.mxu1 %v8587_v5  ;;  %13476 = vlog2.f32 %v10116_v10  ;;  %v10576_v18 = vand.u32 2147483647, %v10512_v13  ;;  %v18895_v34 = vadd.f32 %v18622_v9, %v8790_v49  ;;  %v8383_v38 = vpop.f32.mrf.mxu0  ;;  %v8797_v11 = vpop.f32.mrf.mxu1  ;;  %v9669_v37 = vmax.f32 %v18782_v17, 0.0 }
 0x5f5   :  { %v10702_v7 = vadd.f32 %v10701_v56, %v10639_v21  ;;  %8986 = vmatmul.mubr.bf16.gmra.mxu1 %v8586_v4  ;;  %v9733_v12 = vmul.f32 %v18787_v8, %v18782_v17  ;;  %13478 = vpow2.f32 %v9996_v45  ;;  %v9998_v23 = vmul.f32 1.442695, %v9928_v35 }
 0x5f6   :  { %v9670_v56 = vmax.f32 %v18823_v32, 0.0  ;;  %v10640_v49 = vmul.f32 %v10576_v18, %v18551_v0  ;;  %v8376_v24 = vadd.f32 %v8375_v46, %v18454_v33  ;;  %v11812_v44 = vpack.c.bf16 %v18895_v34, %v18866_v15  ;;  %v18910_v5 = vpop.f32.mrf.mxu0  ;;  %v8798_v4 = vpop.f32.mrf.mxu1 }
 0x5f7   :  { %v13469_v61 = vpop.eup %13468  ;;  %13480 = vpow2.f32 %v9998_v23  ;;  %v9865_v10 = vand.u32 2147483647, %v18895_v34  ;;  %v10513_v17 = vsub.f32 %v18895_v34, %v18900_v51  ;;  %v8378_v8 = vadd.f32 %v8377_v52, %v18458_v43 }
 0x5f8   :  { %v10117_v45 = vadd.f32 1.0, %v13469_v61  ;;  %v10703_v21 = vadd.f32 %v10702_v7, %v10640_v49  ;;  %v8518_v0 = vmax.f32 %v8374_v59, 0.0  ;;  %12084 = vst [vmem:[%s20479_s7 + $0x18] sm:$0xff] %v11812_v44   ;;  %v8380_v33 = vadd.f32 %v8379_v57, %v18462_v63  ;;  %v8800_v46 = vpop.f32.mrf.mxu1  ;;  %v8387_v42 = vpop.f32.mrf.mxu0  ;;  %v18926_v59 = vld [vmem:[%s20478_s6 + $0x40] sm:$0xff] }
 0x5f9   :  { %v9929_v35 = vsub.f32 0.0, %v9865_v10  ;;  %v10577_v18 = vand.u32 2147483647, %v10513_v17  ;;  %v8520_v11 = vmax.f32 %v8378_v8, 0.0  ;;  %v18921_v23 = vadd.f32 %v18622_v9, %v8795_v30 }
 0x5fa   :  { %13482 = vlog2.f32 %v10117_v45  ;;  %v8519_v43 = vmax.f32 %v8376_v24, 0.0  ;;  %v8521_v52 = vmax.f32 %v8380_v33, 0.0  ;;  %v8803_v7 = vpop.f32.mrf.mxu1  ;;  %v9734_v57 = vmul.f32 %v18828_v27, %v18823_v32  ;;  %v21398_v24 = vld [vmem:[#allocation182_spill] sm:$0xff]  ;;  %v8389_v27 = vpop.f32.mrf.mxu0 }
 0x5fb   :  { %v13471_v13 = vpop.eup %13470  ;;  %v10000_v49 = vmul.f32 1.442695, %v9929_v35  ;;  %v10641_v44 = vmul.f32 %v10577_v18, %v18554_v62  ;;  %v8588_v30 = vpack.c.bf16 %v8520_v11, %v8518_v0  ;;  %v18933_v8 = vadd.f32 %v8383_v38, %v21398_v24 }
 0x5fc   :  { %v10179_v2 = vmul.f32 0.6931472, %v13471_v13  ;;  %v13473_v63 = vpop.eup %13472  ;;  %v8589_v17 = vpack.c.bf16 %v8521_v52, %v8519_v43  ;;  %v8805_v45 = vpop.f32.mrf.mxu1  ;;  %v9866_v13 = vand.u32 2147483647, %v18921_v23  ;;  %v10514_v32 = vsub.f32 %v18921_v23, %v18926_v59 }
 0x5fd   :  { %v10118_v10 = vadd.f32 1.0, %v13473_v63  ;;  %v13475_v33 = vpop.eup %13474  ;;  %13484 = vpow2.f32 %v10000_v49  ;;  %v10704_v46 = vadd.f32 %v10703_v21, %v10641_v44  ;;  %v9795_v62 = vsub.f32 %v9667_v60, %v18882_v1 }
 0x5fe   :  { %v10306_v61 = vadd.f32 %v10179_v2, %v18859_v53  ;;  %v10181_v53 = vmul.f32 0.6931472, %v13475_v33  ;;  %v21399_v2 = vmax.f32 %v18756_v19, 0.0  ;;  %8993 = vmatprep.mubr.bf16.mxu1 %v8589_v17  ;;  %v18944_v0 = vpop.f32.mrf.mxu1  ;;  %v9797_v21 = vsub.f32 %v9669_v37, %v9733_v12  ;;  %v18958_v12 = vld [vmem:[%s20478_s6 + $0x48] sm:$0xff] }
 0x5ff   :  { %13486 = vlog2.f32 %v10118_v10  ;;  %v18946_v35 = vsub.f32 %v9670_v56, %v9734_v57  ;;  %v9930_v18 = vsub.f32 0.0, %v9866_v13  ;;  %v10578_v11 = vand.u32 2147483647, %v10514_v32  ;;  %8994 = vmatmul.mubr.bf16.gmra.mxu1 %v8588_v30  ;;  %v8393_v56 = vpop.f32.mrf.mxu0 }
 0x600   :  { %v9796_v38 = vsub.f32 %v21399_v2, %v18891_v29  ;;  %v10370_v43 = vmul.f32 %v10306_v61, %v18515_v6  ;;  %v10307_v52 = vadd.f32 %v10181_v53, %v9795_v62  ;;  %v9671_v14 = vmax.f32 %v18851_v28, 0.0  ;;  %v8808_v19 = vpop.f32.mrf.mxu1  ;;  %v18982_v62 = vld [vmem:[%s20478_s6 + $0x50] sm:$0xff] }
 0x601   :  { %v18951_v60 = vadd.f32 %v18622_v9, %v8798_v4  ;;  %v13477_v1 = vpop.eup %13476  ;;  %v10002_v29 = vmul.f32 1.442695, %v9930_v18  ;;  %v10642_v63 = vmul.f32 %v10578_v11, %v18562_v58  ;;  %v8522_v37 = vmax.f32 %v18933_v8, 0.0 }
 0x602   :  { %v8388_v6 = vadd.f32 %v8387_v42, %v18475_v55  ;;  %v13479_v57 = vpop.eup %13478  ;;  %v10371_v49 = vmul.f32 %v10307_v52, %v18557_v20  ;;  %v10183_v4 = vmul.f32 0.6931472, %v13477_v1  ;;  %v8390_v30 = vadd.f32 %v8389_v27, %v18479_v54  ;;  %v18965_v58 = vpop.f32.mrf.mxu1 }
 0x603   :  { %v11817_v44 = vpack.c.bf16 %v18951_v60, %v18921_v23  ;;  %v10119_v61 = vadd.f32 1.0, %v13479_v57  ;;  %13488 = vpow2.f32 %v10002_v29  ;;  %v10705_v10 = vadd.f32 %v10704_v46, %v10642_v63 }
 0x604   :  { %v8386_v17 = vadd.f32 %v18910_v5, %v18466_v22  ;;  %v13481_v24 = vpop.eup %13480  ;;  %v10434_v55 = vadd.f32 %v10371_v49, %v10370_v43  ;;  %v10308_v42 = vadd.f32 %v10183_v4, %v9796_v38  ;;  %v9867_v20 = vand.u32 2147483647, %v18951_v60  ;;  %v8813_v8 = vpop.f32.mrf.mxu1 }
 0x605   :  { %12085 = vst [vmem:[%s20479_s7 + $0x20] sm:$0xff] %v11817_v44   ;;  %v10515_v54 = vsub.f32 %v18951_v60, %v18958_v12  ;;  %13490 = vlog2.f32 %v10119_v61  ;;  %v10120_v45 = vadd.f32 1.0, %v13481_v24  ;;  %v8524_v33 = vmax.f32 %v8388_v6, 0.0  ;;  %v8395_v22 = vpop.f32.mrf.mxu0  ;;  %v21401_v8 = vld [vmem:[#allocation186_spill] sm:$0xff] }
 0x606   :  { %v18976_v46 = vadd.f32 %v18622_v9, %v8803_v7  ;;  %v10372_v5 = vmul.f32 %v10308_v42, %v18574_v25  ;;  %v9931_v13 = vsub.f32 0.0, %v9867_v20  ;;  %v8525_v27 = vmax.f32 %v8390_v30, 0.0  ;;  %v18984_v53 = vpop.f32.mrf.mxu1  ;;  %v21400_v20 = vld [vmem:[#allocation85_spill] sm:$0xff] }
 0x607   :  { %v10579_v32 = vand.u32 2147483647, %v10515_v54  ;;  %v13483_v2 = vpop.eup %13482  ;;  %v9735_v38 = vmul.f32 %v18856_v26, %v18851_v28  ;;  %13492 = vlog2.f32 %v10120_v45  ;;  %v8523_v7 = vmax.f32 %v8386_v17, 0.0  ;;  %v8397_v57 = vpop.f32.mrf.mxu0 }
 0x608   :  { %v8590_v18 = vpack.c.bf16 %v8524_v33, %v8522_v37  ;;  %v10435_v11 = vadd.f32 %v10434_v55, %v10372_v5  ;;  %v10185_v43 = vmul.f32 0.6931472, %v13483_v2  ;;  %v10004_v25 = vmul.f32 1.442695, %v9931_v13  ;;  %v8816_v19 = vpop.f32.mrf.mxu1 }
 0x609   :  { %v10643_v52 = vmul.f32 %v10579_v32, %v18582_v47  ;;  %v9672_v1 = vmax.f32 %v18866_v15, 0.0  ;;  %v8591_v29 = vpack.c.bf16 %v8525_v27, %v8523_v7  ;;  %v9868_v63 = vand.u32 2147483647, %v18976_v46  ;;  %v21402_v27 = vld [vmem:[#allocation77_spill] sm:$0xff] }
 0x60a   :  { %v10516_v6 = vsub.f32 %v18976_v46, %v18982_v62  ;;  %v13485_v49 = vpop.eup %13484  ;;  %v10309_v26 = vadd.f32 %v10185_v43, %v9797_v21  ;;  %v9736_v37 = vmul.f32 %v18877_v31, %v18866_v15  ;;  %13494 = vpow2.f32 %v10004_v25  ;;  %v18995_v44 = vpop.f32.mrf.mxu1 }
 0x60b   :  { %v10706_v4 = vadd.f32 %v10705_v10, %v10643_v52  ;;  %v10121_v30 = vadd.f32 1.0, %v13485_v49  ;;  %v9932_v61 = vsub.f32 0.0, %v9868_v63  ;;  %v8394_v24 = vadd.f32 %v8393_v56, %v18127_v36  ;;  %9001 = vmatprep.mubr.bf16.mxu1 %v8591_v29  ;;  %v19010_v36 = vld [vmem:[%s20478_s6 + $0x58] sm:$0xff] }
 0x60c   :  { %v13487_v47 = vpop.eup %13486  ;;  %v10580_v17 = vand.u32 2147483647, %v10516_v6  ;;  %v10373_v55 = vmul.f32 %v10309_v26, %v18577_v40  ;;  %v9799_v21 = vsub.f32 %v9671_v14, %v9735_v38  ;;  %v19003_v15 = vadd.f32 %v18622_v9, %v18944_v0  ;;  %9002 = vmatmul.mubr.bf16.gmra.mxu1 %v8590_v18  ;;  %v8821_v31 = vpop.f32.mrf.mxu1  ;;  %v21403_v38 = vld [vmem:[#allocation187_spill] sm:$0xff]  ;;  %v21404_v18 = vld [vmem:[#allocation76_spill] sm:$0xff] }
 0x60d   :  { %v10187_v42 = vmul.f32 0.6931472, %v13487_v47  ;;  %13496 = vlog2.f32 %v10121_v30  ;;  %v10006_v10 = vmul.f32 1.442695, %v9932_v61  ;;  %v8396_v45 = vadd.f32 %v8395_v22, %v21401_v8  ;;  %v8399_v40 = vpop.f32.mrf.mxu0  ;;  %v19036_v30 = vld [vmem:[%s20478_s6 + $0x60] sm:$0xff] }
 0x60e   :  { %v10644_v54 = vmul.f32 %v10580_v17, %v21400_v20  ;;  %v10436_v28 = vadd.f32 %v10435_v11, %v10373_v55  ;;  %v9800_v56 = vsub.f32 %v9672_v1, %v9736_v37  ;;  %v11822_v0 = vpack.c.bf16 %v19003_v15, %v18976_v46  ;;  %v19015_v33 = vpop.f32.mrf.mxu1  ;;  %v21405_v17 = vld [vmem:[#allocation86_spill] sm:$0xff] }
 0x60f   :  { %v10310_v14 = vadd.f32 %v10187_v42, %v18946_v35  ;;  %13498 = vpow2.f32 %v10006_v10  ;;  %v8526_v13 = vmax.f32 %v8394_v24, 0.0  ;;  %v9869_v22 = vand.u32 2147483647, %v19003_v15 }
 0x610   :  { %v10707_v5 = vadd.f32 %v10706_v4, %v10644_v54  ;;  %v13489_v32 = vpop.eup %13488  ;;  %12086 = vst [vmem:[%s20479_s7 + $0x28] sm:$0xff] %v11822_v0   ;;  %v10517_v35 = vsub.f32 %v19003_v15, %v19010_v36  ;;  %v8398_v7 = vadd.f32 %v8397_v57, %v21403_v38  ;;  %v8400_v11 = vadd.f32 %v8399_v40, %v21404_v18  ;;  %v8824_v43 = vpop.f32.mrf.mxu1 }
 0x611   :  { %v10374_v2 = vmul.f32 %v10310_v14, %v21402_v27  ;;  %v10122_v25 = vadd.f32 1.0, %v13489_v32  ;;  %v8527_v52 = vmax.f32 %v8396_v45, 0.0  ;;  %v9933_v19 = vsub.f32 0.0, %v9869_v22  ;;  %v21407_v14 = vld [vmem:[#allocation87_spill] sm:$0xff] }
 0x612   :  { %v19028_v1 = vadd.f32 %v18622_v9, %v18965_v58  ;;  %v13491_v29 = vpop.eup %13490  ;;  %v10581_v6 = vand.u32 2147483647, %v10517_v35  ;;  %v8528_v49 = vmax.f32 %v8398_v7, 0.0  ;;  %v8529_v26 = vmax.f32 %v8400_v11, 0.0  ;;  %v19030_v37 = vpop.f32.mrf.mxu1  ;;  %v19059_v22 = vld [vmem:[%s20478_s6 + $0x68] sm:$0xff]  ;;  %v21410_v11 = vld [vmem:[#allocation90_spill] sm:$0xff] }
 0x613   :  { %v10437_v63 = vadd.f32 %v10436_v28, %v10374_v2  ;;  %v10189_v4 = vmul.f32 0.6931472, %v13491_v29  ;;  %v9673_v57 = vmax.f32 %v18895_v34, 0.0  ;;  %13500 = vlog2.f32 %v10122_v25  ;;  %v21411_v29 = vld [vmem:[#allocation88_spill] sm:$0xff] }
 0x614   :  { %v10008_v47 = vmul.f32 1.442695, %v9933_v19  ;;  %v13493_v61 = vpop.eup %13492  ;;  %v9737_v58 = vmul.f32 %v18900_v51, %v18895_v34  ;;  %v10645_v24 = vmul.f32 %v10581_v6, %v21405_v17  ;;  %v8592_v55 = vpack.c.bf16 %v8528_v49, %v8526_v13  ;;  %v8829_v31 = vpop.f32.mrf.mxu1 }
 0x615   :  { %v8593_v42 = vpack.c.bf16 %v8529_v26, %v8527_v52  ;;  %v10311_v10 = vadd.f32 %v10189_v4, %v9799_v21  ;;  %v10191_v20 = vmul.f32 0.6931472, %v13493_v61  ;;  %v9870_v54 = vand.u32 2147483647, %v19028_v1 }
 0x616   :  { %13502 = vpow2.f32 %v10008_v47  ;;  %v10708_v8 = vadd.f32 %v10707_v5, %v10645_v24  ;;  %v10518_v45 = vsub.f32 %v19028_v1, %v19036_v30  ;;  %v19046_v40 = vadd.f32 %v18622_v9, %v18984_v53  ;;  %v19048_v34 = vpop.f32.mrf.mxu1  ;;  %v21408_v53 = vld [vmem:[#allocation89_spill] sm:$0xff]  ;;  %v19086_v47 = vld [vmem:[%s20478_s6 + $0x70] sm:$0xff] }
 0x617   :  { %9009 = vmatprep.mubr.bf16.mxu1 %v8593_v42  ;;  %v21406_v51 = vunpack.c.h.bf16 %v18778_v48  ;;  %v13495_v21 = vpop.eup %13494  ;;  %v10375_v0 = vmul.f32 %v10311_v10, %v21407_v14  ;;  %v10312_v13 = vadd.f32 %v10191_v20, %v9800_v56  ;;  %v9934_v5 = vsub.f32 0.0, %v9870_v54 }
 0x618   :  { %9010 = vmatmul.mubr.bf16.gmra.mxu1 %v8592_v55  ;;  %v21409_v32 = vunpack.c.l.bf16 %v21408_v53  ;;  %v9801_v2 = vsub.f32 %v9673_v57, %v9737_v58  ;;  %v10123_v35 = vadd.f32 1.0, %v13495_v21  ;;  %v10582_v38 = vand.u32 2147483647, %v10518_v45  ;;  %v8832_v18 = vpop.f32.mrf.mxu1 }
 0x619   :  { %v19053_v28 = vmul.f32 %v21406_v51, %v18497_v3  ;;  %v11827_v7 = vpack.c.bf16 %v19046_v40, %v19028_v1  ;;  %v10438_v56 = vadd.f32 %v10437_v63, %v10375_v0  ;;  %v10376_v43 = vmul.f32 %v10312_v13, %v21410_v11  ;;  %v21412_v51 = vld [vmem:[#allocation92_spill] sm:$0xff] }
 0x61a   :  { %v19064_v27 = vmul.f32 %v21409_v32, %v18493_v50  ;;  %v10010_v25 = vmul.f32 1.442695, %v9934_v5  ;;  %v19071_v52 = vadd.f32 %v18622_v9, %v18995_v44  ;;  %v13497_v19 = vpop.eup %13496  ;;  %13504 = vlog2.f32 %v10123_v35  ;;  %v19080_v26 = vpop.f32.mrf.mxu1  ;;  %v19107_v32 = vld [vmem:[%s20478_s6 + $0x78] sm:$0xff] }
 0x61b   :  { %v10646_v6 = vmul.f32 %v10582_v38, %v21411_v29  ;;  %12087 = vst [vmem:[%s20479_s7 + $0x30] sm:$0xff] %v11827_v7   ;;  %v9871_v49 = vand.u32 2147483647, %v19046_v40  ;;  %v10519_v63 = vsub.f32 %v19046_v40, %v19059_v22  ;;  %v10439_v4 = vadd.f32 %v10438_v56, %v10376_v43 }
 0x61c   :  { %v10193_v57 = vmul.f32 0.6931472, %v13497_v19  ;;  %v9674_v44 = vmax.f32 %v18921_v23, 0.0  ;;  %13506 = vpow2.f32 %v10010_v25  ;;  %v13499_v61 = vpop.eup %13498  ;;  %v9738_v58 = vmul.f32 %v18926_v59, %v18921_v23  ;;  %v8837_v42 = vpop.f32.mrf.mxu1  ;;  %v21413_v59 = vld [vmem:[#allocation91_spill] sm:$0xff] }
 0x61d   :  { %v10709_v17 = vadd.f32 %v10708_v8, %v10646_v6  ;;  %v9935_v24 = vsub.f32 0.0, %v9871_v49  ;;  %v10583_v55 = vand.u32 2147483647, %v10519_v63  ;;  %v9675_v10 = vmax.f32 %v18951_v60, 0.0  ;;  %v21416_v42 = vld [vmem:[#allocation95_spill] sm:$0xff] }
 0x61e   :  { %v10313_v31 = vadd.f32 %v10193_v57, %v9801_v2  ;;  %v10124_v20 = vadd.f32 1.0, %v13499_v61  ;;  %v9872_v54 = vand.u32 2147483647, %v19071_v52  ;;  %v10520_v14 = vsub.f32 %v19071_v52, %v19086_v47  ;;  %v19099_v23 = vpop.f32.mrf.mxu1  ;;  %v19132_v61 = vld [vmem:[%s20478_s6 + $0x80] sm:$0xff] }
 0x61f   :  { %v10012_v45 = vmul.f32 1.442695, %v9935_v24  ;;  %v10647_v21 = vmul.f32 %v10583_v55, %v21412_v51  ;;  %v19097_v0 = vadd.f32 %v18622_v9, %v19015_v33  ;;  %v9739_v13 = vmul.f32 %v18958_v12, %v18951_v60  ;;  %v21414_v12 = vld [vmem:[#allocation93_spill] sm:$0xff] }
 0x620   :  { %v10377_v8 = vmul.f32 %v10313_v31, %v21413_v59  ;;  %13508 = vlog2.f32 %v10124_v20  ;;  %v9936_v5 = vsub.f32 0.0, %v9872_v54  ;;  %v13501_v2 = vpop.eup %13500  ;;  %v10584_v38 = vand.u32 2147483647, %v10520_v14  ;;  %v8840_v7 = vpop.f32.mrf.mxu1 }
 0x621   :  { %13510 = vpow2.f32 %v10012_v45  ;;  %v10710_v35 = vadd.f32 %v10709_v17, %v10647_v21  ;;  %v11832_v33 = vpack.c.bf16 %v19097_v0, %v19071_v52  ;;  %v9802_v56 = vsub.f32 %v9674_v44, %v9738_v58  ;;  %v21417_v45 = vld [vmem:[#allocation96_spill] sm:$0xff] }
 0x622   :  { %v10440_v18 = vadd.f32 %v10439_v4, %v10377_v8  ;;  %v10195_v11 = vmul.f32 0.6931472, %v13501_v2  ;;  %v10014_v43 = vmul.f32 1.442695, %v9936_v5  ;;  %v10648_v25 = vmul.f32 %v10584_v38, %v21414_v12  ;;  %v19123_v63 = vpop.f32.mrf.mxu1 }
 0x623   :  { %v13503_v60 = vpop.eup %13502  ;;  %12088 = vst [vmem:[%s20479_s7 + $0x38] sm:$0xff] %v11832_v33   ;;  %v9873_v19 = vand.u32 2147483647, %v19097_v0  ;;  %v10521_v29 = vsub.f32 %v19097_v0, %v19107_v32  ;;  %v21415_v6 = vunpack.c.h.bf16 %v21408_v53  ;;  %v19127_v44 = vadd.f32 %v18622_v9, %v19030_v37  ;;  %v19154_v33 = vld [vmem:[%s20478_s6 + $0x88] sm:$0xff] }
 0x624   :  { %v10314_v4 = vadd.f32 %v10195_v11, %v9802_v56  ;;  %v10125_v57 = vadd.f32 1.0, %v13503_v60  ;;  %13512 = vpow2.f32 %v10014_v43  ;;  %v9803_v58 = vsub.f32 %v9675_v10, %v9739_v13  ;;  %v8845_v55 = vpop.f32.mrf.mxu1 }
 0x625   :  { %v19121_v49 = vmul.f32 %v21415_v6, %v18493_v50  ;;  %v10711_v17 = vadd.f32 %v10710_v35, %v10648_v25  ;;  %v9937_v24 = vsub.f32 0.0, %v9873_v19  ;;  %v10585_v53 = vand.u32 2147483647, %v10521_v29  ;;  %v21418_v19 = vld [vmem:[#allocation98_spill] sm:$0xff] }
 0x626   :  { %v10378_v31 = vmul.f32 %v10314_v4, %v21416_v42  ;;  %v9676_v20 = vmax.f32 %v18976_v46, 0.0  ;;  %v9740_v54 = vmul.f32 %v18982_v62, %v18976_v46  ;;  %13514 = vlog2.f32 %v10125_v57  ;;  %v19142_v14 = vpop.f32.mrf.mxu1  ;;  %v21419_v57 = vld [vmem:[#allocation97_spill] sm:$0xff] }
 0x627   :  { %v10016_v37 = vmul.f32 1.442695, %v9937_v24  ;;  %v10649_v51 = vmul.f32 %v10585_v53, %v21417_v45  ;;  %v9874_v21 = vand.u32 2147483647, %v19127_v44  ;;  %v10522_v10 = vsub.f32 %v19127_v44, %v19132_v61  ;;  %v13505_v59 = vpop.eup %13504 }
 0x628   :  { %v10441_v8 = vadd.f32 %v10440_v18, %v10378_v31  ;;  %v9677_v13 = vmax.f32 %v19003_v15, 0.0  ;;  %v9741_v5 = vmul.f32 %v19010_v36, %v19003_v15  ;;  %v19149_v46 = vadd.f32 %v18622_v9, %v19048_v34  ;;  %v8848_v7 = vpop.f32.mrf.mxu1 }
 0x629   :  { %v13507_v62 = vpop.eup %13506  ;;  %v10197_v2 = vmul.f32 0.6931472, %v13505_v59  ;;  %13516 = vpow2.f32 %v10016_v37  ;;  %v10712_v35 = vadd.f32 %v10711_v17, %v10649_v51  ;;  %v9938_v38 = vsub.f32 0.0, %v9874_v21  ;;  %v21421_v7 = vld [vmem:[#allocation100_spill] sm:$0xff] }
 0x62a   :  { %v9678_v18 = vmax.f32 %v19028_v1, 0.0  ;;  %v10126_v56 = vadd.f32 1.0, %v13507_v62  ;;  %v10586_v11 = vand.u32 2147483647, %v10522_v10  ;;  %v11837_v15 = vpack.c.bf16 %v19149_v46, %v19127_v44  ;;  %v19164_v12 = vpop.f32.mrf.mxu1  ;;  %v21420_v10 = vld [vmem:[#allocation99_spill] sm:$0xff] }
 0x62b   :  { %v10315_v36 = vadd.f32 %v10197_v2, %v9803_v58  ;;  %v10018_v34 = vmul.f32 1.442695, %v9938_v38  ;;  %v9875_v43 = vand.u32 2147483647, %v19149_v46  ;;  %v19162_v60 = vadd.f32 %v18622_v9, %v19080_v26 }
 0x62c   :  { %v9742_v25 = vmul.f32 %v19036_v30, %v19028_v1  ;;  %13518 = vlog2.f32 %v10126_v56  ;;  %v10650_v29 = vmul.f32 %v10586_v11, %v21418_v19  ;;  %12089 = vst [vmem:[%s20479_s7 + $0x40] sm:$0xff] %v11837_v15   ;;  %v10523_v6 = vsub.f32 %v19149_v46, %v19154_v33  ;;  %v19178_v1 = vld [vmem:[%s20478_s6 + $0x90] sm:$0xff]  ;;  %v8853_v30 = vpop.f32.mrf.mxu1  ;;  %v19202_v15 = vld [vmem:[%s20478_s6 + $0x98] sm:$0xff] }
 0x62d   :  { %v13509_v4 = vpop.eup %13508  ;;  %v10379_v58 = vmul.f32 %v10315_v36, %v21419_v57  ;;  %v9804_v9 = vsub.f32 %v9676_v20, %v9740_v54  ;;  %13520 = vpow2.f32 %v10018_v34  ;;  %v9939_v26 = vsub.f32 0.0, %v9875_v43  ;;  %v21422_v57 = vld [vmem:[#allocation101_spill] sm:$0xff] }
 0x62e   :  { %v13511_v17 = vpop.eup %13510  ;;  %v10199_v24 = vmul.f32 0.6931472, %v13509_v4  ;;  %v9805_v53 = vsub.f32 %v9677_v13, %v9741_v5  ;;  %v10713_v55 = vadd.f32 %v10712_v35, %v10650_v29  ;;  %v10587_v42 = vand.u32 2147483647, %v10523_v6  ;;  %v19181_v21 = vpop.f32.mrf.mxu1 }
 0x62f   :  { %v10442_v31 = vadd.f32 %v10441_v8, %v10379_v58  ;;  %v10127_v37 = vadd.f32 1.0, %v13511_v17  ;;  %v10020_v45 = vmul.f32 1.442695, %v9939_v26  ;;  %v9876_v51 = vand.u32 2147483647, %v19162_v60 }
 0x630   :  { %v10316_v20 = vadd.f32 %v10199_v24, %v9804_v9  ;;  %v19183_v54 = vsub.f32 %v9678_v18, %v9742_v25  ;;  %v10651_v59 = vmul.f32 %v10587_v42, %v21420_v10  ;;  %v10524_v62 = vsub.f32 %v19162_v60, %v19178_v1  ;;  %v19192_v8 = vld [vmem:[%s20477_s4] ss:$0 sm:$0xff]  ;;  %v8856_v38 = vpop.f32.mrf.mxu1 }
 0x631   :  { %v13513_v2 = vpop.eup %13512  ;;  %v9679_v13 = vmax.f32 %v19046_v40, 0.0  ;;  %13522 = vlog2.f32 %v10127_v37  ;;  %v9940_v5 = vsub.f32 0.0, %v9876_v51  ;;  %v19196_v35 = vadd.f32 %v19192_v8, %v19099_v23  ;;  %v19224_v9 = vld [vmem:[%s20478_s6 + $0xa0] sm:$0xff] }
 0x632   :  { %v10380_v18 = vmul.f32 %v10316_v20, %v21421_v7  ;;  %v10128_v56 = vadd.f32 1.0, %v13513_v2  ;;  %13524 = vpow2.f32 %v10020_v45  ;;  %v10714_v11 = vadd.f32 %v10713_v55, %v10651_v59  ;;  %v19208_v19 = vpop.f32.mrf.mxu1  ;;  %v21423_v20 = vld [vmem:[#allocation102_spill] sm:$0xff] }
 0x633   :  { %v13515_v36 = vpop.eup %13514  ;;  %v9743_v34 = vmul.f32 %v19059_v22, %v19046_v40  ;;  %v10022_v43 = vmul.f32 1.442695, %v9940_v5  ;;  %v10588_v25 = vand.u32 2147483647, %v10524_v62  ;;  %v11842_v23 = vpack.c.bf16 %v19196_v35, %v19162_v60 }
 0x634   :  { %v10443_v29 = vadd.f32 %v10442_v31, %v10380_v18  ;;  %v10201_v6 = vmul.f32 0.6931472, %v13515_v36  ;;  %13526 = vlog2.f32 %v10128_v56  ;;  %v19212_v4 = vadd.f32 %v19192_v8, %v19123_v63  ;;  %v8861_v26 = vpop.f32.mrf.mxu1 }
 0x635   :  { %13528 = vpow2.f32 %v10022_v43  ;;  %v10652_v58 = vmul.f32 %v10588_v25, %v21422_v57  ;;  %12090 = vst [vmem:[%s20479_s7 + $0x48] sm:$0xff] %v11842_v23   ;;  %v9877_v40 = vand.u32 2147483647, %v19196_v35  ;;  %v10525_v22 = vsub.f32 %v19196_v35, %v19202_v15 }
 0x636   :  { %v13517_v63 = vpop.eup %13516  ;;  %v10317_v30 = vadd.f32 %v10201_v6, %v9805_v53  ;;  %v9680_v17 = vmax.f32 %v19071_v52, 0.0  ;;  %v9744_v24 = vmul.f32 %v19086_v47, %v19071_v52  ;;  %v9681_v55 = vmax.f32 %v19097_v0, 0.0  ;;  %v19230_v51 = vpop.f32.mrf.mxu1  ;;  %v21424_v47 = vld [vmem:[#allocation103_spill] sm:$0xff] }
 0x637   :  { %v10129_v42 = vadd.f32 1.0, %v13517_v63  ;;  %v10715_v31 = vadd.f32 %v10714_v11, %v10652_v58  ;;  %v9941_v37 = vsub.f32 0.0, %v9877_v40  ;;  %v10589_v45 = vand.u32 2147483647, %v10525_v22  ;;  %v21425_v58 = vld [vmem:[#allocation104_spill] sm:$0xff] }
 0x638   :  { %v10381_v10 = vmul.f32 %v10317_v30, %v21423_v20  ;;  %v9745_v59 = vmul.f32 %v19107_v32, %v19097_v0  ;;  %v9878_v53 = vand.u32 2147483647, %v19212_v4  ;;  %v10526_v62 = vsub.f32 %v19212_v4, %v19224_v9  ;;  %v8864_v7 = vpop.f32.mrf.mxu1  ;;  %v19246_v32 = vld [vmem:[%s20478_s6 + $0xa8] sm:$0xff] }
 0x639   :  { %v13519_v2 = vpop.eup %13518  ;;  %13530 = vlog2.f32 %v10129_v42  ;;  %v10024_v52 = vmul.f32 1.442695, %v9941_v37  ;;  %v10653_v5 = vmul.f32 %v10589_v45, %v21424_v47  ;;  %v19241_v38 = vadd.f32 %v19192_v8, %v19142_v14 }
 0x63a   :  { %v13521_v18 = vpop.eup %13520  ;;  %v10444_v56 = vadd.f32 %v10443_v29, %v10381_v10  ;;  %v10203_v11 = vmul.f32 0.6931472, %v13519_v2  ;;  %v9942_v36 = vsub.f32 0.0, %v9878_v53  ;;  %v10590_v0 = vand.u32 2147483647, %v10526_v62  ;;  %v19250_v6 = vpop.f32.mrf.mxu1  ;;  %v19268_v10 = vld [vmem:[%s20478_s6 + $0xb0] sm:$0xff] }
 0x63b   :  { %v10130_v43 = vadd.f32 1.0, %v13521_v18  ;;  %13532 = vpow2.f32 %v10024_v52  ;;  %v10716_v25 = vadd.f32 %v10715_v31, %v10653_v5  ;;  %v11847_v23 = vpack.c.bf16 %v19241_v38, %v19212_v4  ;;  %v21426_v31 = vld [vmem:[#allocation78_spill] sm:$0xff] }
 0x63c   :  { %v10318_v14 = vadd.f32 %v10203_v11, %v19183_v54  ;;  %v9807_v57 = vsub.f32 %v9679_v13, %v9743_v34  ;;  %v10026_v29 = vmul.f32 1.442695, %v9942_v36  ;;  %v10654_v40 = vmul.f32 %v10590_v0, %v21425_v58  ;;  %v8869_v30 = vpop.f32.mrf.mxu1 }
 0x63d   :  { %v9808_v22 = vsub.f32 %v9680_v17, %v9744_v24  ;;  %13534 = vlog2.f32 %v10130_v43  ;;  %12091 = vst [vmem:[%s20479_s7 + $0x50] sm:$0xff] %v11847_v23   ;;  %v9879_v26 = vand.u32 2147483647, %v19241_v38  ;;  %v10527_v63 = vsub.f32 %v19241_v38, %v19246_v32 }
 0x63e   :  { %v13523_v42 = vpop.eup %13522  ;;  %v10382_v37 = vmul.f32 %v10318_v14, %v21426_v31  ;;  %13536 = vpow2.f32 %v10026_v29  ;;  %v10717_v54 = vadd.f32 %v10716_v25, %v10654_v40  ;;  %v19263_v13 = vadd.f32 %v19192_v8, %v19164_v12  ;;  %v19270_v53 = vpop.f32.mrf.mxu1  ;;  %v21428_v25 = vld [vmem:[#allocation80_spill] sm:$0xff] }
 0x63f   :  { %v13525_v34 = vpop.eup %13524  ;;  %v10205_v17 = vmul.f32 0.6931472, %v13523_v42  ;;  %v9809_v24 = vsub.f32 %v9681_v55, %v9745_v59  ;;  %v9943_v45 = vsub.f32 0.0, %v9879_v26  ;;  %v10591_v20 = vand.u32 2147483647, %v10527_v63  ;;  %v21427_v55 = vld [vmem:[#allocation105_spill] sm:$0xff] }
 0x640   :  { %v10445_v62 = vadd.f32 %v10444_v56, %v10382_v37  ;;  %v9682_v2 = vmax.f32 %v19127_v44, 0.0  ;;  %v9746_v52 = vmul.f32 %v19132_v61, %v19127_v44  ;;  %v10131_v12 = vadd.f32 1.0, %v13525_v34  ;;  %v8872_v11 = vpop.f32.mrf.mxu1  ;;  %v19293_v42 = vld [vmem:[%s20478_s6 + $0xb8] sm:$0xff]  ;;  %v21429_v34 = vld [vmem:[#allocation106_spill] sm:$0xff] }
 0x641   :  { %v13527_v47 = vpop.eup %13526  ;;  %v10319_v5 = vadd.f32 %v10205_v17, %v9807_v57  ;;  %v10028_v7 = vmul.f32 1.442695, %v9943_v45  ;;  %v10655_v59 = vmul.f32 %v10591_v20, %v21427_v55  ;;  %v9880_v18 = vand.u32 2147483647, %v19263_v13 }
 0x642   :  { %v13529_v36 = vpop.eup %13528  ;;  %v10207_v0 = vmul.f32 0.6931472, %v13527_v47  ;;  %v9683_v43 = vmax.f32 %v19149_v46, 0.0  ;;  %13538 = vlog2.f32 %v10131_v12  ;;  %v10528_v56 = vsub.f32 %v19263_v13, %v19268_v10  ;;  %v19281_v14 = vpop.f32.mrf.mxu1 }
 0x643   :  { %v10383_v23 = vmul.f32 %v10319_v5, %v21428_v25  ;;  %v10132_v44 = vadd.f32 1.0, %v13529_v36  ;;  %13540 = vpow2.f32 %v10028_v7  ;;  %v10718_v61 = vadd.f32 %v10717_v54, %v10655_v59 }
 0x644   :  { %v10320_v57 = vadd.f32 %v10207_v0, %v9808_v22  ;;  %v9944_v29 = vsub.f32 0.0, %v9880_v18  ;;  %v10592_v58 = vand.u32 2147483647, %v10528_v56  ;;  %v19285_v40 = vadd.f32 %v19192_v8, %v19181_v21  ;;  %v8877_v31 = vpop.f32.mrf.mxu1  ;;  %v21430_v0 = vld [vmem:[#allocation94_spill] sm:$0xff] }
 0x645   :  { %v10446_v26 = vadd.f32 %v10445_v62, %v10383_v23  ;;  %v9747_v63 = vmul.f32 %v19154_v33, %v19149_v46  ;;  %v9684_v30 = vmax.f32 %v19162_v60, 0.0  ;;  %13542 = vlog2.f32 %v10132_v44  ;;  %v19302_v46 = vld [vmem:[%s20476_s5 + $0x68] sm:$0xff]   ;;  %v19327_v44 = vld [vmem:[%s20478_s6 + $0xc0] sm:$0xff] }
 0x646   :  { %v13531_v22 = vpop.eup %13530  ;;  %v10384_v37 = vmul.f32 %v10320_v57, %v18793_v39  ;;  %v10030_v54 = vmul.f32 1.442695, %v9944_v29  ;;  %v10656_v21 = vmul.f32 %v10592_v58, %v21429_v34  ;;  %v11852_v17 = vpack.c.bf16 %v19285_v40, %v19263_v13  ;;  %v19311_v62 = vpop.f32.mrf.mxu1 }
 0x647   :  { %v10209_v33 = vmul.f32 0.6931472, %v13531_v22  ;;  %v9748_v45 = vmul.f32 %v19178_v1, %v19162_v60  ;;  %v9881_v20 = vand.u32 2147483647, %v19285_v40  ;;  %v19309_v39 = vadd.f32 %v19192_v8, %v19208_v19 }
 0x648   :  { %v13533_v12 = vpop.eup %13532  ;;  %v10447_v47 = vadd.f32 %v10446_v26, %v10384_v37  ;;  %13544 = vpow2.f32 %v10030_v54  ;;  %v10719_v5 = vadd.f32 %v10718_v61, %v10656_v21  ;;  %12092 = vst [vmem:[%s20479_s7 + $0x58] sm:$0xff] %v11852_v17   ;;  %v10529_v7 = vsub.f32 %v19285_v40, %v19293_v42  ;;  %v8880_v19 = vpop.f32.mrf.mxu1  ;;  %v21432_v61 = vld [vmem:[#allocation84_spill] sm:$0xff] }
 0x649   :  { %v10321_v60 = vadd.f32 %v10209_v33, %v9809_v24  ;;  %v10133_v1 = vadd.f32 1.0, %v13533_v12  ;;  %v9945_v55 = vsub.f32 0.0, %v9881_v20  ;;  %v12008_v59 = vunpack.c.l.bf16 %v19302_v46 }
 0x64a   :  { %v13535_v18 = vpop.eup %13534  ;;  %v9810_v11 = vsub.f32 %v9682_v2, %v9746_v52  ;;  %v9811_v36 = vsub.f32 %v9683_v43, %v9747_v63  ;;  %v21431_v56 = vunpack.c.l.bf16 %v21430_v0  ;;  %v10593_v23 = vand.u32 2147483647, %v10529_v7  ;;  %v19330_v26 = vpop.f32.mrf.mxu1  ;;  %v21433_v43 = vld [vmem:[#allocation81_spill] sm:$0xff] }
 0x64b   :  { %v13537_v24 = vpop.eup %13536  ;;  %v10385_v57 = vmul.f32 %v10321_v60, %v21432_v61  ;;  %v10211_v29 = vmul.f32 0.6931472, %v13535_v18  ;;  %13546 = vlog2.f32 %v10133_v1  ;;  %v10032_v58 = vmul.f32 1.442695, %v9945_v55  ;;  %v19347_v60 = vld [vmem:[%s20478_s6 + $0xc8] sm:$0xff] }
 0x64c   :  { %v19322_v25 = vmul.f32 %v21431_v56, %v18493_v50  ;;  %v9812_v2 = vsub.f32 %v9684_v30, %v9748_v45  ;;  %v10134_v52 = vadd.f32 1.0, %v13537_v24  ;;  %v10657_v63 = vmul.f32 %v10593_v23, %v21433_v43  ;;  %v8885_v34 = vpop.f32.mrf.mxu1  ;;  %v21434_v45 = vld [vmem:[#allocation107_spill] sm:$0xff] }
 0x64d   :  { %v9882_v31 = vand.u32 2147483647, %v19309_v39  ;;  %v10448_v22 = vadd.f32 %v10447_v47, %v10385_v57  ;;  %v10322_v37 = vadd.f32 %v10211_v29, %v9810_v11  ;;  %13548 = vpow2.f32 %v10032_v58 }
 0x64e   :  { %v10530_v54 = vsub.f32 %v19309_v39, %v19327_v44  ;;  %13550 = vlog2.f32 %v10134_v52  ;;  %v10720_v21 = vadd.f32 %v10719_v5, %v10657_v63  ;;  %v19338_v33 = vadd.f32 %v19192_v8, %v19230_v51  ;;  %v19349_v5 = vpop.f32.mrf.mxu1 }
 0x64f   :  { %v9946_v17 = vsub.f32 0.0, %v9882_v31  ;;  %v13539_v30 = vpop.eup %13538  ;;  %v10386_v20 = vmul.f32 %v10322_v37, %v21434_v45  ;;  %v9685_v12 = vmax.f32 %v19196_v35, 0.0  ;;  %v9749_v47 = vmul.f32 %v19202_v15, %v19196_v35 }
 0x650   :  { %v10594_v7 = vand.u32 2147483647, %v10530_v54  ;;  %v13541_v1 = vpop.eup %13540  ;;  %v10213_v55 = vmul.f32 0.6931472, %v13539_v30  ;;  %v9686_v51 = vmax.f32 %v19212_v4, 0.0  ;;  %v11857_v18 = vpack.c.bf16 %v19338_v33, %v19309_v39  ;;  %v8888_v23 = vpop.f32.mrf.mxu1 }
 0x651   :  { %v10034_v19 = vmul.f32 1.442695, %v9946_v17  ;;  %v10449_v11 = vadd.f32 %v10448_v22, %v10386_v20  ;;  %v9750_v35 = vmul.f32 %v19224_v9, %v19212_v4  ;;  %v10135_v15 = vadd.f32 1.0, %v13541_v1  ;;  %v19378_v22 = vld [vmem:[%s20478_s6 + $0xd0] sm:$0xff] }
 0x652   :  { %v10658_v56 = vmul.f32 %v10594_v7, %v18834_v41  ;;  %v13543_v24 = vpop.eup %13542  ;;  %v10323_v61 = vadd.f32 %v10213_v55, %v9811_v36  ;;  %12093 = vst [vmem:[%s20479_s7 + $0x60] sm:$0xff] %v11857_v18   ;;  %v9883_v57 = vand.u32 2147483647, %v19338_v33  ;;  %v10531_v29 = vsub.f32 %v19338_v33, %v19347_v60  ;;  %v19367_v41 = vpop.f32.mrf.mxu1 }
 0x653   :  { %13552 = vpow2.f32 %v10034_v19  ;;  %v10215_v58 = vmul.f32 0.6931472, %v13543_v24  ;;  %v19365_v4 = vadd.f32 %v19192_v8, %v19250_v6  ;;  %v21435_v36 = vunpack.c.h.bf16 %v21430_v0 }
 0x654   :  { %13554 = vlog2.f32 %v10135_v15  ;;  %v10721_v52 = vadd.f32 %v10720_v21, %v10658_v56  ;;  %v10387_v9 = vmul.f32 %v10323_v61, %v18846_v16  ;;  %v9947_v63 = vsub.f32 0.0, %v9883_v57  ;;  %v21436_v21 = vld [vmem:[#allocation79_spill] sm:$0xff]  ;;  %v8893_v30 = vpop.f32.mrf.mxu1 }
 0x655   :  { %v19373_v43 = vmul.f32 %v21435_v36, %v18493_v50  ;;  %v10595_v31 = vand.u32 2147483647, %v10531_v29  ;;  %v13545_v37 = vpop.eup %13544  ;;  %v10324_v54 = vadd.f32 %v10215_v58, %v9812_v2  ;;  %v9813_v6 = vsub.f32 %v9685_v12, %v9749_v47 }
 0x656   :  { %v9814_v34 = vsub.f32 %v9686_v51, %v9750_v35  ;;  %v21437_v17 = vunpack.c.l.bf16 %v21436_v21  ;;  %v10450_v0 = vadd.f32 %v10449_v11, %v10387_v9  ;;  %v10136_v45 = vadd.f32 1.0, %v13545_v37  ;;  %v19393_v47 = vpop.f32.mrf.mxu1 }
 0x657   :  { %v10036_v20 = vmul.f32 1.442695, %v9947_v63  ;;  %v10659_v7 = vmul.f32 %v10595_v31, %v19053_v28  ;;  %v10388_v1 = vmul.f32 %v10324_v54, %v19064_v27  ;;  %v9628_v55 = vmul.f32 %v12008_v59, %v18497_v3 }
 0x658   :  { %v19383_v16 = vmul.f32 %v21437_v17, %v18493_v50  ;;  %v9884_v2 = vand.u32 2147483647, %v19365_v4  ;;  %v10532_v12 = vsub.f32 %v19365_v4, %v19378_v22  ;;  %v13547_v51 = vpop.eup %13546  ;;  %13556 = vlog2.f32 %v10136_v45  ;;  %v8896_v15 = vpop.f32.mrf.mxu1 }
 0x659   :  { %v10722_v19 = vadd.f32 %v10721_v52, %v10659_v7  ;;  %v19397_v18 = vadd.f32 %v19192_v8, %v19270_v53  ;;  %v12009_v28 = vunpack.c.h.bf16 %v19302_v46  ;;  %v10451_v27 = vadd.f32 %v10450_v0, %v10388_v1  ;;  %v19408_v53 = vld [vmem:[%s20478_s6 + $0xd8] sm:$0xff]  ;;  %v19606_v46 = vld [vmem:[%s20476_s5 + $0x88] sm:$0xff]  }
 0x65a   :  { %v10217_v11 = vmul.f32 0.6931472, %v13547_v51  ;;  %13558 = vpow2.f32 %v10036_v20  ;;  %v9948_v35 = vsub.f32 0.0, %v9884_v2  ;;  %v13549_v56 = vpop.eup %13548  ;;  %v9687_v23 = vmax.f32 %v19241_v38, 0.0  ;;  %v19411_v63 = vpop.f32.mrf.mxu1 }
 0x65b   :  { %v9751_v24 = vmul.f32 %v19246_v32, %v19241_v38  ;;  %v10596_v61 = vand.u32 2147483647, %v10532_v12  ;;  %v11862_v57 = vpack.c.bf16 %v19397_v18, %v19365_v4  ;;  %v13551_v29 = vpop.eup %13550  ;;  %v9688_v52 = vmax.f32 %v19263_v13, 0.0 }
 0x65c   :  { %v10325_v58 = vadd.f32 %v10217_v11, %v9813_v6  ;;  %v10137_v9 = vadd.f32 1.0, %v13549_v56  ;;  %v10038_v36 = vmul.f32 1.442695, %v9948_v35  ;;  %v10219_v31 = vmul.f32 0.6931472, %v13551_v29 }
 0x65d   :  { %v9752_v38 = vmul.f32 %v19268_v10, %v19263_v13  ;;  %v10660_v32 = vmul.f32 %v10596_v61, %v9628_v55  ;;  %12094 = vst [vmem:[%s20479_s7 + $0x68] sm:$0xff] %v11862_v57   ;;  %v9885_v37 = vand.u32 2147483647, %v19397_v18  ;;  %v9629_v6 = vmul.f32 %v12009_v28, %v18497_v3  ;;  %v19428_v13 = vld [vmem:[%s20476_s5 + $0x70] sm:$0xff]   ;;  %v8901_v10 = vpop.f32.mrf.mxu1 }
 0x65e   :  { %v10389_v54 = vmul.f32 %v10325_v58, %v19121_v49  ;;  %13560 = vlog2.f32 %v10137_v9  ;;  %v10533_v17 = vsub.f32 %v19397_v18, %v19408_v53  ;;  %v10326_v30 = vadd.f32 %v10219_v31, %v9814_v34 }
 0x65f   :  { %v9689_v0 = vmax.f32 %v19285_v40, 0.0  ;;  %13562 = vpow2.f32 %v10038_v36  ;;  %v10723_v45 = vadd.f32 %v10722_v19, %v10660_v32  ;;  %v9949_v7 = vsub.f32 0.0, %v9885_v37  ;;  %v19435_v2 = vpop.f32.mrf.mxu1 }
 0x660   :  { %v13553_v49 = vpop.eup %13552  ;;  %v10452_v20 = vadd.f32 %v10451_v27, %v10389_v54  ;;  %v10597_v1 = vand.u32 2147483647, %v10533_v17  ;;  %v19433_v55 = vadd.f32 %v19192_v8, %v19281_v14  ;;  %v10390_v51 = vmul.f32 %v10326_v30, %v19322_v25  ;;  %v19444_v14 = vld [vmem:[%s20478_s6 + $0xe0] sm:$0xff]  ;;  %v19473_v17 = vld [vmem:[%s20476_s5 + $0x78] sm:$0xff]  }
 0x661   :  { %v13555_v12 = vpop.eup %13554  ;;  %v9753_v34 = vmul.f32 %v19293_v42, %v19285_v40  ;;  %v10138_v11 = vadd.f32 1.0, %v13553_v49  ;;  %v12012_v35 = vunpack.c.l.bf16 %v19428_v13  ;;  %v9815_v19 = vsub.f32 %v9687_v23, %v9751_v24  ;;  %v8904_v61 = vpop.f32.mrf.mxu1  ;;  %v19481_v49 = vld [vmem:[%s20478_s6 + $0xe8] sm:$0xff] }
 0x662   :  { %v10221_v15 = vmul.f32 0.6931472, %v13555_v12  ;;  %v10040_v27 = vmul.f32 1.442695, %v9949_v7  ;;  %v10661_v56 = vmul.f32 %v10597_v1, %v9629_v6  ;;  %v10453_v57 = vadd.f32 %v10452_v20, %v10390_v51 }
 0x663   :  { %v9816_v29 = vsub.f32 %v9688_v52, %v9752_v38  ;;  %v21438_v25 = vunpack.c.h.bf16 %v21436_v21  ;;  %13564 = vlog2.f32 %v10138_v11  ;;  %v9886_v23 = vand.u32 2147483647, %v19433_v55  ;;  %v19452_v24 = vpop.f32.mrf.mxu1 }
 0x664   :  { %v10327_v40 = vadd.f32 %v10221_v15, %v9815_v19  ;;  %13566 = vpow2.f32 %v10040_v27  ;;  %v10724_v42 = vadd.f32 %v10723_v45, %v10661_v56  ;;  %v9817_v9 = vsub.f32 %v9689_v0, %v9753_v34 }
 0x665   :  { %v19449_v58 = vmul.f32 %v21438_v25, %v18493_v50  ;;  %v9630_v36 = vmul.f32 %v12012_v35, %v18497_v3  ;;  %v10534_v52 = vsub.f32 %v19433_v55, %v19444_v14  ;;  %v19461_v21 = vadd.f32 %v19192_v8, %v19311_v62  ;;  %v13557_v31 = vpop.eup %13556  ;;  %v8909_v10 = vpop.f32.mrf.mxu1 }
 0x666   :  { %v10391_v38 = vmul.f32 %v10327_v40, %v19373_v43  ;;  %v21439_v32 = vunpack.c.l.bf16 %v18778_v48  ;;  %v9950_v54 = vsub.f32 0.0, %v9886_v23  ;;  %v12013_v6 = vunpack.c.h.bf16 %v19428_v13 }
 0x667   :  { %v13559_v30 = vpop.eup %13558  ;;  %v10223_v62 = vmul.f32 0.6931472, %v13557_v31  ;;  %v9690_v0 = vmax.f32 %v19309_v39, 0.0  ;;  %v10598_v45 = vand.u32 2147483647, %v10534_v52  ;;  %v11867_v43 = vpack.c.bf16 %v19461_v21, %v19433_v55  ;;  %v19485_v51 = vpop.f32.mrf.mxu1  ;;  %v19509_v31 = vld [vmem:[%s20478_s6 + $0xf0] sm:$0xff] }
 0x668   :  { %v19467_v37 = vmul.f32 %v21439_v32, %v18493_v50  ;;  %v10454_v20 = vadd.f32 %v10453_v57, %v10391_v38  ;;  %v9754_v7 = vmul.f32 %v19327_v44, %v19309_v39  ;;  %v10139_v1 = vadd.f32 1.0, %v13559_v30 }
 0x669   :  { %v10042_v12 = vmul.f32 1.442695, %v9950_v54  ;;  %v10328_v34 = vadd.f32 %v10223_v62, %v9816_v29  ;;  %v10662_v11 = vmul.f32 %v10598_v45, %v9630_v36  ;;  %12095 = vst [vmem:[%s20479_s7 + $0x70] sm:$0xff] %v11867_v43   ;;  %v19492_v19 = vadd.f32 %v19192_v8, %v19330_v26  ;;  %v8912_v56 = vpop.f32.mrf.mxu1 }
 0x66a   :  { %v12016_v15 = vunpack.c.l.bf16 %v19473_v17  ;;  %13568 = vlog2.f32 %v10139_v1  ;;  %v9631_v39 = vmul.f32 %v12013_v6, %v18497_v3  ;;  %v9887_v44 = vand.u32 2147483647, %v19461_v21 }
 0x66b   :  { %v10535_v27 = vsub.f32 %v19461_v21, %v19481_v49  ;;  %v13561_v61 = vpop.eup %13560  ;;  %v10392_v57 = vmul.f32 %v10328_v34, %v19383_v16  ;;  %13570 = vpow2.f32 %v10042_v12  ;;  %v10725_v29 = vadd.f32 %v10724_v42, %v10662_v11  ;;  %v19511_v38 = vpop.f32.mrf.mxu1 }
 0x66c   :  { %v19504_v26 = vadd.f32 %v19192_v8, %v19349_v5  ;;  %v13563_v25 = vpop.eup %13562  ;;  %v10225_v40 = vmul.f32 0.6931472, %v13561_v61  ;;  %v9818_v23 = vsub.f32 %v9690_v0, %v9754_v7  ;;  %v9951_v36 = vsub.f32 0.0, %v9887_v44 }
 0x66d   :  { %v10599_v52 = vand.u32 2147483647, %v10535_v27  ;;  %v10455_v32 = vadd.f32 %v10454_v20, %v10392_v57  ;;  %v9691_v16 = vmax.f32 %v19338_v33, 0.0  ;;  %v9755_v42 = vmul.f32 %v19347_v60, %v19338_v33  ;;  %v8917_v0 = vpop.f32.mrf.mxu1 }
 0x66e   :  { %v10140_v5 = vadd.f32 1.0, %v13563_v25  ;;  %v10329_v54 = vadd.f32 %v10225_v40, %v9817_v9  ;;  %v10044_v10 = vmul.f32 1.442695, %v9951_v36  ;;  %v9888_v62 = vand.u32 2147483647, %v19492_v19 }
 0x66f   :  { %v10663_v30 = vmul.f32 %v10599_v52, %v9631_v39  ;;  %v9632_v45 = vmul.f32 %v12016_v15, %v18497_v3  ;;  %v10536_v43 = vsub.f32 %v19492_v19, %v19509_v31  ;;  %v11872_v20 = vpack.c.bf16 %v19504_v26, %v19492_v19  ;;  %v19525_v1 = vpop.f32.mrf.mxu1 }
 0x670   :  { %13572 = vlog2.f32 %v10140_v5  ;;  %v13565_v7 = vpop.eup %13564  ;;  %v10393_v33 = vmul.f32 %v10329_v54, %v19449_v58  ;;  %v9952_v9 = vsub.f32 0.0, %v9888_v62  ;;  %v21440_v11 = vunpack.c.h.bf16 %v18778_v48  ;;  %v19537_v58 = vld [vmem:[%s20478_s6 + $0xf8] sm:$0xff]  ;;  %v19545_v5 = vld [vmem:[%s20476_s5 + $0x80] sm:$0xff]  }
 0x671   :  { %13574 = vpow2.f32 %v10044_v10  ;;  %v10726_v60 = vadd.f32 %v10725_v29, %v10663_v30  ;;  %v13567_v12 = vpop.eup %13566  ;;  %v10227_v34 = vmul.f32 0.6931472, %v13565_v7  ;;  %v10600_v44 = vand.u32 2147483647, %v10536_v43  ;;  %12096 = vst [vmem:[%s20479_s7 + $0x78] sm:$0xff] %v11872_v20   ;;  %v8920_v25 = vpop.f32.mrf.mxu1 }
 0x672   :  { %v9560_v39 = vmul.f32 %v21440_v11, %v18493_v50  ;;  %v12017_v27 = vunpack.c.h.bf16 %v19473_v17  ;;  %v10456_v56 = vadd.f32 %v10455_v32, %v10393_v33  ;;  %v9819_v61 = vsub.f32 %v9691_v16, %v9755_v42 }
 0x673   :  { %v10141_v57 = vadd.f32 1.0, %v13567_v12  ;;  %v10046_v29 = vmul.f32 1.442695, %v9952_v9  ;;  %v10330_v40 = vadd.f32 %v10227_v34, %v9818_v23  ;;  %v9692_v48 = vmax.f32 %v19365_v4, 0.0  ;;  %v19553_v42 = vpop.f32.mrf.mxu1 }
 0x674   :  { %v9756_v36 = vmul.f32 %v19378_v22, %v19365_v4  ;;  %v10664_v52 = vmul.f32 %v10600_v44, %v9632_v45  ;;  %v9633_v32 = vmul.f32 %v12017_v27, %v18497_v3  ;;  %v9889_v16 = vand.u32 2147483647, %v19504_v26 }
 0x675   :  { %13576 = vlog2.f32 %v10141_v57  ;;  %v10537_v23 = vsub.f32 %v19504_v26, %v19537_v58  ;;  %v10394_v4 = vmul.f32 %v10330_v40, %v19467_v37  ;;  %v19558_v54 = vadd.f32 %v19192_v8, %v19367_v41  ;;  %v8925_v45 = vpop.f32.mrf.mxu1  ;;  %v19568_v37 = vld [vmem:[%s20478_s6 + $0x100] sm:$0xff] }
 0x676   :  { %13578 = vpow2.f32 %v10046_v29  ;;  %v10727_v22 = vadd.f32 %v10726_v60, %v10664_v52  ;;  %v9561_v10 = vmul.f32 %v12008_v59, %v18493_v50  ;;  %v9953_v30 = vsub.f32 0.0, %v9889_v16 }
 0x677   :  { %v10601_v62 = vand.u32 2147483647, %v10537_v23  ;;  %v12020_v0 = vunpack.c.l.bf16 %v19545_v5  ;;  %v13569_v43 = vpop.eup %13568  ;;  %v10457_v20 = vadd.f32 %v10456_v56, %v10394_v4  ;;  %v9693_v7 = vmax.f32 %v19397_v18, 0.0  ;;  %v19577_v11 = vpop.f32.mrf.mxu1  ;;  %v19593_v4 = vld [vmem:[%s20478_s6 + $0x108] sm:$0xff] }
 0x678   :  { %v9890_v41 = vand.u32 2147483647, %v19558_v54  ;;  %v19573_v33 = vadd.f32 %v19192_v8, %v19393_v47  ;;  %v13571_v59 = vpop.eup %13570  ;;  %v10229_v60 = vmul.f32 0.6931472, %v13569_v43  ;;  %v9757_v9 = vmul.f32 %v19408_v53, %v19397_v18 }
 0x679   :  { %v10048_v12 = vmul.f32 1.442695, %v9953_v30  ;;  %v10665_v34 = vmul.f32 %v10601_v62, %v9633_v32  ;;  %v9820_v44 = vsub.f32 %v9692_v48, %v9756_v36  ;;  %v10142_v56 = vadd.f32 1.0, %v13571_v59  ;;  %v8928_v52 = vpop.f32.mrf.mxu1 }
 0x67a   :  { %v9634_v57 = vmul.f32 %v12020_v0, %v18497_v3  ;;  %v9954_v29 = vsub.f32 0.0, %v9890_v41  ;;  %v10331_v25 = vadd.f32 %v10229_v60, %v9819_v61  ;;  %v10538_v40 = vsub.f32 %v19558_v54, %v19568_v37 }
 0x67b   :  { %13580 = vpow2.f32 %v10048_v12  ;;  %v10728_v47 = vadd.f32 %v10727_v22, %v10665_v34  ;;  %v11877_v53 = vpack.c.bf16 %v19573_v33, %v19558_v54  ;;  %v12021_v48 = vunpack.c.h.bf16 %v19545_v5  ;;  %v19595_v22 = vpop.f32.mrf.mxu1 }
 0x67c   :  { %13582 = vlog2.f32 %v10142_v56  ;;  %v10050_v18 = vmul.f32 1.442695, %v9954_v29  ;;  %v10395_v32 = vmul.f32 %v10331_v25, %v9560_v39  ;;  %v9562_v16 = vmul.f32 %v12009_v28, %v18493_v50  ;;  %v19629_v25 = vld [vmem:[%s20478_s6 + $0x110] sm:$0xff] }
 0x67d   :  { %v13573_v36 = vpop.eup %13572  ;;  %v9821_v61 = vsub.f32 %v9693_v7, %v9757_v9  ;;  %v10602_v23 = vand.u32 2147483647, %v10538_v40  ;;  %v9694_v45 = vmax.f32 %v19433_v55, 0.0  ;;  %v9758_v39 = vmul.f32 %v19444_v14, %v19433_v55  ;;  %12097 = vst [vmem:[%s20479_s7 + $0x80] sm:$0xff] %v11877_v53   ;;  %v8933_v59 = vpop.f32.mrf.mxu1 }
 0x67e   :  { %v13575_v30 = vpop.eup %13574  ;;  %v10231_v62 = vmul.f32 0.6931472, %v13573_v36  ;;  %13584 = vpow2.f32 %v10050_v18  ;;  %v10458_v28 = vadd.f32 %v10457_v20, %v10395_v32  ;;  %v19611_v43 = vmul.f32 %v12012_v35, %v18493_v50 }
 0x67f   :  { %v10143_v7 = vadd.f32 1.0, %v13575_v30  ;;  %v10666_v41 = vmul.f32 %v10602_v23, %v9634_v57  ;;  %v9635_v14 = vmul.f32 %v12021_v48, %v18497_v3  ;;  %v9891_v60 = vand.u32 2147483647, %v19573_v33  ;;  %v19624_v34 = vpop.f32.mrf.mxu1 }
 0x680   :  { %v10332_v55 = vadd.f32 %v10231_v62, %v9820_v44  ;;  %v10539_v9 = vsub.f32 %v19573_v33, %v19593_v4  ;;  %v19621_v12 = vadd.f32 %v19192_v8, %v19411_v63  ;;  %v12024_v35 = vunpack.c.l.bf16 %v19606_v46 }
 0x681   :  { %13586 = vlog2.f32 %v10143_v7  ;;  %v10729_v20 = vadd.f32 %v10728_v47, %v10666_v41  ;;  %v9955_v57 = vsub.f32 0.0, %v9891_v60  ;;  %v19633_v47 = vadd.f32 %v19192_v8, %v19435_v2  ;;  %v8936_v53 = vpop.f32.mrf.mxu1 }
 0x682   :  { %v13577_v44 = vpop.eup %13576  ;;  %v10396_v56 = vmul.f32 %v10332_v55, %v9561_v10  ;;  %v10603_v29 = vand.u32 2147483647, %v10539_v9  ;;  %v9822_v52 = vsub.f32 %v9694_v45, %v9758_v39  ;;  %v19638_v18 = vmul.f32 %v12013_v6, %v18493_v50  ;;  %v19655_v55 = vld [vmem:[%s20478_s6 + $0x118] sm:$0xff] }
 0x683   :  { %v13579_v40 = vpop.eup %13578  ;;  %v10233_v63 = vmul.f32 0.6931472, %v13577_v44  ;;  %v9695_v10 = vmax.f32 %v19461_v21, 0.0  ;;  %v10052_v23 = vmul.f32 1.442695, %v9955_v57  ;;  %v9636_v2 = vmul.f32 %v12024_v35, %v18497_v3  ;;  %v19647_v13 = vpop.f32.mrf.mxu1 }
 0x684   :  { %v10459_v36 = vadd.f32 %v10458_v28, %v10396_v56  ;;  %v10144_v32 = vadd.f32 1.0, %v13579_v40  ;;  %v10667_v30 = vmul.f32 %v10603_v29, %v9635_v14  ;;  %v9892_v7 = vand.u32 2147483647, %v19621_v12  ;;  %v19673_v56 = vld [vmem:[%s20476_s5 + $0x90] sm:$0xff]  }
 0x685   :  { %v10333_v62 = vadd.f32 %v10233_v63, %v9821_v61  ;;  %v10540_v45 = vsub.f32 %v19621_v12, %v19629_v25  ;;  %v11882_v39 = vpack.c.bf16 %v19633_v47, %v19621_v12  ;;  %v12025_v28 = vunpack.c.h.bf16 %v19606_v46  ;;  %v8941_v14 = vpop.f32.mrf.mxu1 }
 0x686   :  { %13588 = vlog2.f32 %v10144_v32  ;;  %v10730_v6 = vadd.f32 %v10729_v20, %v10667_v30  ;;  %v9956_v61 = vsub.f32 0.0, %v9892_v7  ;;  %v9759_v9 = vmul.f32 %v19481_v49, %v19461_v21 }
 0x687   :  { %v10397_v41 = vmul.f32 %v10333_v62, %v9562_v16  ;;  %13590 = vpow2.f32 %v10052_v23  ;;  %v10604_v59 = vand.u32 2147483647, %v10540_v45  ;;  %v19662_v20 = vmul.f32 %v12016_v15, %v18493_v50  ;;  %12098 = vst [vmem:[%s20479_s7 + $0x88] sm:$0xff] %v11882_v39   ;;  %v19675_v40 = vpop.f32.mrf.mxu1  ;;  %v19691_v39 = vld [vmem:[%s20478_s6 + $0x120] sm:$0xff] }
 0x688   :  { %v13581_v60 = vpop.eup %13580  ;;  %v9696_v16 = vmax.f32 %v19492_v19, 0.0  ;;  %v9760_v44 = vmul.f32 %v19509_v31, %v19492_v19  ;;  %v10054_v29 = vmul.f32 1.442695, %v9956_v61  ;;  %v9637_v19 = vmul.f32 %v12025_v28, %v18497_v3 }
 0x689   :  { %v13583_v21 = vpop.eup %13582  ;;  %v10460_v49 = vadd.f32 %v10459_v36, %v10397_v41  ;;  %v10145_v57 = vadd.f32 1.0, %v13581_v60  ;;  %v10668_v15 = vmul.f32 %v10604_v59, %v9636_v2  ;;  %v9893_v31 = vand.u32 2147483647, %v19633_v47  ;;  %v8944_v62 = vpop.f32.mrf.mxu1 }
 0x68a   :  { %v10235_v63 = vmul.f32 0.6931472, %v13583_v21  ;;  %v10541_v53 = vsub.f32 %v19633_v47, %v19655_v55  ;;  %v19685_v36 = vadd.f32 %v19192_v8, %v19452_v24  ;;  %v12028_v30 = vunpack.c.l.bf16 %v19673_v56 }
 0x68b   :  { %v13585_v32 = vpop.eup %13584  ;;  %13592 = vlog2.f32 %v10145_v57  ;;  %v10731_v23 = vadd.f32 %v10730_v6, %v10668_v15  ;;  %v9957_v45 = vsub.f32 0.0, %v9893_v31  ;;  %v9823_v41 = vsub.f32 %v9695_v10, %v9759_v9  ;;  %v19694_v14 = vpop.f32.mrf.mxu1 }
 0x68c   :  { %v10334_v2 = vadd.f32 %v10235_v63, %v9822_v52  ;;  %v10146_v7 = vadd.f32 1.0, %v13585_v32  ;;  %13594 = vpow2.f32 %v10054_v29  ;;  %v9824_v61 = vsub.f32 %v9696_v16, %v9760_v44 }
 0x68d   :  { %v9697_v6 = vmax.f32 %v19504_v26, 0.0  ;;  %v10605_v59 = vand.u32 2147483647, %v10541_v53  ;;  %v10056_v52 = vmul.f32 1.442695, %v9957_v45  ;;  %v9638_v21 = vmul.f32 %v12028_v30, %v18497_v3  ;;  %v8949_v9 = vpop.f32.mrf.mxu1 }
 0x68e   :  { %v13587_v24 = vpop.eup %13586  ;;  %v10398_v60 = vmul.f32 %v10334_v2, %v19611_v43  ;;  %13596 = vlog2.f32 %v10146_v7  ;;  %v9894_v15 = vand.u32 2147483647, %v19685_v36  ;;  %v10542_v10 = vsub.f32 %v19685_v36, %v19691_v39 }
 0x68f   :  { %v10237_v57 = vmul.f32 0.6931472, %v13587_v24  ;;  %v10669_v29 = vmul.f32 %v10605_v59, %v9637_v19  ;;  %v9761_v44 = vmul.f32 %v19537_v58, %v19504_v26  ;;  %13598 = vpow2.f32 %v10056_v52  ;;  %v19709_v19 = vpop.f32.mrf.mxu1 }
 0x690   :  { %v10461_v16 = vadd.f32 %v10460_v49, %v10398_v60  ;;  %v19707_v43 = vadd.f32 %v19192_v8, %v19485_v51  ;;  %v9958_v53 = vsub.f32 0.0, %v9894_v15  ;;  %v10606_v32 = vand.u32 2147483647, %v10542_v10  ;;  %v19736_v60 = vld [vmem:[%s20476_s5 + $0x98] sm:$0xff]   ;;  %v19748_v10 = vld [vmem:[%s20477_s4] ss:$0 sm:$0xff] }
 0x691   :  { %v10335_v63 = vadd.f32 %v10237_v57, %v9823_v41  ;;  %v10732_v31 = vadd.f32 %v10731_v23, %v10669_v29  ;;  %v9698_v62 = vmax.f32 %v19558_v54, 0.0  ;;  %v9762_v2 = vmul.f32 %v19568_v37, %v19558_v54  ;;  %v19721_v23 = vld [vmem:[%s20478_s6 + $0x128] sm:$0xff]  ;;  %v8952_v41 = vpop.f32.mrf.mxu1 }
 0x692   :  { %v11887_v49 = vpack.c.bf16 %v19707_v43, %v19685_v36  ;;  %v12029_v26 = vunpack.c.h.bf16 %v19673_v56  ;;  %v10058_v51 = vmul.f32 1.442695, %v9958_v53  ;;  %v10670_v7 = vmul.f32 %v10606_v32, %v9638_v21  ;;  %v19759_v32 = vld [vmem:[%s20478_s6 + $0x130] sm:$0xff] }
 0x693   :  { %v13589_v58 = vpop.eup %13588  ;;  %v10399_v8 = vmul.f32 %v10335_v63, %v19638_v18  ;;  %v9895_v45 = vand.u32 2147483647, %v19707_v43  ;;  %v9566_v37 = vmul.f32 %v12017_v27, %v18493_v50  ;;  %v9825_v24 = vsub.f32 %v9697_v6, %v9761_v44  ;;  %v19738_v17 = vpop.f32.mrf.mxu1  ;;  %v19916_v56 = vld [vmem:[%s20476_s5 + $0xb0] sm:$0xff]  }
 0x694   :  { %v13591_v59 = vpop.eup %13590  ;;  %v10239_v54 = vmul.f32 0.6931472, %v13589_v58  ;;  %v9567_v18 = vmul.f32 %v12020_v0, %v18493_v50  ;;  %12099 = vst [vmem:[%s20479_s7 + $0x90] sm:$0xff] %v11887_v49   ;;  %13600 = vpow2.f32 %v10058_v51  ;;  %v10733_v57 = vadd.f32 %v10732_v31, %v10670_v7 }
 0x695   :  { %v10462_v52 = vadd.f32 %v10461_v16, %v10399_v8  ;;  %v10147_v21 = vadd.f32 1.0, %v13591_v59  ;;  %v9639_v0 = vmul.f32 %v12029_v26, %v18497_v3  ;;  %v9959_v6 = vsub.f32 0.0, %v9895_v45  ;;  %v8957_v16 = vpop.f32.mrf.mxu1 }
 0x696   :  { %v10336_v27 = vadd.f32 %v10239_v54, %v9824_v61  ;;  %v10543_v29 = vsub.f32 %v19707_v43, %v19721_v23  ;;  %v9826_v15 = vsub.f32 %v9698_v62, %v9762_v2  ;;  %v19752_v9 = vadd.f32 %v19748_v10, %v19511_v38 }
 0x697   :  { %13602 = vlog2.f32 %v10147_v21  ;;  %v12032_v61 = vunpack.c.l.bf16 %v19736_v60  ;;  %v10060_v31 = vmul.f32 1.442695, %v9959_v6  ;;  %v19763_v62 = vadd.f32 %v19748_v10, %v19525_v1  ;;  %v19769_v8 = vpop.f32.mrf.mxu1 }
 0x698   :  { %v13593_v44 = vpop.eup %13592  ;;  %v10400_v63 = vmul.f32 %v10336_v27, %v19662_v20  ;;  %v10607_v53 = vand.u32 2147483647, %v10543_v29  ;;  %v9699_v49 = vmax.f32 %v19573_v33, 0.0  ;;  %v9763_v58 = vmul.f32 %v19593_v4, %v19573_v33 }
 0x699   :  { %v13595_v2 = vpop.eup %13594  ;;  %v10241_v38 = vmul.f32 0.6931472, %v13593_v44  ;;  %v12033_v20 = vunpack.c.h.bf16 %v19736_v60  ;;  %13604 = vpow2.f32 %v10060_v31  ;;  %v9640_v1 = vmul.f32 %v12032_v61, %v18497_v3  ;;  %v8960_v33 = vpop.f32.mrf.mxu1  ;;  %v19787_v44 = vld [vmem:[%s20478_s6 + $0x138] sm:$0xff] }
 0x69a   :  { %v10463_v51 = vadd.f32 %v10462_v52, %v10400_v63  ;;  %v10148_v7 = vadd.f32 1.0, %v13595_v2  ;;  %v10671_v45 = vmul.f32 %v10607_v53, %v9639_v0  ;;  %v9896_v54 = vand.u32 2147483647, %v19752_v9 }
 0x69b   :  { %v13597_v41 = vpop.eup %13596  ;;  %v10337_v59 = vadd.f32 %v10241_v38, %v9825_v24  ;;  %v10544_v21 = vsub.f32 %v19752_v9, %v19759_v32  ;;  %v11892_v52 = vpack.c.bf16 %v19763_v62, %v19752_v9  ;;  %v19782_v24 = vmul.f32 %v12021_v48, %v18493_v50  ;;  %v19789_v63 = vpop.f32.mrf.mxu1 }
 0x69c   :  { %v10243_v4 = vmul.f32 0.6931472, %v13597_v41  ;;  %13606 = vlog2.f32 %v10148_v7  ;;  %v10734_v27 = vadd.f32 %v10733_v57, %v10671_v45  ;;  %v13599_v6 = vpop.eup %13598  ;;  %v9960_v29 = vsub.f32 0.0, %v9896_v54 }
 0x69d   :  { %v10401_v0 = vmul.f32 %v10337_v59, %v9566_v37  ;;  %v10608_v16 = vand.u32 2147483647, %v10544_v21  ;;  %v9700_v31 = vmax.f32 %v19621_v12, 0.0  ;;  %v9764_v37 = vmul.f32 %v19629_v25, %v19621_v12  ;;  %12100 = vst [vmem:[%s20479_s7 + $0x98] sm:$0xff] %v11892_v52   ;;  %v8965_v7 = vpop.f32.mrf.mxu1 }
 0x69e   :  { %v10338_v57 = vadd.f32 %v10243_v4, %v9826_v15  ;;  %v10149_v53 = vadd.f32 1.0, %v13599_v6  ;;  %v10062_v48 = vmul.f32 1.442695, %v9960_v29  ;;  %v9641_v38 = vmul.f32 %v12033_v20, %v18497_v3  ;;  %v19803_v15 = vld [vmem:[%s20476_s5 + $0xa0] sm:$0xff]  }
 0x69f   :  { %v10464_v5 = vadd.f32 %v10463_v51, %v10401_v0  ;;  %v10672_v2 = vmul.f32 %v10608_v16, %v9640_v1  ;;  %v9897_v12 = vand.u32 2147483647, %v19763_v62  ;;  %v10545_v25 = vsub.f32 %v19763_v62, %v19787_v44  ;;  %v19812_v1 = vpop.f32.mrf.mxu1 }
 0x6a0   :  { %v10402_v45 = vmul.f32 %v10338_v57, %v9567_v18  ;;  %13608 = vlog2.f32 %v10149_v53  ;;  %v9827_v51 = vsub.f32 %v9699_v49, %v9763_v58  ;;  %v19810_v59 = vadd.f32 %v19748_v10, %v19553_v42  ;;  %v19821_v58 = vld [vmem:[%s20478_s6 + $0x140] sm:$0xff] }
 0x6a1   :  { %13610 = vpow2.f32 %v10062_v48  ;;  %v10735_v41 = vadd.f32 %v10734_v27, %v10672_v2  ;;  %v13601_v54 = vpop.eup %13600  ;;  %v9961_v33 = vsub.f32 0.0, %v9897_v12  ;;  %v10609_v4 = vand.u32 2147483647, %v10545_v25  ;;  %v8968_v27 = vpop.f32.mrf.mxu1 }
 0x6a2   :  { %v10465_v21 = vadd.f32 %v10464_v5, %v10402_v45  ;;  %v12036_v18 = vunpack.c.l.bf16 %v19803_v15  ;;  %v9569_v52 = vmul.f32 %v12024_v35, %v18493_v50  ;;  %v9828_v6 = vsub.f32 %v9700_v31, %v9764_v37 }
 0x6a3   :  { %v10150_v49 = vadd.f32 1.0, %v13601_v54  ;;  %v9898_v42 = vand.u32 2147483647, %v19810_v59  ;;  %v19827_v29 = vmul.f32 %v12025_v28, %v18493_v50  ;;  %v9701_v16 = vmax.f32 %v19633_v47, 0.0  ;;  %v19833_v5 = vpop.f32.mrf.mxu1 }
 0x6a4   :  { %v13603_v0 = vpop.eup %13602  ;;  %v10064_v57 = vmul.f32 1.442695, %v9961_v33  ;;  %v10673_v35 = vmul.f32 %v10609_v4, %v9641_v38  ;;  %v9642_v37 = vmul.f32 %v12036_v18, %v18497_v3  ;;  %v10546_v46 = vsub.f32 %v19810_v59, %v19821_v58 }
 0x6a5   :  { %v10245_v31 = vmul.f32 0.6931472, %v13603_v0  ;;  %13612 = vlog2.f32 %v10150_v49  ;;  %v9962_v53 = vsub.f32 0.0, %v9898_v42  ;;  %v19839_v28 = vadd.f32 %v19748_v10, %v19577_v11  ;;  %v8973_v25 = vpop.f32.mrf.mxu1  ;;  %v19850_v11 = vld [vmem:[%s20478_s6 + $0x148] sm:$0xff] }
 0x6a6   :  { %13614 = vpow2.f32 %v10064_v57  ;;  %v10736_v48 = vadd.f32 %v10735_v41, %v10673_v35  ;;  %v13605_v2 = vpop.eup %13604  ;;  %v9765_v7 = vmul.f32 %v19655_v55, %v19633_v47  ;;  %v12037_v12 = vunpack.c.h.bf16 %v19803_v15  ;;  %v19855_v47 = vld [vmem:[%s20476_s5 + $0xa8] sm:$0xff]  }
 0x6a7   :  { %v10339_v38 = vadd.f32 %v10245_v31, %v9827_v51  ;;  %v10066_v45 = vmul.f32 1.442695, %v9962_v53  ;;  %v9702_v54 = vmax.f32 %v19685_v36, 0.0  ;;  %v10151_v33 = vadd.f32 1.0, %v13605_v2  ;;  %v19864_v27 = vpop.f32.mrf.mxu1 }
 0x6a8   :  { %v10610_v41 = vand.u32 2147483647, %v10546_v46  ;;  %v11897_v4 = vpack.c.bf16 %v19839_v28, %v19810_v59  ;;  %v9766_v49 = vmul.f32 %v19691_v39, %v19685_v36  ;;  %v19862_v42 = vadd.f32 %v19748_v10, %v19595_v22 }
 0x6a9   :  { %v13607_v55 = vpop.eup %13606  ;;  %v10403_v51 = vmul.f32 %v10339_v38, %v19782_v24  ;;  %13616 = vpow2.f32 %v10066_v45  ;;  %v9643_v24 = vmul.f32 %v12037_v12, %v18497_v3  ;;  %v9899_v36 = vand.u32 2147483647, %v19839_v28  ;;  %v8976_v31 = vpop.f32.mrf.mxu1  ;;  %v19882_v38 = vld [vmem:[%s20478_s6 + $0x150] sm:$0xff] }
 0x6aa   :  { %v10247_v0 = vmul.f32 0.6931472, %v13607_v55  ;;  %13618 = vlog2.f32 %v10151_v33  ;;  %v10674_v57 = vmul.f32 %v10610_v41, %v9642_v37  ;;  %12101 = vst [vmem:[%s20479_s7 + $0xa0] sm:$0xff] %v11897_v4   ;;  %v10547_v22 = vsub.f32 %v19839_v28, %v19850_v11 }
 0x6ab   :  { %v10466_v35 = vadd.f32 %v10465_v21, %v10403_v51  ;;  %v12040_v39 = vunpack.c.l.bf16 %v19855_v47  ;;  %v9829_v46 = vsub.f32 %v9701_v16, %v9765_v7  ;;  %v9571_v37 = vmul.f32 %v12028_v30, %v18493_v50 }
 0x6ac   :  { %v10340_v53 = vadd.f32 %v10247_v0, %v9828_v6  ;;  %v10737_v2 = vadd.f32 %v10736_v48, %v10674_v57  ;;  %v9830_v45 = vsub.f32 %v9702_v54, %v9766_v49  ;;  %v9703_v25 = vmax.f32 %v19707_v43, 0.0 }
 0x6ad   :  { %v13609_v21 = vpop.eup %13608  ;;  %v9963_v33 = vsub.f32 0.0, %v9899_v36  ;;  %v10611_v41 = vand.u32 2147483647, %v10547_v22  ;;  %v9644_v16 = vmul.f32 %v12040_v39, %v18497_v3  ;;  %v9900_v30 = vand.u32 2147483647, %v19862_v42  ;;  %v19891_v54 = vpop.f32.mrf.mxu1 }
 0x6ae   :  { %v13611_v4 = vpop.eup %13610  ;;  %v10404_v55 = vmul.f32 %v10340_v53, %v9569_v52  ;;  %v10249_v6 = vmul.f32 0.6931472, %v13609_v21  ;;  %v10548_v0 = vsub.f32 %v19862_v42, %v19882_v38  ;;  %v9767_v52 = vmul.f32 %v19721_v23, %v19707_v43 }
 0x6af   :  { %v10152_v48 = vadd.f32 1.0, %v13611_v4  ;;  %v10068_v7 = vmul.f32 1.442695, %v9963_v33  ;;  %v10675_v51 = vmul.f32 %v10611_v41, %v9643_v24  ;;  %v9964_v36 = vsub.f32 0.0, %v9900_v30  ;;  %v8981_v21 = vpop.f32.mrf.mxu1 }
 0x6b0   :  { %v10467_v49 = vadd.f32 %v10466_v35, %v10404_v55  ;;  %v10341_v57 = vadd.f32 %v10249_v6, %v9829_v46  ;;  %v10612_v31 = vand.u32 2147483647, %v10548_v0  ;;  %v19897_v53 = vadd.f32 %v19748_v10, %v19624_v34  ;;  %v19909_v34 = vld [vmem:[%s20478_s6 + $0x158] sm:$0xff] }
 0x6b1   :  { %13620 = vlog2.f32 %v10152_v48  ;;  %v10738_v22 = vadd.f32 %v10737_v2, %v10675_v51  ;;  %v10070_v41 = vmul.f32 1.442695, %v9964_v36  ;;  %v12041_v35 = vunpack.c.h.bf16 %v19855_v47 }
 0x6b2   :  { %v13613_v24 = vpop.eup %13612  ;;  %v10405_v33 = vmul.f32 %v10341_v57, %v19827_v29  ;;  %13622 = vpow2.f32 %v10068_v7  ;;  %v9572_v43 = vmul.f32 %v12029_v26, %v18493_v50  ;;  %v10676_v23 = vmul.f32 %v10612_v31, %v9644_v16  ;;  %v19911_v29 = vpop.f32.mrf.mxu1 }
 0x6b3   :  { %v13615_v46 = vpop.eup %13614  ;;  %v10251_v4 = vmul.f32 0.6931472, %v13613_v24  ;;  %v11902_v2 = vpack.c.bf16 %v19897_v53, %v19862_v42  ;;  %v9831_v6 = vsub.f32 %v9703_v25, %v9767_v52  ;;  %13624 = vpow2.f32 %v10070_v41 }
 0x6b4   :  { %v10468_v55 = vadd.f32 %v10467_v49, %v10405_v33  ;;  %v10153_v30 = vadd.f32 1.0, %v13615_v46  ;;  %v9704_v16 = vmax.f32 %v19752_v9, 0.0  ;;  %v9768_v48 = vmul.f32 %v19759_v32, %v19752_v9  ;;  %v8984_v51 = vpop.f32.mrf.mxu1 }
 0x6b5   :  { %v10342_v26 = vadd.f32 %v10251_v4, %v9830_v45  ;;  %v10739_v7 = vadd.f32 %v10738_v22, %v10676_v23  ;;  %12102 = vst [vmem:[%s20479_s7 + $0xa8] sm:$0xff] %v11902_v2   ;;  %v9645_v0 = vmul.f32 %v12041_v35, %v18497_v3  ;;  %v9901_v49 = vand.u32 2147483647, %v19897_v53 }
 0x6b6   :  { %v13617_v25 = vpop.eup %13616  ;;  %13626 = vlog2.f32 %v10153_v30  ;;  %v10549_v45 = vsub.f32 %v19897_v53, %v19909_v34  ;;  %v19932_v32 = vadd.f32 %v19748_v10, %v19647_v13  ;;  %v12044_v36 = vunpack.c.l.bf16 %v19916_v56  ;;  %v19935_v22 = vpop.f32.mrf.mxu1 }
 0x6b7   :  { %v13619_v57 = vpop.eup %13618  ;;  %v10406_v52 = vmul.f32 %v10342_v26, %v9571_v37  ;;  %v10154_v9 = vadd.f32 1.0, %v13617_v25  ;;  %v9573_v21 = vmul.f32 %v12032_v61, %v18493_v50  ;;  %v9965_v24 = vsub.f32 0.0, %v9901_v49  ;;  %v19943_v37 = vld [vmem:[%s20478_s6 + $0x160] sm:$0xff] }
 0x6b8   :  { %v10253_v31 = vmul.f32 0.6931472, %v13619_v57  ;;  %v10613_v33 = vand.u32 2147483647, %v10549_v45  ;;  %v9832_v46 = vsub.f32 %v9704_v16, %v9768_v48  ;;  %v9705_v13 = vmax.f32 %v19763_v62, 0.0  ;;  %v8989_v4 = vpop.f32.mrf.mxu1 }
 0x6b9   :  { %v10469_v41 = vadd.f32 %v10468_v55, %v10406_v52  ;;  %13628 = vlog2.f32 %v10154_v9  ;;  %v9769_v2 = vmul.f32 %v19787_v44, %v19763_v62  ;;  %v10072_v30 = vmul.f32 1.442695, %v9965_v24 }
 0x6ba   :  { %v10343_v23 = vadd.f32 %v10253_v31, %v9831_v6  ;;  %v10677_v26 = vmul.f32 %v10613_v33, %v9645_v0  ;;  %v9646_v61 = vmul.f32 %v12044_v36, %v18497_v3  ;;  %v9902_v51 = vand.u32 2147483647, %v19932_v32  ;;  %v19958_v48 = vpop.f32.mrf.mxu1 }
 0x6bb   :  { %v10550_v55 = vsub.f32 %v19932_v32, %v19943_v37  ;;  %v19956_v16 = vadd.f32 %v19748_v10, %v19675_v40  ;;  %13630 = vpow2.f32 %v10072_v30  ;;  %v12045_v44 = vunpack.c.h.bf16 %v19916_v56  ;;  %v19969_v40 = vld [vmem:[%s20478_s6 + $0x168] sm:$0xff] }
 0x6bc   :  { %v10407_v6 = vmul.f32 %v10343_v23, %v9572_v43  ;;  %v10740_v62 = vadd.f32 %v10739_v7, %v10677_v26  ;;  %v9574_v25 = vmul.f32 %v12033_v20, %v18493_v50  ;;  %v9966_v0 = vsub.f32 0.0, %v9902_v51  ;;  %v8992_v57 = vpop.f32.mrf.mxu1  ;;  %v19977_v20 = vld [vmem:[%s20476_s5 + $0xb8] sm:$0xff]  }
 0x6bd   :  { %v10614_v49 = vand.u32 2147483647, %v10550_v55  ;;  %v11907_v45 = vpack.c.bf16 %v19956_v16, %v19932_v32  ;;  %v9833_v7 = vsub.f32 %v9705_v13, %v9769_v2  ;;  %v9706_v9 = vmax.f32 %v19810_v59, 0.0 }
 0x6be   :  { %v13621_v43 = vpop.eup %13620  ;;  %v10470_v52 = vadd.f32 %v10469_v41, %v10407_v6  ;;  %v9770_v60 = vmul.f32 %v19821_v58, %v19810_v59  ;;  %v10074_v33 = vmul.f32 1.442695, %v9966_v0  ;;  %v9903_v41 = vand.u32 2147483647, %v19956_v16 }
 0x6bf   :  { %v13623_v31 = vpop.eup %13622  ;;  %v10255_v24 = vmul.f32 0.6931472, %v13621_v43  ;;  %v10678_v4 = vmul.f32 %v10614_v49, %v9646_v61  ;;  %12103 = vst [vmem:[%s20479_s7 + $0xb0] sm:$0xff] %v11907_v45   ;;  %v9647_v59 = vmul.f32 %v12045_v44, %v18497_v3  ;;  %v10551_v58 = vsub.f32 %v19956_v16, %v19969_v40  ;;  %v19993_v0 = vpop.f32.mrf.mxu1 }
 0x6c0   :  { %v10155_v13 = vadd.f32 1.0, %v13623_v31  ;;  %v19990_v23 = vadd.f32 %v19748_v10, %v19694_v14  ;;  %v13625_v2 = vpop.eup %13624  ;;  %13632 = vpow2.f32 %v10074_v33  ;;  %v9967_v61 = vsub.f32 0.0, %v9903_v41 }
 0x6c1   :  { %v10344_v30 = vadd.f32 %v10255_v24, %v9832_v46  ;;  %v10741_v26 = vadd.f32 %v10740_v62, %v10678_v4  ;;  %v10156_v51 = vadd.f32 1.0, %v13625_v2  ;;  %v10615_v55 = vand.u32 2147483647, %v10551_v58  ;;  %v20001_v46 = vld [vmem:[%s20478_s6 + $0x170] sm:$0xff]  ;;  %v8997_v33 = vpop.f32.mrf.mxu1 }
 0x6c2   :  { %13634 = vlog2.f32 %v10155_v13  ;;  %v12048_v6 = vunpack.c.l.bf16 %v19977_v20  ;;  %v9575_v57 = vmul.f32 %v12036_v18, %v18493_v50  ;;  %v9834_v14 = vsub.f32 %v9706_v9, %v9770_v60 }
 0x6c3   :  { %v13627_v49 = vpop.eup %13626  ;;  %v10408_v45 = vmul.f32 %v10344_v30, %v9573_v21  ;;  %v10076_v43 = vmul.f32 1.442695, %v9967_v61  ;;  %v9707_v31 = vmax.f32 %v19839_v28, 0.0  ;;  %13636 = vlog2.f32 %v10156_v51  ;;  %v20020_v15 = vpop.f32.mrf.mxu1 }
 0x6c4   :  { %v10257_v62 = vmul.f32 0.6931472, %v13627_v49  ;;  %v10679_v24 = vmul.f32 %v10615_v55, %v9647_v59  ;;  %v20007_v21 = vmul.f32 %v12037_v12, %v18493_v50  ;;  %v9648_v18 = vmul.f32 %v12048_v6, %v18497_v3 }
 0x6c5   :  { %v10471_v4 = vadd.f32 %v10470_v52, %v10408_v45  ;;  %13638 = vpow2.f32 %v10076_v43  ;;  %v9904_v13 = vand.u32 2147483647, %v19990_v23  ;;  %v10552_v59 = vsub.f32 %v19990_v23, %v20001_v46  ;;  %v20018_v52 = vld [vmem:[%s20476_s5 + $0xc0] sm:$0xff]   ;;  %v9000_v55 = vpop.f32.mrf.mxu1 }
 0x6c6   :  { %v13629_v9 = vpop.eup %13628  ;;  %v10345_v60 = vadd.f32 %v10257_v62, %v9833_v7  ;;  %v10742_v41 = vadd.f32 %v10741_v26, %v10679_v24  ;;  %v9771_v58 = vmul.f32 %v19850_v11, %v19839_v28  ;;  %v9708_v2 = vmax.f32 %v19862_v42, 0.0  ;;  %v20037_v11 = vld [vmem:[%s20478_s6 + $0x178] sm:$0xff] }
 0x6c7   :  { %v10259_v12 = vmul.f32 0.6931472, %v13629_v9  ;;  %v20027_v7 = vadd.f32 %v19748_v10, %v19709_v19  ;;  %v9968_v26 = vsub.f32 0.0, %v9904_v13  ;;  %v10616_v61 = vand.u32 2147483647, %v10552_v59 }
 0x6c8   :  { %v10409_v30 = vmul.f32 %v10345_v60, %v9574_v25  ;;  %v20496_v51 = vunpack.c.h.bf16 %v19977_v20  ;;  %v13631_v49 = vpop.eup %13630  ;;  %v9772_v43 = vmul.f32 %v19882_v38, %v19862_v42  ;;  %v20495_v19 = vunpack.c.l.bf16 %v20018_v52 }
 0x6c9   :  { %v10346_v45 = vadd.f32 %v10259_v12, %v9834_v14  ;;  %v11912_v28 = vpack.c.bf16 %v20027_v7, %v19990_v23  ;;  %v10157_v62 = vadd.f32 1.0, %v13631_v49  ;;  %v10078_v24 = vmul.f32 1.442695, %v9968_v26 }
 0x6ca   :  { %v10472_v25 = vadd.f32 %v10471_v4, %v10409_v30  ;;  %v10680_v33 = vmul.f32 %v10616_v61, %v9648_v18  ;;  %v9835_v60 = vsub.f32 %v9707_v31, %v9771_v58  ;;  %v9905_v42 = vand.u32 2147483647, %v20027_v7  ;;  %v20056_v31 = vld [vmem:[%s20478_s6 + $0x180] sm:$0xff] }
 0x6cb   :  { %v10410_v9 = vmul.f32 %v10346_v45, %v9575_v57  ;;  %12104 = vst [vmem:[%s20479_s7 + $0xb8] sm:$0xff] %v11912_v28   ;;  %v20046_v38 = vadd.f32 %v19748_v10, %v19738_v17  ;;  %13640 = vlog2.f32 %v10157_v62  ;;  %v9649_v4 = vmul.f32 %v20496_v51, %v18497_v3 }
 0x6cc   :  { %v10743_v14 = vadd.f32 %v10742_v41, %v10680_v33  ;;  %v10553_v57 = vsub.f32 %v20027_v7, %v20037_v11  ;;  %v9577_v17 = vmul.f32 %v12040_v39, %v18493_v50  ;;  %13642 = vpow2.f32 %v10078_v24  ;;  %v20068_v39 = vpop.f32.mrf.mxu1 }
 0x6cd   :  { %v10473_v18 = vadd.f32 %v10472_v25, %v10410_v9  ;;  %v9969_v13 = vsub.f32 0.0, %v9905_v42  ;;  %v13633_v41 = vpop.eup %13632  ;;  %v9836_v59 = vsub.f32 %v9708_v2, %v9772_v43  ;;  %v9709_v12 = vmax.f32 %v19897_v53, 0.0 }
 0x6ce   :  { %v10617_v58 = vand.u32 2147483647, %v10553_v57  ;;  %v9650_v30 = vmul.f32 %v20495_v19, %v18497_v3  ;;  %v10158_v61 = vadd.f32 1.0, %v13633_v41  ;;  %v9906_v49 = vand.u32 2147483647, %v20046_v38  ;;  %v9005_v42 = vpop.f32.mrf.mxu1 }
 0x6cf   :  { %v13635_v26 = vpop.eup %13634  ;;  %v10080_v55 = vmul.f32 1.442695, %v9969_v13  ;;  %v10554_v45 = vsub.f32 %v20046_v38, %v20056_v31  ;;  %v9773_v2 = vmul.f32 %v19909_v34, %v19897_v53  ;;  %v20074_v25 = vadd.f32 %v19748_v10, %v19769_v8 }
 0x6d0   :  { %v10261_v28 = vmul.f32 0.6931472, %v13635_v26  ;;  %v10681_v43 = vmul.f32 %v10617_v58, %v9649_v4  ;;  %v13637_v62 = vpop.eup %13636  ;;  %13644 = vlog2.f32 %v10158_v61  ;;  %v9970_v24 = vsub.f32 0.0, %v9906_v49  ;;  %v20079_v8 = vpop.f32.mrf.mxu1 }
 0x6d1   :  { %v10618_v33 = vand.u32 2147483647, %v10554_v45  ;;  %v12053_v9 = vunpack.c.h.bf16 %v20018_v52  ;;  %v10263_v41 = vmul.f32 0.6931472, %v13637_v62  ;;  %13646 = vpow2.f32 %v10080_v55 }
 0x6d2   :  { %v13639_v57 = vpop.eup %13638  ;;  %v10347_v13 = vadd.f32 %v10261_v28, %v9835_v60  ;;  %v10744_v26 = vadd.f32 %v10743_v14, %v10681_v43  ;;  %v10082_v51 = vmul.f32 1.442695, %v9970_v24  ;;  %v11917_v34 = vpack.c.bf16 %v20074_v25, %v20046_v38  ;;  %v20088_v60 = vld [vmem:[%s20478_s6 + $0x188] sm:$0xff]  ;;  %v9008_v47 = vpop.f32.mrf.mxu1 }
 0x6d3   :  { %v10159_v19 = vadd.f32 1.0, %v13639_v57  ;;  %v10682_v53 = vmul.f32 %v10618_v33, %v9650_v30  ;;  %v10348_v58 = vadd.f32 %v10263_v41, %v9836_v59  ;;  %v9578_v61 = vmul.f32 %v12041_v35, %v18493_v50  ;;  %v20093_v14 = vld [vmem:[%s20476_s5 + $0xc8] sm:$0xff]  }
 0x6d4   :  { %v10411_v4 = vmul.f32 %v10347_v13, %v20007_v21  ;;  %v9837_v30 = vsub.f32 %v9709_v12, %v9773_v2  ;;  %v9710_v55 = vmax.f32 %v19932_v32, 0.0  ;;  %12105 = vst [vmem:[%s20479_s7 + $0xc0] sm:$0xff] %v11917_v34   ;;  %v9907_v49 = vand.u32 2147483647, %v20074_v25 }
 0x6d5   :  { %13648 = vlog2.f32 %v10159_v19  ;;  %v10745_v21 = vadd.f32 %v10744_v26, %v10682_v53  ;;  %v10412_v59 = vmul.f32 %v10348_v58, %v9577_v17  ;;  %v9651_v45 = vmul.f32 %v12053_v9, %v18497_v3  ;;  %v20115_v17 = vld [vmem:[%s20478_s6 + $0x190] sm:$0xff] }
 0x6d6   :  { %v10474_v35 = vadd.f32 %v10473_v18, %v10411_v4  ;;  %13650 = vpow2.f32 %v10082_v51  ;;  %v10555_v12 = vsub.f32 %v20074_v25, %v20088_v60  ;;  %v20107_v19 = vadd.f32 %v19748_v10, %v19789_v63 }
 0x6d7   :  { %v12056_v28 = vunpack.c.l.bf16 %v20093_v14  ;;  %v9774_v18 = vmul.f32 %v19943_v37, %v19932_v32  ;;  %v9971_v51 = vsub.f32 0.0, %v9907_v49  ;;  %v20119_v43 = vadd.f32 %v19748_v10, %v19812_v1 }
 0x6d8   :  { %v10475_v2 = vadd.f32 %v10474_v35, %v10412_v59  ;;  %v13641_v62 = vpop.eup %13640  ;;  %v9711_v63 = vmax.f32 %v19956_v16, 0.0  ;;  %v9775_v24 = vmul.f32 %v19969_v40, %v19956_v16  ;;  %v10619_v33 = vand.u32 2147483647, %v10555_v12  ;;  %v20129_v1 = vpop.f32.mrf.mxu1 }
 0x6d9   :  { %v12057_v42 = vunpack.c.h.bf16 %v20093_v14  ;;  %v13643_v32 = vpop.eup %13642  ;;  %v10265_v37 = vmul.f32 0.6931472, %v13641_v62  ;;  %v10084_v57 = vmul.f32 1.442695, %v9971_v51  ;;  %v9652_v13 = vmul.f32 %v12056_v28, %v18497_v3  ;;  %v13720_v14 = vld [vmem:[%s20477_s4] ss:$0 sm:$0xff] }
 0x6da   :  { %v9908_v41 = vand.u32 2147483647, %v20107_v19  ;;  %v10160_v26 = vadd.f32 1.0, %v13643_v32  ;;  %v10683_v53 = vmul.f32 %v10619_v33, %v9651_v45  ;;  %v10556_v34 = vsub.f32 %v20107_v19, %v20115_v17  ;;  %v9013_v47 = vpop.f32.mrf.mxu1  ;;  %v20144_v45 = vld [vmem:[%s20478_s6 + $0x198] sm:$0xff] }
 0x6db   :  { %v11922_v16 = vpack.c.bf16 %v20119_v43, %v20107_v19  ;;  %v10349_v40 = vadd.f32 %v10265_v37, %v9837_v30  ;;  %v9579_v4 = vmul.f32 %v12044_v36, %v18493_v50  ;;  %13652 = vpow2.f32 %v10084_v57 }
 0x6dc   :  { %v9972_v58 = vsub.f32 0.0, %v9908_v41  ;;  %v9838_v35 = vsub.f32 %v9710_v55, %v9774_v18  ;;  %13654 = vlog2.f32 %v10160_v26  ;;  %v10746_v59 = vadd.f32 %v10745_v21, %v10683_v53  ;;  %v20149_v18 = vpop.f32.mrf.mxu1 }
 0x6dd   :  { %v10620_v49 = vand.u32 2147483647, %v10556_v34  ;;  %12106 = vst [vmem:[%s20479_s7 + $0xc8] sm:$0xff] %v11922_v16   ;;  %v13645_v30 = vpop.eup %13644  ;;  %v10413_v12 = vmul.f32 %v10349_v40, %v9578_v61  ;;  %v9580_v36 = vmul.f32 %v12045_v44, %v18493_v50  ;;  %v9839_v51 = vsub.f32 %v9711_v63, %v9775_v24  ;;  %v20158_v61 = vld [vmem:[%s20476_s5 + $0xd0] sm:$0xff]  }
 0x6de   :  { %v10086_v55 = vmul.f32 1.442695, %v9972_v58  ;;  %v13647_v21 = vpop.eup %13646  ;;  %v10267_v62 = vmul.f32 0.6931472, %v13645_v30  ;;  %v9653_v32 = vmul.f32 %v12057_v42, %v18497_v3  ;;  %v9909_v37 = vand.u32 2147483647, %v20119_v43  ;;  %v9016_v24 = vpop.f32.mrf.mxu1 }
 0x6df   :  { %v10684_v33 = vmul.f32 %v10620_v49, %v9652_v13  ;;  %v10476_v56 = vadd.f32 %v10475_v2, %v10413_v12  ;;  %v10161_v44 = vadd.f32 1.0, %v13647_v21  ;;  %v10557_v63 = vsub.f32 %v20119_v43, %v20144_v45 }
 0x6e0   :  { %13656 = vpow2.f32 %v10086_v55  ;;  %v10350_v57 = vadd.f32 %v10267_v62, %v9838_v35  ;;  %v9712_v13 = vmax.f32 %v19990_v23, 0.0  ;;  %v9973_v26 = vsub.f32 0.0, %v9909_v37 }
 0x6e1   :  { %v10747_v41 = vadd.f32 %v10746_v59, %v10684_v33  ;;  %13658 = vlog2.f32 %v10161_v44  ;;  %v10621_v34 = vand.u32 2147483647, %v10557_v63  ;;  %v20165_v16 = vadd.f32 %v19748_v10, %v19833_v5  ;;  %v20178_v5 = vld [vmem:[%s20478_s6 + $0x1a0] sm:$0xff] }
 0x6e2   :  { %v13649_v53 = vpop.eup %13648  ;;  %v12060_v2 = vunpack.c.l.bf16 %v20158_v61  ;;  %v10414_v58 = vmul.f32 %v10350_v57, %v9579_v4  ;;  %v10088_v49 = vmul.f32 1.442695, %v9973_v26  ;;  %v20170_v35 = vadd.f32 %v19748_v10, %v19864_v27 }
 0x6e3   :  { %v13651_v40 = vpop.eup %13650  ;;  %v10269_v47 = vmul.f32 0.6931472, %v13649_v53  ;;  %v9776_v59 = vmul.f32 %v20001_v46, %v19990_v23  ;;  %v9713_v30 = vmax.f32 %v20027_v7, 0.0  ;;  %v10685_v55 = vmul.f32 %v10621_v34, %v9653_v32 }
 0x6e4   :  { %v10162_v12 = vadd.f32 1.0, %v13651_v40  ;;  %v10477_v21 = vadd.f32 %v10476_v56, %v10414_v58  ;;  %v9777_v62 = vmul.f32 %v20037_v11, %v20027_v7  ;;  %13660 = vpow2.f32 %v10088_v49  ;;  %v20197_v56 = vld [vmem:[%s20478_s6 + $0x1a8] sm:$0xff] }
 0x6e5   :  { %v10351_v4 = vadd.f32 %v10269_v47, %v9839_v51  ;;  %v10748_v27 = vadd.f32 %v10747_v41, %v10685_v55  ;;  %v9654_v23 = vmul.f32 %v12060_v2, %v18497_v3  ;;  %v9910_v46 = vand.u32 2147483647, %v20165_v16 }
 0x6e6   :  { %13662 = vlog2.f32 %v10162_v12  ;;  %v10558_v32 = vsub.f32 %v20165_v16, %v20178_v5  ;;  %v11927_v37 = vpack.c.bf16 %v20170_v35, %v20165_v16  ;;  %v12061_v51 = vunpack.c.h.bf16 %v20158_v61 }
 0x6e7   :  { %v10415_v33 = vmul.f32 %v10351_v4, %v9580_v36  ;;  %v9581_v7 = vmul.f32 %v12048_v6, %v18493_v50  ;;  %v9974_v11 = vsub.f32 0.0, %v9910_v46  ;;  %v9840_v63 = vsub.f32 %v9712_v13, %v9776_v59  ;;  %v20208_v6 = vld [vmem:[%s20476_s5 + $0xd8] sm:$0xff]  }
 0x6e8   :  { %v13653_v44 = vpop.eup %13652  ;;  %v21441_v24 = vunpack.c.h.bf16 %v19977_v20  ;;  %v10622_v41 = vand.u32 2147483647, %v10558_v32  ;;  %12107 = vst [vmem:[%s20479_s7 + $0xd0] sm:$0xff] %v11927_v37   ;;  %v9841_v53 = vsub.f32 %v9713_v30, %v9777_v62  ;;  %v9911_v13 = vand.u32 2147483647, %v20170_v35 }
 0x6e9   :  { %v10478_v36 = vadd.f32 %v10477_v21, %v10415_v33  ;;  %v13655_v26 = vpop.eup %13654  ;;  %v10163_v34 = vadd.f32 1.0, %v13653_v44  ;;  %v10090_v40 = vmul.f32 1.442695, %v9974_v11  ;;  %v9655_v20 = vmul.f32 %v12061_v51, %v18497_v3 }
 0x6ea   :  { %v9582_v57 = vmul.f32 %v21441_v24, %v18493_v50  ;;  %v10271_v58 = vmul.f32 0.6931472, %v13655_v26  ;;  %v10686_v47 = vmul.f32 %v10622_v41, %v9654_v23  ;;  %v10559_v49 = vsub.f32 %v20170_v35, %v20197_v56  ;;  %v20225_v23 = vld [vmem:[%s20478_s6 + $0x1b0] sm:$0xff] }
 0x6eb   :  { %13664 = vlog2.f32 %v10163_v34  ;;  %v9975_v59 = vsub.f32 0.0, %v9911_v13  ;;  %v20218_v12 = vadd.f32 %v19748_v10, %v19891_v54  ;;  %v12064_v30 = vunpack.c.l.bf16 %v20208_v6 }
 0x6ec   :  { %v10352_v21 = vadd.f32 %v10271_v58, %v9840_v63  ;;  %v9714_v4 = vmax.f32 %v20046_v38, 0.0  ;;  %13666 = vpow2.f32 %v10090_v40  ;;  %v10623_v62 = vand.u32 2147483647, %v10559_v49 }
 0x6ed   :  { %v13657_v55 = vpop.eup %13656  ;;  %v9778_v46 = vmul.f32 %v20056_v31, %v20046_v38  ;;  %v10092_v32 = vmul.f32 1.442695, %v9975_v59  ;;  %v20231_v54 = vadd.f32 %v19748_v10, %v19911_v29  ;;  %v10749_v44 = vadd.f32 %v10748_v27, %v10686_v47 }
 0x6ee   :  { %v10164_v33 = vadd.f32 1.0, %v13657_v55  ;;  %v13659_v37 = vpop.eup %13658  ;;  %v10416_v11 = vmul.f32 %v10352_v21, %v9581_v7  ;;  %v10687_v63 = vmul.f32 %v10623_v62, %v9655_v20  ;;  %v9656_v24 = vmul.f32 %v12064_v30, %v18497_v3 }
 0x6ef   :  { %v10273_v41 = vmul.f32 0.6931472, %v13659_v37  ;;  %v9912_v26 = vand.u32 2147483647, %v20218_v12  ;;  %v10560_v38 = vsub.f32 %v20218_v12, %v20225_v23  ;;  %v11932_v27 = vpack.c.bf16 %v20231_v54, %v20218_v12 }
 0x6f0   :  { %13668 = vlog2.f32 %v10164_v33  ;;  %v10479_v31 = vadd.f32 %v10478_v36, %v10416_v11  ;;  %v10750_v34 = vadd.f32 %v10749_v44, %v10687_v63  ;;  %v21442_v47 = vunpack.c.l.bf16 %v20018_v52 }
 0x6f1   :  { %13670 = vpow2.f32 %v10092_v32  ;;  %v13661_v29 = vpop.eup %13660  ;;  %v10353_v40 = vadd.f32 %v10273_v41, %v9841_v53  ;;  %v9976_v13 = vsub.f32 0.0, %v9912_v26  ;;  %v10624_v7 = vand.u32 2147483647, %v10560_v38  ;;  %12108 = vst [vmem:[%s20479_s7 + $0xd8] sm:$0xff] %v11932_v27  }
 0x6f2   :  { %v9583_v20 = vmul.f32 %v21442_v47, %v18493_v50  ;;  %v9842_v49 = vsub.f32 %v9714_v4, %v9778_v46  ;;  %v10165_v59 = vadd.f32 1.0, %v13661_v29  ;;  %v9715_v53 = vmax.f32 %v20074_v25, 0.0 }
 0x6f3   :  { %v13663_v58 = vpop.eup %13662  ;;  %v10417_v55 = vmul.f32 %v10353_v40, %v9582_v57  ;;  %v10094_v62 = vmul.f32 1.442695, %v9976_v13  ;;  %v10688_v36 = vmul.f32 %v10624_v7, %v9656_v24  ;;  %v9779_v33 = vmul.f32 %v20088_v60, %v20074_v25 }
 0x6f4   :  { %v10275_v21 = vmul.f32 0.6931472, %v13663_v58  ;;  %13672 = vlog2.f32 %v10165_v59  ;;  %v9913_v32 = vand.u32 2147483647, %v20231_v54  ;;  %v20255_v46 = vadd.f32 %v19748_v10, %v19935_v22 }
 0x6f5   :  { %v10480_v37 = vadd.f32 %v10479_v31, %v10417_v55  ;;  %13674 = vpow2.f32 %v10094_v62  ;;  %v20251_v4 = vadd.f32 %v10750_v34, %v10688_v36  ;;  %v20259_v63 = vadd.f32 %v19748_v10, %v19958_v48 }
 0x6f6   :  { %v10354_v11 = vadd.f32 %v10275_v21, %v9842_v49  ;;  %v9977_v57 = vsub.f32 0.0, %v9913_v32  ;;  %v9584_v25 = vmul.f32 %v12053_v9, %v18493_v50  ;;  %v9716_v60 = vmax.f32 %v20107_v19, 0.0 }
 0x6f7   :  { %v9780_v41 = vmul.f32 %v20115_v17, %v20107_v19  ;;  %v9843_v22 = vsub.f32 %v9715_v53, %v9779_v33  ;;  %v9914_v29 = vand.u32 2147483647, %v20255_v46  ;;  %v11937_v52 = vpack.c.bf16 %v20259_v63, %v20255_v46 }
 0x6f8   :  { %v10418_v44 = vmul.f32 %v10354_v11, %v9583_v20  ;;  %v13665_v24 = vpop.eup %13664  ;;  %v10096_v26 = vmul.f32 1.442695, %v9977_v57  ;;  %v9585_v7 = vmul.f32 %v12056_v28, %v18493_v50  ;;  %v20275_v17 = vadd.f32 %v19748_v10, %v19993_v0 }
 0x6f9   :  { %v13667_v38 = vpop.eup %13666  ;;  %v10277_v34 = vmul.f32 0.6931472, %v13665_v24  ;;  %v9978_v13 = vsub.f32 0.0, %v9914_v29  ;;  %v9844_v19 = vsub.f32 %v9716_v60, %v9780_v41  ;;  %12109 = vst [vmem:[%s20479_s7 + $0xe0] sm:$0xff] %v11937_v52   ;;  %v9915_v49 = vand.u32 2147483647, %v20259_v63 }
 0x6fa   :  { %v10481_v31 = vadd.f32 %v10480_v37, %v10418_v44  ;;  %v10166_v40 = vadd.f32 1.0, %v13667_v38  ;;  %13676 = vpow2.f32 %v10096_v26  ;;  %v9717_v59 = vmax.f32 %v20119_v43, 0.0 }
 0x6fb   :  { %v10355_v48 = vadd.f32 %v10277_v34, %v9843_v22  ;;  %v10098_v20 = vmul.f32 1.442695, %v9978_v13  ;;  %v9781_v28 = vmul.f32 %v20144_v45, %v20119_v43  ;;  %v20286_v0 = vadd.f32 %v19748_v10, %v20020_v15 }
 0x6fc   :  { %13678 = vlog2.f32 %v10166_v40  ;;  %v9979_v36 = vsub.f32 0.0, %v9915_v49  ;;  %v9916_v37 = vand.u32 2147483647, %v20275_v17  ;;  %v9586_v43 = vmul.f32 %v12057_v42, %v18493_v50 }
 0x6fd   :  { %v13669_v9 = vpop.eup %13668  ;;  %v10419_v58 = vmul.f32 %v10355_v48, %v9584_v25  ;;  %13680 = vpow2.f32 %v10098_v20  ;;  %v9845_v45 = vsub.f32 %v9717_v59, %v9781_v28  ;;  %v11942_v10 = vpack.c.bf16 %v20286_v0, %v20275_v17 }
 0x6fe   :  { %v13671_v27 = vpop.eup %13670  ;;  %v10279_v47 = vmul.f32 0.6931472, %v13669_v9  ;;  %v10100_v32 = vmul.f32 1.442695, %v9979_v36  ;;  %v9980_v24 = vsub.f32 0.0, %v9916_v37  ;;  %v20302_v42 = vadd.f32 %v13720_v14, %v20068_v39 }
 0x6ff   :  { %v10167_v55 = vadd.f32 1.0, %v13671_v27  ;;  %v10482_v21 = vadd.f32 %v10481_v31, %v10419_v58  ;;  %12110 = vst [vmem:[%s20479_s7 + $0xe8] sm:$0xff] %v11942_v10   ;;  %v9917_v60 = vand.u32 2147483647, %v20286_v0  ;;  %v20305_v31 = vadd.f32 %v13720_v14, %v20079_v8 }
 0x700   :  { %v10356_v62 = vadd.f32 %v10279_v47, %v9844_v19  ;;  %v10102_v41 = vmul.f32 1.442695, %v9980_v24  ;;  %v20308_v22 = vadd.f32 %v13720_v14, %v20129_v1  ;;  %v9718_v29 = vmax.f32 %v20165_v16, 0.0 }
 0x701   :  { %13682 = vlog2.f32 %v10167_v55  ;;  %v13673_v53 = vpop.eup %13672  ;;  %v9981_v38 = vsub.f32 0.0, %v9917_v60  ;;  %v9782_v40 = vmul.f32 %v20178_v5, %v20165_v16  ;;  %v9918_v48 = vand.u32 2147483647, %v20302_v42 }
 0x702   :  { %v10420_v33 = vmul.f32 %v10356_v62, %v9585_v7  ;;  %v13675_v11 = vpop.eup %13674  ;;  %v10281_v57 = vmul.f32 0.6931472, %v13673_v53  ;;  %13684 = vpow2.f32 %v10100_v32  ;;  %v11947_v9 = vpack.c.bf16 %v20305_v31, %v20302_v42  ;;  %v9521_v32 = vld [vmem:[%s20478_s6 + $0x1b8] sm:$0xff] }
 0x703   :  { %v10168_v44 = vadd.f32 1.0, %v13675_v11  ;;  %v10104_v52 = vmul.f32 1.442695, %v9981_v38  ;;  %v9982_v7 = vsub.f32 0.0, %v9918_v48  ;;  %v9919_v1 = vand.u32 2147483647, %v20305_v31 }
 0x704   :  { %v10483_v15 = vadd.f32 %v10482_v21, %v10420_v33  ;;  %v10357_v25 = vadd.f32 %v10281_v57, %v9845_v45  ;;  %v9920_v19 = vand.u32 2147483647, %v20308_v22  ;;  %v20319_v27 = vadd.f32 %v13720_v14, %v20149_v18  ;;  %12111 = vst [vmem:[%s20479_s7 + $0xf0] sm:$0xff] %v11947_v9   ;;  %v20355_v14 = vld [vmem:[%s20476_s5 + $0xe0] sm:$0xff]  }
 0x705   :  { %13686 = vlog2.f32 %v10168_v44  ;;  %v9719_v16 = vmax.f32 %v20170_v35, 0.0  ;;  %v9783_v5 = vmul.f32 %v20197_v56, %v20170_v35  ;;  %v10106_v47 = vmul.f32 1.442695, %v9982_v7 }
 0x706   :  { %v10421_v26 = vmul.f32 %v10357_v25, %v9586_v43  ;;  %13688 = vpow2.f32 %v10102_v41  ;;  %v9983_v20 = vsub.f32 0.0, %v9919_v1  ;;  %v9984_v49 = vsub.f32 0.0, %v9920_v19 }
 0x707   :  { %v13677_v34 = vpop.eup %13676  ;;  %v9587_v18 = vmul.f32 %v12060_v2, %v18493_v50  ;;  %v9846_v28 = vsub.f32 %v9718_v29, %v9782_v40  ;;  %v11952_v55 = vpack.c.bf16 %v20319_v27, %v20308_v22  ;;  %v9847_v53 = vsub.f32 %v9719_v16, %v9783_v5 }
 0x708   :  { %v10484_v13 = vadd.f32 %v10483_v15, %v10421_v26  ;;  %v10169_v39 = vadd.f32 1.0, %v13677_v34  ;;  %v10108_v56 = vmul.f32 1.442695, %v9983_v20  ;;  %v10110_v62 = vmul.f32 1.442695, %v9984_v49  ;;  %v9522_v34 = vld [vmem:[%s20478_s6 + $0x1c0] sm:$0xff] }
 0x709   :  { %v13679_v8 = vpop.eup %13678  ;;  %12112 = vst [vmem:[%s20479_s7 + $0xf8] sm:$0xff] %v11952_v55   ;;  %v9921_v2 = vand.u32 2147483647, %v20319_v27  ;;  %v9720_v37 = vmax.f32 %v20218_v12, 0.0  ;;  %v9784_v11 = vmul.f32 %v20225_v23, %v20218_v12  ;;  %v9588_v45 = vmul.f32 %v12061_v51, %v18493_v50 }
 0x70a   :  { %v10283_v58 = vmul.f32 0.6931472, %v13679_v8  ;;  %13690 = vlog2.f32 %v10169_v39  ;;  %v13681_v59 = vpop.eup %13680  ;;  %v12065_v10 = vunpack.c.h.bf16 %v20208_v6  ;;  %v9721_v15 = vmax.f32 %v20231_v54, 0.0 }
 0x70b   :  { %13692 = vpow2.f32 %v10104_v52  ;;  %v10170_v35 = vadd.f32 1.0, %v13681_v59  ;;  %v9785_v44 = vmul.f32 %v9521_v32, %v20231_v54  ;;  %v10561_v12 = vsub.f32 %v20231_v54, %v9521_v32 }
 0x70c   :  { %13694 = vpow2.f32 %v10106_v47  ;;  %v10358_v36 = vadd.f32 %v10283_v58, %v9846_v28  ;;  %v9985_v23 = vsub.f32 0.0, %v9921_v2  ;;  %v9589_v61 = vmul.f32 %v12064_v30, %v18493_v50 }
 0x70d   :  { %13696 = vlog2.f32 %v10170_v35  ;;  %v9848_v51 = vsub.f32 %v9720_v37, %v9784_v11  ;;  %v9657_v29 = vmul.f32 %v12065_v10, %v18497_v3  ;;  %v9849_v40 = vsub.f32 %v9721_v15, %v9785_v44 }
 0x70e   :  { %v13683_v21 = vpop.eup %13682  ;;  %13698 = vpow2.f32 %v10108_v56  ;;  %v10422_v60 = vmul.f32 %v10358_v36, %v9587_v18  ;;  %v10625_v48 = vand.u32 2147483647, %v10561_v12  ;;  %v12068_v39 = vunpack.c.l.bf16 %v20355_v14  ;;  %v9523_v18 = vld [vmem:[%s20478_s6 + $0x1c8] sm:$0xff]  ;;  %v20383_v12 = vld [vmem:[%s20478_s6 + $0x1d8] sm:$0xff] }
 0x70f   :  { %v10285_v33 = vmul.f32 0.6931472, %v13683_v21  ;;  %v13685_v43 = vpop.eup %13684  ;;  %13700 = vpow2.f32 %v10110_v62  ;;  %v10112_v52 = vmul.f32 1.442695, %v9985_v23  ;;  %v9722_v7 = vmax.f32 %v20255_v46, 0.0  ;;  %v9524_v62 = vld [vmem:[%s20478_s6 + $0x1d0] sm:$0xff] }
 0x710   :  { %v10171_v24 = vadd.f32 1.0, %v13685_v43  ;;  %v10485_v30 = vadd.f32 %v10484_v13, %v10422_v60  ;;  %v9786_v1 = vmul.f32 %v9522_v34, %v20255_v46  ;;  %v10562_v16 = vsub.f32 %v20255_v46, %v9522_v34  ;;  %v12141_v34 = vld [vmem:[%s20476_s5 + $0xe8] sm:$0xff]  }
 0x711   :  { %v10359_v57 = vadd.f32 %v10285_v33, %v9847_v53  ;;  %v9590_v47 = vmul.f32 %v12065_v10, %v18493_v50  ;;  %v10689_v21 = vmul.f32 %v10625_v48, %v9657_v29  ;;  %v9658_v35 = vmul.f32 %v12068_v39, %v18497_v3 }
 0x712   :  { %v13687_v25 = vpop.eup %13686  ;;  %13702 = vlog2.f32 %v10171_v24  ;;  %v9850_v56 = vsub.f32 %v9722_v7, %v9786_v1  ;;  %v10626_v46 = vand.u32 2147483647, %v10562_v16  ;;  %v9591_v33 = vmul.f32 %v12068_v39, %v18493_v50  ;;  %v9527_v16 = vld [vmem:[%s20478_s6 + $0x1e8] sm:$0xff] }
 0x713   :  { %v10287_v41 = vmul.f32 0.6931472, %v13687_v25  ;;  %v13689_v26 = vpop.eup %13688  ;;  %v10423_v38 = vmul.f32 %v10359_v57, %v9588_v45  ;;  %v9723_v37 = vmax.f32 %v20259_v63, 0.0  ;;  %v9787_v11 = vmul.f32 %v9523_v18, %v20259_v63 }
 0x714   :  { %v10172_v6 = vadd.f32 1.0, %v13689_v26  ;;  %v10563_v43 = vsub.f32 %v20259_v63, %v9523_v18  ;;  %v9724_v10 = vmax.f32 %v20275_v17, 0.0  ;;  %v9788_v15 = vmul.f32 %v9524_v62, %v20275_v17 }
 0x715   :  { %v10360_v54 = vadd.f32 %v10287_v41, %v9848_v51  ;;  %v10486_v5 = vadd.f32 %v10485_v30, %v10423_v38  ;;  %v10690_v24 = vmul.f32 %v10626_v46, %v9658_v35  ;;  %v10564_v25 = vsub.f32 %v20275_v17, %v9524_v62  ;;  %v20388_v51 = vld [vmem:[%s20478_s6 + $0x1e0] sm:$0xff]  ;;  %v20409_v30 = vld [vmem:[%s20476_s5 + $0xf8] sm:$0xff]  }
 0x716   :  { %13704 = vlog2.f32 %v10172_v6  ;;  %v10752_v41 = vadd.f32 %v20251_v4, %v10689_v21  ;;  %v20391_v26 = vand.u32 2147483647, %v10563_v43  ;;  %v9852_v17 = vsub.f32 %v9724_v10, %v9788_v15  ;;  %v20404_v4 = vld [vmem:[%s20476_s5 + $0xf0] sm:$0xff]  }
 0x717   :  { %v13691_v9 = vpop.eup %13690  ;;  %v10424_v8 = vmul.f32 %v10360_v54, %v9589_v61  ;;  %13706 = vpow2.f32 %v10112_v52  ;;  %v9851_v61 = vsub.f32 %v9723_v37, %v9787_v11  ;;  %v9725_v38 = vmax.f32 %v20286_v0, 0.0 }
 0x718   :  { %v13693_v19 = vpop.eup %13692  ;;  %v10289_v58 = vmul.f32 0.6931472, %v13691_v9  ;;  %v9789_v6 = vmul.f32 %v20383_v12, %v20286_v0  ;;  %v20411_v39 = vadd.f32 %v10752_v41, %v10690_v24  ;;  %v10565_v9 = vsub.f32 %v20286_v0, %v20383_v12 }
 0x719   :  { %v10173_v13 = vadd.f32 1.0, %v13693_v19  ;;  %v13695_v20 = vpop.eup %13694  ;;  %v10487_v59 = vadd.f32 %v10486_v5, %v10424_v8  ;;  %v9726_v8 = vmax.f32 %v20302_v42, 0.0  ;;  %v9790_v7 = vmul.f32 %v20388_v51, %v20302_v42  ;;  %v20425_v5 = vld [vmem:[%s20478_s6 + $0x1f0] sm:$0xff] }
 0x71a   :  { %v10361_v49 = vadd.f32 %v10289_v58, %v9849_v40  ;;  %v10174_v28 = vadd.f32 1.0, %v13695_v20  ;;  %v13697_v55 = vpop.eup %13696  ;;  %v20397_v40 = vand.u32 2147483647, %v10564_v25  ;;  %v12069_v1 = vunpack.c.h.bf16 %v20355_v14 }
 0x71b   :  { %13708 = vlog2.f32 %v10173_v13  ;;  %v13699_v36 = vpop.eup %13698  ;;  %v10291_v53 = vmul.f32 0.6931472, %v13697_v55  ;;  %v12072_v19 = vunpack.c.l.bf16 %v12141_v34  ;;  %v12073_v58 = vunpack.c.h.bf16 %v12141_v34 }
 0x71c   :  { %13710 = vlog2.f32 %v10174_v28  ;;  %v10425_v32 = vmul.f32 %v10361_v49, %v9590_v47  ;;  %v13701_v2 = vpop.eup %13700  ;;  %v10175_v45 = vadd.f32 1.0, %v13699_v36  ;;  %v12076_v13 = vunpack.c.l.bf16 %v20404_v4 }
 0x71d   :  { %v10362_v57 = vadd.f32 %v10291_v53, %v9850_v56  ;;  %v10176_v44 = vadd.f32 1.0, %v13701_v2  ;;  %v12077_v20 = vunpack.c.h.bf16 %v20404_v4  ;;  %v12080_v49 = vunpack.c.l.bf16 %v20409_v30 }
 0x71e   :  { %13712 = vlog2.f32 %v10175_v45  ;;  %v10488_v63 = vadd.f32 %v10487_v59, %v10425_v32  ;;  %v12081_v14 = vunpack.c.h.bf16 %v20409_v30  ;;  %v9592_v18 = vmul.f32 %v12069_v1, %v18493_v50 }
 0x71f   :  { %v13703_v60 = vpop.eup %13702  ;;  %13714 = vlog2.f32 %v10176_v44  ;;  %v10426_v23 = vmul.f32 %v10362_v57, %v9591_v33  ;;  %v9727_v28 = vmax.f32 %v20305_v31, 0.0  ;;  %v9728_v21 = vmax.f32 %v20308_v22, 0.0 }
 0x720   :  { %v10293_v48 = vmul.f32 0.6931472, %v13703_v60  ;;  %v9791_v35 = vmul.f32 %v9527_v16, %v20305_v31  ;;  %v9792_v56 = vmul.f32 %v20425_v5, %v20308_v22  ;;  %v9593_v36 = vmul.f32 %v12072_v19, %v18493_v50 }
 0x721   :  { %v10489_v54 = vadd.f32 %v10488_v63, %v10426_v23  ;;  %v9594_v53 = vmul.f32 %v12073_v58, %v18493_v50  ;;  %v9853_v33 = vsub.f32 %v9725_v38, %v9789_v6  ;;  %v9595_v2 = vmul.f32 %v12076_v13, %v18493_v50  ;;  %v9529_v63 = vld [vmem:[%s20478_s6 + $0x1f8] sm:$0xff] }
 0x722   :  { %v10363_v55 = vadd.f32 %v10293_v48, %v9851_v61  ;;  %v9596_v37 = vmul.f32 %v12077_v20, %v18493_v50  ;;  %v9597_v11 = vmul.f32 %v12080_v49, %v18493_v50  ;;  %v9854_v45 = vsub.f32 %v9726_v8, %v9790_v7 }
 0x723   :  { %v13705_v29 = vpop.eup %13704  ;;  %v9659_v15 = vmul.f32 %v12069_v1, %v18497_v3  ;;  %v9729_v24 = vmax.f32 %v20319_v27, 0.0  ;;  %v9855_v25 = vsub.f32 %v9727_v28, %v9791_v35  ;;  %v9856_v60 = vsub.f32 %v9728_v21, %v9792_v56 }
 0x724   :  { %v13707_v52 = vpop.eup %13706  ;;  %v10295_v0 = vmul.f32 0.6931472, %v13705_v29  ;;  %v10427_v10 = vmul.f32 %v10363_v55, %v9592_v18  ;;  %v10566_v12 = vsub.f32 %v20302_v42, %v20388_v51  ;;  %v9660_v38 = vmul.f32 %v12072_v19, %v18497_v3 }
 0x725   :  { %v10177_v47 = vadd.f32 1.0, %v13707_v52  ;;  %v9661_v29 = vmul.f32 %v12073_v58, %v18497_v3  ;;  %v10567_v6 = vsub.f32 %v20305_v31, %v9527_v16  ;;  %v10629_v4 = vand.u32 2147483647, %v10565_v9 }
 0x726   :  { %v10364_v32 = vadd.f32 %v10295_v0, %v9852_v17  ;;  %v10490_v8 = vadd.f32 %v10489_v54, %v10427_v10  ;;  %v10691_v42 = vmul.f32 %v20391_v26, %v9659_v15  ;;  %v9793_v51 = vmul.f32 %v9529_v63, %v20319_v27 }
 0x727   :  { %13716 = vlog2.f32 %v10177_v47  ;;  %v9662_v7 = vmul.f32 %v12076_v13, %v18497_v3  ;;  %v10568_v1 = vsub.f32 %v20308_v22, %v20425_v5  ;;  %v10630_v47 = vand.u32 2147483647, %v10566_v12 }
 0x728   :  { %v13709_v59 = vpop.eup %13708  ;;  %v10428_v17 = vmul.f32 %v10364_v32, %v9593_v36  ;;  %v10692_v58 = vmul.f32 %v20397_v40, %v9660_v38  ;;  %v9598_v31 = vmul.f32 %v12081_v14, %v18493_v50  ;;  %v9663_v54 = vmul.f32 %v12077_v20, %v18497_v3 }
 0x729   :  { %v10297_v46 = vmul.f32 0.6931472, %v13709_v59  ;;  %v13711_v62 = vpop.eup %13710  ;;  %v10569_v26 = vsub.f32 %v20319_v27, %v9529_v63  ;;  %v10631_v9 = vand.u32 2147483647, %v10567_v6  ;;  %v10693_v18 = vmul.f32 %v10629_v4, %v9661_v29 }
 0x72a   :  { %v10299_v43 = vmul.f32 0.6931472, %v13711_v62  ;;  %v10491_v59 = vadd.f32 %v10490_v8, %v10428_v17  ;;  %v10754_v22 = vadd.f32 %v20411_v39, %v10691_v42  ;;  %v9857_v28 = vsub.f32 %v9729_v24, %v9793_v51  ;;  %v21443_v17 = vld [vmem:[#allocation75_spill] sm:$0xff] }
 0x72b   :  { %v10365_v57 = vadd.f32 %v10297_v46, %v9853_v33  ;;  %v13713_v44 = vpop.eup %13712  ;;  %v9664_v55 = vmul.f32 %v12080_v49, %v18497_v3  ;;  %v10632_v21 = vand.u32 2147483647, %v10568_v1  ;;  %v10694_v40 = vmul.f32 %v10630_v47, %v9662_v7 }
 0x72c   :  { %v13715_v23 = vpop.eup %13714  ;;  %v10301_v61 = vmul.f32 0.6931472, %v13713_v44  ;;  %v10366_v41 = vadd.f32 %v10299_v43, %v9854_v45  ;;  %v10755_v50 = vadd.f32 %v10754_v22, %v10692_v58  ;;  %v9665_v27 = vmul.f32 %v12081_v14, %v18497_v3 }
 0x72d   :  { %v10303_v34 = vmul.f32 0.6931472, %v13715_v23  ;;  %v10429_v52 = vmul.f32 %v10365_v57, %v9594_v53  ;;  %v10633_v20 = vand.u32 2147483647, %v10569_v26  ;;  %v10695_v53 = vmul.f32 %v10631_v9, %v9663_v54 }
 0x72e   :  { %v10367_v48 = vadd.f32 %v10301_v61, %v9855_v25  ;;  %v10430_v0 = vmul.f32 %v10366_v41, %v9595_v2  ;;  %v10756_v33 = vadd.f32 %v10755_v50, %v10693_v18  ;;  %v10696_v2 = vmul.f32 %v10632_v21, %v9664_v55 }
 0x72f   :  { %v10368_v19 = vadd.f32 %v10303_v34, %v9856_v60  ;;  %v10492_v13 = vadd.f32 %v10491_v59, %v10429_v52  ;;  %v10697_v43 = vmul.f32 %v10633_v20, %v9665_v27  ;;  %vm10770_vm2 = vcmp.lt.s32.totalorder %v21443_v17, 1 }
 0x730   :  { %v10431_v16 = vmul.f32 %v10367_v48, %v9596_v37  ;;  %v10757_v37 = vadd.f32 %v10756_v33, %v10694_v40 }
 0x731   :  { %v10432_v56 = vmul.f32 %v10368_v19, %v9597_v11  ;;  %v10493_v46 = vadd.f32 %v10492_v13, %v10430_v0 }
 0x732   :  { %v10758_v45 = vadd.f32 %v10757_v37, %v10695_v53 }
 0x733   :  { %v10494_v36 = vadd.f32 %v10493_v46, %v10431_v16 }
 0x734   :  { %v13717_v5 = vpop.eup %13716  ;;  %v10759_v11 = vadd.f32 %v10758_v45, %v10696_v2 }
 0x735   :  { %v10305_v35 = vmul.f32 0.6931472, %v13717_v5  ;;  %v10495_v32 = vadd.f32 %v10494_v36, %v10432_v56 }
 0x736   :  { %v10760_v57 = vadd.f32 %v10759_v11, %v10697_v43 }
 0x737   :  { %v10369_v62 = vadd.f32 %v10305_v35, %v9857_v28 }
 0x739   :  { %v10433_v39 = vmul.f32 %v10369_v62, %v9598_v31 }
 0x73b   :  { %v10496_v49 = vadd.f32 %v10495_v32, %v10433_v39 }
 0x73d   :  { %10497 = vadd.xlane.f32.xlu0 %v10496_v49 }
 0x741   :  { %10761 = vadd.xlane.f32.xlu0 %v10760_v57 }
 0x7c6   :  { %v10498_v10 = vpop.xlane.xlu0 %10497 }
 0x7c7   :  { %v10499_v15 = vrot.slane %v10498_v10, 4 }
 0x7c9   :  { %v10500_v30 = vadd.f32 %v10499_v15, %v10498_v10 }
 0x7ca   :  { %v10762_v3 = vpop.xlane.xlu0 %10761 }
 0x7cb   :  { %v10501_v14 = vrot.slane %v10500_v30, 2  ;;  %v10763_v44 = vrot.slane %v10762_v3, 4 }
 0x7cd   :  { %v10764_v24 = vadd.f32 %v10763_v44, %v10762_v3  ;;  %v10502_v25 = vadd.f32 %v10501_v14, %v10500_v30 }
 0x7cf   :  { %v10765_v60 = vrot.slane %v10764_v24, 2  ;;  %v10503_v12 = vrot.slane %v10502_v25, 1 }
 0x7d1   :  { %v10766_v23 = vadd.f32 %v10765_v60, %v10764_v24  ;;  %v10504_v63 = vadd.f32 %v10503_v12, %v10502_v25 }
 0x7d3   :  { %12144 = vpush %v10504_v63  ;;  %v10767_v61 = vrot.slane %v10766_v23, 1 }
 0x7d5   :  { %v10768_v41 = vadd.f32 %v10767_v61, %v10766_v23 }
 0x7d7   :  { %12146 = vpush %v10768_v41 }
 0x804   :  { %s12145_s6 = spop %12144 }
 0x805   :  { %v10771_v38 = vstv %s12145_s6 }
 0x808   :  { %s12147_s0 = spop %12146 }
 0x809   :  { %v10772_v34 = vstv %s12147_s0 }
 0x80a   :  { %v10773_v29 = vsel %vm10770_vm2, %v10771_v38, %v10772_v34 }
 0x80b   :  { %10774 = vst [vmem:[%s20480_s8] sm:$0x1] %v10773_v29 }

</bundles_post_ra>
